<compile_context>
chip_gen: v7x
topology: tpu7x:2x2x1
jax: 0.10.0
libtpu: 0.0.40
codegen_flags: <defaults>
</compile_context>

<pallas_src>
import functools

import jax
import jax.numpy as jnp
import numpy as np
from jax.experimental import pallas as pl
from jax.experimental.pallas import tpu as pltpu

START_CH = 1024
BN_EPS = 1e-5
VMEM_LIMIT = 32 * 1024 * 1024   # <= v7x 64 MiB physical VMEM, plenty for <10 MB tiles


# ----------------------------------------------------------------------------
# Kernel 1: fused two-layer MLP
#   out_tile = silu(silu(x @ W1 + b1) @ W2_tile + b2_tile)
# fc1 (K1 = num_DV) is tiny; recomputing it per N-tile is far cheaper than a
# separate pallas_call launch.
# ----------------------------------------------------------------------------
def _fc_kernel(x_ref, w1_ref, b1_ref, w2_ref, b2_ref, o_ref):
    x = x_ref[...].astype(jnp.bfloat16)
    h = jnp.dot(x, w1_ref[...], preferred_element_type=jnp.float32) + b1_ref[...]
    h = h * jax.nn.sigmoid(h)                                # SiLU
    y = jnp.dot(h.astype(jnp.bfloat16), w2_ref[...],
                preferred_element_type=jnp.float32) + b2_ref[...]
    y = y * jax.nn.sigmoid(y)                                # SiLU
    o_ref[...] = y


def fused_fc(x, w1, b1, w2, b2, *, tn=2048):
    B, K1 = x.shape
    H = w1.shape[1]
    N = w2.shape[1]
    assert N % tn == 0
    return pl.pallas_call(
        _fc_kernel,
        out_shape=jax.ShapeDtypeStruct((B, N), jnp.float32),
        grid=(N // tn,),                          # (2,) -> shardable on v7x's 2 TCs
        in_specs=[
            pl.BlockSpec((B, K1), lambda j: (0, 0)),
            pl.BlockSpec((K1, H), lambda j: (0, 0)),
            pl.BlockSpec((1, H), lambda j: (0, 0)),
            pl.BlockSpec((H, tn), lambda j: (0, j)),
            pl.BlockSpec((1, tn), lambda j: (0, j)),
        ],
        out_specs=pl.BlockSpec((B, tn), lambda j: (0, j)),
        compiler_params=pltpu.CompilerParams(
            dimension_semantics=("parallel",),
            vmem_limit_bytes=VMEM_LIMIT,
        ),
    )(x, w1, b1, w2, b2)


# ----------------------------------------------------------------------------
# Kernel 2: fused phase matmul  out = act((A @ W + bias) * scale + shift)
#   A: (P, M, K)  W: (P, K, N) bf16   bias/scale/shift: (1, 1, N)   out: (P, M, N)
# ----------------------------------------------------------------------------
def _fused_matmul_kernel(act, a_ref, w_ref, b_ref, s_ref, t_ref, o_ref):
    a = a_ref[0].astype(jnp.bfloat16)
    w = w_ref[0].astype(jnp.bfloat16)
    y = jnp.dot(a, w, preferred_element_type=jnp.float32)
    y = (y + b_ref[0]) * s_ref[0] + t_ref[0]
    if act == "silu":
        y = y * jax.nn.sigmoid(y)
    elif act == "sigmoid":
        y = jax.nn.sigmoid(y)
    o_ref[0] = y


def fused_matmul(a, w, bias, scale, shift, act, *, tn_cap=2048):
    P, M, K = a.shape
    N = w.shape[-1]
    tn = N if N <= tn_cap else tn_cap
    assert N % tn == 0
    kernel = functools.partial(_fused_matmul_kernel, act)
    return pl.pallas_call(
        kernel,
        out_shape=jax.ShapeDtypeStruct((P, M, N), jnp.float32),
        grid=(P, N // tn),
        in_specs=[
            pl.BlockSpec((1, M, K), lambda p, j: (p, 0, 0)),
            pl.BlockSpec((1, K, tn), lambda p, j: (p, 0, j)),
            pl.BlockSpec((1, 1, tn), lambda p, j: (0, 0, j)),
            pl.BlockSpec((1, 1, tn), lambda p, j: (0, 0, j)),
            pl.BlockSpec((1, 1, tn), lambda p, j: (0, 0, j)),
        ],
        out_specs=pl.BlockSpec((1, M, tn), lambda p, j: (p, 0, j)),
        compiler_params=pltpu.CompilerParams(
            dimension_semantics=("parallel", "parallel"),
            vmem_limit_bytes=VMEM_LIMIT,
        ),
    )(a, w, bias, scale, shift)


# ----------------------------------------------------------------------------
# ConvTranspose2d(k=4, s=2, p=1) as 4 sub-pixel output phases.
#   phase r=0 (even out idx): kernel tap 1 @ padded-slice start 1, tap 3 @ start 0
#   phase r=1 (odd  out idx): kernel tap 0 @ padded-slice start 2, tap 2 @ start 1
# ----------------------------------------------------------------------------
_ROW_TAPS = {0: [(1, 1), (3, 0)], 1: [(0, 2), (2, 1)]}


def _phase_inputs(x):
    """x: (B,H,W,Cin) NHWC -> list of 4 matrices (B*H*W, 4*Cin), one per phase."""
    B, H, W_, Cin = x.shape
    xp = jnp.pad(x, ((0, 0), (1, 1), (1, 1), (0, 0)))
    mats = []
    for r in (0, 1):
        for t in (0, 1):
            slabs = []
            for _, rs in _ROW_TAPS[r]:
                for _, cs in _ROW_TAPS[t]:
                    slabs.append(xp[:, rs:rs + H, cs:cs + W_, :])
            mats.append(jnp.concatenate(slabs, axis=-1).reshape(B * H * W_, 4 * Cin))
    return mats


def pack_convt_weights(w):
    """w: (Cin, Cout, 4, 4) (PyTorch ConvTranspose2d layout) ->
    (4, 4*Cin, Cout) bf16 matmul slabs, one per output phase.
    Done ONCE at init so the forward pass never re-gathers weights in HBM."""
    cols = []
    for r in (0, 1):
        for t in (0, 1):
            taps = []
            for kh, _ in _ROW_TAPS[r]:
                for kw, _ in _ROW_TAPS[t]:
                    taps.append(w[:, :, kh, kw])             # (Cin, Cout)
            cols.append(jnp.concatenate(taps, axis=0))        # (4*Cin, Cout)
    return jnp.stack(cols).astype(jnp.bfloat16)                # (4, 4*Cin, Cout)


def conv_transpose_2x(x, w_packed, bias, scale, shift, act):
    """x: (B,H,W,Cin) NHWC -> act(BN_fold(conv_transpose(x) + bias)): (B,2H,2W,Cout)."""
    B, H, W_, Cin = x.shape
    Cout = w_packed.shape[-1]
    a = jnp.stack(_phase_inputs(x))                            # (4, BHW, 4*Cin) f32
    phases = fused_matmul(a, w_packed, bias, scale, shift, act)  # (4, BHW, Cout)
    out = phases.reshape(2, 2, B, H, W_, Cout).transpose(2, 3, 0, 4, 1, 5)
    return out.reshape(B, 2 * H, 2 * W_, Cout)


def conv_transpose_2x_c1(x, w_packed_t, bias, act):
    """Final ConvTranspose2d with Cout=1.  Transposed so the lane axis is the
    spatial dim (lane-dense output): per phase (1,4*Cin) @ (4*Cin, B*H*W)."""
    B, H, W_, Cin = x.shape
    mats = _phase_inputs(x)                                    # each (BHW, 4*Cin)
    a_t = jnp.stack([m.T for m in mats])                       # (4, 4*Cin, BHW) f32
    N = B * H * W_
    b_ = jnp.broadcast_to(bias.reshape(1, 1, 1), (1, 1, N))
    ones = jnp.ones((1, 1, N), jnp.float32)
    zeros = jnp.zeros((1, 1, N), jnp.float32)
    phases = fused_matmul(w_packed_t, a_t, b_, ones, zeros, act)  # (4, 1, BHW)
    out = phases[:, 0, :].reshape(2, 2, B, H, W_).transpose(2, 3, 0, 4, 1)
    return out.reshape(B, 2 * H, 2 * W_)


def bn_fold(gamma, beta, mean, var):
    scale = gamma / jnp.sqrt(var + BN_EPS)
    shift = beta - mean * scale
    return scale, shift


# ----------------------------------------------------------------------------
# Parameters (deterministic synthetic init), one-time packing, forward pass
# ----------------------------------------------------------------------------
def init_params(key, num_dv):
    ks = jax.random.split(key, 16)

    def rnd(k, shape, s=0.05):
        return (s * jax.random.normal(k, shape)).astype(jnp.float32)

    return {
        "fc1_w": rnd(ks[0], (num_dv, START_CH)),
        "fc1_b": rnd(ks[1], (START_CH,)),
        "fc2_w": rnd(ks[2], (START_CH, START_CH * 4)),
        "fc2_b": rnd(ks[3], (START_CH * 4,)),
        "ct1_w": rnd(ks[4], (START_CH, START_CH // 4, 4, 4)),
        "ct1_b": rnd(ks[5], (START_CH // 4,)),
        "ct2_w": rnd(ks[6], (START_CH // 4, START_CH // 8, 4, 4)),
        "ct2_b": rnd(ks[7], (START_CH // 8,)),
        "ct3_w": rnd(ks[8], (START_CH // 8, 1, 4, 4)),
        "ct3_b": rnd(ks[9], (1,)),
        # BatchNorm2d params + running stats (eval mode), made non-trivial:
        "bn1_gamma": 1.0 + rnd(ks[10], (START_CH // 4,)),
        "bn1_beta": rnd(ks[11], (START_CH // 4,)),
        "bn1_mean": rnd(ks[12], (START_CH // 4,)),
        "bn1_var": 0.9 + jnp.abs(rnd(ks[13], (START_CH // 4,))),
        "bn2_gamma": 1.0 + rnd(ks[14], (START_CH // 8,)),
        "bn2_beta": rnd(ks[15], (START_CH // 8,)),
        "bn2_mean": rnd(ks[10], (START_CH // 8,)),
        "bn2_var": 0.9 + jnp.abs(rnd(ks[11], (START_CH // 8,))),
    }


def prepare_params(p):
    """One-time inference packing: bf16 weights, pre-packed conv slabs,
    pre-folded BN scale/shift, (1,1,Cout) bias rows."""
    s1, t1 = bn_fold(p["bn1_gamma"], p["bn1_beta"], p["bn1_mean"], p["bn1_var"])
    s2, t2 = bn_fold(p["bn2_gamma"], p["bn2_beta"], p["bn2_mean"], p["bn2_var"])
    row = lambda v: v.reshape(1, 1, -1).astype(jnp.float32)
    return {
        "fc1_w": p["fc1_w"].astype(jnp.bfloat16),
        "fc1_b": p["fc1_b"].reshape(1, -1),
        "fc2_w": p["fc2_w"].astype(jnp.bfloat16),
        "fc2_b": p["fc2_b"].reshape(1, -1),
        "ct1_w": pack_convt_weights(p["ct1_w"]),
        "ct1_b": row(p["ct1_b"]), "ct1_s": row(s1), "ct1_t": row(t1),
        "ct2_w": pack_convt_weights(p["ct2_w"]),
        "ct2_b": row(p["ct2_b"]), "ct2_s": row(s2), "ct2_t": row(t2),
        "ct3_w": pack_convt_weights(p["ct3_w"]).transpose(0, 2, 1),  # (4,1,4*Cin)
        "ct3_b": p["ct3_b"],
    }


def model_forward(prep, x):
    """x: (B, num_DV) -> (B, 16, 16)"""
    b = x.shape[0]
    # fc: Linear -> SiLU -> Linear -> SiLU (one fused Pallas kernel)
    h = fused_fc(x, prep["fc1_w"], prep["fc1_b"], prep["fc2_w"], prep["fc2_b"])
    # view(-1, 1024, 2, 2) (NCHW) -> NHWC
    h = h.reshape(b, START_CH, 2, 2).transpose(0, 2, 3, 1)
    # conv5 block 1: ConvT -> BN -> SiLU -> Dropout(eval: identity)
    h = conv_transpose_2x(h, prep["ct1_w"], prep["ct1_b"], prep["ct1_s"],
                          prep["ct1_t"], "silu")
    # TODO(synk): Dropout(0.2) / batch-statistics BN only implemented in eval mode.
    # conv5 block 2
    h = conv_transpose_2x(h, prep["ct2_w"], prep["ct2_b"], prep["ct2_s"],
                          prep["ct2_t"], "silu")
    # conv_last: ConvT -> Sigmoid (Cout=1, lane-dense transposed kernel)
    return conv_transpose_2x_c1(h, prep["ct3_w"], prep["ct3_b"], "sigmoid")


# ----------------------------------------------------------------------------
# Pure-JAX references (NCHW, mirror the PyTorch forward) for validation.
# bf16=True applies the same bf16 weight/activation quantization as the kernels.
# ----------------------------------------------------------------------------
def _ref_conv_transpose(x_nchw, w, b, *, bf16):
    w_conv = jnp.transpose(w, (1, 0, 2, 3))[:, :, ::-1, ::-1]  # (Cout, Cin, 4, 4)
    lhs = x_nchw
    if bf16:
        w_conv = w_conv.astype(jnp.bfloat16)
        lhs = lhs.astype(jnp.bfloat16)
    y = jax.lax.conv_general_dilated(
        lhs, w_conv, window_strides=(1, 1), padding=[(2, 2), (2, 2)],
        lhs_dilation=(2, 2), dimension_numbers=("NCHW", "OIHW", "NCHW"),
        preferred_element_type=jnp.float32,
        precision=None if bf16 else jax.lax.Precision.HIGHEST)
    return y + b[None, :, None, None]


def _ref_bn(x, gamma, beta, mean, var):
    inv = gamma / jnp.sqrt(var + BN_EPS)
    return (x - mean[None, :, None, None]) * inv[None, :, None, None] \
        + beta[None, :, None, None]


def reference_forward(params, x, *, bf16):
    b = x.shape[0]
    if bf16:
        mm = lambda a, w: jnp.dot(a.astype(jnp.bfloat16), w.astype(jnp.bfloat16),
                                  preferred_element_type=jnp.float32)
    else:
        mm = lambda a, w: jnp.dot(a, w, precision=jax.lax.Precision.HIGHEST)
    h = jax.nn.silu(mm(x, params["fc1_w"]) + params["fc1_b"])
    h = jax.nn.silu(mm(h, params["fc2_w"]) + params["fc2_b"])
    h = h.reshape(b, START_CH, 2, 2)
    h = _ref_conv_transpose(h, params["ct1_w"], params["ct1_b"], bf16=bf16)
    h = jax.nn.silu(_ref_bn(h, params["bn1_gamma"], params["bn1_beta"],
                            params["bn1_mean"], params["bn1_var"]))
    h = _ref_conv_transpose(h, params["ct2_w"], params["ct2_b"], bf16=bf16)
    h = jax.nn.silu(_ref_bn(h, params["bn2_gamma"], params["bn2_beta"],
                            params["bn2_mean"], params["bn2_var"]))
    h = jax.nn.sigmoid(_ref_conv_transpose(h, params["ct3_w"], params["ct3_b"],
                                           bf16=bf16))
    return h.reshape(b, 16, 16)


if __name__ == "__main__":
    num_dv = 32
    batch = 2
    key = jax.random.PRNGKey(0)
    kp, kx = jax.random.split(key)
    params = init_params(kp, num_dv)
    prep = prepare_params(params)
    x = jax.random.normal(kx, (batch, num_dv), dtype=jnp.float32)

    fwd = jax.jit(model_forward)
    out = jax.block_until_ready(fwd(prep, x))
    assert out.shape == (batch, 16, 16), out.shape

    # Tight check vs a reference that uses the identical bf16 quantization
    # (validates kernel logic / conv-transpose decomposition).
    ref_bf16 = reference_forward(params, x, bf16=True)
    np.testing.assert_allclose(np.asarray(out), np.asarray(ref_bf16),
                               rtol=1e-3, atol=1e-3)
    # Loose check vs the full-f32 reference (bounds the bf16 precision loss
    # relative to the original PyTorch f32 semantics).
    ref_f32 = reference_forward(params, x, bf16=False)
    np.testing.assert_allclose(np.asarray(out), np.asarray(ref_f32),
                               rtol=2e-2, atol=2e-2)
    print("KERNEL_OK")
</pallas_src>

<mosaic_0001>
module attributes {stable_mosaic.version = 11 : i64} {
  func.func @_fc_kernel(%arg0: i32, %arg1: memref<2x32xf32, #tpu.memory_space<vmem>>, %arg2: memref<32x1024xbf16, #tpu.memory_space<vmem>>, %arg3: memref<1x1024xf32, #tpu.memory_space<vmem>>, %arg4: memref<1024x2048xbf16, #tpu.memory_space<vmem>>, %arg5: memref<1x2048xf32, #tpu.memory_space<vmem>>, %arg6: memref<2x2048xf32, #tpu.memory_space<vmem>>) attributes {dimension_semantics = [#tpu.dimension_semantics<parallel>], iteration_bounds = array<i64: 2>, scalar_prefetch = 0 : i64, scratch_operands = 0 : i64, tpu.core_type = #tpu.core_type<tc>, window_params = [{pipeline_mode = #tpu.pipeline_mode<synchronous>, transform_indices = @transform_0, window_bounds = array<i64: 2, 32>}, {pipeline_mode = #tpu.pipeline_mode<synchronous>, transform_indices = @transform_1, window_bounds = array<i64: 32, 1024>}, {pipeline_mode = #tpu.pipeline_mode<synchronous>, transform_indices = @transform_2, window_bounds = array<i64: 1, 1024>}, {transform_indices = @transform_3, window_bounds = array<i64: 1024, 2048>}, {transform_indices = @transform_4, window_bounds = array<i64: 1, 2048>}, {transform_indices = @transform_5, window_bounds = array<i64: 2, 2048>}]} {
    %c0 = arith.constant 0 : index
    %c0_0 = arith.constant 0 : index
    %0 = vector.load %arg1[%c0, %c0_0] : memref<2x32xf32, #tpu.memory_space<vmem>>, vector<2x32xf32>
    %1 = arith.truncf %0 : vector<2x32xf32> to vector<2x32xbf16>
    %c0_1 = arith.constant 0 : index
    %c0_2 = arith.constant 0 : index
    %2 = vector.load %arg2[%c0_1, %c0_2] : memref<32x1024xbf16, #tpu.memory_space<vmem>>, vector<32x1024xbf16>
    %cst = arith.constant dense<0.000000e+00> : vector<2x1024xf32>
    %3 = tpu.matmul %1, %2, %cst {dimension_numbers = #tpu.dot_dimension_numbers<[1], [0], [0], [1], [0, 0, 1, 1], [], []>} : vector<2x32xbf16>, vector<32x1024xbf16>, vector<2x1024xf32> -> vector<2x1024xf32>
    %c0_3 = arith.constant 0 : index
    %c0_4 = arith.constant 0 : index
    %4 = vector.load %arg3[%c0_3, %c0_4] : memref<1x1024xf32, #tpu.memory_space<vmem>>, vector<1x1024xf32>
    %5 = vector.broadcast %4 : vector<1x1024xf32> to vector<2x1024xf32>
    %6 = arith.addf %3, %5 : vector<2x1024xf32>
    %7 = arith.negf %6 : vector<2x1024xf32>
    %8 = math.exp %7 : vector<2x1024xf32>
    %cst_5 = arith.constant 1.000000e+00 : f32
    %9 = vector.broadcast %cst_5 : f32 to vector<2x1024xf32>
    %10 = arith.addf %9, %8 : vector<2x1024xf32>
    %11 = arith.divf %9, %10 : vector<2x1024xf32>
    %12 = arith.mulf %6, %11 : vector<2x1024xf32>
    %13 = arith.truncf %12 : vector<2x1024xf32> to vector<2x1024xbf16>
    %c0_6 = arith.constant 0 : index
    %c0_7 = arith.constant 0 : index
    %14 = vector.load %arg4[%c0_6, %c0_7] : memref<1024x2048xbf16, #tpu.memory_space<vmem>>, vector<1024x2048xbf16>
    %cst_8 = arith.constant dense<0.000000e+00> : vector<2x2048xf32>
    %15 = tpu.matmul %13, %14, %cst_8 {dimension_numbers = #tpu.dot_dimension_numbers<[1], [0], [0], [1], [0, 0, 1, 1], [], []>} : vector<2x1024xbf16>, vector<1024x2048xbf16>, vector<2x2048xf32> -> vector<2x2048xf32>
    %c0_9 = arith.constant 0 : index
    %c0_10 = arith.constant 0 : index
    %16 = vector.load %arg5[%c0_9, %c0_10] : memref<1x2048xf32, #tpu.memory_space<vmem>>, vector<1x2048xf32>
    %17 = vector.broadcast %16 : vector<1x2048xf32> to vector<2x2048xf32>
    %18 = arith.addf %15, %17 : vector<2x2048xf32>
    %19 = arith.negf %18 : vector<2x2048xf32>
    %20 = math.exp %19 : vector<2x2048xf32>
    %cst_11 = arith.constant 1.000000e+00 : f32
    %21 = vector.broadcast %cst_11 : f32 to vector<2x2048xf32>
    %22 = arith.addf %21, %20 : vector<2x2048xf32>
    %23 = arith.divf %21, %22 : vector<2x2048xf32>
    %24 = arith.mulf %18, %23 : vector<2x2048xf32>
    %c0_12 = arith.constant 0 : index
    %c0_13 = arith.constant 0 : index
    %25 = vector.load %arg6[%c0_12, %c0_13] : memref<2x2048xf32, #tpu.memory_space<vmem>>, vector<2x2048xf32>
    tpu.vector_store %arg6[%c0_12, %c0_13], %24 {strides = array<i32>} : memref<2x2048xf32, #tpu.memory_space<vmem>>, vector<2x2048xf32>,
    return
  }
  func.func @transform_0(%arg0: i32) -> (i32, i32) {
    %c0_i32 = arith.constant 0 : i32
    %c0_i32_0 = arith.constant 0 : i32
    %c0_i32_1 = arith.constant 0 : i32
    return %c0_i32, %c0_i32_0 : i32, i32
  }
  func.func @transform_1(%arg0: i32) -> (i32, i32) {
    %c0_i32 = arith.constant 0 : i32
    %c0_i32_0 = arith.constant 0 : i32
    %c0_i32_1 = arith.constant 0 : i32
    return %c0_i32, %c0_i32_0 : i32, i32
  }
  func.func @transform_2(%arg0: i32) -> (i32, i32) {
    %c0_i32 = arith.constant 0 : i32
    %c0_i32_0 = arith.constant 0 : i32
    %c0_i32_1 = arith.constant 0 : i32
    return %c0_i32, %c0_i32_0 : i32, i32
  }
  func.func @transform_3(%arg0: i32) -> (i32, i32) {
    %c0_i32 = arith.constant 0 : i32
    %c0_i32_0 = arith.constant 0 : i32
    return %c0_i32, %arg0 : i32, i32
  }
  func.func @transform_4(%arg0: i32) -> (i32, i32) {
    %c0_i32 = arith.constant 0 : i32
    %c0_i32_0 = arith.constant 0 : i32
    return %c0_i32, %arg0 : i32, i32
  }
  func.func @transform_5(%arg0: i32) -> (i32, i32) {
    %c0_i32 = arith.constant 0 : i32
    %c0_i32_0 = arith.constant 0 : i32
    return %c0_i32, %arg0 : i32, i32
  }
}

module attributes {stable_mosaic.version = 11 : i64} {
  func.func @_fused_matmul_kernel(%arg0: i32, %arg1: i32, %arg2: memref<1x8x4096xf32, #tpu.memory_space<vmem>>, %arg3: memref<1x4096x256xbf16, #tpu.memory_space<vmem>>, %arg4: memref<1x1x256xf32, #tpu.memory_space<vmem>>, %arg5: memref<1x1x256xf32, #tpu.memory_space<vmem>>, %arg6: memref<1x1x256xf32, #tpu.memory_space<vmem>>, %arg7: memref<1x8x256xf32, #tpu.memory_space<vmem>>) attributes {dimension_semantics = [#tpu.dimension_semantics<parallel>, #tpu.dimension_semantics<parallel>], iteration_bounds = array<i64: 4, 1>, scalar_prefetch = 0 : i64, scratch_operands = 0 : i64, tpu.core_type = #tpu.core_type<tc>, window_params = [{transform_indices = @transform_0, window_bounds = array<i64: 1, 8, 4096>}, {transform_indices = @transform_1, window_bounds = array<i64: 1, 4096, 256>}, {transform_indices = @transform_2, window_bounds = array<i64: 1, 1, 256>}, {transform_indices = @transform_3, window_bounds = array<i64: 1, 1, 256>}, {transform_indices = @transform_4, window_bounds = array<i64: 1, 1, 256>}, {transform_indices = @transform_5, window_bounds = array<i64: 1, 8, 256>}]} {
    %c0 = arith.constant 0 : index
    %c0_0 = arith.constant 0 : index
    %c0_1 = arith.constant 0 : index
    %0 = vector.load %arg2[%c0, %c0_0, %c0_1] : memref<1x8x4096xf32, #tpu.memory_space<vmem>>, vector<1x8x4096xf32>
    %1 = vector.shape_cast %0 : vector<1x8x4096xf32> to vector<8x4096xf32>
    %2 = arith.truncf %1 : vector<8x4096xf32> to vector<8x4096xbf16>
    %c0_2 = arith.constant 0 : index
    %c0_3 = arith.constant 0 : index
    %c0_4 = arith.constant 0 : index
    %3 = vector.load %arg3[%c0_2, %c0_3, %c0_4] : memref<1x4096x256xbf16, #tpu.memory_space<vmem>>, vector<1x4096x256xbf16>
    %4 = vector.shape_cast %3 : vector<1x4096x256xbf16> to vector<4096x256xbf16>
    %cst = arith.constant dense<0.000000e+00> : vector<8x256xf32>
    %5 = tpu.matmul %2, %4, %cst {dimension_numbers = #tpu.dot_dimension_numbers<[1], [0], [0], [1], [0, 0, 1, 1], [], []>} : vector<8x4096xbf16>, vector<4096x256xbf16>, vector<8x256xf32> -> vector<8x256xf32>
    %c0_5 = arith.constant 0 : index
    %c0_6 = arith.constant 0 : index
    %c0_7 = arith.constant 0 : index
    %6 = vector.load %arg4[%c0_5, %c0_6, %c0_7] : memref<1x1x256xf32, #tpu.memory_space<vmem>>, vector<1x1x256xf32>
    %7 = vector.shape_cast %6 : vector<1x1x256xf32> to vector<1x256xf32>
    %8 = vector.broadcast %7 : vector<1x256xf32> to vector<8x256xf32>
    %9 = arith.addf %5, %8 : vector<8x256xf32>
    %c0_8 = arith.constant 0 : index
    %c0_9 = arith.constant 0 : index
    %c0_10 = arith.constant 0 : index
    %10 = vector.load %arg5[%c0_8, %c0_9, %c0_10] : memref<1x1x256xf32, #tpu.memory_space<vmem>>, vector<1x1x256xf32>
    %11 = vector.shape_cast %10 : vector<1x1x256xf32> to vector<1x256xf32>
    %12 = vector.broadcast %11 : vector<1x256xf32> to vector<8x256xf32>
    %13 = arith.mulf %9, %12 : vector<8x256xf32>
    %c0_11 = arith.constant 0 : index
    %c0_12 = arith.constant 0 : index
    %c0_13 = arith.constant 0 : index
    %14 = vector.load %arg6[%c0_11, %c0_12, %c0_13] : memref<1x1x256xf32, #tpu.memory_space<vmem>>, vector<1x1x256xf32>
    %15 = vector.shape_cast %14 : vector<1x1x256xf32> to vector<1x256xf32>
    %16 = vector.broadcast %15 : vector<1x256xf32> to vector<8x256xf32>
    %17 = arith.addf %13, %16 : vector<8x256xf32>
    %18 = arith.negf %17 : vector<8x256xf32>
    %19 = math.exp %18 : vector<8x256xf32>
    %cst_14 = arith.constant 1.000000e+00 : f32
    %20 = vector.broadcast %cst_14 : f32 to vector<8x256xf32>
    %21 = arith.addf %20, %19 : vector<8x256xf32>
    %22 = arith.divf %20, %21 : vector<8x256xf32>
    %23 = arith.mulf %17, %22 : vector<8x256xf32>
    %c0_15 = arith.constant 0 : index
    %c0_16 = arith.constant 0 : index
    %c0_17 = arith.constant 0 : index
    %24 = vector.load %arg7[%c0_15, %c0_16, %c0_17] : memref<1x8x256xf32, #tpu.memory_space<vmem>>, vector<1x8x256xf32>
    %25 = vector.shape_cast %24 : vector<1x8x256xf32> to vector<8x256xf32>
    %26 = vector.shape_cast %23 : vector<8x256xf32> to vector<1x8x256xf32>
    tpu.vector_store %arg7[%c0_15, %c0_16, %c0_17], %26 {strides = array<i32>} : memref<1x8x256xf32, #tpu.memory_space<vmem>>, vector<1x8x256xf32>,
    return
  }
  func.func @transform_0(%arg0: i32, %arg1: i32) -> (i32, i32, i32) {
    %c0_i32 = arith.constant 0 : i32
    %c0_i32_0 = arith.constant 0 : i32
    %c0_i32_1 = arith.constant 0 : i32
    return %arg0, %c0_i32, %c0_i32_0 : i32, i32, i32
  }
  func.func @transform_1(%arg0: i32, %arg1: i32) -> (i32, i32, i32) {
    %c0_i32 = arith.constant 0 : i32
    %c0_i32_0 = arith.constant 0 : i32
    return %arg0, %c0_i32, %arg1 : i32, i32, i32
  }
  func.func @transform_2(%arg0: i32, %arg1: i32) -> (i32, i32, i32) {
    %c0_i32 = arith.constant 0 : i32
    %c0_i32_0 = arith.constant 0 : i32
    %c0_i32_1 = arith.constant 0 : i32
    return %c0_i32, %c0_i32_0, %arg1 : i32, i32, i32
  }
  func.func @transform_3(%arg0: i32, %arg1: i32) -> (i32, i32, i32) {
    %c0_i32 = arith.constant 0 : i32
    %c0_i32_0 = arith.constant 0 : i32
    %c0_i32_1 = arith.constant 0 : i32
    return %c0_i32, %c0_i32_0, %arg1 : i32, i32, i32
  }
  func.func @transform_4(%arg0: i32, %arg1: i32) -> (i32, i32, i32) {
    %c0_i32 = arith.constant 0 : i32
    %c0_i32_0 = arith.constant 0 : i32
    %c0_i32_1 = arith.constant 0 : i32
    return %c0_i32, %c0_i32_0, %arg1 : i32, i32, i32
  }
  func.func @transform_5(%arg0: i32, %arg1: i32) -> (i32, i32, i32) {
    %c0_i32 = arith.constant 0 : i32
    %c0_i32_0 = arith.constant 0 : i32
    return %arg0, %c0_i32, %arg1 : i32, i32, i32
  }
}

module attributes {stable_mosaic.version = 11 : i64} {
  func.func @_fused_matmul_kernel(%arg0: i32, %arg1: i32, %arg2: memref<1x32x1024xf32, #tpu.memory_space<vmem>>, %arg3: memref<1x1024x128xbf16, #tpu.memory_space<vmem>>, %arg4: memref<1x1x128xf32, #tpu.memory_space<vmem>>, %arg5: memref<1x1x128xf32, #tpu.memory_space<vmem>>, %arg6: memref<1x1x128xf32, #tpu.memory_space<vmem>>, %arg7: memref<1x32x128xf32, #tpu.memory_space<vmem>>) attributes {dimension_semantics = [#tpu.dimension_semantics<parallel>, #tpu.dimension_semantics<parallel>], iteration_bounds = array<i64: 4, 1>, scalar_prefetch = 0 : i64, scratch_operands = 0 : i64, tpu.core_type = #tpu.core_type<tc>, window_params = [{transform_indices = @transform_0, window_bounds = array<i64: 1, 32, 1024>}, {transform_indices = @transform_1, window_bounds = array<i64: 1, 1024, 128>}, {transform_indices = @transform_2, window_bounds = array<i64: 1, 1, 128>}, {transform_indices = @transform_3, window_bounds = array<i64: 1, 1, 128>}, {transform_indices = @transform_4, window_bounds = array<i64: 1, 1, 128>}, {transform_indices = @transform_5, window_bounds = array<i64: 1, 32, 128>}]} {
    %c0 = arith.constant 0 : index
    %c0_0 = arith.constant 0 : index
    %c0_1 = arith.constant 0 : index
    %0 = vector.load %arg2[%c0, %c0_0, %c0_1] : memref<1x32x1024xf32, #tpu.memory_space<vmem>>, vector<1x32x1024xf32>
    %1 = vector.shape_cast %0 : vector<1x32x1024xf32> to vector<32x1024xf32>
    %2 = arith.truncf %1 : vector<32x1024xf32> to vector<32x1024xbf16>
    %c0_2 = arith.constant 0 : index
    %c0_3 = arith.constant 0 : index
    %c0_4 = arith.constant 0 : index
    %3 = vector.load %arg3[%c0_2, %c0_3, %c0_4] : memref<1x1024x128xbf16, #tpu.memory_space<vmem>>, vector<1x1024x128xbf16>
    %4 = vector.shape_cast %3 : vector<1x1024x128xbf16> to vector<1024x128xbf16>
    %cst = arith.constant dense<0.000000e+00> : vector<32x128xf32>
    %5 = tpu.matmul %2, %4, %cst {dimension_numbers = #tpu.dot_dimension_numbers<[1], [0], [0], [1], [0, 0, 1, 1], [], []>} : vector<32x1024xbf16>, vector<1024x128xbf16>, vector<32x128xf32> -> vector<32x128xf32>
    %c0_5 = arith.constant 0 : index
    %c0_6 = arith.constant 0 : index
    %c0_7 = arith.constant 0 : index
    %6 = vector.load %arg4[%c0_5, %c0_6, %c0_7] : memref<1x1x128xf32, #tpu.memory_space<vmem>>, vector<1x1x128xf32>
    %7 = vector.shape_cast %6 : vector<1x1x128xf32> to vector<1x128xf32>
    %8 = vector.broadcast %7 : vector<1x128xf32> to vector<32x128xf32>
    %9 = arith.addf %5, %8 : vector<32x128xf32>
    %c0_8 = arith.constant 0 : index
    %c0_9 = arith.constant 0 : index
    %c0_10 = arith.constant 0 : index
    %10 = vector.load %arg5[%c0_8, %c0_9, %c0_10] : memref<1x1x128xf32, #tpu.memory_space<vmem>>, vector<1x1x128xf32>
    %11 = vector.shape_cast %10 : vector<1x1x128xf32> to vector<1x128xf32>
    %12 = vector.broadcast %11 : vector<1x128xf32> to vector<32x128xf32>
    %13 = arith.mulf %9, %12 : vector<32x128xf32>
    %c0_11 = arith.constant 0 : index
    %c0_12 = arith.constant 0 : index
    %c0_13 = arith.constant 0 : index
    %14 = vector.load %arg6[%c0_11, %c0_12, %c0_13] : memref<1x1x128xf32, #tpu.memory_space<vmem>>, vector<1x1x128xf32>
    %15 = vector.shape_cast %14 : vector<1x1x128xf32> to vector<1x128xf32>
    %16 = vector.broadcast %15 : vector<1x128xf32> to vector<32x128xf32>
    %17 = arith.addf %13, %16 : vector<32x128xf32>
    %18 = arith.negf %17 : vector<32x128xf32>
    %19 = math.exp %18 : vector<32x128xf32>
    %cst_14 = arith.constant 1.000000e+00 : f32
    %20 = vector.broadcast %cst_14 : f32 to vector<32x128xf32>
    %21 = arith.addf %20, %19 : vector<32x128xf32>
    %22 = arith.divf %20, %21 : vector<32x128xf32>
    %23 = arith.mulf %17, %22 : vector<32x128xf32>
    %c0_15 = arith.constant 0 : index
    %c0_16 = arith.constant 0 : index
    %c0_17 = arith.constant 0 : index
    %24 = vector.load %arg7[%c0_15, %c0_16, %c0_17] : memref<1x32x128xf32, #tpu.memory_space<vmem>>, vector<1x32x128xf32>
    %25 = vector.shape_cast %24 : vector<1x32x128xf32> to vector<32x128xf32>
    %26 = vector.shape_cast %23 : vector<32x128xf32> to vector<1x32x128xf32>
    tpu.vector_store %arg7[%c0_15, %c0_16, %c0_17], %26 {strides = array<i32>} : memref<1x32x128xf32, #tpu.memory_space<vmem>>, vector<1x32x128xf32>,
    return
  }
  func.func @transform_0(%arg0: i32, %arg1: i32) -> (i32, i32, i32) {
    %c0_i32 = arith.constant 0 : i32
    %c0_i32_0 = arith.constant 0 : i32
    %c0_i32_1 = arith.constant 0 : i32
    return %arg0, %c0_i32, %c0_i32_0 : i32, i32, i32
  }
  func.func @transform_1(%arg0: i32, %arg1: i32) -> (i32, i32, i32) {
    %c0_i32 = arith.constant 0 : i32
    %c0_i32_0 = arith.constant 0 : i32
    return %arg0, %c0_i32, %arg1 : i32, i32, i32
  }
  func.func @transform_2(%arg0: i32, %arg1: i32) -> (i32, i32, i32) {
    %c0_i32 = arith.constant 0 : i32
    %c0_i32_0 = arith.constant 0 : i32
    %c0_i32_1 = arith.constant 0 : i32
    return %c0_i32, %c0_i32_0, %arg1 : i32, i32, i32
  }
  func.func @transform_3(%arg0: i32, %arg1: i32) -> (i32, i32, i32) {
    %c0_i32 = arith.constant 0 : i32
    %c0_i32_0 = arith.constant 0 : i32
    %c0_i32_1 = arith.constant 0 : i32
    return %c0_i32, %c0_i32_0, %arg1 : i32, i32, i32
  }
  func.func @transform_4(%arg0: i32, %arg1: i32) -> (i32, i32, i32) {
    %c0_i32 = arith.constant 0 : i32
    %c0_i32_0 = arith.constant 0 : i32
    %c0_i32_1 = arith.constant 0 : i32
    return %c0_i32, %c0_i32_0, %arg1 : i32, i32, i32
  }
  func.func @transform_5(%arg0: i32, %arg1: i32) -> (i32, i32, i32) {
    %c0_i32 = arith.constant 0 : i32
    %c0_i32_0 = arith.constant 0 : i32
    return %arg0, %c0_i32, %arg1 : i32, i32, i32
  }
}

module attributes {stable_mosaic.version = 11 : i64} {
  func.func @_fused_matmul_kernel(%arg0: i32, %arg1: i32, %arg2: memref<1x1x512xbf16, #tpu.memory_space<vmem>>, %arg3: memref<1x512x128xf32, #tpu.memory_space<vmem>>, %arg4: memref<1x1x128xf32, #tpu.memory_space<vmem>>, %arg5: memref<1x1x128xf32, #tpu.memory_space<vmem>>, %arg6: memref<1x1x128xf32, #tpu.memory_space<vmem>>, %arg7: memref<1x1x128xf32, #tpu.memory_space<vmem>>) attributes {dimension_semantics = [#tpu.dimension_semantics<parallel>, #tpu.dimension_semantics<parallel>], iteration_bounds = array<i64: 4, 1>, scalar_prefetch = 0 : i64, scratch_operands = 0 : i64, tpu.core_type = #tpu.core_type<tc>, window_params = [{transform_indices = @transform_0, window_bounds = array<i64: 1, 1, 512>}, {transform_indices = @transform_1, window_bounds = array<i64: 1, 512, 128>}, {transform_indices = @transform_2, window_bounds = array<i64: 1, 1, 128>}, {transform_indices = @transform_3, window_bounds = array<i64: 1, 1, 128>}, {transform_indices = @transform_4, window_bounds = array<i64: 1, 1, 128>}, {transform_indices = @transform_5, window_bounds = array<i64: 1, 1, 128>}]} {
    %c0 = arith.constant 0 : index
    %c0_0 = arith.constant 0 : index
    %c0_1 = arith.constant 0 : index
    %0 = vector.load %arg2[%c0, %c0_0, %c0_1] : memref<1x1x512xbf16, #tpu.memory_space<vmem>>, vector<1x1x512xbf16>
    %1 = vector.shape_cast %0 : vector<1x1x512xbf16> to vector<1x512xbf16>
    %c0_2 = arith.constant 0 : index
    %c0_3 = arith.constant 0 : index
    %c0_4 = arith.constant 0 : index
    %2 = vector.load %arg3[%c0_2, %c0_3, %c0_4] : memref<1x512x128xf32, #tpu.memory_space<vmem>>, vector<1x512x128xf32>
    %3 = vector.shape_cast %2 : vector<1x512x128xf32> to vector<512x128xf32>
    %4 = arith.truncf %3 : vector<512x128xf32> to vector<512x128xbf16>
    %cst = arith.constant dense<0.000000e+00> : vector<1x128xf32>
    %5 = tpu.matmul %1, %4, %cst {dimension_numbers = #tpu.dot_dimension_numbers<[1], [0], [0], [1], [0, 0, 1, 1], [], []>} : vector<1x512xbf16>, vector<512x128xbf16>, vector<1x128xf32> -> vector<1x128xf32>
    %c0_5 = arith.constant 0 : index
    %c0_6 = arith.constant 0 : index
    %c0_7 = arith.constant 0 : index
    %6 = vector.load %arg4[%c0_5, %c0_6, %c0_7] : memref<1x1x128xf32, #tpu.memory_space<vmem>>, vector<1x1x128xf32>
    %7 = vector.shape_cast %6 : vector<1x1x128xf32> to vector<1x128xf32>
    %8 = arith.addf %5, %7 : vector<1x128xf32>
    %c0_8 = arith.constant 0 : index
    %c0_9 = arith.constant 0 : index
    %c0_10 = arith.constant 0 : index
    %9 = vector.load %arg5[%c0_8, %c0_9, %c0_10] : memref<1x1x128xf32, #tpu.memory_space<vmem>>, vector<1x1x128xf32>
    %10 = vector.shape_cast %9 : vector<1x1x128xf32> to vector<1x128xf32>
    %11 = arith.mulf %8, %10 : vector<1x128xf32>
    %c0_11 = arith.constant 0 : index
    %c0_12 = arith.constant 0 : index
    %c0_13 = arith.constant 0 : index
    %12 = vector.load %arg6[%c0_11, %c0_12, %c0_13] : memref<1x1x128xf32, #tpu.memory_space<vmem>>, vector<1x1x128xf32>
    %13 = vector.shape_cast %12 : vector<1x1x128xf32> to vector<1x128xf32>
    %14 = arith.addf %11, %13 : vector<1x128xf32>
    %15 = arith.negf %14 : vector<1x128xf32>
    %16 = math.exp %15 : vector<1x128xf32>
    %cst_14 = arith.constant 1.000000e+00 : f32
    %17 = vector.broadcast %cst_14 : f32 to vector<1x128xf32>
    %18 = arith.addf %17, %16 : vector<1x128xf32>
    %19 = arith.divf %17, %18 : vector<1x128xf32>
    %c0_15 = arith.constant 0 : index
    %c0_16 = arith.constant 0 : index
    %c0_17 = arith.constant 0 : index
    %20 = vector.load %arg7[%c0_15, %c0_16, %c0_17] : memref<1x1x128xf32, #tpu.memory_space<vmem>>, vector<1x1x128xf32>
    %21 = vector.shape_cast %20 : vector<1x1x128xf32> to vector<1x128xf32>
    %22 = vector.shape_cast %19 : vector<1x128xf32> to vector<1x1x128xf32>
    tpu.vector_store %arg7[%c0_15, %c0_16, %c0_17], %22 {strides = array<i32>} : memref<1x1x128xf32, #tpu.memory_space<vmem>>, vector<1x1x128xf32>,
    return
  }
  func.func @transform_0(%arg0: i32, %arg1: i32) -> (i32, i32, i32) {
    %c0_i32 = arith.constant 0 : i32
    %c0_i32_0 = arith.constant 0 : i32
    %c0_i32_1 = arith.constant 0 : i32
    return %arg0, %c0_i32, %c0_i32_0 : i32, i32, i32
  }
  func.func @transform_1(%arg0: i32, %arg1: i32) -> (i32, i32, i32) {
    %c0_i32 = arith.constant 0 : i32
    %c0_i32_0 = arith.constant 0 : i32
    return %arg0, %c0_i32, %arg1 : i32, i32, i32
  }
  func.func @transform_2(%arg0: i32, %arg1: i32) -> (i32, i32, i32) {
    %c0_i32 = arith.constant 0 : i32
    %c0_i32_0 = arith.constant 0 : i32
    %c0_i32_1 = arith.constant 0 : i32
    return %c0_i32, %c0_i32_0, %arg1 : i32, i32, i32
  }
  func.func @transform_3(%arg0: i32, %arg1: i32) -> (i32, i32, i32) {
    %c0_i32 = arith.constant 0 : i32
    %c0_i32_0 = arith.constant 0 : i32
    %c0_i32_1 = arith.constant 0 : i32
    return %c0_i32, %c0_i32_0, %arg1 : i32, i32, i32
  }
  func.func @transform_4(%arg0: i32, %arg1: i32) -> (i32, i32, i32) {
    %c0_i32 = arith.constant 0 : i32
    %c0_i32_0 = arith.constant 0 : i32
    %c0_i32_1 = arith.constant 0 : i32
    return %c0_i32, %c0_i32_0, %arg1 : i32, i32, i32
  }
  func.func @transform_5(%arg0: i32, %arg1: i32) -> (i32, i32, i32) {
    %c0_i32 = arith.constant 0 : i32
    %c0_i32_0 = arith.constant 0 : i32
    return %arg0, %c0_i32, %arg1 : i32, i32, i32
  }
}

</mosaic_0001>

<bundles_post_ra>
// kernel: model_forward.4
= control target key start
LH: loop header
LB: loop body
LE: loop exit
PB: predicated region body
PF: predicated region fallthrough
CT: control target
= control target key end

     0   :  { %s11723_s0 = inlined_call_operand.hbm [shape: f32[2,32], index: 0, kind: input, shape index: {}]   ;;  %s11724_s1 = inlined_call_operand.hbm [shape: bf16[32,1024], index: 1, kind: input, shape index: {}]   ;;  %s11725_s2 = inlined_call_operand.hbm [shape: f32[1,1024], index: 2, kind: input, shape index: {}]   ;;  %s11726_s3 = inlined_call_operand.hbm [shape: bf16[1024,4096], index: 3, kind: input, shape index: {}]   ;;  %s11727_s4 = inlined_call_operand.hbm [shape: f32[1,4096], index: 4, kind: input, shape index: {}]   ;;  %s11728_s5 = inlined_call_operand.vmem [shape: f32[2,4096], index: 5, kind: output, shape index: {}]  }
   0x1   :  { %11738 = sst [smem:[#allocation14_spill]] %s11724_s1 }
   0x2   :  { %11739 = sst [smem:[#allocation15_spill]] %s11726_s3 }
   0x3   :  { %10 = vsyncpa [#allocation3], 0 }
   0x4   :  { %11 = vsyncpa [#allocation5], 0 }
   0x5   :  { %12 = vsyncpa [#allocation8], 0 }
   0x6   :  { %14 = vsyncpa [#allocation8 + $0x1], 0  ;;  %s10173_s18 = smov 0   ;;  %s10175_s19 = smov 0  }
   0x7   :  { %s10177_s20 = smov 0   ;;  %s10179_s21 = smov 0  }
   0x8 LB: > { %s10192_s22 = sadd.s32 4294967295, %s10129_s21   ;;  %s10195_s23 = sadd.s32 1, %s10129_s21   ;;  %s10129_s21 = sphi %s10179_s21, %s11766_s21   ;;  %s10125_s20 = sphi %s10177_s20, %s11765_s20   ;;  %s10121_s19 = sphi %s10175_s19, %s11764_s19   ;;  %s10117_s18 = sphi %s10173_s18, %s11763_s18  }
   0x9   : > { %s87_s24 = ssub.s32 %s10129_s21, %s10195_s23  ;;  %s90_s25 = sadd.s32 1, %s10125_s20 }
   0xa   : > { %p88_p0 = scmp.eq.s32.totalorder %s87_s24, 0  ;;  %p97_p1 = scmp.ne.s32.totalorder %s10125_s20, %s10121_s19 }
   0xb   : > { %p98_p2 = scmp.eq.s32.totalorder %s10129_s21, 0  ;;  %p103_p3 = scmp.ne.s32.totalorder %s10121_s19, %s10117_s18 }
   0xc   : > { %s10205_s26 = scalar_select %p88_p0, %s10125_s20, %s90_s25  }
   0xd   : > { %p10207_p4 = por %p98_p2, %p97_p1  ;;  %p11729_p5 = scmp.eq.s32.totalorder %s10192_s22, 0 }
   0xe   : > { %11740 = sst [smem:[#allocation13_spill]] %s10205_s26  ;;  %p8560_p6 = scmp.ge.s32.totalorder %s10129_s21, 1 }
   0xf   : > { %p166_p7 = scmp.lt.s32.totalorder %s10129_s21, 3  ;;  %p10216_p8 = por %p11729_p5, %p103_p3 }
  0x10   : > { %s10131_s30 = smov [#allocation4]   ;;  %p9799_p12 = scmp.lt.s32.totalorder %s10129_s21, 2 }
  0x11   : > { %s11742_s28 = scalar_select %p10216_p8, 1, 0 }
  0x12   : > { %p10220_p9 = pnand %p8560_p6, %p166_p7  ;;  %s189_s6 = sshll.u32 %s10131_s30, 4  ;;  %s190_s6 = int_to_ptr.vmem [resolvable:$true] %s189_s6 }
  0x13   : > { %s214_s8 = sand.u32 1, %s10129_s21   ;;  %s11735_s9 = sand.u32 1, %s10125_s20  }
  0x14   : > { %s11743_s29 = scalar_select %p10220_p9, 1, 0 }
  0x15   : > { %p9779_p10 = pneg %p10220_p9  ;;  %p10237_p13 = pnand %p9799_p12, %p10207_p4 }
  0x16   : > { %s11746_s1 = sld [smem:[#allocation14_spill]] }
  0x17   : > { %p10228_p11 = pnand %p9779_p10, %p11729_p5 }
  0x18   : > { %s11745_s10 = scalar_select %p10237_p13, 1, 0 }
  0x19   : > { %s11744_s7 = scalar_select %p10228_p11, 1, 0 }
  0x1a   : > { %p10249_p1 = pneg %p10228_p11 }
  0x1c   : > { %s9943_s13 = scalar_lea.hbm %s11746_s1, 2048 }
  0x1d   : > { %p9944_p0 = scmp.ne.s32.totalorder %s11746_s1, %s9943_s13  ;;  %p9950_p4 = scmp.lt.u32.totalorder %s9943_s13, %s11746_s1 }
  0x1f   : > { %p9946_p2 = pnand %p10249_p1, %p9944_p0 }
  0x21   : > { %p9947_p3 = pneg %p9946_p2 }
  0x23   : > { %p9952_p6 = pnand %p9950_p4, %p9947_p3 }
  0x25   : > { %9955 = shalt.err (!%p9952_p6)
}
  0x26   : > { %s9956_s24 = scalar_lea.vmem %s190_s6, 2048  ;;  %p9964_p5 = scmp.lt.s32.totalorder %s190_s6, %s190_s6 }
  0x27   : > { %p9957_p7 = scmp.ne.s32.totalorder %s190_s6, %s9956_s24  ;;  %p9965_p8 = scmp.lt.s32.totalorder %s9956_s24, %s9956_s24 }
  0x29   : > { %p9959_p10 = pnand %p9957_p7, %p10249_p1  ;;  %p9966_p9 = por %p9965_p8, %p9964_p5 }
  0x2b   : > { %p9960_p12 = pneg %p9959_p10 }
  0x2d   : > { %p9967_p13 = pnand %p9966_p9, %p9960_p12 }
  0x2f   : > { %9970 = shalt.err (!%p9967_p13)
}
  0x30   : > { %s10132_s25 = smov 512   ;;  %s10133_s27 = smov 32  }
  0x31   : > { %9785 = dma.hbm_to_vmem [thread:$0]  (!%p10228_p11), %s11746_s1, 2048, %s190_s6, [#allocation5], %s10132_s25, %s10132_s25, %s10133_s27  }
  0x32   : > { %s8565_s12 = sshll.u32 %s11735_s9, 13  ;;  %s9649_s13 = sshll.u32 %s10129_s21, 10 }
  0x33   : > { %s11748_s3 = sld [smem:[#allocation15_spill]]  ;;  %s218_s18 = scalar_lea.vmem [#allocation7], %s8565_s12 }
  0x34   : > { %s225_s24 = sshll.u32 %s218_s18, 4  ;;  %s10275_s26 = scalar_lea.sflag [#allocation8], %s214_s8  ;;  %s10273_s24 = int_to_ptr.vmem [resolvable:$true] %s225_s24 }
  0x35   : > { %p11749_p8 = scmp.ne.s32.totalorder %s11745_s10, 0 }
  0x37   : > { %p11736_p9 = pneg %p11749_p8 }
  0x39   : > { %s10271_s17 = scalar_lea.hbm %s11748_s3, %s9649_s13  ;;  %s9976_s27 = scalar_lea.hbm %s11748_s3, 262144 }
  0x3a   : > { %s9971_s30 = scalar_lea.hbm %s10271_s17, 131072  ;;  %p9977_p2 = scmp.lt.u32.totalorder %s10271_s17, %s11748_s3 }
  0x3b   : > { %p9972_p5 = scmp.ne.s32.totalorder %s10271_s17, %s9971_s30  ;;  %p9978_p3 = scmp.lt.u32.totalorder %s9976_s27, %s9971_s30 }
  0x3c   : > { %p9980_p6 = scmp.lt.u32.totalorder %s9971_s30, %s10271_s17 }
  0x3d   : > { %p9974_p13 = pnand %p11736_p9, %p9972_p5  ;;  %p9979_p4 = por %p9978_p3, %p9977_p2 }
  0x3f   : > { %p9975_p0 = pneg %p9974_p13  ;;  %p9981_p7 = por %p9980_p6, %p9979_p4 }
  0x41   : > { %p9982_p10 = pnand %p9981_p7, %p9975_p0 }
  0x43   : > { %9985 = shalt.err (!%p9982_p10)
}
  0x44   : > { %s9986_s8 = scalar_lea.vmem %s10273_s24, 131072  ;;  %s10134_s12 = smov [#allocation7]  }
  0x45   : > { %p9987_p12 = scmp.ne.s32.totalorder %s10273_s24, %s9986_s8  ;;  %s9991_s14 = sshll.u32 %s10134_s12, 4  ;;  %s9992_s14 = int_to_ptr.vmem [resolvable:$false] %s9991_s14 }
  0x46   : > { %s9993_s15 = scalar_lea.vmem %s9992_s14, 262144  ;;  %p9994_p11 = scmp.lt.s32.totalorder %s10273_s24, %s9992_s14 }
  0x47   : > { %p9989_p5 = pnand %p9987_p12, %p11736_p9  ;;  %p9995_p2 = scmp.lt.s32.totalorder %s9993_s15, %s9986_s8 }
  0x49   : > { %p9990_p13 = pneg %p9989_p5  ;;  %p9996_p3 = por %p9995_p2, %p9994_p11 }
  0x4b   : > { %p9997_p4 = pnand %p9996_p3, %p9990_p13 }
  0x4d   : > { %10000 = shalt.err (!%p9997_p4)
}
  0x4e   : > { %s10135_s18 = smov 2048   ;;  %s10136_s30 = smov 1024  }
  0x4f   : > { %s10137_s6 = smov 64   ;;  %s10138_s25 = smov [#allocation2]  }
  0x50   : > { %9792 = dma.hbm_to_vmem [thread:$0]  (!%p11749_p8), %s10271_s17, 131072, %s10273_s24, %s10275_s26, %s10135_s18, %s10136_s30, %s10137_s6  }
  0x51   : > { %s179_s27 = sshll.u32 %s10138_s25, 4  ;;  %s10139_s11 = smov [#allocation6]   ;;  %s180_s27 = int_to_ptr.vmem [resolvable:$true] %s179_s27 }
  0x52   : > { %s203_s13 = sshll.u32 %s10139_s11, 4  ;;  %s10001_s14 = scalar_lea.hbm %s11723_s0, 32  ;;  %s204_s13 = int_to_ptr.vmem [resolvable:$true] %s203_s13 }
  0x53   : > { %p10002_p11 = scmp.ne.s32.totalorder %s11723_s0, %s10001_s14  ;;  %p10008_p7 = scmp.lt.u32.totalorder %s10001_s14, %s11723_s0 }
  0x55   : > { %p10004_p0 = pnand %p10002_p11, %p10249_p1 }
  0x57   : > { %p10005_p6 = pneg %p10004_p0 }
  0x59   : > { %p10010_p10 = pnand %p10008_p7, %p10005_p6 }
  0x5b   : > { %10013 = shalt.err (!%p10010_p10)
}
  0x5c   : > { %s10014_s17 = scalar_lea.vmem %s180_s27, 32  ;;  %p10022_p2 = scmp.lt.s32.totalorder %s180_s27, %s180_s27 }
  0x5d   : > { %p10015_p12 = scmp.ne.s32.totalorder %s180_s27, %s10014_s17  ;;  %p10023_p3 = scmp.lt.s32.totalorder %s10014_s17, %s10014_s17 }
  0x5f   : > { %p10017_p5 = pnand %p10015_p12, %p10249_p1  ;;  %p10024_p4 = por %p10023_p3, %p10022_p2 }
  0x61   : > { %p10018_p13 = pneg %p10017_p5 }
  0x63   : > { %p10025_p9 = pnand %p10024_p4, %p10018_p13 }
  0x65   : > { %10028 = shalt.err (!%p10025_p9)
}
  0x66   : > { %p11750_p11 = scmp.ne.s32.totalorder %s11744_s7, 0  ;;  %s11751_s1 = sand.u32 1, %s10125_s20  }
  0x67   : > { %s8568_s3 = sshll.u32 %s11751_s1, 4  ;;  %s10029_s6 = scalar_lea.hbm %s11725_s2, 128 }
  0x68   : > { %9782 = dma.hbm_to_vmem [thread:$0]  (!%p11750_p11), %s11723_s0, 32, %s180_s27, [#allocation3]  }
  0x69   : > { %p10030_p0 = scmp.ne.s32.totalorder %s11725_s2, %s10029_s6  ;;  %p10036_p7 = scmp.lt.u32.totalorder %s10029_s6, %s11725_s2 }
  0x6b   : > { %p10032_p9 = pnand %p10030_p0, %p10249_p1 }
  0x6d   : > { %p10033_p6 = pneg %p10032_p9 }
  0x6f   : > { %p10038_p10 = pnand %p10036_p7, %p10033_p6 }
  0x71   : > { %10041 = shalt.err (!%p10038_p10)
}
  0x72   : > { %s10042_s27 = scalar_lea.vmem %s204_s13, 128  ;;  %p10050_p2 = scmp.lt.s32.totalorder %s204_s13, %s204_s13 }
  0x73   : > { %p10043_p12 = scmp.ne.s32.totalorder %s204_s13, %s10042_s27  ;;  %p10051_p3 = scmp.lt.s32.totalorder %s10042_s27, %s10042_s27 }
  0x75   : > { %p10045_p5 = pnand %p10043_p12, %p10249_p1  ;;  %p10052_p4 = por %p10051_p3, %p10050_p2 }
  0x77   : > { %p10046_p13 = pneg %p10045_p5 }
  0x79   : > { %p10053_p8 = pnand %p10052_p4, %p10046_p13 }
  0x7b   : > { %10056 = shalt.err (!%p10053_p8)
}
  0x7c   : > { %9788 = dma.hbm_to_vmem [thread:$0]  (!%p11750_p11), %s11725_s2, 128, %s204_s13, [#allocation5]  }
  0x7d   : > { %s9650_s17 = sshll.u32 %s10129_s21, 8  ;;  %s239_s1 = scalar_lea.vmem [#allocation9], %s8568_s3 }
  0x7e   : > { %s10345_s16 = scalar_lea.hbm %s11727_s4, %s9650_s17  ;;  %s247_s18 = sshll.u32 %s239_s1, 4  ;;  %s248_s18 = int_to_ptr.vmem [resolvable:$true] %s247_s18 }
  0x7f   : > { %s10057_s7 = scalar_lea.hbm %s10345_s16, 256  ;;  %p11752_p8 = scmp.ne.s32.totalorder %s11745_s10, 0 }
  0x80   : > { %p10058_p1 = scmp.ne.s32.totalorder %s10345_s16, %s10057_s7  ;;  %s10062_s30 = scalar_lea.hbm %s11727_s4, 512 }
  0x81   : > { %p11753_p0 = pneg %p11752_p8  ;;  %p10063_p11 = scmp.lt.u32.totalorder %s10345_s16, %s11727_s4 }
  0x82   : > { %p10064_p7 = scmp.lt.u32.totalorder %s10062_s30, %s10057_s7  ;;  %p10066_p12 = scmp.lt.u32.totalorder %s10057_s7, %s10345_s16 }
  0x83   : > { %p10060_p9 = pnand %p10058_p1, %p11753_p0 }
  0x84   : > { %p10065_p10 = por %p10064_p7, %p10063_p11 }
  0x85   : > { %p10061_p6 = pneg %p10060_p9 }
  0x86   : > { %p10067_p5 = por %p10066_p12, %p10065_p10 }
  0x88   : > { %p10068_p13 = pnand %p10067_p5, %p10061_p6 }
  0x8a   : > { %10071 = shalt.err (!%p10068_p13)
}
  0x8b   : > { %s10072_s3 = scalar_lea.vmem %s248_s18, 256  ;;  %p11754_p3 = pmov %p11753_p0 }
  0x8c   : > { %p10073_p2 = scmp.ne.s32.totalorder %s248_s18, %s10072_s3  ;;  %s10140_s11 = smov [#allocation9]  }
  0x8d   : > { %s10077_s12 = sshll.u32 %s10140_s11, 4  ;;  %s10078_s12 = int_to_ptr.vmem [resolvable:$false] %s10077_s12 }
  0x8e   : > { %p10075_p4 = pnand %p10073_p2, %p11754_p3  ;;  %s10079_s8 = scalar_lea.vmem %s10078_s12, 512 }
  0x8f   : > { %p10080_p0 = scmp.lt.s32.totalorder %s248_s18, %s10078_s12  ;;  %p10081_p9 = scmp.lt.s32.totalorder %s10079_s8, %s10072_s3 }
  0x90   : > { %p10076_p1 = pneg %p10075_p4 }
  0x91   : > { %p10082_p7 = por %p10081_p9, %p10080_p0 }
  0x93   : > { %p10083_p11 = pnand %p10082_p7, %p10076_p1 }
  0x95   : > { %10086 = shalt.err (!%p10083_p11)
}
  0x96   : > { %9795 = dma.hbm_to_vmem [thread:$0]  (!%p11752_p8), %s10345_s16, 256, %s248_s18, %s10275_s26  }
  0x97   : > { %p11755_p6 = scmp.ne.s32.totalorder %s11743_s29, 0 }
  0x98   : > { %p11756_p10 = scmp.eq.s32.totalorder (!%p11755_p6), %s10192_s22, 0 }
  0x99   : > { %256 = sbr.rel (%p11755_p6) target bundleno = 1639 (0x667), region = 40 }
  0xa0   : > { %10104 = dma.done.wait (%p11756_p10), [#allocation3], 32   ;;  %p11757_p12 = pmov %p11756_p10 }
  0xa1   : > { %p11758_p5 = pmov %p11756_p10 }
  0xa2   : > { %10106 = vsyncadd (%p11757_p12), [#allocation3], 4294967264 }
  0xa3   : > { %10108 = dma.done.wait (%p11758_p5), [#allocation5], 2176   ;;  %p11759_p13 = pmov %p11758_p5 }
  0xa4   : > { %s270_s26 = sand.u32 1, %s10192_s22   ;;  %s272_s10 = sand.u32 1, %s10121_s19  }
  0xa5   : > { %10110 = vsyncadd (%p11759_p13), [#allocation5], 4294965120  ;;  %s8575_s29 = sshll.u32 %s272_s10, 13  ;;  %s271_s27 = scalar_lea.sflag [#allocation8], %s270_s26 }
  0xa6   : > { %s10381_s14 = scalar_lea.vmem [#allocation7], %s8575_s29  ;;  %p11760_p8 = scmp.ne.s32.totalorder %s11742_s28, 0 }
  0xa8   : > { %10112 = dma.done.wait (%p11760_p8), %s271_s27, 131328  }
  0xa9   : > { %10114 = vsyncadd (%p11760_p8), %s271_s27, 4294835968  ;;  %v10141_v0 = vmov 0   ;;  %v326_v1 = vld [vmem:[#allocation4] sm:$0xff]  ;;  %v327_v7 = vld [vmem:[#allocation4 + $0x8] sm:$0xff]  ;;  %vm464_vm0 = vcmask 261120   ;;  %s8576_s28 = sshll.u32 %s272_s10, 4 }
  0xaa   : > { %500 = vmatprep.mubr.bf16.mxu0 %v10141_v0  ;;  %541 = vmatprep.mubr.bf16.mxu1 %v10141_v0  ;;  %v330_v2 = vld [vmem:[#allocation4 + $0x20] sm:$0xff]  ;;  %v331_v9 = vld [vmem:[#allocation4 + $0x28] sm:$0xff]  ;;  %v328_v15 = vld [vmem:[#allocation4 + $0x10] sm:$0xff]  ;;  %s11011_s15 = scalar_lea.vmem [#allocation9], %s8576_s28  ;;  %s8577_s17 = sshll.u32 %s10192_s22, 4 }
  0xab   : > { %v334_v3 = vld [vmem:[#allocation4 + $0x40] sm:$0xff]  ;;  %v8580_v4 = vcombine.high %v326_v1, %v330_v2  ;;  %v8579_v5 = vcombine.low %v326_v1, %v330_v2  ;;  %v335_v10 = vld [vmem:[#allocation4 + $0x48] sm:$0xff]  ;;  %v8582_v12 = vcombine.high %v327_v7, %v331_v9  ;;  %v8581_v13 = vcombine.low %v327_v7, %v331_v9  ;;  %v332_v16 = vld [vmem:[#allocation4 + $0x30] sm:$0xff]  ;;  %p11065_p2 = scmp.lt.s32.totalorder %s8577_s17, 31 }
  0xac   : > { %v338_v6 = vld [vmem:[#allocation4 + $0x60] sm:$0xff]  ;;  %v339_v11 = vld [vmem:[#allocation4 + $0x68] sm:$0xff]  ;;  %v324_v18 = vld [vmem:[#allocation2] sm:$0x3]  ;;  %v8584_v21 = vcombine.high %v328_v15, %v332_v16  ;;  %v8583_v27 = vcombine.low %v328_v15, %v332_v16 }
  0xad   : > { %v8588_v8 = vcombine.high %v334_v3, %v338_v6  ;;  %468 = vmatprep.subr.bf16.mxu0 %v8580_v4  ;;  %v8590_v14 = vcombine.high %v335_v10, %v339_v11  ;;  %v8587_v17 = vcombine.low %v334_v3, %v338_v6  ;;  %v329_v19 = vld [vmem:[#allocation4 + $0x18] sm:$0xff]  ;;  %509 = vmatprep.subr.bf16.mxu1 %v8582_v12  ;;  %v336_v23 = vld [vmem:[#allocation4 + $0x50] sm:$0xff]  ;;  %v696_v32 = vld [vmem:[%s10381_s14] sm:$0xff]  ;;  %s11768_s17 = smov (!%p11065_p2, %s8577_s17), 31 }
  0xae   : > { %469 = vmatpush1.bf16.msra.mxu0 %v8579_v5  ;;  %v333_v20 = vld [vmem:[#allocation4 + $0x38] sm:$0xff]  ;;  %510 = vmatpush1.bf16.msra.mxu1 %v8581_v13  ;;  %v8589_v22 = vcombine.low %v335_v10, %v339_v11  ;;  %v340_v24 = vld [vmem:[#allocation4 + $0x70] sm:$0xff]  ;;  %v325_v25 = vpack.c.bf16 %v324_v18, %v324_v18  ;;  %v704_v33 = vld [vmem:[%s10381_s14 + $0x40] sm:$0xff]  ;;  %s8578_s22 = sshll.u32 %s11768_s17, 1 }
  0xaf   : > { %470 = vmatprep.subr.bf16.mxu0 %v8588_v8  ;;  %511 = vmatprep.subr.bf16.mxu1 %v8590_v14  ;;  %v8586_v26 = vcombine.high %v329_v19, %v333_v20  ;;  %v337_v28 = vld [vmem:[#allocation4 + $0x58] sm:$0xff]  ;;  %v8592_v30 = vcombine.high %v336_v23, %v340_v24  ;;  %v8585_v31 = vcombine.low %v329_v19, %v333_v20  ;;  %v697_v36 = vld [vmem:[%s10381_s14 + $0x8] sm:$0xff]  ;;  %v712_v40 = vld [vmem:[%s10381_s14 + $0x80] sm:$0xff]  ;;  %s11098_s1 = scalar_lea.vmem %s11728_s5, %s8578_s22 }
  0xb0   : > { %v341_v29 = vld [vmem:[#allocation4 + $0x78] sm:$0xff]  ;;  %v8591_v35 = vcombine.low %v336_v23, %v340_v24  ;;  %v705_v37 = vld [vmem:[%s10381_s14 + $0x48] sm:$0xff]  ;;  %v8608_v38 = vcombine.high %v696_v32, %v704_v33  ;;  %v720_v41 = vld [vmem:[%s10381_s14 + $0xc0] sm:$0xff]  ;;  %v8607_v43 = vcombine.low %v696_v32, %v704_v33 }
  0xb1   : > { %v8594_v34 = vcombine.high %v337_v28, %v341_v29  ;;  %v8593_v39 = vcombine.low %v337_v28, %v341_v29  ;;  %v8610_v42 = vcombine.high %v697_v36, %v705_v37  ;;  %v713_v44 = vld [vmem:[%s10381_s14 + $0x88] sm:$0xff]  ;;  %v8624_v46 = vcombine.high %v712_v40, %v720_v41  ;;  %v728_v48 = vld [vmem:[%s10381_s14 + $0x100] sm:$0xff] }
  0xb2   : > { %471 = vmatpush1.bf16.msra.mxu0 %v8587_v17  ;;  %512 = vmatpush1.bf16.msra.mxu1 %v8589_v22  ;;  %v721_v45 = vld [vmem:[%s10381_s14 + $0xc8] sm:$0xff]  ;;  %v8609_v47 = vcombine.low %v697_v36, %v705_v37  ;;  %v736_v49 = vld [vmem:[%s10381_s14 + $0x140] sm:$0xff]  ;;  %v8623_v51 = vcombine.low %v712_v40, %v720_v41 }
  0xb3   : > { %550 = vmatprep.subr.bf16.mxu0 %v8584_v21  ;;  %591 = vmatprep.subr.bf16.mxu1 %v8586_v26  ;;  %v8626_v50 = vcombine.high %v713_v44, %v721_v45  ;;  %v729_v52 = vld [vmem:[%s10381_s14 + $0x108] sm:$0xff]  ;;  %v8640_v54 = vcombine.high %v728_v48, %v736_v49  ;;  %v8625_v55 = vcombine.low %v713_v44, %v721_v45  ;;  %v744_v56 = vld [vmem:[%s10381_s14 + $0x180] sm:$0xff] }
  0xb4   : > { %v737_v53 = vld [vmem:[%s10381_s14 + $0x148] sm:$0xff]  ;;  %v752_v57 = vld [vmem:[%s10381_s14 + $0x1c0] sm:$0xff]  ;;  %v8639_v59 = vcombine.low %v728_v48, %v736_v49 }
  0xb5   : > { %8595 = vmatmul.mubr.msk.bf16.vlgmr.msra.gmra.mrb[0].mxu0 %vm464_vm0, %v325_v25  ;;  %8596 = vmatmul.mubr.msk.bf16.vlgmr.msra.gmra.mrb[0].mxu1 %vm464_vm0, %v325_v25  ;;  %v8642_v58 = vcombine.high %v729_v52, %v737_v53  ;;  %v745_v60 = vld [vmem:[%s10381_s14 + $0x188] sm:$0xff]  ;;  %v8656_v62 = vcombine.high %v744_v56, %v752_v57  ;;  %v8641_v63 = vcombine.low %v729_v52, %v737_v53  ;;  %v768_v1 = vld [vmem:[%s10381_s14 + $0x240] sm:$0xff] }
  0xb6   : > { %551 = vmatpush1.bf16.msra.mxu0 %v8583_v27  ;;  %582 = vmatprep.mubr.bf16.mxu0 %v10141_v0  ;;  %v753_v61 = vld [vmem:[%s10381_s14 + $0x1c8] sm:$0xff]  ;;  %v8655_v3 = vcombine.low %v744_v56, %v752_v57  ;;  %v776_v8 = vld [vmem:[%s10381_s14 + $0x280] sm:$0xff] }
  0xb7   : > { %552 = vmatprep.subr.bf16.mxu0 %v8592_v30  ;;  %592 = vmatpush1.bf16.msra.mxu1 %v8585_v31  ;;  %v8658_v2 = vcombine.high %v745_v60, %v753_v61  ;;  %v761_v4 = vld [vmem:[%s10381_s14 + $0x208] sm:$0xff]  ;;  %v8657_v7 = vcombine.low %v745_v60, %v753_v61  ;;  %v784_v9 = vld [vmem:[%s10381_s14 + $0x2c0] sm:$0xff] }
  0xb8   : > { %623 = vmatprep.mubr.bf16.mxu1 %v10141_v0  ;;  %593 = vmatprep.subr.bf16.mxu1 %v8594_v34  ;;  %v760_v0 = vld [vmem:[%s10381_s14 + $0x200] sm:$0xff]  ;;  %v769_v5 = vld [vmem:[%s10381_s14 + $0x248] sm:$0xff]  ;;  %v8688_v14 = vcombine.high %v776_v8, %v784_v9  ;;  %v8687_v19 = vcombine.low %v776_v8, %v784_v9 }
  0xb9   : > { %v8672_v6 = vcombine.high %v760_v0, %v768_v1  ;;  %v8674_v10 = vcombine.high %v761_v4, %v769_v5  ;;  %v8671_v11 = vcombine.low %v760_v0, %v768_v1  ;;  %v777_v12 = vld [vmem:[%s10381_s14 + $0x288] sm:$0xff]  ;;  %v8673_v15 = vcombine.low %v761_v4, %v769_v5  ;;  %v792_v16 = vld [vmem:[%s10381_s14 + $0x300] sm:$0xff] }
  0xba   : > { %553 = vmatpush1.bf16.msra.mxu0 %v8591_v35  ;;  %v785_v13 = vld [vmem:[%s10381_s14 + $0x2c8] sm:$0xff]  ;;  %v800_v17 = vld [vmem:[%s10381_s14 + $0x340] sm:$0xff] }
  0xbb   : > { %6924 = vmatprep.subr.bf16.mxu0 %v8608_v38  ;;  %594 = vmatpush1.bf16.msra.mxu1 %v8593_v39  ;;  %v8690_v18 = vcombine.high %v777_v12, %v785_v13  ;;  %v793_v20 = vld [vmem:[%s10381_s14 + $0x308] sm:$0xff]  ;;  %v8704_v22 = vcombine.high %v792_v16, %v800_v17  ;;  %v8689_v23 = vcombine.low %v777_v12, %v785_v13  ;;  %v808_v24 = vld [vmem:[%s10381_s14 + $0x380] sm:$0xff] }
  0xbc   : > { %7088 = vmatprep.subr.bf16.mxu1 %v8610_v42  ;;  %v801_v21 = vld [vmem:[%s10381_s14 + $0x348] sm:$0xff]  ;;  %v8703_v27 = vcombine.low %v792_v16, %v800_v17  ;;  %v824_v35 = vld [vmem:[%s10381_s14 + $0x400] sm:$0xff] }
  0xbd   : > { %8597 = vmatmul.mubr.msk.bf16.vlgmr.msra.gmra.mrb[4].mxu0 %vm464_vm0, %v325_v25  ;;  %v8706_v26 = vcombine.high %v793_v20, %v801_v21  ;;  %v809_v28 = vld [vmem:[%s10381_s14 + $0x388] sm:$0xff]  ;;  %v8705_v31 = vcombine.low %v793_v20, %v801_v21  ;;  %v832_v36 = vld [vmem:[%s10381_s14 + $0x440] sm:$0xff] }
  0xbe   : > { %6925 = vmatpush1.bf16.msra.mxu0 %v8607_v43  ;;  %8598 = vmatmul.mubr.msk.bf16.vlgmr.msra.gmra.mrb[4].mxu1 %vm464_vm0, %v325_v25  ;;  %v816_v25 = vld [vmem:[%s10381_s14 + $0x3c0] sm:$0xff]  ;;  %v817_v29 = vld [vmem:[%s10381_s14 + $0x3c8] sm:$0xff]  ;;  %v8736_v38 = vcombine.high %v824_v35, %v832_v36  ;;  %v8735_v40 = vcombine.low %v824_v35, %v832_v36 }
  0xbf   : > { %6926 = vmatprep.subr.bf16.mxu0 %v8624_v46  ;;  %7089 = vmatpush1.bf16.msra.mxu1 %v8609_v47  ;;  %v8720_v30 = vcombine.high %v808_v24, %v816_v25  ;;  %v8722_v32 = vcombine.high %v809_v28, %v817_v29  ;;  %v8719_v33 = vcombine.low %v808_v24, %v816_v25  ;;  %v825_v37 = vld [vmem:[%s10381_s14 + $0x408] sm:$0xff]  ;;  %v840_v43 = vld [vmem:[%s10381_s14 + $0x480] sm:$0xff] }
  0xc0   : > { %7090 = vmatprep.subr.bf16.mxu1 %v8626_v50  ;;  %v8721_v34 = vcombine.low %v809_v28, %v817_v29  ;;  %v833_v39 = vld [vmem:[%s10381_s14 + $0x448] sm:$0xff]  ;;  %v848_v44 = vld [vmem:[%s10381_s14 + $0x4c0] sm:$0xff] }
  0xc1   : > { %v8737_v41 = vcombine.low %v825_v37, %v833_v39  ;;  %v8738_v42 = vcombine.high %v825_v37, %v833_v39  ;;  %v841_v45 = vld [vmem:[%s10381_s14 + $0x488] sm:$0xff]  ;;  %v8752_v46 = vcombine.high %v840_v43, %v848_v44  ;;  %v8751_v48 = vcombine.low %v840_v43, %v848_v44  ;;  %v864_v52 = vld [vmem:[%s10381_s14 + $0x540] sm:$0xff] }
  0xc2   : > { %6927 = vmatpush1.bf16.msra.mxu0 %v8623_v51  ;;  %v849_v47 = vld [vmem:[%s10381_s14 + $0x4c8] sm:$0xff]  ;;  %v856_v51 = vld [vmem:[%s10381_s14 + $0x500] sm:$0xff]  ;;  %v344_v43 = vlaneseq }
  0xc3   : > { %6928 = vmatprep.subr.bf16.mxu0 %v8640_v54  ;;  %7091 = vmatpush1.bf16.msra.mxu1 %v8625_v55  ;;  %v8753_v49 = vcombine.low %v841_v45, %v849_v47  ;;  %v8754_v50 = vcombine.high %v841_v45, %v849_v47  ;;  %v857_v53 = vld [vmem:[%s10381_s14 + $0x508] sm:$0xff]  ;;  %v8768_v54 = vcombine.high %v856_v51, %v864_v52  ;;  %v880_v60 = vld [vmem:[%s10381_s14 + $0x5c0] sm:$0xff] }
  0xc4   : > { %7092 = vmatprep.subr.bf16.mxu1 %v8642_v58  ;;  %v865_v55 = vld [vmem:[%s10381_s14 + $0x548] sm:$0xff]  ;;  %v8767_v56 = vcombine.low %v856_v51, %v864_v52  ;;  %v896_v4 = vld [vmem:[%s10381_s14 + $0x640] sm:$0xff]  ;;  %v10475_v44 = vshrl.u32 %v344_v43, 7 }
  0xc5   : > { %v8769_v57 = vcombine.low %v857_v53, %v865_v55  ;;  %v8770_v58 = vcombine.high %v857_v53, %v865_v55  ;;  %v873_v61 = vld [vmem:[%s10381_s14 + $0x588] sm:$0xff]  ;;  %v912_v12 = vld [vmem:[%s10381_s14 + $0x6c0] sm:$0xff] }
  0xc6   : > { %6929 = vmatpush1.bf16.msra.mxu0 %v8639_v59  ;;  %v872_v59 = vld [vmem:[%s10381_s14 + $0x580] sm:$0xff]  ;;  %v889_v5 = vld [vmem:[%s10381_s14 + $0x608] sm:$0xff]  ;;  %v10478_v45 = vsub.s32 0, %v10475_v44  ;;  %v10483_v47 = vsub.s32 1, %v10475_v44 }
  0xc7   : > { %6930 = vmatprep.subr.bf16.mxu0 %v8656_v62  ;;  %7093 = vmatpush1.bf16.msra.mxu1 %v8641_v63  ;;  %v8784_v62 = vcombine.high %v872_v59, %v880_v60  ;;  %v881_v63 = vld [vmem:[%s10381_s14 + $0x5c8] sm:$0xff]  ;;  %v8783_v0 = vcombine.low %v872_v59, %v880_v60  ;;  %v928_v20 = vld [vmem:[%s10381_s14 + $0x740] sm:$0xff] }
  0xc8   : > { %7094 = vmatprep.subr.bf16.mxu1 %v8658_v2  ;;  %v8785_v1 = vcombine.low %v873_v61, %v881_v63  ;;  %v8786_v2 = vcombine.high %v873_v61, %v881_v63  ;;  %v905_v13 = vld [vmem:[%s10381_s14 + $0x688] sm:$0xff]  ;;  %v944_v28 = vld [vmem:[%s10381_s14 + $0x7c0] sm:$0xff] }
  0xc9   : > { %v921_v21 = vld [vmem:[%s10381_s14 + $0x708] sm:$0xff]  ;;  %v10456_v35 = vld [vmem:[%s10381_s14 + $0x800] sm:$0xff] }
  0xca   : > { %6931 = vmatpush1.bf16.msra.mxu0 %v8655_v3  ;;  %v888_v3 = vld [vmem:[%s10381_s14 + $0x600] sm:$0xff]  ;;  %v937_v29 = vld [vmem:[%s10381_s14 + $0x788] sm:$0xff] }
  0xcb   : > { %6932 = vmatprep.subr.bf16.mxu0 %v8672_v6  ;;  %7095 = vmatpush1.bf16.msra.mxu1 %v8657_v7  ;;  %v8800_v6 = vcombine.high %v888_v3, %v896_v4  ;;  %v897_v7 = vld [vmem:[%s10381_s14 + $0x648] sm:$0xff]  ;;  %v8799_v8 = vcombine.low %v888_v3, %v896_v4  ;;  %v10459_v36 = vld [vmem:[%s10381_s14 + $0x840] sm:$0xff] }
  0xcc   : > { %7096 = vmatprep.subr.bf16.mxu1 %v8674_v10  ;;  %v8801_v9 = vcombine.low %v889_v5, %v897_v7  ;;  %v8802_v10 = vcombine.high %v889_v5, %v897_v7  ;;  %v10462_v37 = vld [vmem:[%s10381_s14 + $0x808] sm:$0xff] }
  0xcd   : > { %v10467_v39 = vld [vmem:[%s10381_s14 + $0x848] sm:$0xff] }
  0xce   : > { %6933 = vmatpush1.bf16.msra.mxu0 %v8671_v11  ;;  %v904_v11 = vld [vmem:[%s10381_s14 + $0x680] sm:$0xff] }
  0xcf   : > { %6934 = vmatprep.subr.bf16.mxu0 %v8688_v14  ;;  %7097 = vmatpush1.bf16.msra.mxu1 %v8673_v15  ;;  %v8816_v14 = vcombine.high %v904_v11, %v912_v12  ;;  %v913_v15 = vld [vmem:[%s10381_s14 + $0x6c8] sm:$0xff]  ;;  %v8815_v16 = vcombine.low %v904_v11, %v912_v12 }
  0xd0   : > { %7098 = vmatprep.subr.bf16.mxu1 %v8690_v18  ;;  %v8817_v17 = vcombine.low %v905_v13, %v913_v15  ;;  %v8818_v18 = vcombine.high %v905_v13, %v913_v15 }
  0xd2   : > { %6935 = vmatpush1.bf16.msra.mxu0 %v8687_v19  ;;  %v920_v19 = vld [vmem:[%s10381_s14 + $0x700] sm:$0xff] }
  0xd3   : > { %6936 = vmatprep.subr.bf16.mxu0 %v8704_v22  ;;  %7099 = vmatpush1.bf16.msra.mxu1 %v8689_v23  ;;  %v8832_v22 = vcombine.high %v920_v19, %v928_v20  ;;  %v929_v23 = vld [vmem:[%s10381_s14 + $0x748] sm:$0xff]  ;;  %v8831_v24 = vcombine.low %v920_v19, %v928_v20  ;;  %v976_v20 = vld [vmem:[%s10381_s14 + $0x8c0] sm:$0xff] }
  0xd4   : > { %7100 = vmatprep.subr.bf16.mxu1 %v8706_v26  ;;  %v8833_v25 = vcombine.low %v921_v21, %v929_v23  ;;  %v8834_v26 = vcombine.high %v921_v21, %v929_v23  ;;  %v969_v21 = vld [vmem:[%s10381_s14 + $0x888] sm:$0xff] }
  0xd6   : > { %6937 = vmatpush1.bf16.msra.mxu0 %v8703_v27  ;;  %v936_v27 = vld [vmem:[%s10381_s14 + $0x780] sm:$0xff] }
  0xd7   : > { %6938 = vmatprep.subr.bf16.mxu0 %v8720_v30  ;;  %7101 = vmatpush1.bf16.msra.mxu1 %v8705_v31  ;;  %v8848_v30 = vcombine.high %v936_v27, %v944_v28  ;;  %v945_v31 = vld [vmem:[%s10381_s14 + $0x7c8] sm:$0xff] }
  0xd8   : > { %7102 = vmatprep.subr.bf16.mxu1 %v8722_v32  ;;  %v8847_v32 = vcombine.low %v936_v27, %v944_v28 }
  0xda   : > { %6939 = vmatpush1.bf16.msra.mxu0 %v8719_v33  ;;  %v8849_v33 = vcombine.low %v937_v29, %v945_v31 }
  0xdb   : > { %7103 = vmatpush1.bf16.msra.mxu1 %v8721_v34  ;;  %6940 = vmatprep.subr.bf16.mxu0 %v8736_v38  ;;  %v8850_v34 = vcombine.high %v937_v29, %v945_v31  ;;  %v8864_v38 = vcombine.high %v10456_v35, %v10459_v36 }
  0xdc   : > { %7104 = vmatprep.subr.bf16.mxu1 %v8738_v42  ;;  %v8866_v42 = vcombine.high %v10462_v37, %v10467_v39 }
  0xde   : > { %6941 = vmatpush1.bf16.msra.mxu0 %v8735_v40  ;;  %v8863_v40 = vcombine.low %v10456_v35, %v10459_v36 }
  0xdf   : > { %7105 = vmatpush1.bf16.msra.mxu1 %v8737_v41  ;;  %6942 = vmatprep.subr.bf16.mxu0 %v8752_v46  ;;  %v8865_v41 = vcombine.low %v10462_v37, %v10467_v39  ;;  %v10480_v46 = vld [vmem:[#allocation6] sm:$0xff] }
  0xe0   : > { %7106 = vmatprep.subr.bf16.mxu1 %v8754_v50  ;;  %v351_v50 = vrot.slane %v10480_v46, %v10483_v47 }
  0xe2   : > { %6943 = vmatpush1.bf16.msra.mxu0 %v8751_v48  ;;  %v10486_v48 = vsub.s32 3, %v10475_v44 }
  0xe3   : > { %7107 = vmatpush1.bf16.msra.mxu1 %v8753_v49  ;;  %6944 = vmatprep.subr.bf16.mxu0 %v8768_v54  ;;  %v347_v49 = vrot.slane %v10480_v46, %v10478_v45 }
  0xe4   : > { %7108 = vmatprep.subr.bf16.mxu1 %v8770_v58  ;;  %v359_v52 = vrot.slane %v10480_v46, %v10486_v48 }
  0xe6   : > { %6945 = vmatpush1.bf16.msra.mxu0 %v8767_v56 }
  0xe7   : > { %7109 = vmatpush1.bf16.msra.mxu1 %v8769_v57  ;;  %6946 = vmatprep.subr.bf16.mxu0 %v8784_v62 }
  0xe8   : > { %7110 = vmatprep.subr.bf16.mxu1 %v8786_v2 }
  0xea   : > { %6947 = vmatpush1.bf16.msra.mxu0 %v8783_v0 }
  0xeb   : > { %7111 = vmatpush1.bf16.msra.mxu1 %v8785_v1  ;;  %6948 = vmatprep.subr.bf16.mxu0 %v8800_v6 }
  0xec   : > { %7112 = vmatprep.subr.bf16.mxu1 %v8802_v10 }
  0xee   : > { %6949 = vmatpush1.bf16.msra.mxu0 %v8799_v8 }
  0xef   : > { %7113 = vmatpush1.bf16.msra.mxu1 %v8801_v9  ;;  %6950 = vmatprep.subr.bf16.mxu0 %v8816_v14 }
  0xf0   : > { %7114 = vmatprep.subr.bf16.mxu1 %v8818_v18 }
  0xf2   : > { %6951 = vmatpush1.bf16.msra.mxu0 %v8815_v16 }
  0xf3   : > { %7115 = vmatpush1.bf16.msra.mxu1 %v8817_v17  ;;  %6952 = vmatprep.subr.bf16.mxu0 %v8832_v22  ;;  %v968_v17 = vld [vmem:[%s10381_s14 + $0x880] sm:$0xff]  ;;  %v977_v22 = vld [vmem:[%s10381_s14 + $0x8c8] sm:$0xff] }
  0xf4   : > { %7116 = vmatprep.subr.bf16.mxu1 %v8834_v26  ;;  %v8880_v28 = vcombine.high %v968_v17, %v976_v20  ;;  %v8882_v29 = vcombine.high %v969_v21, %v977_v22 }
  0xf6   : > { %6953 = vmatpush1.bf16.msra.mxu0 %v8831_v24 }
  0xf7   : > { %7117 = vmatpush1.bf16.msra.mxu1 %v8833_v25  ;;  %6954 = vmatprep.subr.bf16.mxu0 %v8848_v30  ;;  %v984_v30 = vld [vmem:[%s10381_s14 + $0x900] sm:$0xff] }
  0xf8   : > { %7118 = vmatprep.subr.bf16.mxu1 %v8850_v34  ;;  %v993_v34 = vld [vmem:[%s10381_s14 + $0x948] sm:$0xff] }
  0xfa   : > { %6955 = vmatpush1.bf16.msra.mxu0 %v8847_v32  ;;  %v992_v32 = vld [vmem:[%s10381_s14 + $0x940] sm:$0xff] }
  0xfb   : > { %7119 = vmatpush1.bf16.msra.mxu1 %v8849_v33  ;;  %6965 = vmatprep.subr.bf16.mxu0 %v8864_v38  ;;  %v985_v33 = vld [vmem:[%s10381_s14 + $0x908] sm:$0xff]  ;;  %v8879_v38 = vcombine.low %v968_v17, %v976_v20  ;;  %v8896_v43 = vcombine.high %v984_v30, %v992_v32  ;;  %v8895_v35 = vcombine.low %v984_v30, %v992_v32 }
  0xfc   : > { %7129 = vmatprep.subr.bf16.mxu1 %v8866_v42  ;;  %v8881_v42 = vcombine.low %v969_v21, %v977_v22  ;;  %v8897_v36 = vcombine.low %v985_v33, %v993_v34  ;;  %v1064_v21 = vld [vmem:[%s10381_s14 + $0xb80] sm:$0xff] }
  0xfd   : > { %v1072_v22 = vld [vmem:[%s10381_s14 + $0xbc0] sm:$0xff] }
  0xfe   : > { %v8976_v32 = vcombine.high %v1064_v21, %v1072_v22 }
 0x188   : > { %v502_v51 = vpop.f32.mrb[0].mxu0  ;;  %v10494_v57 = vpop.f32.mrb[0].mxu1 }
 0x189   : > { %v503_v53 = vadd.f32 %v502_v51, %v347_v49  ;;  %v504_v54 = vpop.f32.mrb[1].mxu0  ;;  %v545_v60 = vpop.f32.mrb[1].mxu1  ;;  %v8898_v49 = vcombine.high %v985_v33, %v993_v34  ;;  %v1008_v51 = vld [vmem:[%s10381_s14 + $0x9c0] sm:$0xff] }
 0x18a   : > { %v505_v55 = vadd.f32 %v504_v54, %v351_v50  ;;  %v506_v56 = vpop.f32.mrb[2].mxu0  ;;  %v546_v62 = vadd.f32 %v545_v60, %v359_v52  ;;  %v547_v63 = vpop.f32.mrb[2].mxu1  ;;  %v1000_v50 = vld [vmem:[%s10381_s14 + $0x980] sm:$0xff]  ;;  %v1001_v52 = vld [vmem:[%s10381_s14 + $0x988] sm:$0xff] }
 0x18b   : > { %v8599_v58 = vmul.f32 -1.442695, %v503_v53  ;;  %v507_v59 = vpop.f32.mrb[3].mxu0  ;;  %v548_v0 = vpop.f32.mrb[3].mxu1  ;;  %v8912_v37 = vcombine.high %v1000_v50, %v1008_v51  ;;  %v1017_v54 = vld [vmem:[%s10381_s14 + $0xa08] sm:$0xff]  ;;  %v8911_v56 = vcombine.low %v1000_v50, %v1008_v51  ;;  %v1080_v34 = vld [vmem:[%s10381_s14 + $0xc00] sm:$0xff] }
 0x18c   : > { %v8600_v61 = vmul.f32 -1.442695, %v505_v55  ;;  %v8602_v1 = vmul.f32 -1.442695, %v546_v62  ;;  %v1033_v63 = vld [vmem:[%s10381_s14 + $0xa88] sm:$0xff] }
 0x18d   : > { %9845 = vpow2.f32 %v8599_v58  ;;  %v1041_v0 = vld [vmem:[%s10381_s14 + $0xac8] sm:$0xff] }
 0x18e   : > { %9847 = vpow2.f32 %v8600_v61  ;;  %v1032_v61 = vld [vmem:[%s10381_s14 + $0xa80] sm:$0xff]  ;;  %v8945_v17 = vcombine.low %v1033_v63, %v1041_v0 }
 0x18f   : > { %9849 = vpow2.f32 %v8602_v1  ;;  %v10543_v1 = vsub.s32 2, %v10475_v44 }
 0x190   : > { %v10496_v2 = vpop.f32.mrb[4].mxu0 }
 0x191   : > { %v10498_v3 = vpop.f32.mrb[5].mxu0  ;;  %v10500_v12 = vpop.f32.mrb[4].mxu1 }
 0x192   : > { %v588_v4 = vpop.f32.mrb[6].mxu0  ;;  %v10502_v14 = vpop.f32.mrb[5].mxu1 }
 0x193   : > { %v589_v5 = vpop.f32.mrb[7].mxu0  ;;  %v629_v18 = vpop.f32.mrb[6].mxu1 }
 0x194   : > { %v630_v23 = vpop.f32.mrb[7].mxu1 }
 0x195   : > { %v1065_v23 = vld [vmem:[%s10381_s14 + $0xb88] sm:$0xff] }
 0x197   : > { %v9846_v6 = vpop.eup %9845 }
 0x198   : > { %v9848_v7 = vpop.eup %9847  ;;  %v656_v8 = vadd.f32 1.0, %v9846_v6  ;;  %v10546_v6 = vsub.s32 5, %v10475_v44 }
 0x199   : > { %v657_v9 = vadd.f32 1.0, %v9848_v7  ;;  %v9850_v10 = vpop.eup %9849 }
 0x19a   : > { %9851 = vrcp.f32 %v656_v8  ;;  %v659_v11 = vadd.f32 1.0, %v9850_v10  ;;  %v8946_v8 = vcombine.high %v1033_v63, %v1041_v0  ;;  %v1056_v10 = vld [vmem:[%s10381_s14 + $0xb40] sm:$0xff]  ;;  %v367_v18 = vrot.slane %v10480_v46, %v10546_v6 }
 0x19b   : > { %9853 = vrcp.f32 %v657_v9  ;;  %v1048_v9 = vld [vmem:[%s10381_s14 + $0xb00] sm:$0xff] }
 0x19c   : > { %9855 = vrcp.f32 %v659_v11  ;;  %v1049_v11 = vld [vmem:[%s10381_s14 + $0xb08] sm:$0xff]  ;;  %v10564_v30 = vadd.f32 %v10498_v3, %v367_v18  ;;  %v1128_v0 = vld [vmem:[%s10381_s14 + $0xd80] sm:$0xff] }
 0x19d   : > { %v1145_v18 = vld [vmem:[%s10381_s14 + $0xe08] sm:$0xff] }
 0x19e   : > { %v8604_v3 = vmul.f32 -1.442695, %v10564_v30 }
 0x1a4   : > { %v9852_v13 = vpop.eup %9851 }
 0x1a5   : > { %v9854_v15 = vpop.eup %9853  ;;  %v680_v16 = vmul.f32 %v9852_v13, %v503_v53  ;;  %v1009_v53 = vld [vmem:[%s10381_s14 + $0x9c8] sm:$0xff] }
 0x1a6   : > { %v681_v19 = vmul.f32 %v9854_v15, %v505_v55  ;;  %v9856_v24 = vpop.eup %9855  ;;  %v8914_v39 = vcombine.high %v1001_v52, %v1009_v53  ;;  %v1025_v55 = vld [vmem:[%s10381_s14 + $0xa48] sm:$0xff]  ;;  %v8913_v58 = vcombine.low %v1001_v52, %v1009_v53  ;;  %v355_v15 = vrot.slane %v10480_v46, %v10543_v1  ;;  %v1096_v53 = vld [vmem:[%s10381_s14 + $0xc80] sm:$0xff] }
 0x1a7   : > { %v683_v26 = vmul.f32 %v9856_v24, %v546_v62  ;;  %v10510_v27 = vpack.c.bf16 %v680_v16, %v680_v16  ;;  %v8930_v60 = vcombine.high %v1017_v54, %v1025_v55  ;;  %v1040_v62 = vld [vmem:[%s10381_s14 + $0xac0] sm:$0xff]  ;;  %v8929_v5 = vcombine.low %v1017_v54, %v1025_v55  ;;  %v1057_v13 = vld [vmem:[%s10381_s14 + $0xb48] sm:$0xff] }
 0x1a8   : > { %v10508_v25 = vpack.c.bf16 %v681_v19, %v681_v19  ;;  %v8944_v7 = vcombine.high %v1032_v61, %v1040_v62  ;;  %v8943_v16 = vcombine.low %v1032_v61, %v1040_v62  ;;  %v8960_v19 = vcombine.high %v1048_v9, %v1056_v10  ;;  %v1073_v24 = vld [vmem:[%s10381_s14 + $0xbc8] sm:$0xff]  ;;  %v1112_v55 = vld [vmem:[%s10381_s14 + $0xd00] sm:$0xff] }
 0x1a9   : > { %v10515_v31 = vpack.c.bf16 %v683_v26, %v683_v26  ;;  %v8962_v20 = vcombine.high %v1049_v11, %v1057_v13  ;;  %v10561_v26 = vadd.f32 %v10494_v57, %v355_v15  ;;  %v8978_v33 = vcombine.high %v1065_v23, %v1073_v24  ;;  %v1089_v57 = vld [vmem:[%s10381_s14 + $0xc48] sm:$0xff]  ;;  %v1144_v15 = vld [vmem:[%s10381_s14 + $0xe00] sm:$0xff] }
 0x1aa   : > { %6956 = vmatprep.mubr.bf16.mxu0 %v10508_v25  ;;  %7120 = vmatprep.mubr.bf16.mxu1 %v10508_v25  ;;  %v8977_v50 = vcombine.low %v1065_v23, %v1073_v24 }
 0x1ab   : > { %6957 = vmatmul.mubr.bf16.vlgmr.msra.gmra.mrb[8].mxu0 %v10510_v27  ;;  %7121 = vmatmul.mubr.bf16.vlgmr.msra.gmra.mrb[8].mxu1 %v10510_v27 }
 0x1ac   : > { %6966 = vmatpush1.bf16.msra.mxu0 %v8863_v40  ;;  %7130 = vmatpush1.bf16.msra.mxu1 %v8865_v41  ;;  %v1016_v40 = vld [vmem:[%s10381_s14 + $0xa00] sm:$0xff] }
 0x1ad   : > { %6967 = vmatprep.subr.bf16.mxu0 %v8880_v28  ;;  %7131 = vmatprep.subr.bf16.mxu1 %v8882_v29  ;;  %v1024_v41 = vld [vmem:[%s10381_s14 + $0xa40] sm:$0xff]  ;;  %v8959_v28 = vcombine.low %v1048_v9, %v1056_v10  ;;  %v8961_v29 = vcombine.low %v1049_v11, %v1057_v13 }
 0x1ae   : > { %6997 = vmatprep.mubr.bf16.mxu0 %v10515_v31  ;;  %7161 = vmatprep.mubr.bf16.mxu1 %v10515_v31  ;;  %v8928_v59 = vcombine.high %v1016_v40, %v1024_v41  ;;  %v8927_v4 = vcombine.low %v1016_v40, %v1024_v41 }
 0x1b0   : > { %6968 = vmatpush1.bf16.msra.mxu0 %v8879_v38  ;;  %7132 = vmatpush1.bf16.msra.mxu1 %v8881_v42  ;;  %v1088_v38 = vld [vmem:[%s10381_s14 + $0xc40] sm:$0xff]  ;;  %v1081_v42 = vld [vmem:[%s10381_s14 + $0xc08] sm:$0xff] }
 0x1b1   : > { %6969 = vmatprep.subr.bf16.mxu0 %v8896_v43  ;;  %7133 = vmatprep.subr.bf16.mxu1 %v8898_v49  ;;  %v8601_v43 = vmul.f32 -1.442695, %v10561_v26  ;;  %v8975_v49 = vcombine.low %v1064_v21, %v1072_v22  ;;  %v8992_v51 = vcombine.high %v1080_v34, %v1088_v38  ;;  %v8994_v52 = vcombine.high %v1081_v42, %v1089_v57 }
 0x1b2   : > { %v8993_v40 = vcombine.low %v1081_v42, %v1089_v57 }
 0x1b3   : > { %9857 = vpow2.f32 %v8601_v43 }
 0x1b4   : > { %6970 = vmatpush1.bf16.msra.mxu0 %v8895_v35  ;;  %7134 = vmatpush1.bf16.msra.mxu1 %v8897_v36  ;;  %v1104_v35 = vld [vmem:[%s10381_s14 + $0xcc0] sm:$0xff]  ;;  %v1097_v36 = vld [vmem:[%s10381_s14 + $0xc88] sm:$0xff]  ;;  %9859 = vpow2.f32 %v8604_v3 }
 0x1b5   : > { %6971 = vmatprep.subr.bf16.mxu0 %v8912_v37  ;;  %7135 = vmatprep.subr.bf16.mxu1 %v8914_v39  ;;  %v1105_v37 = vld [vmem:[%s10381_s14 + $0xcc8] sm:$0xff]  ;;  %v8991_v39 = vcombine.low %v1080_v34, %v1088_v38  ;;  %v9008_v41 = vcombine.high %v1096_v53, %v1104_v35 }
 0x1b6   : > { %v9010_v54 = vcombine.high %v1097_v36, %v1105_v37  ;;  %v9009_v61 = vcombine.low %v1097_v36, %v1105_v37  ;;  %v1169_v34 = vld [vmem:[%s10381_s14 + $0xec8] sm:$0xff]  ;;  %v1192_v37 = vld [vmem:[%s10381_s14 + $0xf80] sm:$0xff] }
 0x1b7   : > { %v1177_v3 = vld [vmem:[%s10381_s14 + $0xf08] sm:$0xff] }
 0x1b8   : > { %6972 = vmatpush1.bf16.msra.mxu0 %v8911_v56  ;;  %7136 = vmatpush1.bf16.msra.mxu1 %v8913_v58  ;;  %v1120_v56 = vld [vmem:[%s10381_s14 + $0xd40] sm:$0xff]  ;;  %v1113_v58 = vld [vmem:[%s10381_s14 + $0xd08] sm:$0xff] }
 0x1b9   : > { %6973 = vmatprep.subr.bf16.mxu0 %v8928_v59  ;;  %7137 = vmatprep.subr.bf16.mxu1 %v8930_v60  ;;  %v1121_v59 = vld [vmem:[%s10381_s14 + $0xd48] sm:$0xff]  ;;  %v9007_v60 = vcombine.low %v1096_v53, %v1104_v35  ;;  %v9024_v62 = vcombine.high %v1112_v55, %v1120_v56 }
 0x1ba   : > { %v9026_v63 = vcombine.high %v1113_v58, %v1121_v59  ;;  %v9025_v9 = vcombine.low %v1113_v58, %v1121_v59  ;;  %v1208_v59 = vld [vmem:[%s10381_s14 + $0x1000] sm:$0xff] }
 0x1bc   : > { %6974 = vmatpush1.bf16.msra.mxu0 %v8927_v4  ;;  %7138 = vmatpush1.bf16.msra.mxu1 %v8929_v5  ;;  %v1136_v4 = vld [vmem:[%s10381_s14 + $0xdc0] sm:$0xff]  ;;  %v1129_v5 = vld [vmem:[%s10381_s14 + $0xd88] sm:$0xff] }
 0x1bd   : > { %6975 = vmatprep.subr.bf16.mxu0 %v8944_v7  ;;  %7139 = vmatprep.subr.bf16.mxu1 %v8946_v8  ;;  %v1137_v7 = vld [vmem:[%s10381_s14 + $0xdc8] sm:$0xff]  ;;  %v9023_v8 = vcombine.low %v1112_v55, %v1120_v56  ;;  %v9858_v10 = vpop.eup %9857  ;;  %v9040_v11 = vcombine.high %v1128_v0, %v1136_v4  ;;  %v9039_v21 = vcombine.low %v1128_v0, %v1136_v4 }
 0x1be   : > { %v9042_v13 = vcombine.high %v1129_v5, %v1137_v7  ;;  %v9041_v22 = vcombine.low %v1129_v5, %v1137_v7 }
 0x1c0   : > { %6976 = vmatpush1.bf16.msra.mxu0 %v8943_v16  ;;  %7140 = vmatpush1.bf16.msra.mxu1 %v8945_v17  ;;  %v9860_v16 = vpop.eup %9859  ;;  %v1152_v17 = vld [vmem:[%s10381_s14 + $0xe40] sm:$0xff] }
 0x1c1   : > { %6977 = vmatprep.subr.bf16.mxu0 %v8960_v19  ;;  %7141 = vmatprep.subr.bf16.mxu1 %v8962_v20  ;;  %v1153_v19 = vld [vmem:[%s10381_s14 + $0xe48] sm:$0xff]  ;;  %v658_v20 = vadd.f32 1.0, %v9858_v10  ;;  %v9056_v23 = vcombine.high %v1144_v15, %v1152_v17  ;;  %v9055_v38 = vcombine.low %v1144_v15, %v1152_v17  ;;  %v1224_v10 = vld [vmem:[%s10381_s14 + $0x1080] sm:$0xff] }
 0x1c2   : > { %v9058_v24 = vcombine.high %v1145_v18, %v1153_v19  ;;  %v9057_v42 = vcombine.low %v1145_v18, %v1153_v19  ;;  %v1225_v15 = vld [vmem:[%s10381_s14 + $0x1088] sm:$0xff] }
 0x1c3   : > { %9861 = vrcp.f32 %v658_v20 }
 0x1c4   : > { %6978 = vmatpush1.bf16.msra.mxu0 %v8959_v28  ;;  %7142 = vmatpush1.bf16.msra.mxu1 %v8961_v29  ;;  %v1160_v28 = vld [vmem:[%s10381_s14 + $0xe80] sm:$0xff]  ;;  %v661_v29 = vadd.f32 1.0, %v9860_v16  ;;  %v1233_v16 = vld [vmem:[%s10381_s14 + $0x10c8] sm:$0xff] }
 0x1c5   : > { %6979 = vmatprep.subr.bf16.mxu0 %v8976_v32  ;;  %7143 = vmatprep.subr.bf16.mxu1 %v8978_v33  ;;  %v1168_v32 = vld [vmem:[%s10381_s14 + $0xec0] sm:$0xff]  ;;  %v1161_v33 = vld [vmem:[%s10381_s14 + $0xe88] sm:$0xff]  ;;  %v9138_v20 = vcombine.high %v1225_v15, %v1233_v16 }
 0x1c6   : > { %v9072_v57 = vcombine.high %v1160_v28, %v1168_v32  ;;  %v9074_v43 = vcombine.high %v1161_v33, %v1169_v34  ;;  %9863 = vrcp.f32 %v661_v29  ;;  %v9073_v53 = vcombine.low %v1161_v33, %v1169_v34  ;;  %v1256_v34 = vld [vmem:[%s10381_s14 + $0x1180] sm:$0xff] }
 0x1c7   : > { %v9137_v29 = vcombine.low %v1225_v15, %v1233_v16  ;;  %v1320_v16 = vld [vmem:[%s10381_s14 + $0x1380] sm:$0xff] }
 0x1c8   : > { %6980 = vmatpush1.bf16.msra.mxu0 %v8975_v49  ;;  %7144 = vmatpush1.bf16.msra.mxu1 %v8977_v50  ;;  %v1176_v49 = vld [vmem:[%s10381_s14 + $0xf00] sm:$0xff] }
 0x1c9   : > { %6981 = vmatprep.subr.bf16.mxu0 %v8992_v51  ;;  %7145 = vmatprep.subr.bf16.mxu1 %v8994_v52  ;;  %v1184_v50 = vld [vmem:[%s10381_s14 + $0xf40] sm:$0xff]  ;;  %v1185_v51 = vld [vmem:[%s10381_s14 + $0xf48] sm:$0xff]  ;;  %v9071_v52 = vcombine.low %v1160_v28, %v1168_v32 }
 0x1ca   : > { %v9088_v35 = vcombine.high %v1176_v49, %v1184_v50  ;;  %v9090_v36 = vcombine.high %v1177_v3, %v1185_v51  ;;  %v9089_v55 = vcombine.low %v1177_v3, %v1185_v51  ;;  %v1272_v51 = vld [vmem:[%s10381_s14 + $0x1200] sm:$0xff] }
 0x1cc   : > { %6982 = vmatpush1.bf16.msra.mxu0 %v8991_v39  ;;  %7146 = vmatpush1.bf16.msra.mxu1 %v8993_v40  ;;  %v1200_v39 = vld [vmem:[%s10381_s14 + $0xfc0] sm:$0xff]  ;;  %v1193_v40 = vld [vmem:[%s10381_s14 + $0xf88] sm:$0xff] }
 0x1cd   : > { %6983 = vmatprep.subr.bf16.mxu0 %v9008_v41  ;;  %7147 = vmatprep.subr.bf16.mxu1 %v9010_v54  ;;  %v1201_v41 = vld [vmem:[%s10381_s14 + $0xfc8] sm:$0xff]  ;;  %v9087_v54 = vcombine.low %v1176_v49, %v1184_v50  ;;  %v9104_v56 = vcombine.high %v1192_v37, %v1200_v39  ;;  %v9103_v4 = vcombine.low %v1192_v37, %v1200_v39 }
 0x1ce   : > { %v9106_v58 = vcombine.high %v1193_v40, %v1201_v41  ;;  %v9105_v5 = vcombine.low %v1193_v40, %v1201_v41  ;;  %v1288_v41 = vld [vmem:[%s10381_s14 + $0x1280] sm:$0xff] }
 0x1d0   : > { %6984 = vmatpush1.bf16.msra.mxu0 %v9007_v60  ;;  %7148 = vmatpush1.bf16.msra.mxu1 %v9009_v61  ;;  %v9862_v60 = vpop.eup %9861  ;;  %v1216_v61 = vld [vmem:[%s10381_s14 + $0x1040] sm:$0xff] }
 0x1d1   : > { %6985 = vmatprep.subr.bf16.mxu0 %v9024_v62  ;;  %7149 = vmatprep.subr.bf16.mxu1 %v9026_v63  ;;  %v1209_v62 = vld [vmem:[%s10381_s14 + $0x1008] sm:$0xff]  ;;  %v9864_v0 = vpop.eup %9863  ;;  %v682_v7 = vmul.f32 %v9862_v60, %v10561_v26  ;;  %v9119_v17 = vcombine.low %v1208_v59, %v1216_v61 }
 0x1d2   : > { %v1217_v63 = vld [vmem:[%s10381_s14 + $0x1048] sm:$0xff] }
 0x1d3   : > { %v9121_v18 = vcombine.low %v1209_v62, %v1217_v63  ;;  %v10610_v19 = vpack.c.bf16 %v682_v7, %v682_v7  ;;  %v1313_v7 = vld [vmem:[%s10381_s14 + $0x1348] sm:$0xff] }
 0x1d4   : > { %6986 = vmatpush1.bf16.msra.mxu0 %v9023_v8  ;;  %7150 = vmatpush1.bf16.msra.mxu1 %v9025_v9  ;;  %v9120_v8 = vcombine.high %v1208_v59, %v1216_v61  ;;  %v9122_v9 = vcombine.high %v1209_v62, %v1217_v63  ;;  %v10638_v61 = vsub.s32 7, %v10475_v44 }
 0x1d5   : > { %6987 = vmatprep.subr.bf16.mxu0 %v9040_v11  ;;  %7151 = vmatprep.subr.bf16.mxu1 %v9042_v13  ;;  %v685_v11 = vmul.f32 %v9864_v0, %v10564_v30  ;;  %v1232_v13 = vld [vmem:[%s10381_s14 + $0x10c0] sm:$0xff] }
 0x1d6   : > { %v9136_v26 = vcombine.high %v1224_v10, %v1232_v13  ;;  %v1248_v30 = vld [vmem:[%s10381_s14 + $0x1140] sm:$0xff]  ;;  %v9135_v28 = vcombine.low %v1224_v10, %v1232_v13 }
 0x1d7   : > { %v1304_v0 = vld [vmem:[%s10381_s14 + $0x1300] sm:$0xff] }
 0x1d8   : > { %6988 = vmatpush1.bf16.msra.mxu0 %v9039_v21  ;;  %7152 = vmatpush1.bf16.msra.mxu1 %v9041_v22  ;;  %v1240_v21 = vld [vmem:[%s10381_s14 + $0x1100] sm:$0xff]  ;;  %v10613_v22 = vpack.c.bf16 %v685_v11, %v685_v11  ;;  %v375_v11 = vrot.slane %v10480_v46, %v10638_v61 }
 0x1d9   : > { %6989 = vmatprep.subr.bf16.mxu0 %v9056_v23  ;;  %7153 = vmatprep.subr.bf16.mxu1 %v9058_v24  ;;  %v1241_v23 = vld [vmem:[%s10381_s14 + $0x1108] sm:$0xff]  ;;  %v9152_v32 = vcombine.high %v1240_v21, %v1248_v30 }
 0x1da   : > { %v1249_v24 = vld [vmem:[%s10381_s14 + $0x1148] sm:$0xff] }
 0x1db   : > { %v9154_v33 = vcombine.high %v1241_v23, %v1249_v24  ;;  %v9153_v49 = vcombine.low %v1241_v23, %v1249_v24 }
 0x1dc   : > { %6990 = vmatpush1.bf16.msra.mxu0 %v9055_v38  ;;  %7154 = vmatpush1.bf16.msra.mxu1 %v9057_v42  ;;  %v1264_v38 = vld [vmem:[%s10381_s14 + $0x11c0] sm:$0xff]  ;;  %v1257_v42 = vld [vmem:[%s10381_s14 + $0x1188] sm:$0xff] }
 0x1dd   : > { %6991 = vmatprep.subr.bf16.mxu0 %v9072_v57  ;;  %7155 = vmatprep.subr.bf16.mxu1 %v9074_v43  ;;  %v1265_v57 = vld [vmem:[%s10381_s14 + $0x11c8] sm:$0xff]  ;;  %v9151_v43 = vcombine.low %v1240_v21, %v1248_v30  ;;  %v9168_v50 = vcombine.high %v1256_v34, %v1264_v38 }
 0x1de   : > { %v9170_v3 = vcombine.high %v1257_v42, %v1265_v57  ;;  %v9169_v37 = vcombine.low %v1257_v42, %v1265_v57 }
 0x1e0   : > { %6992 = vmatpush1.bf16.msra.mxu0 %v9071_v52  ;;  %7156 = vmatpush1.bf16.msra.mxu1 %v9073_v53  ;;  %v1280_v52 = vld [vmem:[%s10381_s14 + $0x1240] sm:$0xff]  ;;  %v1273_v53 = vld [vmem:[%s10381_s14 + $0x1208] sm:$0xff] }
 0x1e1   : > { %6993 = vmatprep.subr.bf16.mxu0 %v9088_v35  ;;  %7157 = vmatprep.subr.bf16.mxu1 %v9090_v36  ;;  %v1281_v35 = vld [vmem:[%s10381_s14 + $0x1248] sm:$0xff]  ;;  %v9167_v36 = vcombine.low %v1256_v34, %v1264_v38  ;;  %v9184_v39 = vcombine.high %v1272_v51, %v1280_v52  ;;  %v9183_v59 = vcombine.low %v1272_v51, %v1280_v52 }
 0x1e2   : > { %v9186_v40 = vcombine.high %v1273_v53, %v1281_v35  ;;  %v9185_v60 = vcombine.low %v1273_v53, %v1281_v35 }
 0x1e4   : > { %6994 = vmatpush1.bf16.msra.mxu0 %v9087_v54  ;;  %7158 = vmatpush1.bf16.msra.mxu1 %v9089_v55  ;;  %v1296_v54 = vld [vmem:[%s10381_s14 + $0x12c0] sm:$0xff]  ;;  %v1289_v55 = vld [vmem:[%s10381_s14 + $0x1288] sm:$0xff] }
 0x1e5   : > { %6995 = vmatprep.subr.bf16.mxu0 %v9104_v56  ;;  %7159 = vmatprep.subr.bf16.mxu1 %v9106_v58  ;;  %v1297_v56 = vld [vmem:[%s10381_s14 + $0x12c8] sm:$0xff]  ;;  %v10635_v58 = vsub.s32 4, %v10475_v44  ;;  %v9200_v62 = vcombine.high %v1288_v41, %v1296_v54 }
 0x1e6   : > { %v9202_v63 = vcombine.high %v1289_v55, %v1297_v56  ;;  %v9201_v10 = vcombine.low %v1289_v55, %v1297_v56 }
 0x1e8   : > { %6996 = vmatpush1.bf16.msra.mxu0 %v9103_v4  ;;  %7160 = vmatpush1.bf16.msra.mxu1 %v9105_v5  ;;  %v1312_v4 = vld [vmem:[%s10381_s14 + $0x1340] sm:$0xff]  ;;  %v1305_v5 = vld [vmem:[%s10381_s14 + $0x1308] sm:$0xff] }
 0x1e9   : > { %7006 = vmatprep.subr.bf16.mxu0 %v9120_v8  ;;  %7170 = vmatprep.subr.bf16.mxu1 %v9122_v9  ;;  %v363_v8 = vrot.slane %v10480_v46, %v10635_v58  ;;  %v9199_v9 = vcombine.low %v1288_v41, %v1296_v54  ;;  %v9216_v13 = vcombine.high %v1304_v0, %v1312_v4 }
 0x1ea   : > { %v9218_v15 = vcombine.high %v1305_v5, %v1313_v7  ;;  %v9215_v21 = vcombine.low %v1304_v0, %v1312_v4  ;;  %v9217_v30 = vcombine.low %v1305_v5, %v1313_v7  ;;  %v10656_v46 = vadd.f32 %v10502_v14, %v375_v11  ;;  %v1408_v11 = vld [vmem:[%s10381_s14 + $0x1640] sm:$0xff] }
 0x1eb   : > { %6998 = vmatmul.mubr.bf16.vlgmr.msra.gmra.mrb[8].mxu0 %v10610_v19  ;;  %7162 = vmatmul.mubr.bf16.vlgmr.msra.gmra.mrb[8].mxu1 %v10610_v19 }
 0x1ec   : > { %7007 = vmatpush1.bf16.msra.mxu0 %v9119_v17  ;;  %7171 = vmatpush1.bf16.msra.mxu1 %v9121_v18  ;;  %v1328_v17 = vld [vmem:[%s10381_s14 + $0x13c0] sm:$0xff]  ;;  %v1321_v18 = vld [vmem:[%s10381_s14 + $0x1388] sm:$0xff]  ;;  %v8606_v14 = vmul.f32 -1.442695, %v10656_v46 }
 0x1ed   : > { %7008 = vmatprep.subr.bf16.mxu0 %v9136_v26  ;;  %7172 = vmatprep.subr.bf16.mxu1 %v9138_v20  ;;  %v1329_v26 = vld [vmem:[%s10381_s14 + $0x13c8] sm:$0xff]  ;;  %v10653_v20 = vadd.f32 %v10496_v2, %v363_v8  ;;  %v9232_v23 = vcombine.high %v1320_v16, %v1328_v17  ;;  %v9231_v34 = vcombine.low %v1320_v16, %v1328_v17 }
 0x1ee   : > { %7038 = vmatprep.mubr.bf16.mxu0 %v10613_v22  ;;  %7202 = vmatprep.mubr.bf16.mxu1 %v10613_v22  ;;  %v9234_v24 = vcombine.high %v1321_v18, %v1329_v26  ;;  %v1345_v2 = vld [vmem:[%s10381_s14 + $0x1448] sm:$0xff]  ;;  %v9233_v38 = vcombine.low %v1321_v18, %v1329_v26 }
 0x1f0   : > { %7009 = vmatpush1.bf16.msra.mxu0 %v9135_v28  ;;  %7173 = vmatpush1.bf16.msra.mxu1 %v9137_v29  ;;  %v1336_v28 = vld [vmem:[%s10381_s14 + $0x1400] sm:$0xff] }
 0x1f1   : > { %7010 = vmatprep.subr.bf16.mxu0 %v9152_v32  ;;  %7174 = vmatprep.subr.bf16.mxu1 %v9154_v33  ;;  %v1344_v29 = vld [vmem:[%s10381_s14 + $0x1440] sm:$0xff]  ;;  %v1337_v32 = vld [vmem:[%s10381_s14 + $0x1408] sm:$0xff]  ;;  %v8603_v33 = vmul.f32 -1.442695, %v10653_v20 }
 0x1f2   : > { %v9248_v42 = vcombine.high %v1336_v28, %v1344_v29  ;;  %v9250_v57 = vcombine.high %v1337_v32, %v1345_v2  ;;  %v9247_v51 = vcombine.low %v1336_v28, %v1344_v29  ;;  %v9249_v52 = vcombine.low %v1337_v32, %v1345_v2  ;;  %v1417_v28 = vld [vmem:[%s10381_s14 + $0x1688] sm:$0xff] }
 0x1f3   : > { %9865 = vpow2.f32 %v8603_v33  ;;  %v1425_v29 = vld [vmem:[%s10381_s14 + $0x16c8] sm:$0xff] }
 0x1f4   : > { %7011 = vmatpush1.bf16.msra.mxu0 %v9151_v43  ;;  %7175 = vmatpush1.bf16.msra.mxu1 %v9153_v49  ;;  %v1352_v43 = vld [vmem:[%s10381_s14 + $0x1480] sm:$0xff]  ;;  %9867 = vpow2.f32 %v8606_v14 }
 0x1f5   : > { %7012 = vmatprep.subr.bf16.mxu0 %v9168_v50  ;;  %7176 = vmatprep.subr.bf16.mxu1 %v9170_v3  ;;  %v1360_v49 = vld [vmem:[%s10381_s14 + $0x14c0] sm:$0xff]  ;;  %v1353_v50 = vld [vmem:[%s10381_s14 + $0x1488] sm:$0xff] }
 0x1f6   : > { %v1361_v3 = vld [vmem:[%s10381_s14 + $0x14c8] sm:$0xff]  ;;  %v9264_v53 = vcombine.high %v1352_v43, %v1360_v49  ;;  %v9263_v41 = vcombine.low %v1352_v43, %v1360_v49  ;;  %v1440_v14 = vld [vmem:[%s10381_s14 + $0x1740] sm:$0xff]  ;;  %v9329_v49 = vcombine.low %v1417_v28, %v1425_v29 }
 0x1f7   : > { %v9266_v35 = vcombine.high %v1353_v50, %v1361_v3  ;;  %v9265_v54 = vcombine.low %v1353_v50, %v1361_v3 }
 0x1f8   : > { %7013 = vmatpush1.bf16.msra.mxu0 %v9167_v36  ;;  %7177 = vmatpush1.bf16.msra.mxu1 %v9169_v37  ;;  %v1368_v36 = vld [vmem:[%s10381_s14 + $0x1500] sm:$0xff] }
 0x1f9   : > { %7014 = vmatprep.subr.bf16.mxu0 %v9184_v39  ;;  %7178 = vmatprep.subr.bf16.mxu1 %v9186_v40  ;;  %v1376_v37 = vld [vmem:[%s10381_s14 + $0x1540] sm:$0xff]  ;;  %v1369_v39 = vld [vmem:[%s10381_s14 + $0x1508] sm:$0xff] }
 0x1fa   : > { %v1377_v40 = vld [vmem:[%s10381_s14 + $0x1548] sm:$0xff]  ;;  %v9280_v55 = vcombine.high %v1368_v36, %v1376_v37  ;;  %v9279_v0 = vcombine.low %v1368_v36, %v1376_v37 }
 0x1fb   : > { %v9282_v56 = vcombine.high %v1369_v39, %v1377_v40  ;;  %v9281_v4 = vcombine.low %v1369_v39, %v1377_v40 }
 0x1fc   : > { %7015 = vmatpush1.bf16.msra.mxu0 %v9183_v59  ;;  %7179 = vmatpush1.bf16.msra.mxu1 %v9185_v60  ;;  %v1384_v59 = vld [vmem:[%s10381_s14 + $0x1580] sm:$0xff] }
 0x1fd   : > { %7016 = vmatprep.subr.bf16.mxu0 %v9200_v62  ;;  %7180 = vmatprep.subr.bf16.mxu1 %v9202_v63  ;;  %v1392_v60 = vld [vmem:[%s10381_s14 + $0x15c0] sm:$0xff]  ;;  %v1385_v62 = vld [vmem:[%s10381_s14 + $0x1588] sm:$0xff]  ;;  %v9866_v5 = vpop.eup %9865 }
 0x1fe   : > { %v1393_v63 = vld [vmem:[%s10381_s14 + $0x15c8] sm:$0xff]  ;;  %v9296_v7 = vcombine.high %v1384_v59, %v1392_v60  ;;  %v660_v16 = vadd.f32 1.0, %v9866_v5  ;;  %v9295_v17 = vcombine.low %v1384_v59, %v1392_v60 }
 0x1ff   : > { %v9298_v8 = vcombine.high %v1385_v62, %v1393_v63  ;;  %v9297_v18 = vcombine.low %v1385_v62, %v1393_v63  ;;  %v1473_v59 = vld [vmem:[%s10381_s14 + $0x1848] sm:$0xff] }
 0x200   : > { %7017 = vmatpush1.bf16.msra.mxu0 %v9199_v9  ;;  %7181 = vmatpush1.bf16.msra.mxu1 %v9201_v10  ;;  %v1400_v9 = vld [vmem:[%s10381_s14 + $0x1600] sm:$0xff]  ;;  %v9868_v10 = vpop.eup %9867  ;;  %9869 = vrcp.f32 %v660_v16 }
 0x201   : > { %7018 = vmatprep.subr.bf16.mxu0 %v9216_v13  ;;  %7182 = vmatprep.subr.bf16.mxu1 %v9218_v15  ;;  %v1401_v13 = vld [vmem:[%s10381_s14 + $0x1608] sm:$0xff]  ;;  %v9312_v26 = vcombine.high %v1400_v9, %v1408_v11  ;;  %v9311_v32 = vcombine.low %v1400_v9, %v1408_v11  ;;  %v1488_v9 = vld [vmem:[%s10381_s14 + $0x18c0] sm:$0xff] }
 0x202   : > { %v1409_v15 = vld [vmem:[%s10381_s14 + $0x1648] sm:$0xff] }
 0x203   : > { %v9313_v2 = vcombine.low %v1401_v13, %v1409_v15  ;;  %v1489_v11 = vld [vmem:[%s10381_s14 + $0x18c8] sm:$0xff] }
 0x204   : > { %7019 = vmatpush1.bf16.msra.mxu0 %v9215_v21  ;;  %7183 = vmatpush1.bf16.msra.mxu1 %v9217_v30  ;;  %v9314_v21 = vcombine.high %v1401_v13, %v1409_v15  ;;  %v1416_v30 = vld [vmem:[%s10381_s14 + $0x1680] sm:$0xff] }
 0x205   : > { %7020 = vmatprep.subr.bf16.mxu0 %v9232_v23  ;;  %7184 = vmatprep.subr.bf16.mxu1 %v9234_v24  ;;  %v663_v23 = vadd.f32 1.0, %v9868_v10  ;;  %v1424_v24 = vld [vmem:[%s10381_s14 + $0x16c0] sm:$0xff]  ;;  %v1481_v10 = vld [vmem:[%s10381_s14 + $0x1888] sm:$0xff] }
 0x206   : > { %v9328_v33 = vcombine.high %v1416_v30, %v1424_v24  ;;  %v9327_v43 = vcombine.low %v1416_v30, %v1424_v24  ;;  %v1505_v30 = vld [vmem:[%s10381_s14 + $0x1948] sm:$0xff]  ;;  %v9393_v24 = vcombine.low %v1481_v10, %v1489_v11 }
 0x207   : > { %9871 = vrcp.f32 %v663_v23 }
 0x208   : > { %7021 = vmatpush1.bf16.msra.mxu0 %v9231_v34  ;;  %7185 = vmatpush1.bf16.msra.mxu1 %v9233_v38  ;;  %v9330_v34 = vcombine.high %v1417_v28, %v1425_v29  ;;  %v1432_v38 = vld [vmem:[%s10381_s14 + $0x1700] sm:$0xff] }
 0x209   : > { %7022 = vmatprep.subr.bf16.mxu0 %v9248_v42  ;;  %7186 = vmatprep.subr.bf16.mxu1 %v9250_v57  ;;  %v1433_v42 = vld [vmem:[%s10381_s14 + $0x1708] sm:$0xff]  ;;  %v9344_v50 = vcombine.high %v1432_v38, %v1440_v14  ;;  %v9343_v36 = vcombine.low %v1432_v38, %v1440_v14 }
 0x20a   : > { %v1441_v57 = vld [vmem:[%s10381_s14 + $0x1748] sm:$0xff] }
 0x20b   : > { %v9346_v3 = vcombine.high %v1433_v42, %v1441_v57  ;;  %v9345_v37 = vcombine.low %v1433_v42, %v1441_v57 }
 0x20c   : > { %7023 = vmatpush1.bf16.msra.mxu0 %v9247_v51  ;;  %7187 = vmatpush1.bf16.msra.mxu1 %v9249_v52  ;;  %v1448_v51 = vld [vmem:[%s10381_s14 + $0x1780] sm:$0xff] }
 0x20d   : > { %7024 = vmatprep.subr.bf16.mxu0 %v9264_v53  ;;  %7188 = vmatprep.subr.bf16.mxu1 %v9266_v35  ;;  %v1456_v52 = vld [vmem:[%s10381_s14 + $0x17c0] sm:$0xff]  ;;  %v1449_v53 = vld [vmem:[%s10381_s14 + $0x1788] sm:$0xff] }
 0x20e   : > { %v1457_v35 = vld [vmem:[%s10381_s14 + $0x17c8] sm:$0xff]  ;;  %v9360_v39 = vcombine.high %v1448_v51, %v1456_v52  ;;  %v9359_v62 = vcombine.low %v1448_v51, %v1456_v52 }
 0x20f   : > { %v9362_v40 = vcombine.high %v1449_v53, %v1457_v35  ;;  %v9361_v63 = vcombine.low %v1449_v53, %v1457_v35 }
 0x210   : > { %7025 = vmatpush1.bf16.msra.mxu0 %v9263_v41  ;;  %7189 = vmatpush1.bf16.msra.mxu1 %v9265_v54  ;;  %v1464_v41 = vld [vmem:[%s10381_s14 + $0x1800] sm:$0xff]  ;;  %v9870_v54 = vpop.eup %9869 }
 0x211   : > { %7026 = vmatprep.subr.bf16.mxu0 %v9280_v55  ;;  %7190 = vmatprep.subr.bf16.mxu1 %v9282_v56  ;;  %v1472_v55 = vld [vmem:[%s10381_s14 + $0x1840] sm:$0xff]  ;;  %v1465_v56 = vld [vmem:[%s10381_s14 + $0x1808] sm:$0xff]  ;;  %v9872_v60 = vpop.eup %9871 }
 0x212   : > { %v9378_v5 = vcombine.high %v1465_v56, %v1473_v59  ;;  %v9375_v13 = vcombine.low %v1464_v41, %v1472_v55  ;;  %v9377_v15 = vcombine.low %v1465_v56, %v1473_v59 }
 0x214   : > { %7027 = vmatpush1.bf16.msra.mxu0 %v9279_v0  ;;  %7191 = vmatpush1.bf16.msra.mxu1 %v9281_v4  ;;  %v684_v0 = vmul.f32 %v9870_v54, %v10653_v20  ;;  %v9376_v4 = vcombine.high %v1464_v41, %v1472_v55  ;;  %v10727_v41 = vsub.s32 6, %v10475_v44 }
 0x215   : > { %7028 = vmatprep.subr.bf16.mxu0 %v9296_v7  ;;  %7192 = vmatprep.subr.bf16.mxu1 %v9298_v8  ;;  %v1480_v7 = vld [vmem:[%s10381_s14 + $0x1880] sm:$0xff]  ;;  %v687_v8 = vmul.f32 %v9872_v60, %v10656_v46 }
 0x216   : > { %v10702_v16 = vpack.c.bf16 %v684_v0, %v684_v0  ;;  %v9392_v20 = vcombine.high %v1480_v7, %v1488_v9  ;;  %v1504_v46 = vld [vmem:[%s10381_s14 + $0x1940] sm:$0xff]  ;;  %v9391_v23 = vcombine.low %v1480_v7, %v1488_v9  ;;  %v1569_v0 = vld [vmem:[%s10381_s14 + $0x1b48] sm:$0xff] }
 0x217   : > { %v1560_v60 = vld [vmem:[%s10381_s14 + $0x1b00] sm:$0xff] }
 0x218   : > { %7029 = vmatpush1.bf16.msra.mxu0 %v9295_v17  ;;  %7193 = vmatpush1.bf16.msra.mxu1 %v9297_v18  ;;  %v9394_v17 = vcombine.high %v1481_v10, %v1489_v11  ;;  %v1496_v18 = vld [vmem:[%s10381_s14 + $0x1900] sm:$0xff] }
 0x219   : > { %7030 = vmatprep.subr.bf16.mxu0 %v9312_v26  ;;  %7194 = vmatprep.subr.bf16.mxu1 %v9314_v21  ;;  %v10705_v26 = vpack.c.bf16 %v687_v8, %v687_v8  ;;  %v1497_v21 = vld [vmem:[%s10381_s14 + $0x1908] sm:$0xff]  ;;  %v9408_v28 = vcombine.high %v1496_v18, %v1504_v46  ;;  %v9407_v38 = vcombine.low %v1496_v18, %v1504_v46  ;;  %v1576_v11 = vld [vmem:[%s10381_s14 + $0x1b80] sm:$0xff] }
 0x21a   : > { %v9410_v29 = vcombine.high %v1497_v21, %v1505_v30  ;;  %v9409_v14 = vcombine.low %v1497_v21, %v1505_v30 }
 0x21c   : > { %7031 = vmatpush1.bf16.msra.mxu0 %v9311_v32  ;;  %7195 = vmatpush1.bf16.msra.mxu1 %v9313_v2  ;;  %v1512_v32 = vld [vmem:[%s10381_s14 + $0x1980] sm:$0xff] }
 0x21d   : > { %7032 = vmatprep.subr.bf16.mxu0 %v9328_v33  ;;  %7196 = vmatprep.subr.bf16.mxu1 %v9330_v34  ;;  %v1520_v2 = vld [vmem:[%s10381_s14 + $0x19c0] sm:$0xff]  ;;  %v1513_v33 = vld [vmem:[%s10381_s14 + $0x1988] sm:$0xff] }
 0x21e   : > { %v1521_v34 = vld [vmem:[%s10381_s14 + $0x19c8] sm:$0xff]  ;;  %v9424_v42 = vcombine.high %v1512_v32, %v1520_v2  ;;  %v9423_v51 = vcombine.low %v1512_v32, %v1520_v2 }
 0x21f   : > { %v9426_v57 = vcombine.high %v1513_v33, %v1521_v34  ;;  %v9425_v52 = vcombine.low %v1513_v33, %v1521_v34 }
 0x220   : > { %7033 = vmatpush1.bf16.msra.mxu0 %v9327_v43  ;;  %7197 = vmatpush1.bf16.msra.mxu1 %v9329_v49  ;;  %v1528_v43 = vld [vmem:[%s10381_s14 + $0x1a00] sm:$0xff] }
 0x221   : > { %7034 = vmatprep.subr.bf16.mxu0 %v9344_v50  ;;  %7198 = vmatprep.subr.bf16.mxu1 %v9346_v3  ;;  %v1536_v49 = vld [vmem:[%s10381_s14 + $0x1a40] sm:$0xff]  ;;  %v1529_v50 = vld [vmem:[%s10381_s14 + $0x1a08] sm:$0xff] }
 0x222   : > { %v1537_v3 = vld [vmem:[%s10381_s14 + $0x1a48] sm:$0xff]  ;;  %v9440_v53 = vcombine.high %v1528_v43, %v1536_v49  ;;  %v9439_v54 = vcombine.low %v1528_v43, %v1536_v49 }
 0x223   : > { %v9442_v35 = vcombine.high %v1529_v50, %v1537_v3  ;;  %v9441_v55 = vcombine.low %v1529_v50, %v1537_v3 }
 0x224   : > { %7035 = vmatpush1.bf16.msra.mxu0 %v9343_v36  ;;  %7199 = vmatpush1.bf16.msra.mxu1 %v9345_v37  ;;  %v1544_v36 = vld [vmem:[%s10381_s14 + $0x1a80] sm:$0xff] }
 0x225   : > { %7036 = vmatprep.subr.bf16.mxu0 %v9360_v39  ;;  %7200 = vmatprep.subr.bf16.mxu1 %v9362_v40  ;;  %v1552_v37 = vld [vmem:[%s10381_s14 + $0x1ac0] sm:$0xff]  ;;  %v1545_v39 = vld [vmem:[%s10381_s14 + $0x1a88] sm:$0xff] }
 0x226   : > { %v1553_v40 = vld [vmem:[%s10381_s14 + $0x1ac8] sm:$0xff]  ;;  %v9456_v56 = vcombine.high %v1544_v36, %v1552_v37  ;;  %v9455_v7 = vcombine.low %v1544_v36, %v1552_v37 }
 0x227   : > { %v9458_v59 = vcombine.high %v1545_v39, %v1553_v40  ;;  %v9457_v8 = vcombine.low %v1545_v39, %v1553_v40 }
 0x228   : > { %7037 = vmatpush1.bf16.msra.mxu0 %v9359_v62  ;;  %7201 = vmatpush1.bf16.msra.mxu1 %v9361_v63  ;;  %v1568_v62 = vld [vmem:[%s10381_s14 + $0x1b40] sm:$0xff]  ;;  %v1561_v63 = vld [vmem:[%s10381_s14 + $0x1b08] sm:$0xff] }
 0x229   : > { %7047 = vmatprep.subr.bf16.mxu0 %v9376_v4  ;;  %7211 = vmatprep.subr.bf16.mxu1 %v9378_v5  ;;  %v9941_v4 = vld [vmem:[#allocation6] sm:$0xff]  ;;  %v9472_v9 = vcombine.high %v1560_v60, %v1568_v62  ;;  %v9474_v10 = vcombine.high %v1561_v63, %v1569_v0  ;;  %v9471_v18 = vcombine.low %v1560_v60, %v1568_v62 }
 0x22a   : > { %v371_v5 = vrot.slane %v9941_v4, %v10727_v41  ;;  %v9473_v46 = vcombine.low %v1561_v63, %v1569_v0 }
 0x22b   : > { %7039 = vmatmul.mubr.bf16.vlgmr.msra.gmra.mrb[8].mxu0 %v10702_v16  ;;  %7203 = vmatmul.mubr.bf16.vlgmr.msra.gmra.mrb[8].mxu1 %v10702_v16 }
 0x22c   : > { %7048 = vmatpush1.bf16.msra.mxu0 %v9375_v13  ;;  %7212 = vmatpush1.bf16.msra.mxu1 %v9377_v15  ;;  %v1584_v13 = vld [vmem:[%s10381_s14 + $0x1bc0] sm:$0xff]  ;;  %v1577_v15 = vld [vmem:[%s10381_s14 + $0x1b88] sm:$0xff] }
 0x22d   : > { %7049 = vmatprep.subr.bf16.mxu0 %v9392_v20  ;;  %7213 = vmatprep.subr.bf16.mxu1 %v9394_v17  ;;  %v1585_v20 = vld [vmem:[%s10381_s14 + $0x1bc8] sm:$0xff]  ;;  %v10739_v17 = vadd.f32 %v10500_v12, %v371_v5  ;;  %v9488_v21 = vcombine.high %v1576_v11, %v1584_v13  ;;  %v9487_v12 = vcombine.low %v1576_v11, %v1584_v13  ;;  %v1656_v5 = vld [vmem:[%s10381_s14 + $0x1e00] sm:$0xff] }
 0x22e   : > { %7079 = vmatprep.mubr.bf16.mxu0 %v10705_v26  ;;  %7243 = vmatprep.mubr.bf16.mxu1 %v10705_v26  ;;  %v9490_v30 = vcombine.high %v1577_v15, %v1585_v20  ;;  %v9489_v2 = vcombine.low %v1577_v15, %v1585_v20 }
 0x22f   : > { %v8605_v32 = vmul.f32 -1.442695, %v10739_v17 }
 0x230   : > { %7050 = vmatpush1.bf16.msra.mxu0 %v9391_v23  ;;  %7214 = vmatpush1.bf16.msra.mxu1 %v9393_v24  ;;  %v1592_v23 = vld [vmem:[%s10381_s14 + $0x1c00] sm:$0xff] }
 0x231   : > { %7051 = vmatprep.subr.bf16.mxu0 %v9408_v28  ;;  %7215 = vmatprep.subr.bf16.mxu1 %v9410_v29  ;;  %v1600_v24 = vld [vmem:[%s10381_s14 + $0x1c40] sm:$0xff]  ;;  %v1593_v28 = vld [vmem:[%s10381_s14 + $0x1c08] sm:$0xff]  ;;  %9873 = vpow2.f32 %v8605_v32 }
 0x232   : > { %v1601_v29 = vld [vmem:[%s10381_s14 + $0x1c48] sm:$0xff]  ;;  %v9504_v33 = vcombine.high %v1592_v23, %v1600_v24  ;;  %v9503_v43 = vcombine.low %v1592_v23, %v1600_v24  ;;  %v1688_v32 = vld [vmem:[%s10381_s14 + $0x1f00] sm:$0xff] }
 0x233   : > { %v9506_v34 = vcombine.high %v1593_v28, %v1601_v29  ;;  %v9505_v49 = vcombine.low %v1593_v28, %v1601_v29 }
 0x234   : > { %7052 = vmatpush1.bf16.msra.mxu0 %v9407_v38  ;;  %7216 = vmatpush1.bf16.msra.mxu1 %v9409_v14  ;;  %v1608_v38 = vld [vmem:[%s10381_s14 + $0x1c80] sm:$0xff] }
 0x235   : > { %7053 = vmatprep.subr.bf16.mxu0 %v9424_v42  ;;  %7217 = vmatprep.subr.bf16.mxu1 %v9426_v57  ;;  %v1616_v14 = vld [vmem:[%s10381_s14 + $0x1cc0] sm:$0xff]  ;;  %v1609_v42 = vld [vmem:[%s10381_s14 + $0x1c88] sm:$0xff] }
 0x236   : > { %v1617_v57 = vld [vmem:[%s10381_s14 + $0x1cc8] sm:$0xff]  ;;  %v9520_v50 = vcombine.high %v1608_v38, %v1616_v14  ;;  %v9519_v36 = vcombine.low %v1608_v38, %v1616_v14 }
 0x237   : > { %v9522_v3 = vcombine.high %v1609_v42, %v1617_v57  ;;  %v9521_v37 = vcombine.low %v1609_v42, %v1617_v57  ;;  %v1704_v57 = vld [vmem:[%s10381_s14 + $0x1f80] sm:$0xff] }
 0x238   : > { %7054 = vmatpush1.bf16.msra.mxu0 %v9423_v51  ;;  %7218 = vmatpush1.bf16.msra.mxu1 %v9425_v52  ;;  %v1624_v51 = vld [vmem:[%s10381_s14 + $0x1d00] sm:$0xff] }
 0x239   : > { %7055 = vmatprep.subr.bf16.mxu0 %v9440_v53  ;;  %7219 = vmatprep.subr.bf16.mxu1 %v9442_v35  ;;  %v1632_v52 = vld [vmem:[%s10381_s14 + $0x1d40] sm:$0xff]  ;;  %v1625_v53 = vld [vmem:[%s10381_s14 + $0x1d08] sm:$0xff] }
 0x23a   : > { %v1633_v35 = vld [vmem:[%s10381_s14 + $0x1d48] sm:$0xff]  ;;  %v9536_v39 = vcombine.high %v1624_v51, %v1632_v52  ;;  %v9535_v60 = vcombine.low %v1624_v51, %v1632_v52 }
 0x23b   : > { %v9538_v40 = vcombine.high %v1625_v53, %v1633_v35  ;;  %v9537_v62 = vcombine.low %v1625_v53, %v1633_v35  ;;  %v9874_v63 = vpop.eup %9873  ;;  %v698_v35 = vld [vmem:[%s10381_s14 + $0x10] sm:$0xff] }
 0x23c   : > { %7056 = vmatpush1.bf16.msra.mxu0 %v9439_v54  ;;  %7220 = vmatpush1.bf16.msra.mxu1 %v9441_v55  ;;  %v1640_v54 = vld [vmem:[%s10381_s14 + $0x1d80] sm:$0xff] }
 0x23d   : > { %7057 = vmatprep.subr.bf16.mxu0 %v9456_v56  ;;  %7221 = vmatprep.subr.bf16.mxu1 %v9458_v59  ;;  %v1648_v55 = vld [vmem:[%s10381_s14 + $0x1dc0] sm:$0xff]  ;;  %v1641_v56 = vld [vmem:[%s10381_s14 + $0x1d88] sm:$0xff] }
 0x23e   : > { %v1649_v59 = vld [vmem:[%s10381_s14 + $0x1dc8] sm:$0xff]  ;;  %v9552_v0 = vcombine.high %v1640_v54, %v1648_v55  ;;  %v9551_v11 = vcombine.low %v1640_v54, %v1648_v55 }
 0x23f   : > { %v9554_v4 = vcombine.high %v1641_v56, %v1649_v59  ;;  %v9553_v13 = vcombine.low %v1641_v56, %v1649_v59 }
 0x240   : > { %7058 = vmatpush1.bf16.msra.mxu0 %v9455_v7  ;;  %7222 = vmatpush1.bf16.msra.mxu1 %v9457_v8  ;;  %v1664_v7 = vld [vmem:[%s10381_s14 + $0x1e40] sm:$0xff]  ;;  %v1657_v8 = vld [vmem:[%s10381_s14 + $0x1e08] sm:$0xff] }
 0x241   : > { %7059 = vmatprep.subr.bf16.mxu0 %v9472_v9  ;;  %7223 = vmatprep.subr.bf16.mxu1 %v9474_v10  ;;  %v1665_v9 = vld [vmem:[%s10381_s14 + $0x1e48] sm:$0xff]  ;;  %v662_v10 = vadd.f32 1.0, %v9874_v63  ;;  %v9568_v15 = vcombine.high %v1656_v5, %v1664_v7  ;;  %v9567_v23 = vcombine.low %v1656_v5, %v1664_v7  ;;  %v722_v63 = vld [vmem:[%s10381_s14 + $0xd0] sm:$0xff] }
 0x242   : > { %v9570_v20 = vcombine.high %v1657_v8, %v1665_v9  ;;  %v9569_v24 = vcombine.low %v1657_v8, %v1665_v9 }
 0x243   : > { %9875 = vrcp.f32 %v662_v10  ;;  %v730_v10 = vld [vmem:[%s10381_s14 + $0x110] sm:$0xff] }
 0x244   : > { %7060 = vmatpush1.bf16.msra.mxu0 %v9471_v18  ;;  %7224 = vmatpush1.bf16.msra.mxu1 %v9473_v46  ;;  %v1672_v18 = vld [vmem:[%s10381_s14 + $0x1e80] sm:$0xff] }
 0x245   : > { %7061 = vmatprep.subr.bf16.mxu0 %v9488_v21  ;;  %7225 = vmatprep.subr.bf16.mxu1 %v9490_v30  ;;  %v1680_v46 = vld [vmem:[%s10381_s14 + $0x1ec0] sm:$0xff]  ;;  %v1673_v21 = vld [vmem:[%s10381_s14 + $0x1e88] sm:$0xff] }
 0x246   : > { %v1681_v30 = vld [vmem:[%s10381_s14 + $0x1ec8] sm:$0xff]  ;;  %v9584_v28 = vcombine.high %v1672_v18, %v1680_v46 }
 0x247   : > { %v9586_v29 = vcombine.high %v1673_v21, %v1681_v30  ;;  %v9585_v38 = vcombine.low %v1673_v21, %v1681_v30  ;;  %v746_v30 = vld [vmem:[%s10381_s14 + $0x190] sm:$0xff] }
 0x248   : > { %7062 = vmatpush1.bf16.msra.mxu0 %v9487_v12  ;;  %7226 = vmatpush1.bf16.msra.mxu1 %v9489_v2  ;;  %v1696_v12 = vld [vmem:[%s10381_s14 + $0x1f40] sm:$0xff]  ;;  %v1689_v2 = vld [vmem:[%s10381_s14 + $0x1f08] sm:$0xff] }
 0x249   : > { %7063 = vmatprep.subr.bf16.mxu0 %v9504_v33  ;;  %7227 = vmatprep.subr.bf16.mxu1 %v9506_v34  ;;  %v1697_v33 = vld [vmem:[%s10381_s14 + $0x1f48] sm:$0xff]  ;;  %v9583_v34 = vcombine.low %v1672_v18, %v1680_v46  ;;  %v9600_v14 = vcombine.high %v1688_v32, %v1696_v12 }
 0x24a   : > { %v9602_v42 = vcombine.high %v1689_v2, %v1697_v33  ;;  %v9601_v51 = vcombine.low %v1689_v2, %v1697_v33  ;;  %v762_v33 = vld [vmem:[%s10381_s14 + $0x210] sm:$0xff] }
 0x24c   : > { %7064 = vmatpush1.bf16.msra.mxu0 %v9503_v43  ;;  %7228 = vmatpush1.bf16.msra.mxu1 %v9505_v49  ;;  %v1712_v43 = vld [vmem:[%s10381_s14 + $0x1fc0] sm:$0xff]  ;;  %v1705_v49 = vld [vmem:[%s10381_s14 + $0x1f88] sm:$0xff] }
 0x24d   : > { %7065 = vmatprep.subr.bf16.mxu0 %v9520_v50  ;;  %7229 = vmatprep.subr.bf16.mxu1 %v9522_v3  ;;  %v1713_v50 = vld [vmem:[%s10381_s14 + $0x1fc8] sm:$0xff]  ;;  %v9599_v3 = vcombine.low %v1688_v32, %v1696_v12  ;;  %v9616_v52 = vcombine.high %v1704_v57, %v1712_v43  ;;  %v9615_v54 = vcombine.low %v1704_v57, %v1712_v43 }
 0x24e   : > { %v9618_v53 = vcombine.high %v1705_v49, %v1713_v50  ;;  %v9617_v55 = vcombine.low %v1705_v49, %v1713_v50  ;;  %v778_v50 = vld [vmem:[%s10381_s14 + $0x290] sm:$0xff] }
 0x250   : > { %7066 = vmatpush1.bf16.msra.mxu0 %v9519_v36  ;;  %7230 = vmatpush1.bf16.msra.mxu1 %v9521_v37  ;;  %v9876_v36 = vpop.eup %9875  ;;  %v706_v37 = vld [vmem:[%s10381_s14 + $0x50] sm:$0xff] }
 0x251   : > { %7067 = vmatprep.subr.bf16.mxu0 %v9536_v39  ;;  %7231 = vmatprep.subr.bf16.mxu1 %v9538_v40  ;;  %v699_v39 = vld [vmem:[%s10381_s14 + $0x18] sm:$0xff]  ;;  %v686_v56 = vmul.f32 %v9876_v36, %v10739_v17  ;;  %v8612_v59 = vcombine.high %v698_v35, %v706_v37  ;;  %v8611_v5 = vcombine.low %v698_v35, %v706_v37 }
 0x252   : > { %v707_v40 = vld [vmem:[%s10381_s14 + $0x58] sm:$0xff] }
 0x253   : > { %v10783_v7 = vpack.c.bf16 %v686_v56, %v686_v56  ;;  %v8613_v8 = vcombine.low %v699_v39, %v707_v40 }
 0x254   : > { %7068 = vmatpush1.bf16.msra.mxu0 %v9535_v60  ;;  %7232 = vmatpush1.bf16.msra.mxu1 %v9537_v62  ;;  %v8614_v60 = vcombine.high %v699_v39, %v707_v40  ;;  %v714_v62 = vld [vmem:[%s10381_s14 + $0x90] sm:$0xff] }
 0x255   : > { %7069 = vmatprep.subr.bf16.mxu0 %v9552_v0  ;;  %7233 = vmatprep.subr.bf16.mxu1 %v9554_v4  ;;  %v715_v0 = vld [vmem:[%s10381_s14 + $0x98] sm:$0xff]  ;;  %v8628_v17 = vcombine.high %v714_v62, %v722_v63  ;;  %v794_v39 = vld [vmem:[%s10381_s14 + $0x310] sm:$0xff] }
 0x256   : > { %v723_v4 = vld [vmem:[%s10381_s14 + $0xd8] sm:$0xff]  ;;  %v802_v40 = vld [vmem:[%s10381_s14 + $0x350] sm:$0xff] }
 0x257   : > { %v8630_v9 = vcombine.high %v715_v0, %v723_v4  ;;  %v8629_v18 = vcombine.low %v715_v0, %v723_v4  ;;  %v818_v0 = vld [vmem:[%s10381_s14 + $0x3d0] sm:$0xff]  ;;  %v811_v4 = vld [vmem:[%s10381_s14 + $0x398] sm:$0xff] }
 0x258   : > { %7070 = vmatpush1.bf16.msra.mxu0 %v9551_v11  ;;  %7234 = vmatpush1.bf16.msra.mxu1 %v9553_v13  ;;  %v738_v11 = vld [vmem:[%s10381_s14 + $0x150] sm:$0xff]  ;;  %v731_v13 = vld [vmem:[%s10381_s14 + $0x118] sm:$0xff] }
 0x259   : > { %7071 = vmatprep.subr.bf16.mxu0 %v9568_v15  ;;  %7235 = vmatprep.subr.bf16.mxu1 %v9570_v20  ;;  %v739_v15 = vld [vmem:[%s10381_s14 + $0x158] sm:$0xff]  ;;  %v8627_v20 = vcombine.low %v714_v62, %v722_v63  ;;  %v8644_v46 = vcombine.high %v730_v10, %v738_v11  ;;  %v810_v63 = vld [vmem:[%s10381_s14 + $0x390] sm:$0xff] }
 0x25a   : > { %v8646_v21 = vcombine.high %v731_v13, %v739_v15  ;;  %v8645_v32 = vcombine.low %v731_v13, %v739_v15  ;;  %v834_v13 = vld [vmem:[%s10381_s14 + $0x450] sm:$0xff]  ;;  %v827_v15 = vld [vmem:[%s10381_s14 + $0x418] sm:$0xff] }
 0x25c   : > { %7072 = vmatpush1.bf16.msra.mxu0 %v9567_v23  ;;  %7236 = vmatpush1.bf16.msra.mxu1 %v9569_v24  ;;  %v754_v23 = vld [vmem:[%s10381_s14 + $0x1d0] sm:$0xff]  ;;  %v747_v24 = vld [vmem:[%s10381_s14 + $0x198] sm:$0xff] }
 0x25d   : > { %7073 = vmatprep.subr.bf16.mxu0 %v9584_v28  ;;  %7237 = vmatprep.subr.bf16.mxu1 %v9586_v29  ;;  %v755_v28 = vld [vmem:[%s10381_s14 + $0x1d8] sm:$0xff]  ;;  %v8643_v29 = vcombine.low %v730_v10, %v738_v11  ;;  %v8660_v12 = vcombine.high %v746_v30, %v754_v23  ;;  %v826_v11 = vld [vmem:[%s10381_s14 + $0x410] sm:$0xff] }
 0x25e   : > { %v8662_v2 = vcombine.high %v747_v24, %v755_v28  ;;  %v8661_v57 = vcombine.low %v747_v24, %v755_v28  ;;  %v850_v24 = vld [vmem:[%s10381_s14 + $0x4d0] sm:$0xff]  ;;  %v843_v28 = vld [vmem:[%s10381_s14 + $0x498] sm:$0xff] }
 0x260   : > { %7074 = vmatpush1.bf16.msra.mxu0 %v9583_v34  ;;  %7238 = vmatpush1.bf16.msra.mxu1 %v9585_v38  ;;  %v770_v34 = vld [vmem:[%s10381_s14 + $0x250] sm:$0xff]  ;;  %v763_v38 = vld [vmem:[%s10381_s14 + $0x218] sm:$0xff] }
 0x261   : > { %7075 = vmatprep.subr.bf16.mxu0 %v9600_v14  ;;  %7239 = vmatprep.subr.bf16.mxu1 %v9602_v42  ;;  %v771_v14 = vld [vmem:[%s10381_s14 + $0x258] sm:$0xff]  ;;  %v8659_v42 = vcombine.low %v746_v30, %v754_v23  ;;  %v8676_v43 = vcombine.high %v762_v33, %v770_v34  ;;  %v842_v23 = vld [vmem:[%s10381_s14 + $0x490] sm:$0xff] }
 0x262   : > { %v8678_v49 = vcombine.high %v763_v38, %v771_v14  ;;  %v8677_v35 = vcombine.low %v763_v38, %v771_v14  ;;  %v866_v38 = vld [vmem:[%s10381_s14 + $0x550] sm:$0xff]  ;;  %v859_v14 = vld [vmem:[%s10381_s14 + $0x518] sm:$0xff] }
 0x264   : > { %7076 = vmatpush1.bf16.msra.mxu0 %v9599_v3  ;;  %7240 = vmatpush1.bf16.msra.mxu1 %v9601_v51  ;;  %v786_v3 = vld [vmem:[%s10381_s14 + $0x2d0] sm:$0xff]  ;;  %v779_v51 = vld [vmem:[%s10381_s14 + $0x298] sm:$0xff] }
 0x265   : > { %7077 = vmatprep.subr.bf16.mxu0 %v9616_v52  ;;  %7241 = vmatprep.subr.bf16.mxu1 %v9618_v53  ;;  %v787_v52 = vld [vmem:[%s10381_s14 + $0x2d8] sm:$0xff]  ;;  %v8675_v53 = vcombine.low %v762_v33, %v770_v34  ;;  %v8692_v36 = vcombine.high %v778_v50, %v786_v3  ;;  %v8691_v56 = vcombine.low %v778_v50, %v786_v3  ;;  %v858_v34 = vld [vmem:[%s10381_s14 + $0x510] sm:$0xff] }
 0x266   : > { %v8694_v37 = vcombine.high %v779_v51, %v787_v52  ;;  %v874_v3 = vld [vmem:[%s10381_s14 + $0x590] sm:$0xff] }
 0x268   : > { %7078 = vmatpush1.bf16.msra.mxu0 %v9615_v54  ;;  %7242 = vmatpush1.bf16.msra.mxu1 %v9617_v55  ;;  %v795_v54 = vld [vmem:[%s10381_s14 + $0x318] sm:$0xff] }
 0x269   : > { %7252 = vmatprep.subr.bf16.mxu0 %v8612_v59  ;;  %7416 = vmatprep.subr.bf16.mxu1 %v8614_v60  ;;  %v803_v55 = vld [vmem:[%s10381_s14 + $0x358] sm:$0xff]  ;;  %v8693_v59 = vcombine.low %v779_v51, %v787_v52  ;;  %v8708_v60 = vcombine.high %v794_v39, %v802_v40  ;;  %v882_v51 = vld [vmem:[%s10381_s14 + $0x5d0] sm:$0xff] }
 0x26a   : > { %v8710_v62 = vcombine.high %v795_v54, %v803_v55  ;;  %v875_v52 = vld [vmem:[%s10381_s14 + $0x598] sm:$0xff] }
 0x26b   : > { %7080 = vmatmul.mubr.bf16.vlgmr.msra.gmra.mrb[8].mxu0 %v10783_v7  ;;  %7244 = vmatmul.mubr.bf16.vlgmr.msra.gmra.mrb[8].mxu1 %v10783_v7 }
 0x26c   : > { %7253 = vmatpush1.bf16.msra.mxu0 %v8611_v5  ;;  %7284 = vmatprep.mubr.bf16.mxu0 %v10508_v25  ;;  %v819_v5 = vld [vmem:[%s10381_s14 + $0x3d8] sm:$0xff] }
 0x26d   : > { %7417 = vmatpush1.bf16.msra.mxu1 %v8613_v8  ;;  %7448 = vmatprep.mubr.bf16.mxu1 %v10508_v25  ;;  %v8707_v8 = vcombine.low %v794_v39, %v802_v40  ;;  %v8726_v10 = vcombine.high %v811_v4, %v819_v5  ;;  %v890_v40 = vld [vmem:[%s10381_s14 + $0x610] sm:$0xff] }
 0x26e   : > { %7254 = vmatprep.subr.bf16.mxu0 %v8628_v17  ;;  %7418 = vmatprep.subr.bf16.mxu1 %v8630_v9  ;;  %v8709_v17 = vcombine.low %v795_v54, %v803_v55  ;;  %v8724_v9 = vcombine.high %v810_v63, %v818_v0  ;;  %v898_v54 = vld [vmem:[%s10381_s14 + $0x650] sm:$0xff]  ;;  %v891_v55 = vld [vmem:[%s10381_s14 + $0x618] sm:$0xff] }
 0x270   : > { %7255 = vmatpush1.bf16.msra.mxu0 %v8627_v20  ;;  %v835_v20 = vld [vmem:[%s10381_s14 + $0x458] sm:$0xff] }
 0x271   : > { %7419 = vmatpush1.bf16.msra.mxu1 %v8629_v18  ;;  %7256 = vmatprep.subr.bf16.mxu0 %v8644_v46  ;;  %v8723_v18 = vcombine.low %v810_v63, %v818_v0  ;;  %v8725_v46 = vcombine.low %v811_v4, %v819_v5  ;;  %v8742_v30 = vcombine.high %v827_v15, %v835_v20  ;;  %v906_v0 = vld [vmem:[%s10381_s14 + $0x690] sm:$0xff]  ;;  %v907_v5 = vld [vmem:[%s10381_s14 + $0x698] sm:$0xff] }
 0x272   : > { %7420 = vmatprep.subr.bf16.mxu1 %v8646_v21  ;;  %v8740_v21 = vcombine.high %v826_v11, %v834_v13  ;;  %v914_v4 = vld [vmem:[%s10381_s14 + $0x6d0] sm:$0xff] }
 0x274   : > { %7257 = vmatpush1.bf16.msra.mxu0 %v8643_v29  ;;  %v851_v29 = vld [vmem:[%s10381_s14 + $0x4d8] sm:$0xff] }
 0x275   : > { %7421 = vmatpush1.bf16.msra.mxu1 %v8645_v32  ;;  %7258 = vmatprep.subr.bf16.mxu0 %v8660_v12  ;;  %v8739_v32 = vcombine.low %v826_v11, %v834_v13  ;;  %v8741_v12 = vcombine.low %v827_v15, %v835_v20  ;;  %v8758_v33 = vcombine.high %v843_v28, %v851_v29  ;;  %v922_v13 = vld [vmem:[%s10381_s14 + $0x710] sm:$0xff]  ;;  %v923_v20 = vld [vmem:[%s10381_s14 + $0x718] sm:$0xff] }
 0x276   : > { %7422 = vmatprep.subr.bf16.mxu1 %v8662_v2  ;;  %v8756_v2 = vcombine.high %v842_v23, %v850_v24  ;;  %v930_v15 = vld [vmem:[%s10381_s14 + $0x750] sm:$0xff] }
 0x278   : > { %7259 = vmatpush1.bf16.msra.mxu0 %v8659_v42  ;;  %v867_v42 = vld [vmem:[%s10381_s14 + $0x558] sm:$0xff] }
 0x279   : > { %7423 = vmatpush1.bf16.msra.mxu1 %v8661_v57  ;;  %7260 = vmatprep.subr.bf16.mxu0 %v8676_v43  ;;  %v8755_v57 = vcombine.low %v842_v23, %v850_v24  ;;  %v8757_v43 = vcombine.low %v843_v28, %v851_v29  ;;  %v8774_v50 = vcombine.high %v859_v14, %v867_v42  ;;  %v938_v24 = vld [vmem:[%s10381_s14 + $0x790] sm:$0xff]  ;;  %v939_v29 = vld [vmem:[%s10381_s14 + $0x798] sm:$0xff] }
 0x27a   : > { %7424 = vmatprep.subr.bf16.mxu1 %v8678_v49  ;;  %v8772_v49 = vcombine.high %v858_v34, %v866_v38  ;;  %v946_v28 = vld [vmem:[%s10381_s14 + $0x7d0] sm:$0xff] }
 0x27c   : > { %7261 = vmatpush1.bf16.msra.mxu0 %v8675_v53  ;;  %v883_v53 = vld [vmem:[%s10381_s14 + $0x5d8] sm:$0xff] }
 0x27d   : > { %7425 = vmatpush1.bf16.msra.mxu1 %v8677_v35  ;;  %7262 = vmatprep.subr.bf16.mxu0 %v8692_v36  ;;  %v8771_v35 = vcombine.low %v858_v34, %v866_v38  ;;  %v8773_v36 = vcombine.low %v859_v14, %v867_v42  ;;  %v8790_v39 = vcombine.high %v875_v52, %v883_v53  ;;  %v954_v38 = vld [vmem:[%s10381_s14 + $0x810] sm:$0xff]  ;;  %v955_v42 = vld [vmem:[%s10381_s14 + $0x818] sm:$0xff] }
 0x27e   : > { %7426 = vmatprep.subr.bf16.mxu1 %v8694_v37  ;;  %v8788_v37 = vcombine.high %v874_v3, %v882_v51  ;;  %v962_v14 = vld [vmem:[%s10381_s14 + $0x850] sm:$0xff] }
 0x280   : > { %7263 = vmatpush1.bf16.msra.mxu0 %v8691_v56  ;;  %v899_v56 = vld [vmem:[%s10381_s14 + $0x658] sm:$0xff] }
 0x281   : > { %7427 = vmatpush1.bf16.msra.mxu1 %v8693_v59  ;;  %7264 = vmatprep.subr.bf16.mxu0 %v8708_v60  ;;  %v8787_v59 = vcombine.low %v874_v3, %v882_v51  ;;  %v8789_v60 = vcombine.low %v875_v52, %v883_v53  ;;  %v8806_v63 = vcombine.high %v891_v55, %v899_v56  ;;  %v970_v51 = vld [vmem:[%s10381_s14 + $0x890] sm:$0xff] }
 0x282   : > { %7428 = vmatprep.subr.bf16.mxu1 %v8710_v62  ;;  %v8804_v62 = vcombine.high %v890_v40, %v898_v54  ;;  %v978_v52 = vld [vmem:[%s10381_s14 + $0x8d0] sm:$0xff]  ;;  %v8867_v53 = vcombine.low %v954_v38, %v962_v14 }
 0x284   : > { %7265 = vmatpush1.bf16.msra.mxu0 %v8707_v8  ;;  %v915_v8 = vld [vmem:[%s10381_s14 + $0x6d8] sm:$0xff] }
 0x285   : > { %7429 = vmatpush1.bf16.msra.mxu1 %v8709_v17  ;;  %7266 = vmatprep.subr.bf16.mxu0 %v8724_v9  ;;  %v8803_v17 = vcombine.low %v890_v40, %v898_v54  ;;  %v8805_v9 = vcombine.low %v891_v55, %v899_v56  ;;  %v8822_v11 = vcombine.high %v907_v5, %v915_v8  ;;  %v986_v40 = vld [vmem:[%s10381_s14 + $0x910] sm:$0xff]  ;;  %v987_v56 = vld [vmem:[%s10381_s14 + $0x918] sm:$0xff] }
 0x286   : > { %7430 = vmatprep.subr.bf16.mxu1 %v8726_v10  ;;  %v8820_v10 = vcombine.high %v906_v0, %v914_v4  ;;  %v994_v54 = vld [vmem:[%s10381_s14 + $0x950] sm:$0xff] }
 0x288   : > { %7267 = vmatpush1.bf16.msra.mxu0 %v8723_v18  ;;  %v931_v18 = vld [vmem:[%s10381_s14 + $0x758] sm:$0xff] }
 0x289   : > { %7431 = vmatpush1.bf16.msra.mxu1 %v8725_v46  ;;  %7268 = vmatprep.subr.bf16.mxu0 %v8740_v21  ;;  %v8819_v46 = vcombine.low %v906_v0, %v914_v4  ;;  %v8821_v21 = vcombine.low %v907_v5, %v915_v8  ;;  %v8838_v23 = vcombine.high %v923_v20, %v931_v18  ;;  %v1002_v4 = vld [vmem:[%s10381_s14 + $0x990] sm:$0xff]  ;;  %v1003_v8 = vld [vmem:[%s10381_s14 + $0x998] sm:$0xff] }
 0x28a   : > { %7432 = vmatprep.subr.bf16.mxu1 %v8742_v30  ;;  %v8836_v30 = vcombine.high %v922_v13, %v930_v15  ;;  %v1010_v5 = vld [vmem:[%s10381_s14 + $0x9d0] sm:$0xff] }
 0x28c   : > { %7269 = vmatpush1.bf16.msra.mxu0 %v8739_v32  ;;  %v947_v32 = vld [vmem:[%s10381_s14 + $0x7d8] sm:$0xff] }
 0x28d   : > { %7433 = vmatpush1.bf16.msra.mxu1 %v8741_v12  ;;  %7270 = vmatprep.subr.bf16.mxu0 %v8756_v2  ;;  %v8835_v12 = vcombine.low %v922_v13, %v930_v15  ;;  %v8837_v2 = vcombine.low %v923_v20, %v931_v18  ;;  %v8854_v34 = vcombine.high %v939_v29, %v947_v32  ;;  %v1018_v15 = vld [vmem:[%s10381_s14 + $0xa10] sm:$0xff]  ;;  %v1019_v18 = vld [vmem:[%s10381_s14 + $0xa18] sm:$0xff] }
 0x28e   : > { %7434 = vmatprep.subr.bf16.mxu1 %v8758_v33  ;;  %v8852_v33 = vcombine.high %v938_v24, %v946_v28  ;;  %v1026_v20 = vld [vmem:[%s10381_s14 + $0xa50] sm:$0xff] }
 0x290   : > { %7271 = vmatpush1.bf16.msra.mxu0 %v8755_v57  ;;  %v963_v57 = vld [vmem:[%s10381_s14 + $0x858] sm:$0xff] }
 0x291   : > { %7435 = vmatpush1.bf16.msra.mxu1 %v8757_v43  ;;  %7272 = vmatprep.subr.bf16.mxu0 %v8772_v49  ;;  %v8851_v43 = vcombine.low %v938_v24, %v946_v28  ;;  %v8853_v49 = vcombine.low %v939_v29, %v947_v32  ;;  %v8870_v3 = vcombine.high %v955_v42, %v963_v57  ;;  %v1034_v28 = vld [vmem:[%s10381_s14 + $0xa90] sm:$0xff]  ;;  %v1035_v32 = vld [vmem:[%s10381_s14 + $0xa98] sm:$0xff] }
 0x292   : > { %7436 = vmatprep.subr.bf16.mxu1 %v8774_v50  ;;  %v8868_v50 = vcombine.high %v954_v38, %v962_v14  ;;  %v1042_v29 = vld [vmem:[%s10381_s14 + $0xad0] sm:$0xff] }
 0x293   : > { %v1050_v14 = vld [vmem:[%s10381_s14 + $0xb10] sm:$0xff] }
 0x294   : > { %7273 = vmatpush1.bf16.msra.mxu0 %v8771_v35  ;;  %v971_v35 = vld [vmem:[%s10381_s14 + $0x898] sm:$0xff] }
 0x295   : > { %7437 = vmatpush1.bf16.msra.mxu1 %v8773_v36  ;;  %7274 = vmatprep.subr.bf16.mxu0 %v8788_v37  ;;  %v979_v36 = vld [vmem:[%s10381_s14 + $0x8d8] sm:$0xff]  ;;  %v8869_v37 = vcombine.low %v955_v42, %v963_v57  ;;  %v1058_v42 = vld [vmem:[%s10381_s14 + $0xb50] sm:$0xff] }
 0x296   : > { %7438 = vmatprep.subr.bf16.mxu1 %v8790_v39  ;;  %v8884_v39 = vcombine.high %v970_v51, %v978_v52  ;;  %v8886_v55 = vcombine.high %v971_v35, %v979_v36  ;;  %v1051_v57 = vld [vmem:[%s10381_s14 + $0xb18] sm:$0xff] }
 0x298   : > { %7275 = vmatpush1.bf16.msra.mxu0 %v8787_v59  ;;  %v995_v59 = vld [vmem:[%s10381_s14 + $0x958] sm:$0xff] }
 0x299   : > { %7439 = vmatpush1.bf16.msra.mxu1 %v8789_v60  ;;  %7276 = vmatprep.subr.bf16.mxu0 %v8804_v62  ;;  %v8883_v60 = vcombine.low %v970_v51, %v978_v52  ;;  %v8885_v62 = vcombine.low %v971_v35, %v979_v36  ;;  %v8902_v0 = vcombine.high %v987_v56, %v995_v59  ;;  %v1066_v52 = vld [vmem:[%s10381_s14 + $0xb90] sm:$0xff]  ;;  %v1067_v35 = vld [vmem:[%s10381_s14 + $0xb98] sm:$0xff] }
 0x29a   : > { %7440 = vmatprep.subr.bf16.mxu1 %v8806_v63  ;;  %v8900_v63 = vcombine.high %v986_v40, %v994_v54  ;;  %v1075_v36 = vld [vmem:[%s10381_s14 + $0xbd8] sm:$0xff] }
 0x29c   : > { %7277 = vmatpush1.bf16.msra.mxu0 %v8803_v17  ;;  %v1011_v17 = vld [vmem:[%s10381_s14 + $0x9d8] sm:$0xff] }
 0x29d   : > { %7441 = vmatpush1.bf16.msra.mxu1 %v8805_v9  ;;  %7278 = vmatprep.subr.bf16.mxu0 %v8820_v10  ;;  %v8899_v9 = vcombine.low %v986_v40, %v994_v54  ;;  %v8901_v10 = vcombine.low %v987_v56, %v995_v59  ;;  %v8918_v13 = vcombine.high %v1003_v8, %v1011_v17  ;;  %v1090_v56 = vld [vmem:[%s10381_s14 + $0xc50] sm:$0xff]  ;;  %v1083_v59 = vld [vmem:[%s10381_s14 + $0xc18] sm:$0xff] }
 0x29e   : > { %7442 = vmatprep.subr.bf16.mxu1 %v8822_v11  ;;  %v8916_v11 = vcombine.high %v1002_v4, %v1010_v5  ;;  %v8982_v54 = vcombine.high %v1067_v35, %v1075_v36 }
 0x2a0   : > { %7279 = vmatpush1.bf16.msra.mxu0 %v8819_v46  ;;  %v1027_v46 = vld [vmem:[%s10381_s14 + $0xa58] sm:$0xff] }
 0x2a1   : > { %7443 = vmatpush1.bf16.msra.mxu1 %v8821_v21  ;;  %7280 = vmatprep.subr.bf16.mxu0 %v8836_v30  ;;  %v8915_v21 = vcombine.low %v1002_v4, %v1010_v5  ;;  %v8917_v30 = vcombine.low %v1003_v8, %v1011_v17  ;;  %v8934_v24 = vcombine.high %v1019_v18, %v1027_v46  ;;  %v1098_v5 = vld [vmem:[%s10381_s14 + $0xc90] sm:$0xff]  ;;  %v1099_v17 = vld [vmem:[%s10381_s14 + $0xc98] sm:$0xff] }
 0x2a2   : > { %7444 = vmatprep.subr.bf16.mxu1 %v8838_v23  ;;  %v8932_v23 = vcombine.high %v1018_v15, %v1026_v20  ;;  %v1106_v8 = vld [vmem:[%s10381_s14 + $0xcd0] sm:$0xff] }
 0x2a4   : > { %7281 = vmatpush1.bf16.msra.mxu0 %v8835_v12  ;;  %v1043_v12 = vld [vmem:[%s10381_s14 + $0xad8] sm:$0xff] }
 0x2a5   : > { %7445 = vmatpush1.bf16.msra.mxu1 %v8837_v2  ;;  %7282 = vmatprep.subr.bf16.mxu0 %v8852_v33  ;;  %v8931_v2 = vcombine.low %v1018_v15, %v1026_v20  ;;  %v8933_v33 = vcombine.low %v1019_v18, %v1027_v46  ;;  %v8950_v38 = vcombine.high %v1035_v32, %v1043_v12  ;;  %v1114_v20 = vld [vmem:[%s10381_s14 + $0xd10] sm:$0xff]  ;;  %v1115_v46 = vld [vmem:[%s10381_s14 + $0xd18] sm:$0xff] }
 0x2a6   : > { %7446 = vmatprep.subr.bf16.mxu1 %v8854_v34  ;;  %v8948_v34 = vcombine.high %v1034_v28, %v1042_v29  ;;  %v1122_v18 = vld [vmem:[%s10381_s14 + $0xd50] sm:$0xff] }
 0x2a8   : > { %7283 = vmatpush1.bf16.msra.mxu0 %v8851_v43  ;;  %v1059_v43 = vld [vmem:[%s10381_s14 + $0xb58] sm:$0xff] }
 0x2a9   : > { %7447 = vmatpush1.bf16.msra.mxu1 %v8853_v49  ;;  %7293 = vmatprep.subr.bf16.mxu0 %v8868_v50  ;;  %v8947_v49 = vcombine.low %v1034_v28, %v1042_v29  ;;  %v8949_v50 = vcombine.low %v1035_v32, %v1043_v12  ;;  %v8966_v51 = vcombine.high %v1051_v57, %v1059_v43  ;;  %v1130_v29 = vld [vmem:[%s10381_s14 + $0xd90] sm:$0xff]  ;;  %v1131_v12 = vld [vmem:[%s10381_s14 + $0xd98] sm:$0xff] }
 0x2aa   : > { %7457 = vmatprep.subr.bf16.mxu1 %v8870_v3  ;;  %v8964_v3 = vcombine.high %v1050_v14, %v1058_v42  ;;  %v1138_v32 = vld [vmem:[%s10381_s14 + $0xdd0] sm:$0xff] }
 0x2ab   : > { %7285 = vmatmul.mubr.bf16.vlgmr.msra.gmra.mrb[12].mxu0 %v10510_v27 }
 0x2ac   : > { %7449 = vmatmul.mubr.bf16.vlgmr.msra.gmra.mrb[12].mxu1 %v10510_v27  ;;  %7294 = vmatpush1.bf16.msra.mxu0 %v8867_v53  ;;  %v1074_v53 = vld [vmem:[%s10381_s14 + $0xbd0] sm:$0xff] }
 0x2ad   : > { %7325 = vmatprep.mubr.bf16.mxu0 %v10515_v31  ;;  %7458 = vmatpush1.bf16.msra.mxu1 %v8869_v37  ;;  %v8963_v37 = vcombine.low %v1050_v14, %v1058_v42  ;;  %v8980_v40 = vcombine.high %v1066_v52, %v1074_v53  ;;  %v1146_v42 = vld [vmem:[%s10381_s14 + $0xe10] sm:$0xff] }
 0x2ae   : > { %7489 = vmatprep.mubr.bf16.mxu1 %v10515_v31  ;;  %7295 = vmatprep.subr.bf16.mxu0 %v8884_v39  ;;  %v8965_v39 = vcombine.low %v1051_v57, %v1059_v43  ;;  %v1154_v57 = vld [vmem:[%s10381_s14 + $0xe50] sm:$0xff]  ;;  %v1147_v43 = vld [vmem:[%s10381_s14 + $0xe18] sm:$0xff] }
 0x2af   : > { %7459 = vmatprep.subr.bf16.mxu1 %v8886_v55  ;;  %v1082_v55 = vld [vmem:[%s10381_s14 + $0xc10] sm:$0xff] }
 0x2b0   : > { %7296 = vmatpush1.bf16.msra.mxu0 %v8883_v60  ;;  %v1091_v60 = vld [vmem:[%s10381_s14 + $0xc58] sm:$0xff] }
 0x2b1   : > { %7460 = vmatpush1.bf16.msra.mxu1 %v8885_v62  ;;  %7297 = vmatprep.subr.bf16.mxu0 %v8900_v63  ;;  %v8979_v62 = vcombine.low %v1066_v52, %v1074_v53  ;;  %v8981_v63 = vcombine.low %v1067_v35, %v1075_v36  ;;  %v8998_v4 = vcombine.high %v1083_v59, %v1091_v60  ;;  %v1162_v53 = vld [vmem:[%s10381_s14 + $0xe90] sm:$0xff]  ;;  %v1163_v36 = vld [vmem:[%s10381_s14 + $0xe98] sm:$0xff] }
 0x2b2   : > { %7461 = vmatprep.subr.bf16.mxu1 %v8902_v0  ;;  %v8996_v0 = vcombine.high %v1082_v55, %v1090_v56  ;;  %v1170_v35 = vld [vmem:[%s10381_s14 + $0xed0] sm:$0xff] }
 0x2b4   : > { %7298 = vmatpush1.bf16.msra.mxu0 %v8899_v9  ;;  %v1107_v9 = vld [vmem:[%s10381_s14 + $0xcd8] sm:$0xff] }
 0x2b5   : > { %7462 = vmatpush1.bf16.msra.mxu1 %v8901_v10  ;;  %7299 = vmatprep.subr.bf16.mxu0 %v8916_v11  ;;  %v8995_v10 = vcombine.low %v1082_v55, %v1090_v56  ;;  %v8997_v11 = vcombine.low %v1083_v59, %v1091_v60  ;;  %v9014_v15 = vcombine.high %v1099_v17, %v1107_v9  ;;  %v1178_v56 = vld [vmem:[%s10381_s14 + $0xf10] sm:$0xff]  ;;  %v1179_v60 = vld [vmem:[%s10381_s14 + $0xf18] sm:$0xff] }
 0x2b6   : > { %7463 = vmatprep.subr.bf16.mxu1 %v8918_v13  ;;  %v9012_v13 = vcombine.high %v1098_v5, %v1106_v8  ;;  %v1186_v59 = vld [vmem:[%s10381_s14 + $0xf50] sm:$0xff] }
 0x2b8   : > { %7300 = vmatpush1.bf16.msra.mxu0 %v8915_v21  ;;  %v1123_v21 = vld [vmem:[%s10381_s14 + $0xd58] sm:$0xff] }
 0x2b9   : > { %7464 = vmatpush1.bf16.msra.mxu1 %v8917_v30  ;;  %7301 = vmatprep.subr.bf16.mxu0 %v8932_v23  ;;  %v9011_v30 = vcombine.low %v1098_v5, %v1106_v8  ;;  %v9013_v23 = vcombine.low %v1099_v17, %v1107_v9  ;;  %v9030_v28 = vcombine.high %v1115_v46, %v1123_v21  ;;  %v1194_v8 = vld [vmem:[%s10381_s14 + $0xf90] sm:$0xff]  ;;  %v1195_v9 = vld [vmem:[%s10381_s14 + $0xf98] sm:$0xff] }
 0x2ba   : > { %7465 = vmatprep.subr.bf16.mxu1 %v8934_v24  ;;  %v9028_v24 = vcombine.high %v1114_v20, %v1122_v18  ;;  %v1202_v17 = vld [vmem:[%s10381_s14 + $0xfd0] sm:$0xff] }
 0x2bc   : > { %7302 = vmatpush1.bf16.msra.mxu0 %v8931_v2  ;;  %v1139_v2 = vld [vmem:[%s10381_s14 + $0xdd8] sm:$0xff] }
 0x2bd   : > { %7466 = vmatpush1.bf16.msra.mxu1 %v8933_v33  ;;  %7303 = vmatprep.subr.bf16.mxu0 %v8948_v34  ;;  %v9027_v33 = vcombine.low %v1114_v20, %v1122_v18  ;;  %v9029_v34 = vcombine.low %v1115_v46, %v1123_v21  ;;  %v9046_v14 = vcombine.high %v1131_v12, %v1139_v2  ;;  %v1210_v18 = vld [vmem:[%s10381_s14 + $0x1010] sm:$0xff]  ;;  %v1211_v21 = vld [vmem:[%s10381_s14 + $0x1018] sm:$0xff] }
 0x2be   : > { %7467 = vmatprep.subr.bf16.mxu1 %v8950_v38  ;;  %v9044_v38 = vcombine.high %v1130_v29, %v1138_v32  ;;  %v1218_v46 = vld [vmem:[%s10381_s14 + $0x1050] sm:$0xff] }
 0x2c0   : > { %7304 = vmatpush1.bf16.msra.mxu0 %v8947_v49  ;;  %v1155_v49 = vld [vmem:[%s10381_s14 + $0xe58] sm:$0xff] }
 0x2c1   : > { %7468 = vmatpush1.bf16.msra.mxu1 %v8949_v50  ;;  %7305 = vmatprep.subr.bf16.mxu0 %v8964_v3  ;;  %v9043_v50 = vcombine.low %v1130_v29, %v1138_v32  ;;  %v9045_v3 = vcombine.low %v1131_v12, %v1139_v2  ;;  %v9062_v52 = vcombine.high %v1147_v43, %v1155_v49  ;;  %v1226_v32 = vld [vmem:[%s10381_s14 + $0x1090] sm:$0xff] }
 0x2c2   : > { %7469 = vmatprep.subr.bf16.mxu1 %v8966_v51  ;;  %v9060_v51 = vcombine.high %v1146_v42, %v1154_v57  ;;  %v1234_v12 = vld [vmem:[%s10381_s14 + $0x10d0] sm:$0xff]  ;;  %v9123_v2 = vcombine.low %v1210_v18, %v1218_v46 }
 0x2c4   : > { %7306 = vmatpush1.bf16.msra.mxu0 %v8963_v37  ;;  %v1171_v37 = vld [vmem:[%s10381_s14 + $0xed8] sm:$0xff] }
 0x2c5   : > { %7470 = vmatpush1.bf16.msra.mxu1 %v8965_v39  ;;  %7307 = vmatprep.subr.bf16.mxu0 %v8980_v40  ;;  %v9059_v39 = vcombine.low %v1146_v42, %v1154_v57  ;;  %v9061_v40 = vcombine.low %v1147_v43, %v1155_v49  ;;  %v9078_v55 = vcombine.high %v1163_v36, %v1171_v37  ;;  %v1242_v42 = vld [vmem:[%s10381_s14 + $0x1110] sm:$0xff]  ;;  %v1243_v49 = vld [vmem:[%s10381_s14 + $0x1118] sm:$0xff] }
 0x2c6   : > { %7471 = vmatprep.subr.bf16.mxu1 %v8982_v54  ;;  %v9076_v54 = vcombine.high %v1162_v53, %v1170_v35  ;;  %v1250_v57 = vld [vmem:[%s10381_s14 + $0x1150] sm:$0xff] }
 0x2c8   : > { %7308 = vmatpush1.bf16.msra.mxu0 %v8979_v62  ;;  %v1187_v62 = vld [vmem:[%s10381_s14 + $0xf58] sm:$0xff] }
 0x2c9   : > { %7472 = vmatpush1.bf16.msra.mxu1 %v8981_v63  ;;  %7309 = vmatprep.subr.bf16.mxu0 %v8996_v0  ;;  %v9075_v63 = vcombine.low %v1162_v53, %v1170_v35  ;;  %v9077_v0 = vcombine.low %v1163_v36, %v1171_v37  ;;  %v9094_v5 = vcombine.high %v1179_v60, %v1187_v62  ;;  %v1258_v35 = vld [vmem:[%s10381_s14 + $0x1190] sm:$0xff]  ;;  %v1259_v37 = vld [vmem:[%s10381_s14 + $0x1198] sm:$0xff] }
 0x2ca   : > { %7473 = vmatprep.subr.bf16.mxu1 %v8998_v4  ;;  %v9092_v4 = vcombine.high %v1178_v56, %v1186_v59  ;;  %v1266_v36 = vld [vmem:[%s10381_s14 + $0x11d0] sm:$0xff] }
 0x2cc   : > { %7310 = vmatpush1.bf16.msra.mxu0 %v8995_v10  ;;  %v1203_v10 = vld [vmem:[%s10381_s14 + $0xfd8] sm:$0xff] }
 0x2cd   : > { %7474 = vmatpush1.bf16.msra.mxu1 %v8997_v11  ;;  %7311 = vmatprep.subr.bf16.mxu0 %v9012_v13  ;;  %v9091_v11 = vcombine.low %v1178_v56, %v1186_v59  ;;  %v9093_v13 = vcombine.low %v1179_v60, %v1187_v62  ;;  %v9110_v20 = vcombine.high %v1195_v9, %v1203_v10  ;;  %v1274_v59 = vld [vmem:[%s10381_s14 + $0x1210] sm:$0xff]  ;;  %v1275_v62 = vld [vmem:[%s10381_s14 + $0x1218] sm:$0xff] }
 0x2ce   : > { %7475 = vmatprep.subr.bf16.mxu1 %v9014_v15  ;;  %v9108_v15 = vcombine.high %v1194_v8, %v1202_v17  ;;  %v1282_v60 = vld [vmem:[%s10381_s14 + $0x1250] sm:$0xff] }
 0x2d0   : > { %7312 = vmatpush1.bf16.msra.mxu0 %v9011_v30  ;;  %v1219_v30 = vld [vmem:[%s10381_s14 + $0x1058] sm:$0xff] }
 0x2d1   : > { %7476 = vmatpush1.bf16.msra.mxu1 %v9013_v23  ;;  %7313 = vmatprep.subr.bf16.mxu0 %v9028_v24  ;;  %v9107_v23 = vcombine.low %v1194_v8, %v1202_v17  ;;  %v9109_v24 = vcombine.low %v1195_v9, %v1203_v10  ;;  %v9126_v29 = vcombine.high %v1211_v21, %v1219_v30  ;;  %v1290_v17 = vld [vmem:[%s10381_s14 + $0x1290] sm:$0xff]  ;;  %v1291_v10 = vld [vmem:[%s10381_s14 + $0x1298] sm:$0xff] }
 0x2d2   : > { %7477 = vmatprep.subr.bf16.mxu1 %v9030_v28  ;;  %v9124_v28 = vcombine.high %v1210_v18, %v1218_v46  ;;  %v1298_v9 = vld [vmem:[%s10381_s14 + $0x12d0] sm:$0xff] }
 0x2d3   : > { %v1306_v46 = vld [vmem:[%s10381_s14 + $0x1310] sm:$0xff] }
 0x2d4   : > { %7314 = vmatpush1.bf16.msra.mxu0 %v9027_v33  ;;  %v1227_v33 = vld [vmem:[%s10381_s14 + $0x1098] sm:$0xff] }
 0x2d5   : > { %7478 = vmatpush1.bf16.msra.mxu1 %v9029_v34  ;;  %7315 = vmatprep.subr.bf16.mxu0 %v9044_v38  ;;  %v1235_v34 = vld [vmem:[%s10381_s14 + $0x10d8] sm:$0xff]  ;;  %v9125_v38 = vcombine.low %v1211_v21, %v1219_v30  ;;  %v1314_v21 = vld [vmem:[%s10381_s14 + $0x1350] sm:$0xff] }
 0x2d6   : > { %7479 = vmatprep.subr.bf16.mxu1 %v9046_v14  ;;  %v9140_v14 = vcombine.high %v1226_v32, %v1234_v12  ;;  %v9142_v43 = vcombine.high %v1227_v33, %v1235_v34  ;;  %v1307_v30 = vld [vmem:[%s10381_s14 + $0x1318] sm:$0xff] }
 0x2d8   : > { %7316 = vmatpush1.bf16.msra.mxu0 %v9043_v50  ;;  %v1251_v50 = vld [vmem:[%s10381_s14 + $0x1158] sm:$0xff] }
 0x2d9   : > { %7480 = vmatpush1.bf16.msra.mxu1 %v9045_v3  ;;  %7317 = vmatprep.subr.bf16.mxu0 %v9060_v51  ;;  %v9139_v3 = vcombine.low %v1226_v32, %v1234_v12  ;;  %v9141_v51 = vcombine.low %v1227_v33, %v1235_v34  ;;  %v9158_v53 = vcombine.high %v1243_v49, %v1251_v50  ;;  %v1322_v12 = vld [vmem:[%s10381_s14 + $0x1390] sm:$0xff]  ;;  %v1323_v33 = vld [vmem:[%s10381_s14 + $0x1398] sm:$0xff] }
 0x2da   : > { %7481 = vmatprep.subr.bf16.mxu1 %v9062_v52  ;;  %v9156_v52 = vcombine.high %v1242_v42, %v1250_v57  ;;  %v1331_v34 = vld [vmem:[%s10381_s14 + $0x13d8] sm:$0xff] }
 0x2dc   : > { %7318 = vmatpush1.bf16.msra.mxu0 %v9059_v39  ;;  %v1267_v39 = vld [vmem:[%s10381_s14 + $0x11d8] sm:$0xff] }
 0x2dd   : > { %7482 = vmatpush1.bf16.msra.mxu1 %v9061_v40  ;;  %7319 = vmatprep.subr.bf16.mxu0 %v9076_v54  ;;  %v9155_v40 = vcombine.low %v1242_v42, %v1250_v57  ;;  %v9157_v54 = vcombine.low %v1243_v49, %v1251_v50  ;;  %v9174_v56 = vcombine.high %v1259_v37, %v1267_v39  ;;  %v1346_v49 = vld [vmem:[%s10381_s14 + $0x1450] sm:$0xff]  ;;  %v1339_v50 = vld [vmem:[%s10381_s14 + $0x1418] sm:$0xff] }
 0x2de   : > { %7483 = vmatprep.subr.bf16.mxu1 %v9078_v55  ;;  %v9172_v55 = vcombine.high %v1258_v35, %v1266_v36  ;;  %v9238_v57 = vcombine.high %v1323_v33, %v1331_v34 }
 0x2e0   : > { %7320 = vmatpush1.bf16.msra.mxu0 %v9075_v63  ;;  %v1283_v63 = vld [vmem:[%s10381_s14 + $0x1258] sm:$0xff] }
 0x2e1   : > { %7484 = vmatpush1.bf16.msra.mxu1 %v9077_v0  ;;  %7321 = vmatprep.subr.bf16.mxu0 %v9092_v4  ;;  %v9171_v0 = vcombine.low %v1258_v35, %v1266_v36  ;;  %v9173_v4 = vcombine.low %v1259_v37, %v1267_v39  ;;  %v9190_v8 = vcombine.high %v1275_v62, %v1283_v63  ;;  %v1354_v36 = vld [vmem:[%s10381_s14 + $0x1490] sm:$0xff]  ;;  %v1355_v39 = vld [vmem:[%s10381_s14 + $0x1498] sm:$0xff] }
 0x2e2   : > { %7485 = vmatprep.subr.bf16.mxu1 %v9094_v5  ;;  %v9188_v5 = vcombine.high %v1274_v59, %v1282_v60  ;;  %v1362_v37 = vld [vmem:[%s10381_s14 + $0x14d0] sm:$0xff] }
 0x2e4   : > { %7322 = vmatpush1.bf16.msra.mxu0 %v9091_v11  ;;  %v1299_v11 = vld [vmem:[%s10381_s14 + $0x12d8] sm:$0xff] }
 0x2e5   : > { %7486 = vmatpush1.bf16.msra.mxu1 %v9093_v13  ;;  %7323 = vmatprep.subr.bf16.mxu0 %v9108_v15  ;;  %v9187_v13 = vcombine.low %v1274_v59, %v1282_v60  ;;  %v9189_v15 = vcombine.low %v1275_v62, %v1283_v63  ;;  %v9206_v18 = vcombine.high %v1291_v10, %v1299_v11  ;;  %v1370_v60 = vld [vmem:[%s10381_s14 + $0x1510] sm:$0xff]  ;;  %v1371_v63 = vld [vmem:[%s10381_s14 + $0x1518] sm:$0xff] }
 0x2e6   : > { %7487 = vmatprep.subr.bf16.mxu1 %v9110_v20  ;;  %v9204_v20 = vcombine.high %v1290_v17, %v1298_v9  ;;  %v1378_v62 = vld [vmem:[%s10381_s14 + $0x1550] sm:$0xff] }
 0x2e8   : > { %7324 = vmatpush1.bf16.msra.mxu0 %v9107_v23  ;;  %v1315_v23 = vld [vmem:[%s10381_s14 + $0x1358] sm:$0xff] }
 0x2e9   : > { %7488 = vmatpush1.bf16.msra.mxu1 %v9109_v24  ;;  %7334 = vmatprep.subr.bf16.mxu0 %v9124_v28  ;;  %v9203_v24 = vcombine.low %v1290_v17, %v1298_v9  ;;  %v9205_v28 = vcombine.low %v1291_v10, %v1299_v11  ;;  %v9222_v32 = vcombine.high %v1307_v30, %v1315_v23  ;;  %v1386_v9 = vld [vmem:[%s10381_s14 + $0x1590] sm:$0xff]  ;;  %v1387_v11 = vld [vmem:[%s10381_s14 + $0x1598] sm:$0xff] }
 0x2ea   : > { %7498 = vmatprep.subr.bf16.mxu1 %v9126_v29  ;;  %v9220_v29 = vcombine.high %v1306_v46, %v1314_v21  ;;  %v1394_v10 = vld [vmem:[%s10381_s14 + $0x15d0] sm:$0xff] }
 0x2eb   : > { %7326 = vmatmul.mubr.bf16.vlgmr.msra.gmra.mrb[12].mxu0 %v10610_v19 }
 0x2ec   : > { %7490 = vmatmul.mubr.bf16.vlgmr.msra.gmra.mrb[12].mxu1 %v10610_v19  ;;  %7335 = vmatpush1.bf16.msra.mxu0 %v9123_v2  ;;  %v1330_v2 = vld [vmem:[%s10381_s14 + $0x13d0] sm:$0xff] }
 0x2ed   : > { %7366 = vmatprep.mubr.bf16.mxu0 %v10613_v22  ;;  %7499 = vmatpush1.bf16.msra.mxu1 %v9125_v38  ;;  %v9219_v38 = vcombine.low %v1306_v46, %v1314_v21  ;;  %v9236_v42 = vcombine.high %v1322_v12, %v1330_v2  ;;  %v1402_v21 = vld [vmem:[%s10381_s14 + $0x1610] sm:$0xff] }
 0x2ee   : > { %7530 = vmatprep.mubr.bf16.mxu1 %v10613_v22  ;;  %7336 = vmatprep.subr.bf16.mxu0 %v9140_v14  ;;  %v9221_v14 = vcombine.low %v1307_v30, %v1315_v23  ;;  %v1410_v30 = vld [vmem:[%s10381_s14 + $0x1650] sm:$0xff]  ;;  %v1403_v23 = vld [vmem:[%s10381_s14 + $0x1618] sm:$0xff] }
 0x2ef   : > { %7500 = vmatprep.subr.bf16.mxu1 %v9142_v43  ;;  %v1338_v43 = vld [vmem:[%s10381_s14 + $0x1410] sm:$0xff] }
 0x2f0   : > { %7337 = vmatpush1.bf16.msra.mxu0 %v9139_v3  ;;  %v1347_v3 = vld [vmem:[%s10381_s14 + $0x1458] sm:$0xff] }
 0x2f1   : > { %7501 = vmatpush1.bf16.msra.mxu1 %v9141_v51  ;;  %7338 = vmatprep.subr.bf16.mxu0 %v9156_v52  ;;  %v9235_v51 = vcombine.low %v1322_v12, %v1330_v2  ;;  %v9237_v52 = vcombine.low %v1323_v33, %v1331_v34  ;;  %v9254_v35 = vcombine.high %v1339_v50, %v1347_v3  ;;  %v1418_v2 = vld [vmem:[%s10381_s14 + $0x1690] sm:$0xff]  ;;  %v1419_v34 = vld [vmem:[%s10381_s14 + $0x1698] sm:$0xff] }
 0x2f2   : > { %7502 = vmatprep.subr.bf16.mxu1 %v9158_v53  ;;  %v9252_v53 = vcombine.high %v1338_v43, %v1346_v49  ;;  %v1426_v33 = vld [vmem:[%s10381_s14 + $0x16d0] sm:$0xff] }
 0x2f4   : > { %7339 = vmatpush1.bf16.msra.mxu0 %v9155_v40  ;;  %v1363_v40 = vld [vmem:[%s10381_s14 + $0x14d8] sm:$0xff] }
 0x2f5   : > { %7503 = vmatpush1.bf16.msra.mxu1 %v9157_v54  ;;  %7340 = vmatprep.subr.bf16.mxu0 %v9172_v55  ;;  %v9251_v54 = vcombine.low %v1338_v43, %v1346_v49  ;;  %v9253_v55 = vcombine.low %v1339_v50, %v1347_v3  ;;  %v9270_v59 = vcombine.high %v1355_v39, %v1363_v40  ;;  %v1434_v49 = vld [vmem:[%s10381_s14 + $0x1710] sm:$0xff]  ;;  %v1435_v3 = vld [vmem:[%s10381_s14 + $0x1718] sm:$0xff] }
 0x2f6   : > { %7504 = vmatprep.subr.bf16.mxu1 %v9174_v56  ;;  %v9268_v56 = vcombine.high %v1354_v36, %v1362_v37  ;;  %v1442_v50 = vld [vmem:[%s10381_s14 + $0x1750] sm:$0xff] }
 0x2f8   : > { %7341 = vmatpush1.bf16.msra.mxu0 %v9171_v0  ;;  %v1379_v0 = vld [vmem:[%s10381_s14 + $0x1558] sm:$0xff] }
 0x2f9   : > { %7505 = vmatpush1.bf16.msra.mxu1 %v9173_v4  ;;  %7342 = vmatprep.subr.bf16.mxu0 %v9188_v5  ;;  %v9267_v4 = vcombine.low %v1354_v36, %v1362_v37  ;;  %v9269_v5 = vcombine.low %v1355_v39, %v1363_v40  ;;  %v9286_v17 = vcombine.high %v1371_v63, %v1379_v0  ;;  %v1450_v37 = vld [vmem:[%s10381_s14 + $0x1790] sm:$0xff]  ;;  %v1451_v40 = vld [vmem:[%s10381_s14 + $0x1798] sm:$0xff] }
 0x2fa   : > { %7506 = vmatprep.subr.bf16.mxu1 %v9190_v8  ;;  %v9284_v8 = vcombine.high %v1370_v60, %v1378_v62  ;;  %v1458_v39 = vld [vmem:[%s10381_s14 + $0x17d0] sm:$0xff] }
 0x2fc   : > { %7343 = vmatpush1.bf16.msra.mxu0 %v9187_v13  ;;  %v1395_v13 = vld [vmem:[%s10381_s14 + $0x15d8] sm:$0xff] }
 0x2fd   : > { %7507 = vmatpush1.bf16.msra.mxu1 %v9189_v15  ;;  %7344 = vmatprep.subr.bf16.mxu0 %v9204_v20  ;;  %v9283_v15 = vcombine.low %v1370_v60, %v1378_v62  ;;  %v9285_v20 = vcombine.low %v1371_v63, %v1379_v0  ;;  %v9302_v46 = vcombine.high %v1387_v11, %v1395_v13  ;;  %v1466_v62 = vld [vmem:[%s10381_s14 + $0x1810] sm:$0xff]  ;;  %v1467_v0 = vld [vmem:[%s10381_s14 + $0x1818] sm:$0xff] }
 0x2fe   : > { %7508 = vmatprep.subr.bf16.mxu1 %v9206_v18  ;;  %v9300_v18 = vcombine.high %v1386_v9, %v1394_v10  ;;  %v1474_v63 = vld [vmem:[%s10381_s14 + $0x1850] sm:$0xff] }
 0x300   : > { %7345 = vmatpush1.bf16.msra.mxu0 %v9203_v24  ;;  %v1411_v24 = vld [vmem:[%s10381_s14 + $0x1658] sm:$0xff] }
 0x301   : > { %7509 = vmatpush1.bf16.msra.mxu1 %v9205_v28  ;;  %7346 = vmatprep.subr.bf16.mxu0 %v9220_v29  ;;  %v9299_v28 = vcombine.low %v1386_v9, %v1394_v10  ;;  %v9301_v29 = vcombine.low %v1387_v11, %v1395_v13  ;;  %v9318_v12 = vcombine.high %v1403_v23, %v1411_v24  ;;  %v1482_v10 = vld [vmem:[%s10381_s14 + $0x1890] sm:$0xff] }
 0x302   : > { %7510 = vmatprep.subr.bf16.mxu1 %v9222_v32  ;;  %v9316_v32 = vcombine.high %v1402_v21, %v1410_v30  ;;  %v1490_v11 = vld [vmem:[%s10381_s14 + $0x18d0] sm:$0xff]  ;;  %v9379_v13 = vcombine.low %v1466_v62, %v1474_v63 }
 0x304   : > { %7347 = vmatpush1.bf16.msra.mxu0 %v9219_v38  ;;  %v1427_v38 = vld [vmem:[%s10381_s14 + $0x16d8] sm:$0xff] }
 0x305   : > { %7511 = vmatpush1.bf16.msra.mxu1 %v9221_v14  ;;  %7348 = vmatprep.subr.bf16.mxu0 %v9236_v42  ;;  %v9315_v14 = vcombine.low %v1402_v21, %v1410_v30  ;;  %v9317_v42 = vcombine.low %v1403_v23, %v1411_v24  ;;  %v9334_v43 = vcombine.high %v1419_v34, %v1427_v38  ;;  %v1498_v21 = vld [vmem:[%s10381_s14 + $0x1910] sm:$0xff]  ;;  %v1499_v24 = vld [vmem:[%s10381_s14 + $0x1918] sm:$0xff] }
 0x306   : > { %7512 = vmatprep.subr.bf16.mxu1 %v9238_v57  ;;  %v9332_v57 = vcombine.high %v1418_v2, %v1426_v33  ;;  %v1506_v30 = vld [vmem:[%s10381_s14 + $0x1950] sm:$0xff] }
 0x308   : > { %7349 = vmatpush1.bf16.msra.mxu0 %v9235_v51  ;;  %v1443_v51 = vld [vmem:[%s10381_s14 + $0x1758] sm:$0xff] }
 0x309   : > { %7513 = vmatpush1.bf16.msra.mxu1 %v9237_v52  ;;  %7350 = vmatprep.subr.bf16.mxu0 %v9252_v53  ;;  %v9331_v52 = vcombine.low %v1418_v2, %v1426_v33  ;;  %v9333_v53 = vcombine.low %v1419_v34, %v1427_v38  ;;  %v9350_v36 = vcombine.high %v1435_v3, %v1443_v51  ;;  %v1514_v33 = vld [vmem:[%s10381_s14 + $0x1990] sm:$0xff]  ;;  %v1515_v38 = vld [vmem:[%s10381_s14 + $0x1998] sm:$0xff] }
 0x30a   : > { %7514 = vmatprep.subr.bf16.mxu1 %v9254_v35  ;;  %v9348_v35 = vcombine.high %v1434_v49, %v1442_v50  ;;  %v1522_v34 = vld [vmem:[%s10381_s14 + $0x19d0] sm:$0xff] }
 0x30c   : > { %7351 = vmatpush1.bf16.msra.mxu0 %v9251_v54  ;;  %v1459_v54 = vld [vmem:[%s10381_s14 + $0x17d8] sm:$0xff] }
 0x30d   : > { %7515 = vmatpush1.bf16.msra.mxu1 %v9253_v55  ;;  %7352 = vmatprep.subr.bf16.mxu0 %v9268_v56  ;;  %v9347_v55 = vcombine.low %v1434_v49, %v1442_v50  ;;  %v9349_v56 = vcombine.low %v1435_v3, %v1443_v51  ;;  %v9366_v60 = vcombine.high %v1451_v40, %v1459_v54  ;;  %v1530_v50 = vld [vmem:[%s10381_s14 + $0x1a10] sm:$0xff]  ;;  %v1531_v51 = vld [vmem:[%s10381_s14 + $0x1a18] sm:$0xff] }
 0x30e   : > { %7516 = vmatprep.subr.bf16.mxu1 %v9270_v59  ;;  %v9364_v59 = vcombine.high %v1450_v37, %v1458_v39  ;;  %v1538_v3 = vld [vmem:[%s10381_s14 + $0x1a50] sm:$0xff] }
 0x310   : > { %7353 = vmatpush1.bf16.msra.mxu0 %v9267_v4  ;;  %v1475_v4 = vld [vmem:[%s10381_s14 + $0x1858] sm:$0xff] }
 0x311   : > { %7517 = vmatpush1.bf16.msra.mxu1 %v9269_v5  ;;  %7354 = vmatprep.subr.bf16.mxu0 %v9284_v8  ;;  %v9363_v5 = vcombine.low %v1450_v37, %v1458_v39  ;;  %v9365_v8 = vcombine.low %v1451_v40, %v1459_v54  ;;  %v9382_v9 = vcombine.high %v1467_v0, %v1475_v4  ;;  %v1546_v39 = vld [vmem:[%s10381_s14 + $0x1a90] sm:$0xff]  ;;  %v1547_v54 = vld [vmem:[%s10381_s14 + $0x1a98] sm:$0xff] }
 0x312   : > { %7518 = vmatprep.subr.bf16.mxu1 %v9286_v17  ;;  %v9380_v17 = vcombine.high %v1466_v62, %v1474_v63  ;;  %v1554_v40 = vld [vmem:[%s10381_s14 + $0x1ad0] sm:$0xff] }
 0x313   : > { %v9460_v62 = vcombine.high %v1546_v39, %v1554_v40 }
 0x314   : > { %7355 = vmatpush1.bf16.msra.mxu0 %v9283_v15  ;;  %v1483_v15 = vld [vmem:[%s10381_s14 + $0x1898] sm:$0xff] }
 0x315   : > { %7519 = vmatpush1.bf16.msra.mxu1 %v9285_v20  ;;  %7356 = vmatprep.subr.bf16.mxu0 %v9300_v18  ;;  %v1491_v20 = vld [vmem:[%s10381_s14 + $0x18d8] sm:$0xff]  ;;  %v9381_v18 = vcombine.low %v1467_v0, %v1475_v4  ;;  %v1562_v0 = vld [vmem:[%s10381_s14 + $0x1b10] sm:$0xff] }
 0x316   : > { %7520 = vmatprep.subr.bf16.mxu1 %v9302_v46  ;;  %v9396_v46 = vcombine.high %v1482_v10, %v1490_v11  ;;  %v9398_v23 = vcombine.high %v1483_v15, %v1491_v20  ;;  %v1570_v4 = vld [vmem:[%s10381_s14 + $0x1b50] sm:$0xff] }
 0x318   : > { %7357 = vmatpush1.bf16.msra.mxu0 %v9299_v28  ;;  %v1507_v28 = vld [vmem:[%s10381_s14 + $0x1958] sm:$0xff] }
 0x319   : > { %7521 = vmatpush1.bf16.msra.mxu1 %v9301_v29  ;;  %7358 = vmatprep.subr.bf16.mxu0 %v9316_v32  ;;  %v9395_v29 = vcombine.low %v1482_v10, %v1490_v11  ;;  %v9397_v32 = vcombine.low %v1483_v15, %v1491_v20  ;;  %v9414_v2 = vcombine.high %v1499_v24, %v1507_v28 }
 0x31a   : > { %7522 = vmatprep.subr.bf16.mxu1 %v9318_v12  ;;  %v9412_v12 = vcombine.high %v1498_v21, %v1506_v30  ;;  %v9476_v20 = vcombine.high %v1562_v0, %v1570_v4 }
 0x31c   : > { %7359 = vmatpush1.bf16.msra.mxu0 %v9315_v14  ;;  %v1523_v14 = vld [vmem:[%s10381_s14 + $0x19d8] sm:$0xff] }
 0x31d   : > { %7523 = vmatpush1.bf16.msra.mxu1 %v9317_v42  ;;  %7360 = vmatprep.subr.bf16.mxu0 %v9332_v57  ;;  %v9411_v42 = vcombine.low %v1498_v21, %v1506_v30  ;;  %v9413_v57 = vcombine.low %v1499_v24, %v1507_v28  ;;  %v9430_v49 = vcombine.high %v1515_v38, %v1523_v14  ;;  %v1578_v30 = vld [vmem:[%s10381_s14 + $0x1b90] sm:$0xff] }
 0x31e   : > { %7524 = vmatprep.subr.bf16.mxu1 %v9334_v43  ;;  %v9428_v43 = vcombine.high %v1514_v33, %v1522_v34 }
 0x320   : > { %7361 = vmatpush1.bf16.msra.mxu0 %v9331_v52  ;;  %v1539_v52 = vld [vmem:[%s10381_s14 + $0x1a58] sm:$0xff] }
 0x321   : > { %7525 = vmatpush1.bf16.msra.mxu1 %v9333_v53  ;;  %7362 = vmatprep.subr.bf16.mxu0 %v9348_v35  ;;  %v9427_v53 = vcombine.low %v1514_v33, %v1522_v34  ;;  %v9429_v35 = vcombine.low %v1515_v38, %v1523_v14  ;;  %v9446_v37 = vcombine.high %v1531_v51, %v1539_v52 }
 0x322   : > { %7526 = vmatprep.subr.bf16.mxu1 %v9350_v36  ;;  %v9444_v36 = vcombine.high %v1530_v50, %v1538_v3 }
 0x324   : > { %7363 = vmatpush1.bf16.msra.mxu0 %v9347_v55  ;;  %v1555_v55 = vld [vmem:[%s10381_s14 + $0x1ad8] sm:$0xff] }
 0x325   : > { %7527 = vmatpush1.bf16.msra.mxu1 %v9349_v56  ;;  %7364 = vmatprep.subr.bf16.mxu0 %v9364_v59  ;;  %v9443_v56 = vcombine.low %v1530_v50, %v1538_v3  ;;  %v1720_v59 = vld [vmem:[%s11011_s15] sm:$0xff]  ;;  %v9462_v63 = vcombine.high %v1547_v54, %v1555_v55  ;;  %v9461_v15 = vcombine.low %v1547_v54, %v1555_v55 }
 0x326   : > { %7528 = vmatprep.subr.bf16.mxu1 %v9366_v60  ;;  %v9445_v60 = vcombine.low %v1531_v51, %v1539_v52  ;;  %v1731_v10 = vrot.slane %v1720_v59, %v10483_v47  ;;  %v1739_v11 = vrot.slane %v1720_v59, %v10486_v48 }
 0x328   : > { %7365 = vmatpush1.bf16.msra.mxu0 %v9363_v5  ;;  %v1727_v5 = vrot.slane %v1720_v59, %v10478_v45 }
 0x329   : > { %7529 = vmatpush1.bf16.msra.mxu1 %v9365_v8  ;;  %7375 = vmatprep.subr.bf16.mxu0 %v9380_v17  ;;  %v1735_v8 = vrot.slane %v1720_v59, %v10543_v1  ;;  %v1563_v17 = vld [vmem:[%s10381_s14 + $0x1b18] sm:$0xff] }
 0x32a   : > { %7539 = vmatprep.subr.bf16.mxu1 %v9382_v9  ;;  %v1571_v9 = vld [vmem:[%s10381_s14 + $0x1b58] sm:$0xff] }
 0x32b   : > { %7367 = vmatmul.mubr.bf16.vlgmr.msra.gmra.mrb[12].mxu0 %v10702_v16  ;;  %v9478_v21 = vcombine.high %v1563_v17, %v1571_v9  ;;  %v9477_v3 = vcombine.low %v1563_v17, %v1571_v9  ;;  %v1626_v9 = vld [vmem:[%s10381_s14 + $0x1d10] sm:$0xff] }
 0x32c   : > { %7531 = vmatmul.mubr.bf16.vlgmr.msra.gmra.mrb[12].mxu1 %v10702_v16  ;;  %7376 = vmatpush1.bf16.msra.mxu0 %v9379_v13  ;;  %v9459_v13 = vcombine.low %v1546_v39, %v1554_v40  ;;  %v1595_v39 = vld [vmem:[%s10381_s14 + $0x1c18] sm:$0xff] }
 0x32d   : > { %7407 = vmatprep.mubr.bf16.mxu0 %v10705_v26  ;;  %7540 = vmatpush1.bf16.msra.mxu1 %v9381_v18  ;;  %v1603_v40 = vld [vmem:[%s10381_s14 + $0x1c58] sm:$0xff] }
 0x32e   : > { %7571 = vmatprep.mubr.bf16.mxu1 %v10705_v26  ;;  %7377 = vmatprep.subr.bf16.mxu0 %v9396_v46  ;;  %v9510_v59 = vcombine.high %v1595_v39, %v1603_v40 }
 0x32f   : > { %7541 = vmatprep.subr.bf16.mxu1 %v9398_v23  ;;  %v1586_v23 = vld [vmem:[%s10381_s14 + $0x1bd0] sm:$0xff] }
 0x330   : > { %7378 = vmatpush1.bf16.msra.mxu0 %v9395_v29  ;;  %v9492_v51 = vcombine.high %v1578_v30, %v1586_v23  ;;  %v9491_v54 = vcombine.low %v1578_v30, %v1586_v23 }
 0x331   : > { %7542 = vmatpush1.bf16.msra.mxu1 %v9397_v32  ;;  %7379 = vmatprep.subr.bf16.mxu0 %v9412_v12  ;;  %v1579_v12 = vld [vmem:[%s10381_s14 + $0x1b98] sm:$0xff] }
 0x332   : > { %7543 = vmatprep.subr.bf16.mxu1 %v9414_v2  ;;  %v1587_v2 = vld [vmem:[%s10381_s14 + $0x1bd8] sm:$0xff] }
 0x333   : > { %v9493_v55 = vcombine.low %v1579_v12, %v1587_v2 }
 0x334   : > { %7380 = vmatpush1.bf16.msra.mxu0 %v9411_v42  ;;  %v9475_v42 = vcombine.low %v1562_v0, %v1570_v4  ;;  %v1619_v0 = vld [vmem:[%s10381_s14 + $0x1cd8] sm:$0xff] }
 0x335   : > { %7544 = vmatpush1.bf16.msra.mxu1 %v9413_v57  ;;  %7381 = vmatprep.subr.bf16.mxu0 %v9428_v43 }
 0x336   : > { %7545 = vmatprep.subr.bf16.mxu1 %v9430_v49 }
 0x338   : > { %7382 = vmatpush1.bf16.msra.mxu0 %v9427_v53 }
 0x339   : > { %7546 = vmatpush1.bf16.msra.mxu1 %v9429_v35  ;;  %7383 = vmatprep.subr.bf16.mxu0 %v9444_v36  ;;  %v9494_v35 = vcombine.high %v1579_v12, %v1587_v2  ;;  %v1594_v36 = vld [vmem:[%s10381_s14 + $0x1c10] sm:$0xff] }
 0x33a   : > { %7547 = vmatprep.subr.bf16.mxu1 %v9446_v37  ;;  %v1602_v37 = vld [vmem:[%s10381_s14 + $0x1c50] sm:$0xff] }
 0x33b   : > { %v9507_v4 = vcombine.low %v1594_v36, %v1602_v37 }
 0x33c   : > { %7384 = vmatpush1.bf16.msra.mxu0 %v9443_v56  ;;  %v9508_v56 = vcombine.high %v1594_v36, %v1602_v37  ;;  %v1667_v36 = vld [vmem:[%s10381_s14 + $0x1e58] sm:$0xff]  ;;  %v10142_v37 = vmov 1983009808  }
 0x33d   : > { %7548 = vmatpush1.bf16.msra.mxu1 %v9445_v60  ;;  %7385 = vmatprep.subr.bf16.mxu0 %v9460_v62  ;;  %v1610_v60 = vld [vmem:[%s10381_s14 + $0x1c90] sm:$0xff] }
 0x33e   : > { %v7081_v18 = vpop.f32.mrb[8].mxu0  ;;  %v7245_v46 = vpop.f32.mrb[8].mxu1  ;;  %7549 = vmatprep.subr.bf16.mxu1 %v9462_v63  ;;  %v1618_v62 = vld [vmem:[%s10381_s14 + $0x1cd0] sm:$0xff]  ;;  %v1611_v63 = vld [vmem:[%s10381_s14 + $0x1c98] sm:$0xff] }
 0x33f   : > { %v11024_v24 = vadd.f32 %v7081_v18, %v1727_v5  ;;  %v11026_v28 = vadd.f32 %v7245_v46, %v1735_v8  ;;  %v7083_v29 = vpop.f32.mrb[9].mxu0  ;;  %v7247_v32 = vpop.f32.mrb[9].mxu1  ;;  %v9509_v5 = vcombine.low %v1595_v39, %v1603_v40  ;;  %v9524_v8 = vcombine.high %v1610_v60, %v1618_v62 }
 0x340   : > { %v11030_v33 = vadd.f32 %v7083_v29, %v1731_v10  ;;  %v11032_v34 = vadd.f32 %v7247_v32, %v1739_v11  ;;  %v7085_v38 = vpop.f32.mrb[10].mxu0  ;;  %v7249_v14 = vpop.f32.mrb[10].mxu1  ;;  %7386 = vmatpush1.bf16.msra.mxu0 %v9459_v13  ;;  %v9526_v17 = vcombine.high %v1611_v63, %v1619_v0  ;;  %v1634_v10 = vld [vmem:[%s10381_s14 + $0x1d50] sm:$0xff]  ;;  %v1627_v11 = vld [vmem:[%s10381_s14 + $0x1d18] sm:$0xff]  ;;  %v9525_v18 = vcombine.low %v1611_v63, %v1619_v0 }
 0x341   : > { %v9631_v57 = vmul.f32 -1.442695, %v11024_v24  ;;  %v9633_v43 = vmul.f32 -1.442695, %v11026_v28  ;;  %7550 = vmatpush1.bf16.msra.mxu1 %v9461_v15  ;;  %v7086_v49 = vpop.f32.mrb[11].mxu0  ;;  %v7250_v50 = vpop.f32.mrb[11].mxu1  ;;  %7387 = vmatprep.subr.bf16.mxu0 %v9476_v20  ;;  %v9523_v15 = vcombine.low %v1610_v60, %v1618_v62  ;;  %v9540_v46 = vcombine.high %v1626_v9, %v1634_v10 }
 0x342   : > { %v9632_v52 = vmul.f32 -1.442695, %v11030_v33  ;;  %v9634_v53 = vmul.f32 -1.442695, %v11032_v34  ;;  %7551 = vmatprep.subr.bf16.mxu1 %v9478_v21  ;;  %v1635_v13 = vld [vmem:[%s10381_s14 + $0x1d58] sm:$0xff]  ;;  %v1642_v29 = vld [vmem:[%s10381_s14 + $0x1d90] sm:$0xff]  ;;  %v8367_v39 = vunpack.c.l.s4 %v10142_v37 }
 0x343   : > { %9877 = vpow2.f32 %v9631_v57  ;;  %v9542_v23 = vcombine.high %v1627_v11, %v1635_v13  ;;  %v1650_v32 = vld [vmem:[%s10381_s14 + $0x1dd0] sm:$0xff]  ;;  %v1643_v38 = vld [vmem:[%s10381_s14 + $0x1d98] sm:$0xff]  ;;  %v9541_v49 = vcombine.low %v1627_v11, %v1635_v13 }
 0x344   : > { %9879 = vpow2.f32 %v9633_v43  ;;  %7388 = vmatpush1.bf16.msra.mxu0 %v9475_v42  ;;  %v1651_v14 = vld [vmem:[%s10381_s14 + $0x1dd8] sm:$0xff]  ;;  %v9539_v43 = vcombine.low %v1626_v9, %v1634_v10  ;;  %v9555_v40 = vcombine.low %v1642_v29, %v1650_v32  ;;  %v1682_v60 = vld [vmem:[%s10381_s14 + $0x1ed0] sm:$0xff]  ;;  %v8368_v0 = vunpack.c.0.s8 %v8367_v39 }
 0x345   : > { %9881 = vpow2.f32 %v9632_v52  ;;  %7552 = vmatpush1.bf16.msra.mxu1 %v9477_v3  ;;  %7389 = vmatprep.subr.bf16.mxu0 %v9492_v51  ;;  %v9556_v3 = vcombine.high %v1642_v29, %v1650_v32  ;;  %v9558_v51 = vcombine.high %v1643_v38, %v1651_v14  ;;  %v1658_v52 = vld [vmem:[%s10381_s14 + $0x1e10] sm:$0xff]  ;;  %v1675_v62 = vld [vmem:[%s10381_s14 + $0x1e98] sm:$0xff] }
 0x346   : > { %9883 = vpow2.f32 %v9634_v53  ;;  %7553 = vmatprep.subr.bf16.mxu1 %v9494_v35  ;;  %v1666_v53 = vld [vmem:[%s10381_s14 + $0x1e50] sm:$0xff]  ;;  %v1659_v35 = vld [vmem:[%s10381_s14 + $0x1e18] sm:$0xff] }
 0x347   : > { %v1683_v63 = vld [vmem:[%s10381_s14 + $0x1ed8] sm:$0xff]  ;;  %v1690_v10 = vld [vmem:[%s10381_s14 + $0x1f10] sm:$0xff] }
 0x348   : > { %7390 = vmatpush1.bf16.msra.mxu0 %v9491_v54  ;;  %v9557_v54 = vcombine.low %v1643_v38, %v1651_v14  ;;  %v9590_v9 = vcombine.high %v1675_v62, %v1683_v63  ;;  %v1698_v11 = vld [vmem:[%s10381_s14 + $0x1f50] sm:$0xff]  ;;  %v9589_v32 = vcombine.low %v1675_v62, %v1683_v63  ;;  %v717_v62 = vld [vmem:[%s10381_s14 + $0xa8] sm:$0xff] }
 0x349   : > { %7554 = vmatpush1.bf16.msra.mxu1 %v9493_v55  ;;  %7391 = vmatprep.subr.bf16.mxu0 %v9508_v56  ;;  %v9572_v55 = vcombine.high %v1658_v52, %v1666_v53  ;;  %v9574_v56 = vcombine.high %v1659_v35, %v1667_v36  ;;  %v1714_v38 = vld [vmem:[%s10381_s14 + $0x1fd0] sm:$0xff]  ;;  %v725_v63 = vld [vmem:[%s10381_s14 + $0xe8] sm:$0xff] }
 0x34a   : > { %7555 = vmatprep.subr.bf16.mxu1 %v9510_v59  ;;  %v1674_v59 = vld [vmem:[%s10381_s14 + $0x1e90] sm:$0xff] }
 0x34c   : > { %7392 = vmatpush1.bf16.msra.mxu0 %v9507_v4  ;;  %v9571_v4 = vcombine.low %v1658_v52, %v1666_v53  ;;  %v700_v52 = vld [vmem:[%s10381_s14 + $0x20] sm:$0xff] }
 0x34d   : > { %v9878_v20 = vpop.eup %9877  ;;  %7556 = vmatpush1.bf16.msra.mxu1 %v9509_v5  ;;  %7393 = vmatprep.subr.bf16.mxu0 %v9524_v8  ;;  %v9573_v5 = vcombine.low %v1659_v35, %v1667_v36  ;;  %v9588_v8 = vcombine.high %v1674_v59, %v1682_v60  ;;  %v708_v53 = vld [vmem:[%s10381_s14 + $0x60] sm:$0xff]  ;;  %v701_v35 = vld [vmem:[%s10381_s14 + $0x28] sm:$0xff] }
 0x34e   : > { %v9880_v21 = vpop.eup %9879  ;;  %v8284_v30 = vadd.f32 1.0, %v9878_v20  ;;  %7557 = vmatprep.subr.bf16.mxu1 %v9526_v17  ;;  %v1691_v20 = vld [vmem:[%s10381_s14 + $0x1f18] sm:$0xff]  ;;  %v709_v36 = vld [vmem:[%s10381_s14 + $0x68] sm:$0xff] }
 0x34f   : > { %v9882_v12 = vpop.eup %9881  ;;  %v8286_v2 = vadd.f32 1.0, %v9880_v21 }
 0x350   : > { %v9884_v42 = vpop.eup %9883  ;;  %9885 = vrcp.f32 %v8284_v30  ;;  %v8285_v57 = vadd.f32 1.0, %v9882_v12  ;;  %7394 = vmatpush1.bf16.msra.mxu0 %v9523_v15  ;;  %v11076_v30 = vsub.s32 %v8368_v0, %v10475_v44  ;;  %v9604_v12 = vcombine.high %v1690_v10, %v1698_v11 }
 0x351   : > { %9887 = vrcp.f32 %v8286_v2  ;;  %v8287_v50 = vadd.f32 1.0, %v9884_v42  ;;  %7558 = vmatpush1.bf16.msra.mxu1 %v9525_v18  ;;  %7395 = vmatprep.subr.bf16.mxu0 %v9540_v46  ;;  %v1699_v18 = vld [vmem:[%s10381_s14 + $0x1f58] sm:$0xff]  ;;  %v1706_v2 = vld [vmem:[%s10381_s14 + $0x1f90] sm:$0xff]  ;;  %v8617_v0 = vcombine.low %v701_v35, %v709_v36 }
 0x352   : > { %9889 = vrcp.f32 %v8285_v57  ;;  %7559 = vmatprep.subr.bf16.mxu1 %v9542_v23  ;;  %v9587_v23 = vcombine.low %v1674_v59, %v1682_v60  ;;  %v9606_v44 = vcombine.high %v1691_v20, %v1699_v18  ;;  %v1707_v42 = vld [vmem:[%s10381_s14 + $0x1f98] sm:$0xff]  ;;  %v9619_v39 = vcombine.low %v1706_v2, %v1714_v38  ;;  %v724_v59 = vld [vmem:[%s10381_s14 + $0xe0] sm:$0xff] }
 0x353   : > { %9891 = vrcp.f32 %v8287_v50  ;;  %v1715_v57 = vld [vmem:[%s10381_s14 + $0x1fd8] sm:$0xff]  ;;  %v9620_v50 = vcombine.high %v1706_v2, %v1714_v38  ;;  %v8615_v60 = vcombine.low %v700_v52, %v708_v53  ;;  %v765_v2 = vld [vmem:[%s10381_s14 + $0x228] sm:$0xff] }
 0x354   : > { %7396 = vmatpush1.bf16.msra.mxu0 %v9539_v43  ;;  %v773_v38 = vld [vmem:[%s10381_s14 + $0x268] sm:$0xff] }
 0x355   : > { %7560 = vmatpush1.bf16.msra.mxu1 %v9541_v49  ;;  %7397 = vmatprep.subr.bf16.mxu0 %v9556_v3 }
 0x356   : > { %7561 = vmatprep.subr.bf16.mxu1 %v9558_v51  ;;  %v9622_v51 = vcombine.high %v1707_v42, %v1715_v57 }
 0x358   : > { %7398 = vmatpush1.bf16.msra.mxu0 %v9555_v40  ;;  %v9621_v40 = vcombine.low %v1707_v42, %v1715_v57 }
 0x359   : > { %7562 = vmatpush1.bf16.msra.mxu1 %v9557_v54  ;;  %7399 = vmatprep.subr.bf16.mxu0 %v9572_v55  ;;  %v8616_v54 = vcombine.high %v700_v52, %v708_v53  ;;  %v8618_v55 = vcombine.high %v701_v35, %v709_v36  ;;  %v796_v35 = vld [vmem:[%s10381_s14 + $0x320] sm:$0xff] }
 0x35a   : > { %v9886_v17 = vpop.eup %9885  ;;  %7563 = vmatprep.subr.bf16.mxu1 %v9574_v56  ;;  %v716_v56 = vld [vmem:[%s10381_s14 + $0xa0] sm:$0xff] }
 0x35b   : > { %v9888_v13 = vpop.eup %9887  ;;  %v8332_v15 = vmul.f32 %v9886_v17, %v11024_v24  ;;  %v8634_v17 = vcombine.high %v717_v62, %v725_v63  ;;  %v804_v36 = vld [vmem:[%s10381_s14 + $0x360] sm:$0xff] }
 0x35c   : > { %v9890_v46 = vpop.eup %9889  ;;  %v8334_v21 = vmul.f32 %v9888_v13, %v11026_v28  ;;  %7400 = vmatpush1.bf16.msra.mxu0 %v9571_v4  ;;  %v8632_v4 = vcombine.high %v716_v56, %v724_v59  ;;  %v8633_v13 = vcombine.low %v717_v62, %v725_v63  ;;  %v813_v62 = vld [vmem:[%s10381_s14 + $0x3a8] sm:$0xff] }
 0x35d   : > { %v9892_v24 = vpop.eup %9891  ;;  %v8333_v29 = vmul.f32 %v9890_v46, %v11030_v33  ;;  %7564 = vmatpush1.bf16.msra.mxu1 %v9573_v5  ;;  %7401 = vmatprep.subr.bf16.mxu0 %v9588_v8  ;;  %v9603_v33 = vcombine.low %v1690_v10, %v1698_v11  ;;  %v732_v5 = vld [vmem:[%s10381_s14 + $0x120] sm:$0xff]  ;;  %v741_v10 = vld [vmem:[%s10381_s14 + $0x168] sm:$0xff]  ;;  %v8631_v11 = vcombine.low %v716_v56, %v724_v59 }
 0x35e   : > { %v8335_v28 = vmul.f32 %v9892_v24, %v11032_v34  ;;  %7565 = vmatprep.subr.bf16.mxu1 %v9590_v9  ;;  %v9605_v34 = vcombine.low %v1691_v20, %v1699_v18  ;;  %v740_v8 = vld [vmem:[%s10381_s14 + $0x160] sm:$0xff]  ;;  %v733_v9 = vld [vmem:[%s10381_s14 + $0x128] sm:$0xff] }
 0x35f   : > { %v8364_v14 = vcombine.low %v8332_v15, %v8333_v29  ;;  %v8648_v15 = vcombine.high %v732_v5, %v740_v8  ;;  %v8650_v20 = vcombine.high %v733_v9, %v741_v10  ;;  %v748_v18 = vld [vmem:[%s10381_s14 + $0x1a0] sm:$0xff]  ;;  %v8647_v24 = vcombine.low %v732_v5, %v740_v8  ;;  %v821_v63 = vld [vmem:[%s10381_s14 + $0x3e8] sm:$0xff] }
 0x360   : > { %v8365_v43 = vcombine.low %v8334_v21, %v8335_v28  ;;  %7402 = vmatpush1.bf16.msra.mxu0 %v9587_v23  ;;  %v756_v46 = vld [vmem:[%s10381_s14 + $0x1e0] sm:$0xff]  ;;  %v749_v21 = vld [vmem:[%s10381_s14 + $0x1a8] sm:$0xff]  ;;  %v8649_v29 = vcombine.low %v733_v9, %v741_v10  ;;  %v8730_v8 = vcombine.high %v813_v62, %v821_v63 }
 0x361   : > { %v8372_v49 = vrot.slane %v8364_v14, %v11076_v30  ;;  %7566 = vmatpush1.bf16.msra.mxu1 %v9589_v32  ;;  %7403 = vmatprep.subr.bf16.mxu0 %v9604_v12  ;;  %v757_v23 = vld [vmem:[%s10381_s14 + $0x1e8] sm:$0xff]  ;;  %v8664_v32 = vcombine.high %v748_v18, %v756_v46  ;;  %v764_v28 = vld [vmem:[%s10381_s14 + $0x220] sm:$0xff]  ;;  %v8663_v14 = vcombine.low %v748_v18, %v756_v46 }
 0x362   : > { %v8379_v3 = vrot.slane %v8365_v43, %v11076_v30  ;;  %7567 = vmatprep.subr.bf16.mxu1 %v9606_v44  ;;  %v8666_v12 = vcombine.high %v749_v21, %v757_v23  ;;  %v772_v44 = vld [vmem:[%s10381_s14 + $0x260] sm:$0xff]  ;;  %v8665_v42 = vcombine.low %v749_v21, %v757_v23  ;;  %v8682_v43 = vcombine.high %v765_v2, %v773_v38  ;;  %v829_v10 = vld [vmem:[%s10381_s14 + $0x428] sm:$0xff] }
 0x363   : > { %v8680_v57 = vcombine.high %v764_v28, %v772_v44  ;;  %v812_v59 = vld [vmem:[%s10381_s14 + $0x3a0] sm:$0xff]  ;;  %v845_v23 = vld [vmem:[%s10381_s14 + $0x4a8] sm:$0xff] }
 0x364   : > { %v8380_v37 = vcombine.low %v8372_v49, %v8379_v3  ;;  %7404 = vmatpush1.bf16.msra.mxu0 %v9603_v33  ;;  %v780_v33 = vld [vmem:[%s10381_s14 + $0x2a0] sm:$0xff]  ;;  %v8679_v3 = vcombine.low %v764_v28, %v772_v44 }
 0x365   : > { %7568 = vmatpush1.bf16.msra.mxu1 %v9605_v34  ;;  %7405 = vmatprep.subr.bf16.mxu0 %v9620_v50  ;;  %v788_v49 = vld [vmem:[%s10381_s14 + $0x2e0] sm:$0xff]  ;;  %v781_v34 = vld [vmem:[%s10381_s14 + $0x2a8] sm:$0xff] }
 0x366   : > { %8436 = vst [vmem:[%s11098_s1] sm:$0xff] %v8380_v37  ;;  %7569 = vmatprep.subr.bf16.mxu1 %v9622_v51  ;;  %v789_v50 = vld [vmem:[%s10381_s14 + $0x2e8] sm:$0xff]  ;;  %v8681_v51 = vcombine.low %v765_v2, %v773_v38  ;;  %v8696_v52 = vcombine.high %v780_v33, %v788_v49  ;;  %v836_v9 = vld [vmem:[%s10381_s14 + $0x460] sm:$0xff] }
 0x367   : > { %v8698_v53 = vcombine.high %v781_v34, %v789_v50  ;;  %v797_v37 = vld [vmem:[%s10381_s14 + $0x328] sm:$0xff]  ;;  %v844_v46 = vld [vmem:[%s10381_s14 + $0x4a0] sm:$0xff] }
 0x368   : > { %7406 = vmatpush1.bf16.msra.mxu0 %v9619_v39  ;;  %v805_v39 = vld [vmem:[%s10381_s14 + $0x368] sm:$0xff]  ;;  %v852_v21 = vld [vmem:[%s10381_s14 + $0x4e0] sm:$0xff] }
 0x369   : > { %7570 = vmatpush1.bf16.msra.mxu1 %v9621_v40  ;;  %7580 = vmatprep.subr.bf16.mxu0 %v8616_v54  ;;  %v8695_v40 = vcombine.low %v780_v33, %v788_v49  ;;  %v8697_v54 = vcombine.low %v781_v34, %v789_v50  ;;  %v8714_v56 = vcombine.high %v797_v37, %v805_v39  ;;  %v860_v44 = vld [vmem:[%s10381_s14 + $0x520] sm:$0xff]  ;;  %v861_v38 = vld [vmem:[%s10381_s14 + $0x528] sm:$0xff] }
 0x36a   : > { %7744 = vmatprep.subr.bf16.mxu1 %v8618_v55  ;;  %v8712_v55 = vcombine.high %v796_v35, %v804_v36  ;;  %v868_v2 = vld [vmem:[%s10381_s14 + $0x560] sm:$0xff]  ;;  %v877_v50 = vld [vmem:[%s10381_s14 + $0x5a8] sm:$0xff] }
 0x36b   : > { %7408 = vmatmul.mubr.bf16.vlgmr.msra.gmra.mrb[12].mxu0 %v10783_v7  ;;  %v876_v49 = vld [vmem:[%s10381_s14 + $0x5a0] sm:$0xff] }
 0x36c   : > { %7572 = vmatmul.mubr.bf16.vlgmr.msra.gmra.mrb[12].mxu1 %v10783_v7  ;;  %7581 = vmatpush1.bf16.msra.mxu0 %v8615_v60  ;;  %v820_v60 = vld [vmem:[%s10381_s14 + $0x3e0] sm:$0xff] }
 0x36d   : > { %7612 = vmatprep.mubr.bf16.mxu0 %v10508_v25  ;;  %7745 = vmatpush1.bf16.msra.mxu1 %v8617_v0  ;;  %v8711_v0 = vcombine.low %v796_v35, %v804_v36  ;;  %v8728_v5 = vcombine.high %v812_v59, %v820_v60  ;;  %v884_v34 = vld [vmem:[%s10381_s14 + $0x5e0] sm:$0xff] }
 0x36e   : > { %7776 = vmatprep.mubr.bf16.mxu1 %v10508_v25  ;;  %7582 = vmatprep.subr.bf16.mxu0 %v8632_v4  ;;  %v8713_v4 = vcombine.low %v797_v37, %v805_v39  ;;  %v892_v36 = vld [vmem:[%s10381_s14 + $0x620] sm:$0xff]  ;;  %v893_v39 = vld [vmem:[%s10381_s14 + $0x628] sm:$0xff] }
 0x36f   : > { %7746 = vmatprep.subr.bf16.mxu1 %v8634_v17  ;;  %v828_v17 = vld [vmem:[%s10381_s14 + $0x420] sm:$0xff] }
 0x370   : > { %7583 = vmatpush1.bf16.msra.mxu0 %v8631_v11  ;;  %v837_v11 = vld [vmem:[%s10381_s14 + $0x468] sm:$0xff]  ;;  %v900_v37 = vld [vmem:[%s10381_s14 + $0x660] sm:$0xff] }
 0x371   : > { %7747 = vmatpush1.bf16.msra.mxu1 %v8633_v13  ;;  %7584 = vmatprep.subr.bf16.mxu0 %v8648_v15  ;;  %v8727_v13 = vcombine.low %v812_v59, %v820_v60  ;;  %v8729_v15 = vcombine.low %v813_v62, %v821_v63  ;;  %v8746_v18 = vcombine.high %v829_v10, %v837_v11  ;;  %v908_v60 = vld [vmem:[%s10381_s14 + $0x6a0] sm:$0xff]  ;;  %v909_v63 = vld [vmem:[%s10381_s14 + $0x6a8] sm:$0xff] }
 0x372   : > { %7748 = vmatprep.subr.bf16.mxu1 %v8650_v20  ;;  %v8744_v20 = vcombine.high %v828_v17, %v836_v9  ;;  %v916_v62 = vld [vmem:[%s10381_s14 + $0x6e0] sm:$0xff] }
 0x374   : > { %7585 = vmatpush1.bf16.msra.mxu0 %v8647_v24  ;;  %v853_v24 = vld [vmem:[%s10381_s14 + $0x4e8] sm:$0xff] }
 0x375   : > { %7749 = vmatpush1.bf16.msra.mxu1 %v8649_v29  ;;  %7586 = vmatprep.subr.bf16.mxu0 %v8664_v32  ;;  %v8743_v29 = vcombine.low %v828_v17, %v836_v9  ;;  %v8745_v32 = vcombine.low %v829_v10, %v837_v11  ;;  %v8762_v28 = vcombine.high %v845_v23, %v853_v24  ;;  %v924_v9 = vld [vmem:[%s10381_s14 + $0x720] sm:$0xff]  ;;  %v925_v11 = vld [vmem:[%s10381_s14 + $0x728] sm:$0xff] }
 0x376   : > { %7750 = vmatprep.subr.bf16.mxu1 %v8666_v12  ;;  %v8760_v12 = vcombine.high %v844_v46, %v852_v21  ;;  %v932_v10 = vld [vmem:[%s10381_s14 + $0x760] sm:$0xff] }
 0x378   : > { %7587 = vmatpush1.bf16.msra.mxu0 %v8663_v14  ;;  %v869_v14 = vld [vmem:[%s10381_s14 + $0x568] sm:$0xff] }
 0x379   : > { %7751 = vmatpush1.bf16.msra.mxu1 %v8665_v42  ;;  %7588 = vmatprep.subr.bf16.mxu0 %v8680_v57  ;;  %v8759_v42 = vcombine.low %v844_v46, %v852_v21  ;;  %v8761_v57 = vcombine.low %v845_v23, %v853_v24  ;;  %v8778_v33 = vcombine.high %v861_v38, %v869_v14  ;;  %v940_v21 = vld [vmem:[%s10381_s14 + $0x7a0] sm:$0xff]  ;;  %v941_v24 = vld [vmem:[%s10381_s14 + $0x7a8] sm:$0xff] }
 0x37a   : > { %7752 = vmatprep.subr.bf16.mxu1 %v8682_v43  ;;  %v8776_v43 = vcombine.high %v860_v44, %v868_v2  ;;  %v948_v23 = vld [vmem:[%s10381_s14 + $0x7e0] sm:$0xff] }
 0x37c   : > { %7589 = vmatpush1.bf16.msra.mxu0 %v8679_v3  ;;  %v885_v3 = vld [vmem:[%s10381_s14 + $0x5e8] sm:$0xff] }
 0x37d   : > { %7753 = vmatpush1.bf16.msra.mxu1 %v8681_v51  ;;  %7590 = vmatprep.subr.bf16.mxu0 %v8696_v52  ;;  %v8775_v51 = vcombine.low %v860_v44, %v868_v2  ;;  %v8777_v52 = vcombine.low %v861_v38, %v869_v14  ;;  %v8794_v35 = vcombine.high %v877_v50, %v885_v3  ;;  %v956_v2 = vld [vmem:[%s10381_s14 + $0x820] sm:$0xff]  ;;  %v957_v14 = vld [vmem:[%s10381_s14 + $0x828] sm:$0xff] }
 0x37e   : > { %7754 = vmatprep.subr.bf16.mxu1 %v8698_v53  ;;  %v8792_v53 = vcombine.high %v876_v49, %v884_v34  ;;  %v964_v38 = vld [vmem:[%s10381_s14 + $0x860] sm:$0xff] }
 0x380   : > { %7591 = vmatpush1.bf16.msra.mxu0 %v8695_v40  ;;  %v901_v40 = vld [vmem:[%s10381_s14 + $0x668] sm:$0xff] }
 0x381   : > { %7755 = vmatpush1.bf16.msra.mxu1 %v8697_v54  ;;  %7592 = vmatprep.subr.bf16.mxu0 %v8712_v55  ;;  %v8791_v54 = vcombine.low %v876_v49, %v884_v34  ;;  %v8793_v55 = vcombine.low %v877_v50, %v885_v3  ;;  %v8810_v59 = vcombine.high %v893_v39, %v901_v40  ;;  %v972_v34 = vld [vmem:[%s10381_s14 + $0x8a0] sm:$0xff] }
 0x382   : > { %7756 = vmatprep.subr.bf16.mxu1 %v8714_v56  ;;  %v8808_v56 = vcombine.high %v892_v36, %v900_v37  ;;  %v980_v50 = vld [vmem:[%s10381_s14 + $0x8e0] sm:$0xff]  ;;  %v8871_v3 = vcombine.low %v956_v2, %v964_v38 }
 0x384   : > { %7593 = vmatpush1.bf16.msra.mxu0 %v8711_v0  ;;  %v917_v0 = vld [vmem:[%s10381_s14 + $0x6e8] sm:$0xff] }
 0x385   : > { %7757 = vmatpush1.bf16.msra.mxu1 %v8713_v4  ;;  %7594 = vmatprep.subr.bf16.mxu0 %v8728_v5  ;;  %v8807_v4 = vcombine.low %v892_v36, %v900_v37  ;;  %v8809_v5 = vcombine.low %v893_v39, %v901_v40  ;;  %v8826_v17 = vcombine.high %v909_v63, %v917_v0  ;;  %v988_v36 = vld [vmem:[%s10381_s14 + $0x920] sm:$0xff]  ;;  %v989_v40 = vld [vmem:[%s10381_s14 + $0x928] sm:$0xff] }
 0x386   : > { %7758 = vmatprep.subr.bf16.mxu1 %v8730_v8  ;;  %v8824_v8 = vcombine.high %v908_v60, %v916_v62  ;;  %v996_v37 = vld [vmem:[%s10381_s14 + $0x960] sm:$0xff] }
 0x388   : > { %7595 = vmatpush1.bf16.msra.mxu0 %v8727_v13  ;;  %v933_v13 = vld [vmem:[%s10381_s14 + $0x768] sm:$0xff] }
 0x389   : > { %7759 = vmatpush1.bf16.msra.mxu1 %v8729_v15  ;;  %7596 = vmatprep.subr.bf16.mxu0 %v8744_v20  ;;  %v8823_v15 = vcombine.low %v908_v60, %v916_v62  ;;  %v8825_v20 = vcombine.low %v909_v63, %v917_v0  ;;  %v8842_v46 = vcombine.high %v925_v11, %v933_v13  ;;  %v1004_v62 = vld [vmem:[%s10381_s14 + $0x9a0] sm:$0xff]  ;;  %v1005_v0 = vld [vmem:[%s10381_s14 + $0x9a8] sm:$0xff] }
 0x38a   : > { %7760 = vmatprep.subr.bf16.mxu1 %v8746_v18  ;;  %v8840_v18 = vcombine.high %v924_v9, %v932_v10  ;;  %v1012_v63 = vld [vmem:[%s10381_s14 + $0x9e0] sm:$0xff] }
 0x38c   : > { %7597 = vmatpush1.bf16.msra.mxu0 %v8743_v29  ;;  %v949_v29 = vld [vmem:[%s10381_s14 + $0x7e8] sm:$0xff] }
 0x38d   : > { %7761 = vmatpush1.bf16.msra.mxu1 %v8745_v32  ;;  %7598 = vmatprep.subr.bf16.mxu0 %v8760_v12  ;;  %v8839_v32 = vcombine.low %v924_v9, %v932_v10  ;;  %v8841_v12 = vcombine.low %v925_v11, %v933_v13  ;;  %v8858_v44 = vcombine.high %v941_v24, %v949_v29  ;;  %v1020_v10 = vld [vmem:[%s10381_s14 + $0xa20] sm:$0xff]  ;;  %v1021_v13 = vld [vmem:[%s10381_s14 + $0xa28] sm:$0xff] }
 0x38e   : > { %7762 = vmatprep.subr.bf16.mxu1 %v8762_v28  ;;  %v8856_v28 = vcombine.high %v940_v21, %v948_v23  ;;  %v1028_v11 = vld [vmem:[%s10381_s14 + $0xa60] sm:$0xff] }
 0x390   : > { %7599 = vmatpush1.bf16.msra.mxu0 %v8759_v42  ;;  %v965_v42 = vld [vmem:[%s10381_s14 + $0x868] sm:$0xff] }
 0x391   : > { %7763 = vmatpush1.bf16.msra.mxu1 %v8761_v57  ;;  %7600 = vmatprep.subr.bf16.mxu0 %v8776_v43  ;;  %v8855_v57 = vcombine.low %v940_v21, %v948_v23  ;;  %v8857_v43 = vcombine.low %v941_v24, %v949_v29  ;;  %v8874_v49 = vcombine.high %v957_v14, %v965_v42  ;;  %v1036_v23 = vld [vmem:[%s10381_s14 + $0xaa0] sm:$0xff]  ;;  %v1037_v29 = vld [vmem:[%s10381_s14 + $0xaa8] sm:$0xff] }
 0x392   : > { %7764 = vmatprep.subr.bf16.mxu1 %v8778_v33  ;;  %v8872_v33 = vcombine.high %v956_v2, %v964_v38  ;;  %v1044_v24 = vld [vmem:[%s10381_s14 + $0xae0] sm:$0xff] }
 0x393   : > { %v1052_v38 = vld [vmem:[%s10381_s14 + $0xb20] sm:$0xff] }
 0x394   : > { %7601 = vmatpush1.bf16.msra.mxu0 %v8775_v51  ;;  %v973_v51 = vld [vmem:[%s10381_s14 + $0x8a8] sm:$0xff] }
 0x395   : > { %7765 = vmatpush1.bf16.msra.mxu1 %v8777_v52  ;;  %7602 = vmatprep.subr.bf16.mxu0 %v8792_v53  ;;  %v981_v52 = vld [vmem:[%s10381_s14 + $0x8e8] sm:$0xff]  ;;  %v8873_v53 = vcombine.low %v957_v14, %v965_v42  ;;  %v1060_v14 = vld [vmem:[%s10381_s14 + $0xb60] sm:$0xff] }
 0x396   : > { %7766 = vmatprep.subr.bf16.mxu1 %v8794_v35  ;;  %v8888_v35 = vcombine.high %v972_v34, %v980_v50  ;;  %v8890_v39 = vcombine.high %v973_v51, %v981_v52  ;;  %v1053_v42 = vld [vmem:[%s10381_s14 + $0xb28] sm:$0xff] }
 0x398   : > { %7603 = vmatpush1.bf16.msra.mxu0 %v8791_v54  ;;  %v997_v54 = vld [vmem:[%s10381_s14 + $0x968] sm:$0xff] }
 0x399   : > { %7767 = vmatpush1.bf16.msra.mxu1 %v8793_v55  ;;  %7604 = vmatprep.subr.bf16.mxu0 %v8808_v56  ;;  %v8887_v55 = vcombine.low %v972_v34, %v980_v50  ;;  %v8889_v56 = vcombine.low %v973_v51, %v981_v52  ;;  %v8906_v60 = vcombine.high %v989_v40, %v997_v54  ;;  %v1068_v50 = vld [vmem:[%s10381_s14 + $0xba0] sm:$0xff]  ;;  %v1069_v51 = vld [vmem:[%s10381_s14 + $0xba8] sm:$0xff] }
 0x39a   : > { %7768 = vmatprep.subr.bf16.mxu1 %v8810_v59  ;;  %v8904_v59 = vcombine.high %v988_v36, %v996_v37  ;;  %v1077_v52 = vld [vmem:[%s10381_s14 + $0xbe8] sm:$0xff] }
 0x39c   : > { %7605 = vmatpush1.bf16.msra.mxu0 %v8807_v4  ;;  %v1013_v4 = vld [vmem:[%s10381_s14 + $0x9e8] sm:$0xff] }
 0x39d   : > { %7769 = vmatpush1.bf16.msra.mxu1 %v8809_v5  ;;  %7606 = vmatprep.subr.bf16.mxu0 %v8824_v8  ;;  %v8903_v5 = vcombine.low %v988_v36, %v996_v37  ;;  %v8905_v8 = vcombine.low %v989_v40, %v997_v54  ;;  %v8922_v9 = vcombine.high %v1005_v0, %v1013_v4  ;;  %v1092_v40 = vld [vmem:[%s10381_s14 + $0xc60] sm:$0xff]  ;;  %v1085_v54 = vld [vmem:[%s10381_s14 + $0xc28] sm:$0xff] }
 0x39e   : > { %7770 = vmatprep.subr.bf16.mxu1 %v8826_v17  ;;  %v8920_v17 = vcombine.high %v1004_v62, %v1012_v63  ;;  %v8986_v37 = vcombine.high %v1069_v51, %v1077_v52 }
 0x3a0   : > { %7607 = vmatpush1.bf16.msra.mxu0 %v8823_v15  ;;  %v1029_v15 = vld [vmem:[%s10381_s14 + $0xa68] sm:$0xff] }
 0x3a1   : > { %7771 = vmatpush1.bf16.msra.mxu1 %v8825_v20  ;;  %7608 = vmatprep.subr.bf16.mxu0 %v8840_v18  ;;  %v8919_v20 = vcombine.low %v1004_v62, %v1012_v63  ;;  %v8921_v18 = vcombine.low %v1005_v0, %v1013_v4  ;;  %v8938_v21 = vcombine.high %v1021_v13, %v1029_v15  ;;  %v1100_v63 = vld [vmem:[%s10381_s14 + $0xca0] sm:$0xff]  ;;  %v1101_v4 = vld [vmem:[%s10381_s14 + $0xca8] sm:$0xff] }
 0x3a2   : > { %7772 = vmatprep.subr.bf16.mxu1 %v8842_v46  ;;  %v8936_v46 = vcombine.high %v1020_v10, %v1028_v11  ;;  %v1108_v0 = vld [vmem:[%s10381_s14 + $0xce0] sm:$0xff] }
 0x3a4   : > { %7609 = vmatpush1.bf16.msra.mxu0 %v8839_v32  ;;  %v1045_v32 = vld [vmem:[%s10381_s14 + $0xae8] sm:$0xff] }
 0x3a5   : > { %7773 = vmatpush1.bf16.msra.mxu1 %v8841_v12  ;;  %7610 = vmatprep.subr.bf16.mxu0 %v8856_v28  ;;  %v8935_v12 = vcombine.low %v1020_v10, %v1028_v11  ;;  %v8937_v28 = vcombine.low %v1021_v13, %v1029_v15  ;;  %v8954_v2 = vcombine.high %v1037_v29, %v1045_v32  ;;  %v1116_v11 = vld [vmem:[%s10381_s14 + $0xd20] sm:$0xff]  ;;  %v1117_v15 = vld [vmem:[%s10381_s14 + $0xd28] sm:$0xff] }
 0x3a6   : > { %7774 = vmatprep.subr.bf16.mxu1 %v8858_v44  ;;  %v8952_v44 = vcombine.high %v1036_v23, %v1044_v24  ;;  %v1124_v13 = vld [vmem:[%s10381_s14 + $0xd60] sm:$0xff] }
 0x3a8   : > { %7611 = vmatpush1.bf16.msra.mxu0 %v8855_v57  ;;  %v1061_v57 = vld [vmem:[%s10381_s14 + $0xb68] sm:$0xff] }
 0x3a9   : > { %7775 = vmatpush1.bf16.msra.mxu1 %v8857_v43  ;;  %7621 = vmatprep.subr.bf16.mxu0 %v8872_v33  ;;  %v8951_v43 = vcombine.low %v1036_v23, %v1044_v24  ;;  %v8953_v33 = vcombine.low %v1037_v29, %v1045_v32  ;;  %v8970_v34 = vcombine.high %v1053_v42, %v1061_v57  ;;  %v1132_v24 = vld [vmem:[%s10381_s14 + $0xda0] sm:$0xff]  ;;  %v1133_v32 = vld [vmem:[%s10381_s14 + $0xda8] sm:$0xff] }
 0x3aa   : > { %7785 = vmatprep.subr.bf16.mxu1 %v8874_v49  ;;  %v8968_v49 = vcombine.high %v1052_v38, %v1060_v14  ;;  %v1140_v29 = vld [vmem:[%s10381_s14 + $0xde0] sm:$0xff] }
 0x3ab   : > { %7613 = vmatmul.mubr.bf16.vlgmr.msra.gmra.mrb[16].mxu0 %v10510_v27 }
 0x3ac   : > { %7777 = vmatmul.mubr.bf16.vlgmr.msra.gmra.mrb[16].mxu1 %v10510_v27  ;;  %7622 = vmatpush1.bf16.msra.mxu0 %v8871_v3  ;;  %v1076_v3 = vld [vmem:[%s10381_s14 + $0xbe0] sm:$0xff] }
 0x3ad   : > { %7653 = vmatprep.mubr.bf16.mxu0 %v10515_v31  ;;  %7786 = vmatpush1.bf16.msra.mxu1 %v8873_v53  ;;  %v8967_v53 = vcombine.low %v1052_v38, %v1060_v14  ;;  %v8984_v36 = vcombine.high %v1068_v50, %v1076_v3  ;;  %v1148_v14 = vld [vmem:[%s10381_s14 + $0xe20] sm:$0xff] }
 0x3ae   : > { %7817 = vmatprep.mubr.bf16.mxu1 %v10515_v31  ;;  %7623 = vmatprep.subr.bf16.mxu0 %v8888_v35  ;;  %v8969_v35 = vcombine.low %v1053_v42, %v1061_v57  ;;  %v1156_v42 = vld [vmem:[%s10381_s14 + $0xe60] sm:$0xff]  ;;  %v1149_v57 = vld [vmem:[%s10381_s14 + $0xe28] sm:$0xff] }
 0x3af   : > { %7787 = vmatprep.subr.bf16.mxu1 %v8890_v39  ;;  %v1084_v39 = vld [vmem:[%s10381_s14 + $0xc20] sm:$0xff] }
 0x3b0   : > { %7624 = vmatpush1.bf16.msra.mxu0 %v8887_v55  ;;  %v1093_v55 = vld [vmem:[%s10381_s14 + $0xc68] sm:$0xff] }
 0x3b1   : > { %7788 = vmatpush1.bf16.msra.mxu1 %v8889_v56  ;;  %7625 = vmatprep.subr.bf16.mxu0 %v8904_v59  ;;  %v8983_v56 = vcombine.low %v1068_v50, %v1076_v3  ;;  %v8985_v59 = vcombine.low %v1069_v51, %v1077_v52  ;;  %v9002_v62 = vcombine.high %v1085_v54, %v1093_v55  ;;  %v1164_v3 = vld [vmem:[%s10381_s14 + $0xea0] sm:$0xff]  ;;  %v1165_v52 = vld [vmem:[%s10381_s14 + $0xea8] sm:$0xff] }
 0x3b2   : > { %7789 = vmatprep.subr.bf16.mxu1 %v8906_v60  ;;  %v9000_v60 = vcombine.high %v1084_v39, %v1092_v40  ;;  %v1172_v51 = vld [vmem:[%s10381_s14 + $0xee0] sm:$0xff] }
 0x3b4   : > { %7626 = vmatpush1.bf16.msra.mxu0 %v8903_v5  ;;  %v1109_v5 = vld [vmem:[%s10381_s14 + $0xce8] sm:$0xff] }
 0x3b5   : > { %7790 = vmatpush1.bf16.msra.mxu1 %v8905_v8  ;;  %7627 = vmatprep.subr.bf16.mxu0 %v8920_v17  ;;  %v8999_v8 = vcombine.low %v1084_v39, %v1092_v40  ;;  %v9001_v17 = vcombine.low %v1085_v54, %v1093_v55  ;;  %v9018_v10 = vcombine.high %v1101_v4, %v1109_v5  ;;  %v1180_v40 = vld [vmem:[%s10381_s14 + $0xf20] sm:$0xff]  ;;  %v1181_v55 = vld [vmem:[%s10381_s14 + $0xf28] sm:$0xff] }
 0x3b6   : > { %7791 = vmatprep.subr.bf16.mxu1 %v8922_v9  ;;  %v9016_v9 = vcombine.high %v1100_v63, %v1108_v0  ;;  %v1188_v54 = vld [vmem:[%s10381_s14 + $0xf60] sm:$0xff] }
 0x3b8   : > { %7628 = vmatpush1.bf16.msra.mxu0 %v8919_v20  ;;  %v1125_v20 = vld [vmem:[%s10381_s14 + $0xd68] sm:$0xff] }
 0x3b9   : > { %7792 = vmatpush1.bf16.msra.mxu1 %v8921_v18  ;;  %7629 = vmatprep.subr.bf16.mxu0 %v8936_v46  ;;  %v9015_v18 = vcombine.low %v1100_v63, %v1108_v0  ;;  %v9017_v46 = vcombine.low %v1101_v4, %v1109_v5  ;;  %v9034_v23 = vcombine.high %v1117_v15, %v1125_v20  ;;  %v1196_v0 = vld [vmem:[%s10381_s14 + $0xfa0] sm:$0xff]  ;;  %v1197_v5 = vld [vmem:[%s10381_s14 + $0xfa8] sm:$0xff] }
 0x3ba   : > { %7793 = vmatprep.subr.bf16.mxu1 %v8938_v21  ;;  %v9032_v21 = vcombine.high %v1116_v11, %v1124_v13  ;;  %v1204_v4 = vld [vmem:[%s10381_s14 + $0xfe0] sm:$0xff] }
 0x3bc   : > { %7630 = vmatpush1.bf16.msra.mxu0 %v8935_v12  ;;  %v1141_v12 = vld [vmem:[%s10381_s14 + $0xde8] sm:$0xff] }
 0x3bd   : > { %7794 = vmatpush1.bf16.msra.mxu1 %v8937_v28  ;;  %7631 = vmatprep.subr.bf16.mxu0 %v8952_v44  ;;  %v9031_v28 = vcombine.low %v1116_v11, %v1124_v13  ;;  %v9033_v44 = vcombine.low %v1117_v15, %v1125_v20  ;;  %v9050_v38 = vcombine.high %v1133_v32, %v1141_v12  ;;  %v1212_v13 = vld [vmem:[%s10381_s14 + $0x1020] sm:$0xff]  ;;  %v1213_v20 = vld [vmem:[%s10381_s14 + $0x1028] sm:$0xff] }
 0x3be   : > { %7795 = vmatprep.subr.bf16.mxu1 %v8954_v2  ;;  %v9048_v2 = vcombine.high %v1132_v24, %v1140_v29  ;;  %v1220_v15 = vld [vmem:[%s10381_s14 + $0x1060] sm:$0xff] }
 0x3c0   : > { %7632 = vmatpush1.bf16.msra.mxu0 %v8951_v43  ;;  %v1157_v43 = vld [vmem:[%s10381_s14 + $0xe68] sm:$0xff] }
 0x3c1   : > { %7796 = vmatpush1.bf16.msra.mxu1 %v8953_v33  ;;  %7633 = vmatprep.subr.bf16.mxu0 %v8968_v49  ;;  %v9047_v33 = vcombine.low %v1132_v24, %v1140_v29  ;;  %v9049_v49 = vcombine.low %v1133_v32, %v1141_v12  ;;  %v9066_v50 = vcombine.high %v1149_v57, %v1157_v43  ;;  %v1228_v29 = vld [vmem:[%s10381_s14 + $0x10a0] sm:$0xff] }
 0x3c2   : > { %7797 = vmatprep.subr.bf16.mxu1 %v8970_v34  ;;  %v9064_v34 = vcombine.high %v1148_v14, %v1156_v42  ;;  %v1236_v32 = vld [vmem:[%s10381_s14 + $0x10e0] sm:$0xff]  ;;  %v9127_v12 = vcombine.low %v1212_v13, %v1220_v15 }
 0x3c4   : > { %7634 = vmatpush1.bf16.msra.mxu0 %v8967_v53  ;;  %v1173_v53 = vld [vmem:[%s10381_s14 + $0xee8] sm:$0xff] }
 0x3c5   : > { %7798 = vmatpush1.bf16.msra.mxu1 %v8969_v35  ;;  %7635 = vmatprep.subr.bf16.mxu0 %v8984_v36  ;;  %v9063_v35 = vcombine.low %v1148_v14, %v1156_v42  ;;  %v9065_v36 = vcombine.low %v1149_v57, %v1157_v43  ;;  %v9082_v39 = vcombine.high %v1165_v52, %v1173_v53  ;;  %v1244_v14 = vld [vmem:[%s10381_s14 + $0x1120] sm:$0xff]  ;;  %v1245_v43 = vld [vmem:[%s10381_s14 + $0x1128] sm:$0xff] }
 0x3c6   : > { %7799 = vmatprep.subr.bf16.mxu1 %v8986_v37  ;;  %v9080_v37 = vcombine.high %v1164_v3, %v1172_v51  ;;  %v1252_v42 = vld [vmem:[%s10381_s14 + $0x1160] sm:$0xff] }
 0x3c8   : > { %7636 = vmatpush1.bf16.msra.mxu0 %v8983_v56  ;;  %v1189_v56 = vld [vmem:[%s10381_s14 + $0xf68] sm:$0xff] }
 0x3c9   : > { %7800 = vmatpush1.bf16.msra.mxu1 %v8985_v59  ;;  %7637 = vmatprep.subr.bf16.mxu0 %v9000_v60  ;;  %v9079_v59 = vcombine.low %v1164_v3, %v1172_v51  ;;  %v9081_v60 = vcombine.low %v1165_v52, %v1173_v53  ;;  %v9098_v63 = vcombine.high %v1181_v55, %v1189_v56  ;;  %v1260_v51 = vld [vmem:[%s10381_s14 + $0x11a0] sm:$0xff]  ;;  %v1261_v53 = vld [vmem:[%s10381_s14 + $0x11a8] sm:$0xff] }
 0x3ca   : > { %7801 = vmatprep.subr.bf16.mxu1 %v9002_v62  ;;  %v9096_v62 = vcombine.high %v1180_v40, %v1188_v54  ;;  %v1268_v52 = vld [vmem:[%s10381_s14 + $0x11e0] sm:$0xff] }
 0x3cc   : > { %7638 = vmatpush1.bf16.msra.mxu0 %v8999_v8  ;;  %v1205_v8 = vld [vmem:[%s10381_s14 + $0xfe8] sm:$0xff] }
 0x3cd   : > { %7802 = vmatpush1.bf16.msra.mxu1 %v9001_v17  ;;  %7639 = vmatprep.subr.bf16.mxu0 %v9016_v9  ;;  %v9095_v17 = vcombine.low %v1180_v40, %v1188_v54  ;;  %v9097_v9 = vcombine.low %v1181_v55, %v1189_v56  ;;  %v9114_v11 = vcombine.high %v1197_v5, %v1205_v8  ;;  %v1276_v54 = vld [vmem:[%s10381_s14 + $0x1220] sm:$0xff]  ;;  %v1277_v56 = vld [vmem:[%s10381_s14 + $0x1228] sm:$0xff] }
 0x3ce   : > { %7803 = vmatprep.subr.bf16.mxu1 %v9018_v10  ;;  %v9112_v10 = vcombine.high %v1196_v0, %v1204_v4  ;;  %v1284_v55 = vld [vmem:[%s10381_s14 + $0x1260] sm:$0xff] }
 0x3d0   : > { %7640 = vmatpush1.bf16.msra.mxu0 %v9015_v18  ;;  %v1221_v18 = vld [vmem:[%s10381_s14 + $0x1068] sm:$0xff] }
 0x3d1   : > { %7804 = vmatpush1.bf16.msra.mxu1 %v9017_v46  ;;  %7641 = vmatprep.subr.bf16.mxu0 %v9032_v21  ;;  %v9111_v46 = vcombine.low %v1196_v0, %v1204_v4  ;;  %v9113_v21 = vcombine.low %v1197_v5, %v1205_v8  ;;  %v9130_v24 = vcombine.high %v1213_v20, %v1221_v18  ;;  %v1292_v4 = vld [vmem:[%s10381_s14 + $0x12a0] sm:$0xff]  ;;  %v1293_v8 = vld [vmem:[%s10381_s14 + $0x12a8] sm:$0xff] }
 0x3d2   : > { %7805 = vmatprep.subr.bf16.mxu1 %v9034_v23  ;;  %v9128_v23 = vcombine.high %v1212_v13, %v1220_v15  ;;  %v1300_v5 = vld [vmem:[%s10381_s14 + $0x12e0] sm:$0xff] }
 0x3d3   : > { %v1308_v15 = vld [vmem:[%s10381_s14 + $0x1320] sm:$0xff] }
 0x3d4   : > { %7642 = vmatpush1.bf16.msra.mxu0 %v9031_v28  ;;  %v1229_v28 = vld [vmem:[%s10381_s14 + $0x10a8] sm:$0xff] }
 0x3d5   : > { %7806 = vmatpush1.bf16.msra.mxu1 %v9033_v44  ;;  %7643 = vmatprep.subr.bf16.mxu0 %v9048_v2  ;;  %v1237_v44 = vld [vmem:[%s10381_s14 + $0x10e8] sm:$0xff]  ;;  %v9129_v2 = vcombine.low %v1213_v20, %v1221_v18  ;;  %v1316_v20 = vld [vmem:[%s10381_s14 + $0x1360] sm:$0xff] }
 0x3d6   : > { %7807 = vmatprep.subr.bf16.mxu1 %v9050_v38  ;;  %v9144_v38 = vcombine.high %v1228_v29, %v1236_v32  ;;  %v9146_v57 = vcombine.high %v1229_v28, %v1237_v44  ;;  %v1309_v18 = vld [vmem:[%s10381_s14 + $0x1328] sm:$0xff] }
 0x3d8   : > { %7644 = vmatpush1.bf16.msra.mxu0 %v9047_v33  ;;  %v1253_v33 = vld [vmem:[%s10381_s14 + $0x1168] sm:$0xff] }
 0x3d9   : > { %7808 = vmatpush1.bf16.msra.mxu1 %v9049_v49  ;;  %7645 = vmatprep.subr.bf16.mxu0 %v9064_v34  ;;  %v9143_v49 = vcombine.low %v1228_v29, %v1236_v32  ;;  %v9145_v34 = vcombine.low %v1229_v28, %v1237_v44  ;;  %v9162_v3 = vcombine.high %v1245_v43, %v1253_v33  ;;  %v1324_v32 = vld [vmem:[%s10381_s14 + $0x13a0] sm:$0xff]  ;;  %v1325_v28 = vld [vmem:[%s10381_s14 + $0x13a8] sm:$0xff] }
 0x3da   : > { %7809 = vmatprep.subr.bf16.mxu1 %v9066_v50  ;;  %v9160_v50 = vcombine.high %v1244_v14, %v1252_v42  ;;  %v1333_v44 = vld [vmem:[%s10381_s14 + $0x13e8] sm:$0xff] }
 0x3dc   : > { %7646 = vmatpush1.bf16.msra.mxu0 %v9063_v35  ;;  %v1269_v35 = vld [vmem:[%s10381_s14 + $0x11e8] sm:$0xff] }
 0x3dd   : > { %7810 = vmatpush1.bf16.msra.mxu1 %v9065_v36  ;;  %7647 = vmatprep.subr.bf16.mxu0 %v9080_v37  ;;  %v9159_v36 = vcombine.low %v1244_v14, %v1252_v42  ;;  %v9161_v37 = vcombine.low %v1245_v43, %v1253_v33  ;;  %v9178_v40 = vcombine.high %v1261_v53, %v1269_v35  ;;  %v1348_v43 = vld [vmem:[%s10381_s14 + $0x1460] sm:$0xff]  ;;  %v1341_v33 = vld [vmem:[%s10381_s14 + $0x1428] sm:$0xff] }
 0x3de   : > { %7811 = vmatprep.subr.bf16.mxu1 %v9082_v39  ;;  %v9176_v39 = vcombine.high %v1260_v51, %v1268_v52  ;;  %v9242_v42 = vcombine.high %v1325_v28, %v1333_v44 }
 0x3e0   : > { %7648 = vmatpush1.bf16.msra.mxu0 %v9079_v59  ;;  %v1285_v59 = vld [vmem:[%s10381_s14 + $0x1268] sm:$0xff] }
 0x3e1   : > { %7812 = vmatpush1.bf16.msra.mxu1 %v9081_v60  ;;  %7649 = vmatprep.subr.bf16.mxu0 %v9096_v62  ;;  %v9175_v60 = vcombine.low %v1260_v51, %v1268_v52  ;;  %v9177_v62 = vcombine.low %v1261_v53, %v1269_v35  ;;  %v9194_v0 = vcombine.high %v1277_v56, %v1285_v59  ;;  %v1356_v52 = vld [vmem:[%s10381_s14 + $0x14a0] sm:$0xff]  ;;  %v1357_v35 = vld [vmem:[%s10381_s14 + $0x14a8] sm:$0xff] }
 0x3e2   : > { %7813 = vmatprep.subr.bf16.mxu1 %v9098_v63  ;;  %v9192_v63 = vcombine.high %v1276_v54, %v1284_v55  ;;  %v1364_v53 = vld [vmem:[%s10381_s14 + $0x14e0] sm:$0xff] }
 0x3e4   : > { %7650 = vmatpush1.bf16.msra.mxu0 %v9095_v17  ;;  %v1301_v17 = vld [vmem:[%s10381_s14 + $0x12e8] sm:$0xff] }
 0x3e5   : > { %7814 = vmatpush1.bf16.msra.mxu1 %v9097_v9  ;;  %7651 = vmatprep.subr.bf16.mxu0 %v9112_v10  ;;  %v9191_v9 = vcombine.low %v1276_v54, %v1284_v55  ;;  %v9193_v10 = vcombine.low %v1277_v56, %v1285_v59  ;;  %v9210_v13 = vcombine.high %v1293_v8, %v1301_v17  ;;  %v1372_v55 = vld [vmem:[%s10381_s14 + $0x1520] sm:$0xff]  ;;  %v1373_v59 = vld [vmem:[%s10381_s14 + $0x1528] sm:$0xff] }
 0x3e6   : > { %7815 = vmatprep.subr.bf16.mxu1 %v9114_v11  ;;  %v9208_v11 = vcombine.high %v1292_v4, %v1300_v5  ;;  %v1380_v56 = vld [vmem:[%s10381_s14 + $0x1560] sm:$0xff] }
 0x3e8   : > { %7652 = vmatpush1.bf16.msra.mxu0 %v9111_v46  ;;  %v1317_v46 = vld [vmem:[%s10381_s14 + $0x1368] sm:$0xff] }
 0x3e9   : > { %7816 = vmatpush1.bf16.msra.mxu1 %v9113_v21  ;;  %7662 = vmatprep.subr.bf16.mxu0 %v9128_v23  ;;  %v9207_v21 = vcombine.low %v1292_v4, %v1300_v5  ;;  %v9209_v23 = vcombine.low %v1293_v8, %v1301_v17  ;;  %v9226_v29 = vcombine.high %v1309_v18, %v1317_v46  ;;  %v1388_v5 = vld [vmem:[%s10381_s14 + $0x15a0] sm:$0xff]  ;;  %v1389_v17 = vld [vmem:[%s10381_s14 + $0x15a8] sm:$0xff] }
 0x3ea   : > { %7826 = vmatprep.subr.bf16.mxu1 %v9130_v24  ;;  %v9224_v24 = vcombine.high %v1308_v15, %v1316_v20  ;;  %v1396_v8 = vld [vmem:[%s10381_s14 + $0x15e0] sm:$0xff] }
 0x3eb   : > { %7654 = vmatmul.mubr.bf16.vlgmr.msra.gmra.mrb[16].mxu0 %v10610_v19 }
 0x3ec   : > { %7818 = vmatmul.mubr.bf16.vlgmr.msra.gmra.mrb[16].mxu1 %v10610_v19  ;;  %7663 = vmatpush1.bf16.msra.mxu0 %v9127_v12  ;;  %v1332_v12 = vld [vmem:[%s10381_s14 + $0x13e0] sm:$0xff] }
 0x3ed   : > { %7694 = vmatprep.mubr.bf16.mxu0 %v10613_v22  ;;  %7827 = vmatpush1.bf16.msra.mxu1 %v9129_v2  ;;  %v9223_v2 = vcombine.low %v1308_v15, %v1316_v20  ;;  %v9240_v14 = vcombine.high %v1324_v32, %v1332_v12  ;;  %v1404_v20 = vld [vmem:[%s10381_s14 + $0x1620] sm:$0xff] }
 0x3ee   : > { %7858 = vmatprep.mubr.bf16.mxu1 %v10613_v22  ;;  %7664 = vmatprep.subr.bf16.mxu0 %v9144_v38  ;;  %v9225_v38 = vcombine.low %v1309_v18, %v1317_v46  ;;  %v1412_v18 = vld [vmem:[%s10381_s14 + $0x1660] sm:$0xff]  ;;  %v1405_v46 = vld [vmem:[%s10381_s14 + $0x1628] sm:$0xff] }
 0x3ef   : > { %7828 = vmatprep.subr.bf16.mxu1 %v9146_v57  ;;  %v1340_v57 = vld [vmem:[%s10381_s14 + $0x1420] sm:$0xff] }
 0x3f0   : > { %7665 = vmatpush1.bf16.msra.mxu0 %v9143_v49  ;;  %v1349_v49 = vld [vmem:[%s10381_s14 + $0x1468] sm:$0xff] }
 0x3f1   : > { %7829 = vmatpush1.bf16.msra.mxu1 %v9145_v34  ;;  %7666 = vmatprep.subr.bf16.mxu0 %v9160_v50  ;;  %v9239_v34 = vcombine.low %v1324_v32, %v1332_v12  ;;  %v9241_v50 = vcombine.low %v1325_v28, %v1333_v44  ;;  %v9258_v51 = vcombine.high %v1341_v33, %v1349_v49  ;;  %v1420_v12 = vld [vmem:[%s10381_s14 + $0x16a0] sm:$0xff]  ;;  %v1421_v44 = vld [vmem:[%s10381_s14 + $0x16a8] sm:$0xff] }
 0x3f2   : > { %7830 = vmatprep.subr.bf16.mxu1 %v9162_v3  ;;  %v9256_v3 = vcombine.high %v1340_v57, %v1348_v43  ;;  %v1428_v28 = vld [vmem:[%s10381_s14 + $0x16e0] sm:$0xff] }
 0x3f4   : > { %7667 = vmatpush1.bf16.msra.mxu0 %v9159_v36  ;;  %v1365_v36 = vld [vmem:[%s10381_s14 + $0x14e8] sm:$0xff] }
 0x3f5   : > { %7831 = vmatpush1.bf16.msra.mxu1 %v9161_v37  ;;  %7668 = vmatprep.subr.bf16.mxu0 %v9176_v39  ;;  %v9255_v37 = vcombine.low %v1340_v57, %v1348_v43  ;;  %v9257_v39 = vcombine.low %v1341_v33, %v1349_v49  ;;  %v9274_v54 = vcombine.high %v1357_v35, %v1365_v36  ;;  %v1436_v43 = vld [vmem:[%s10381_s14 + $0x1720] sm:$0xff]  ;;  %v1437_v49 = vld [vmem:[%s10381_s14 + $0x1728] sm:$0xff] }
 0x3f6   : > { %7832 = vmatprep.subr.bf16.mxu1 %v9178_v40  ;;  %v9272_v40 = vcombine.high %v1356_v52, %v1364_v53  ;;  %v1444_v33 = vld [vmem:[%s10381_s14 + $0x1760] sm:$0xff] }
 0x3f8   : > { %7669 = vmatpush1.bf16.msra.mxu0 %v9175_v60  ;;  %v1381_v60 = vld [vmem:[%s10381_s14 + $0x1568] sm:$0xff] }
 0x3f9   : > { %7833 = vmatpush1.bf16.msra.mxu1 %v9177_v62  ;;  %7670 = vmatprep.subr.bf16.mxu0 %v9192_v63  ;;  %v9271_v62 = vcombine.low %v1356_v52, %v1364_v53  ;;  %v9273_v63 = vcombine.low %v1357_v35, %v1365_v36  ;;  %v9290_v4 = vcombine.high %v1373_v59, %v1381_v60  ;;  %v1452_v53 = vld [vmem:[%s10381_s14 + $0x17a0] sm:$0xff]  ;;  %v1453_v36 = vld [vmem:[%s10381_s14 + $0x17a8] sm:$0xff] }
 0x3fa   : > { %7834 = vmatprep.subr.bf16.mxu1 %v9194_v0  ;;  %v9288_v0 = vcombine.high %v1372_v55, %v1380_v56  ;;  %v1460_v35 = vld [vmem:[%s10381_s14 + $0x17e0] sm:$0xff] }
 0x3fc   : > { %7671 = vmatpush1.bf16.msra.mxu0 %v9191_v9  ;;  %v1397_v9 = vld [vmem:[%s10381_s14 + $0x15e8] sm:$0xff] }
 0x3fd   : > { %7835 = vmatpush1.bf16.msra.mxu1 %v9193_v10  ;;  %7672 = vmatprep.subr.bf16.mxu0 %v9208_v11  ;;  %v9287_v10 = vcombine.low %v1372_v55, %v1380_v56  ;;  %v9289_v11 = vcombine.low %v1373_v59, %v1381_v60  ;;  %v9306_v15 = vcombine.high %v1389_v17, %v1397_v9  ;;  %v1468_v56 = vld [vmem:[%s10381_s14 + $0x1820] sm:$0xff]  ;;  %v1469_v60 = vld [vmem:[%s10381_s14 + $0x1828] sm:$0xff] }
 0x3fe   : > { %7836 = vmatprep.subr.bf16.mxu1 %v9210_v13  ;;  %v9304_v13 = vcombine.high %v1388_v5, %v1396_v8  ;;  %v1476_v59 = vld [vmem:[%s10381_s14 + $0x1860] sm:$0xff] }
 0x400   : > { %7673 = vmatpush1.bf16.msra.mxu0 %v9207_v21  ;;  %v1413_v21 = vld [vmem:[%s10381_s14 + $0x1668] sm:$0xff] }
 0x401   : > { %7837 = vmatpush1.bf16.msra.mxu1 %v9209_v23  ;;  %7674 = vmatprep.subr.bf16.mxu0 %v9224_v24  ;;  %v9303_v23 = vcombine.low %v1388_v5, %v1396_v8  ;;  %v9305_v24 = vcombine.low %v1389_v17, %v1397_v9  ;;  %v9322_v32 = vcombine.high %v1405_v46, %v1413_v21  ;;  %v1484_v8 = vld [vmem:[%s10381_s14 + $0x18a0] sm:$0xff] }
 0x402   : > { %7838 = vmatprep.subr.bf16.mxu1 %v9226_v29  ;;  %v9320_v29 = vcombine.high %v1404_v20, %v1412_v18  ;;  %v1492_v17 = vld [vmem:[%s10381_s14 + $0x18e0] sm:$0xff]  ;;  %v9383_v9 = vcombine.low %v1468_v56, %v1476_v59 }
 0x404   : > { %7675 = vmatpush1.bf16.msra.mxu0 %v9223_v2  ;;  %v1429_v2 = vld [vmem:[%s10381_s14 + $0x16e8] sm:$0xff] }
 0x405   : > { %7839 = vmatpush1.bf16.msra.mxu1 %v9225_v38  ;;  %7676 = vmatprep.subr.bf16.mxu0 %v9240_v14  ;;  %v9319_v38 = vcombine.low %v1404_v20, %v1412_v18  ;;  %v9321_v14 = vcombine.low %v1405_v46, %v1413_v21  ;;  %v9338_v57 = vcombine.high %v1421_v44, %v1429_v2  ;;  %v1500_v20 = vld [vmem:[%s10381_s14 + $0x1920] sm:$0xff]  ;;  %v1501_v21 = vld [vmem:[%s10381_s14 + $0x1928] sm:$0xff] }
 0x406   : > { %7840 = vmatprep.subr.bf16.mxu1 %v9242_v42  ;;  %v9336_v42 = vcombine.high %v1420_v12, %v1428_v28  ;;  %v1508_v18 = vld [vmem:[%s10381_s14 + $0x1960] sm:$0xff] }
 0x408   : > { %7677 = vmatpush1.bf16.msra.mxu0 %v9239_v34  ;;  %v1445_v34 = vld [vmem:[%s10381_s14 + $0x1768] sm:$0xff] }
 0x409   : > { %7841 = vmatpush1.bf16.msra.mxu1 %v9241_v50  ;;  %7678 = vmatprep.subr.bf16.mxu0 %v9256_v3  ;;  %v9335_v50 = vcombine.low %v1420_v12, %v1428_v28  ;;  %v9337_v3 = vcombine.low %v1421_v44, %v1429_v2  ;;  %v9354_v52 = vcombine.high %v1437_v49, %v1445_v34  ;;  %v1516_v28 = vld [vmem:[%s10381_s14 + $0x19a0] sm:$0xff]  ;;  %v1517_v2 = vld [vmem:[%s10381_s14 + $0x19a8] sm:$0xff] }
 0x40a   : > { %7842 = vmatprep.subr.bf16.mxu1 %v9258_v51  ;;  %v9352_v51 = vcombine.high %v1436_v43, %v1444_v33  ;;  %v1524_v44 = vld [vmem:[%s10381_s14 + $0x19e0] sm:$0xff] }
 0x40c   : > { %7679 = vmatpush1.bf16.msra.mxu0 %v9255_v37  ;;  %v1461_v37 = vld [vmem:[%s10381_s14 + $0x17e8] sm:$0xff] }
 0x40d   : > { %7843 = vmatpush1.bf16.msra.mxu1 %v9257_v39  ;;  %7680 = vmatprep.subr.bf16.mxu0 %v9272_v40  ;;  %v9351_v39 = vcombine.low %v1436_v43, %v1444_v33  ;;  %v9353_v40 = vcombine.low %v1437_v49, %v1445_v34  ;;  %v9370_v55 = vcombine.high %v1453_v36, %v1461_v37  ;;  %v1532_v33 = vld [vmem:[%s10381_s14 + $0x1a20] sm:$0xff]  ;;  %v1533_v34 = vld [vmem:[%s10381_s14 + $0x1a28] sm:$0xff] }
 0x40e   : > { %7844 = vmatprep.subr.bf16.mxu1 %v9274_v54  ;;  %v9368_v54 = vcombine.high %v1452_v53, %v1460_v35  ;;  %v1540_v49 = vld [vmem:[%s10381_s14 + $0x1a60] sm:$0xff] }
 0x410   : > { %7681 = vmatpush1.bf16.msra.mxu0 %v9271_v62  ;;  %v1477_v62 = vld [vmem:[%s10381_s14 + $0x1868] sm:$0xff] }
 0x411   : > { %7845 = vmatpush1.bf16.msra.mxu1 %v9273_v63  ;;  %7682 = vmatprep.subr.bf16.mxu0 %v9288_v0  ;;  %v9367_v63 = vcombine.low %v1452_v53, %v1460_v35  ;;  %v9369_v0 = vcombine.low %v1453_v36, %v1461_v37  ;;  %v9386_v5 = vcombine.high %v1469_v60, %v1477_v62  ;;  %v1548_v35 = vld [vmem:[%s10381_s14 + $0x1aa0] sm:$0xff]  ;;  %v1549_v37 = vld [vmem:[%s10381_s14 + $0x1aa8] sm:$0xff] }
 0x412   : > { %7846 = vmatprep.subr.bf16.mxu1 %v9290_v4  ;;  %v9384_v4 = vcombine.high %v1468_v56, %v1476_v59  ;;  %v1556_v36 = vld [vmem:[%s10381_s14 + $0x1ae0] sm:$0xff] }
 0x413   : > { %v1564_v59 = vld [vmem:[%s10381_s14 + $0x1b20] sm:$0xff] }
 0x414   : > { %7683 = vmatpush1.bf16.msra.mxu0 %v9287_v10  ;;  %v1485_v10 = vld [vmem:[%s10381_s14 + $0x18a8] sm:$0xff] }
 0x415   : > { %7847 = vmatpush1.bf16.msra.mxu1 %v9289_v11  ;;  %7684 = vmatprep.subr.bf16.mxu0 %v9304_v13  ;;  %v1493_v11 = vld [vmem:[%s10381_s14 + $0x18e8] sm:$0xff]  ;;  %v9385_v13 = vcombine.low %v1469_v60, %v1477_v62  ;;  %v1572_v60 = vld [vmem:[%s10381_s14 + $0x1b60] sm:$0xff] }
 0x416   : > { %7848 = vmatprep.subr.bf16.mxu1 %v9306_v15  ;;  %v9400_v15 = vcombine.high %v1484_v8, %v1492_v17  ;;  %v9402_v46 = vcombine.high %v1485_v10, %v1493_v11  ;;  %v9942_v62 = vld [vmem:[%s11011_s15] sm:$0xff] }
 0x418   : > { %7685 = vmatpush1.bf16.msra.mxu0 %v9303_v23  ;;  %v1509_v23 = vld [vmem:[%s10381_s14 + $0x1968] sm:$0xff] }
 0x419   : > { %7849 = vmatpush1.bf16.msra.mxu1 %v9305_v24  ;;  %7686 = vmatprep.subr.bf16.mxu0 %v9320_v29  ;;  %v9399_v24 = vcombine.low %v1484_v8, %v1492_v17  ;;  %v9401_v29 = vcombine.low %v1485_v10, %v1493_v11  ;;  %v9418_v12 = vcombine.high %v1501_v21, %v1509_v23 }
 0x41a   : > { %7850 = vmatprep.subr.bf16.mxu1 %v9322_v32  ;;  %v9416_v32 = vcombine.high %v1500_v20, %v1508_v18  ;;  %v1747_v8 = vrot.slane %v9942_v62, %v10546_v6  ;;  %v9463_v17 = vcombine.low %v1548_v35, %v1556_v36  ;;  %v9480_v11 = vcombine.high %v1564_v59, %v1572_v60 }
 0x41c   : > { %7687 = vmatpush1.bf16.msra.mxu0 %v9319_v38  ;;  %v1525_v38 = vld [vmem:[%s10381_s14 + $0x19e8] sm:$0xff] }
 0x41d   : > { %7851 = vmatpush1.bf16.msra.mxu1 %v9321_v14  ;;  %7688 = vmatprep.subr.bf16.mxu0 %v9336_v42  ;;  %v9415_v14 = vcombine.low %v1500_v20, %v1508_v18  ;;  %v9417_v42 = vcombine.low %v1501_v21, %v1509_v23  ;;  %v9434_v43 = vcombine.high %v1517_v2, %v1525_v38  ;;  %v1580_v20 = vld [vmem:[%s10381_s14 + $0x1ba0] sm:$0xff] }
 0x41e   : > { %7852 = vmatprep.subr.bf16.mxu1 %v9338_v57  ;;  %v9432_v57 = vcombine.high %v1516_v28, %v1524_v44  ;;  %v1588_v18 = vld [vmem:[%s10381_s14 + $0x1be0] sm:$0xff] }
 0x420   : > { %7689 = vmatpush1.bf16.msra.mxu0 %v9335_v50  ;;  %v1541_v50 = vld [vmem:[%s10381_s14 + $0x1a68] sm:$0xff] }
 0x421   : > { %7853 = vmatpush1.bf16.msra.mxu1 %v9337_v3  ;;  %7690 = vmatprep.subr.bf16.mxu0 %v9352_v51  ;;  %v9431_v3 = vcombine.low %v1516_v28, %v1524_v44  ;;  %v9433_v51 = vcombine.low %v1517_v2, %v1525_v38  ;;  %v9450_v53 = vcombine.high %v1533_v34, %v1541_v50 }
 0x422   : > { %7854 = vmatprep.subr.bf16.mxu1 %v9354_v52  ;;  %v9448_v52 = vcombine.high %v1532_v33, %v1540_v49  ;;  %v9479_v2 = vcombine.low %v1564_v59, %v1572_v60  ;;  %v1613_v59 = vld [vmem:[%s10381_s14 + $0x1ca8] sm:$0xff] }
 0x423   : > { %v1621_v60 = vld [vmem:[%s10381_s14 + $0x1ce8] sm:$0xff] }
 0x424   : > { %7691 = vmatpush1.bf16.msra.mxu0 %v9351_v39  ;;  %v1557_v39 = vld [vmem:[%s10381_s14 + $0x1ae8] sm:$0xff] }
 0x425   : > { %7855 = vmatpush1.bf16.msra.mxu1 %v9353_v40  ;;  %7692 = vmatprep.subr.bf16.mxu0 %v9368_v54  ;;  %v9447_v40 = vcombine.low %v1532_v33, %v1540_v49  ;;  %v9449_v54 = vcombine.low %v1533_v34, %v1541_v50  ;;  %v9466_v56 = vcombine.high %v1549_v37, %v1557_v39  ;;  %v1596_v49 = vld [vmem:[%s10381_s14 + $0x1c20] sm:$0xff] }
 0x426   : > { %7856 = vmatprep.subr.bf16.mxu1 %v9370_v55  ;;  %v9464_v55 = vcombine.high %v1548_v35, %v1556_v36  ;;  %v9465_v10 = vcombine.low %v1549_v37, %v1557_v39  ;;  %v9496_v33 = vcombine.high %v1580_v20, %v1588_v18  ;;  %v1597_v35 = vld [vmem:[%s10381_s14 + $0x1c28] sm:$0xff]  ;;  %v9495_v37 = vcombine.low %v1580_v20, %v1588_v18 }
 0x427   : > { %v1605_v36 = vld [vmem:[%s10381_s14 + $0x1c68] sm:$0xff] }
 0x428   : > { %7693 = vmatpush1.bf16.msra.mxu0 %v9367_v63  ;;  %v1743_v63 = vrot.slane %v9942_v62, %v10635_v58 }
 0x429   : > { %7857 = vmatpush1.bf16.msra.mxu1 %v9369_v0  ;;  %7703 = vmatprep.subr.bf16.mxu0 %v9384_v4  ;;  %v1565_v0 = vld [vmem:[%s10381_s14 + $0x1b28] sm:$0xff] }
 0x42a   : > { %7867 = vmatprep.subr.bf16.mxu1 %v9386_v5  ;;  %v1573_v4 = vld [vmem:[%s10381_s14 + $0x1b68] sm:$0xff]  ;;  %v1751_v5 = vrot.slane %v9942_v62, %v10727_v41 }
 0x42b   : > { %7695 = vmatmul.mubr.bf16.vlgmr.msra.gmra.mrb[16].mxu0 %v10702_v16 }
 0x42c   : > { %7859 = vmatmul.mubr.bf16.vlgmr.msra.gmra.mrb[16].mxu1 %v10702_v16  ;;  %7704 = vmatpush1.bf16.msra.mxu0 %v9383_v9  ;;  %v1755_v9 = vrot.slane %v9942_v62, %v10638_v61 }
 0x42d   : > { %7735 = vmatprep.mubr.bf16.mxu0 %v10705_v26  ;;  %7868 = vmatpush1.bf16.msra.mxu1 %v9385_v13 }
 0x42e   : > { %7899 = vmatprep.mubr.bf16.mxu1 %v10705_v26  ;;  %7705 = vmatprep.subr.bf16.mxu0 %v9400_v15  ;;  %v9482_v15 = vcombine.high %v1565_v0, %v1573_v4 }
 0x42f   : > { %7869 = vmatprep.subr.bf16.mxu1 %v9402_v46 }
 0x430   : > { %7706 = vmatpush1.bf16.msra.mxu0 %v9399_v24  ;;  %v1581_v24 = vld [vmem:[%s10381_s14 + $0x1ba8] sm:$0xff] }
 0x431   : > { %7870 = vmatpush1.bf16.msra.mxu1 %v9401_v29  ;;  %7707 = vmatprep.subr.bf16.mxu0 %v9416_v32  ;;  %v1589_v29 = vld [vmem:[%s10381_s14 + $0x1be8] sm:$0xff] }
 0x432   : > { %7871 = vmatprep.subr.bf16.mxu1 %v9418_v12  ;;  %v9497_v39 = vcombine.low %v1581_v24, %v1589_v29 }
 0x434   : > { %7708 = vmatpush1.bf16.msra.mxu0 %v9415_v14 }
 0x435   : > { %7872 = vmatpush1.bf16.msra.mxu1 %v9417_v42  ;;  %7709 = vmatprep.subr.bf16.mxu0 %v9432_v57 }
 0x436   : > { %7873 = vmatprep.subr.bf16.mxu1 %v9434_v43  ;;  %v9481_v43 = vcombine.low %v1565_v0, %v1573_v4  ;;  %v9530_v4 = vcombine.high %v1613_v59, %v1621_v60 }
 0x438   : > { %7710 = vmatpush1.bf16.msra.mxu0 %v9431_v3 }
 0x439   : > { %7874 = vmatpush1.bf16.msra.mxu1 %v9433_v51  ;;  %7711 = vmatprep.subr.bf16.mxu0 %v9448_v52  ;;  %v9498_v51 = vcombine.high %v1581_v24, %v1589_v29  ;;  %v1604_v52 = vld [vmem:[%s10381_s14 + $0x1c60] sm:$0xff] }
 0x43a   : > { %7875 = vmatprep.subr.bf16.mxu1 %v9450_v53  ;;  %v9511_v62 = vcombine.low %v1596_v49, %v1604_v52  ;;  %v1652_v24 = vld [vmem:[%s10381_s14 + $0x1de0] sm:$0xff] }
 0x43c   : > { %7712 = vmatpush1.bf16.msra.mxu0 %v9447_v40  ;;  %v9512_v40 = vcombine.high %v1596_v49, %v1604_v52  ;;  %v1669_v52 = vld [vmem:[%s10381_s14 + $0x1e68] sm:$0xff] }
 0x43d   : > { %7876 = vmatpush1.bf16.msra.mxu1 %v9449_v54  ;;  %7713 = vmatprep.subr.bf16.mxu0 %v9464_v55  ;;  %v9514_v54 = vcombine.high %v1597_v35, %v1605_v36  ;;  %v1612_v55 = vld [vmem:[%s10381_s14 + $0x1ca0] sm:$0xff] }
 0x43e   : > { %v7409_v13 = vpop.f32.mrb[12].mxu0  ;;  %7877 = vmatprep.subr.bf16.mxu1 %v9466_v56  ;;  %v1620_v56 = vld [vmem:[%s10381_s14 + $0x1ce0] sm:$0xff] }
 0x43f   : > { %v11342_v46 = vadd.f32 %v7409_v13, %v1743_v63  ;;  %v7573_v21 = vpop.f32.mrb[12].mxu1  ;;  %v7411_v23 = vpop.f32.mrb[13].mxu0  ;;  %v9513_v63 = vcombine.low %v1597_v35, %v1605_v36  ;;  %v9528_v0 = vcombine.high %v1612_v55, %v1620_v56  ;;  %v9529_v13 = vcombine.low %v1613_v59, %v1621_v60 }
 0x440   : > { %v11346_v32 = vadd.f32 %v7573_v21, %v1751_v5  ;;  %v11348_v12 = vadd.f32 %v7411_v23, %v1747_v8  ;;  %v7575_v28 = vpop.f32.mrb[13].mxu1  ;;  %v7413_v44 = vpop.f32.mrb[14].mxu0  ;;  %7714 = vmatpush1.bf16.msra.mxu0 %v9463_v17  ;;  %v1628_v5 = vld [vmem:[%s10381_s14 + $0x1d20] sm:$0xff]  ;;  %v1629_v17 = vld [vmem:[%s10381_s14 + $0x1d28] sm:$0xff] }
 0x441   : > { %v9635_v38 = vmul.f32 -1.442695, %v11342_v46  ;;  %v11351_v14 = vadd.f32 %v7575_v28, %v1755_v9  ;;  %v7577_v42 = vpop.f32.mrb[14].mxu1  ;;  %7878 = vmatpush1.bf16.msra.mxu1 %v9465_v10  ;;  %v7414_v57 = vpop.f32.mrb[15].mxu0  ;;  %7715 = vmatprep.subr.bf16.mxu0 %v9480_v11  ;;  %v1636_v8 = vld [vmem:[%s10381_s14 + $0x1d60] sm:$0xff]  ;;  %v1637_v9 = vld [vmem:[%s10381_s14 + $0x1d68] sm:$0xff]  ;;  %v9527_v10 = vcombine.low %v1612_v55, %v1620_v56 }
 0x442   : > { %v9637_v34 = vmul.f32 -1.442695, %v11346_v32  ;;  %v9636_v50 = vmul.f32 -1.442695, %v11348_v12  ;;  %v7578_v3 = vpop.f32.mrb[15].mxu1  ;;  %7879 = vmatprep.subr.bf16.mxu1 %v9482_v15  ;;  %v9544_v15 = vcombine.high %v1628_v5, %v1636_v8  ;;  %v9546_v21 = vcombine.high %v1629_v17, %v1637_v9  ;;  %v1644_v23 = vld [vmem:[%s10381_s14 + $0x1da0] sm:$0xff] }
 0x443   : > { %9893 = vpow2.f32 %v9635_v38  ;;  %v9638_v53 = vmul.f32 -1.442695, %v11351_v14  ;;  %v1645_v44 = vld [vmem:[%s10381_s14 + $0x1da8] sm:$0xff]  ;;  %v9543_v57 = vcombine.low %v1628_v5, %v1636_v8  ;;  %v9560_v49 = vcombine.high %v1644_v23, %v1652_v24  ;;  %v1668_v3 = vld [vmem:[%s10381_s14 + $0x1e60] sm:$0xff] }
 0x444   : > { %9895 = vpow2.f32 %v9637_v34  ;;  %7716 = vmatpush1.bf16.msra.mxu0 %v9479_v2  ;;  %v1653_v2 = vld [vmem:[%s10381_s14 + $0x1de8] sm:$0xff] }
 0x445   : > { %9897 = vpow2.f32 %v9636_v50  ;;  %7880 = vmatpush1.bf16.msra.mxu1 %v9481_v43  ;;  %7717 = vmatprep.subr.bf16.mxu0 %v9496_v33  ;;  %v9545_v33 = vcombine.low %v1629_v17, %v1637_v9  ;;  %v9562_v34 = vcombine.high %v1645_v44, %v1653_v2  ;;  %v1660_v50 = vld [vmem:[%s10381_s14 + $0x1e20] sm:$0xff]  ;;  %v9561_v35 = vcombine.low %v1645_v44, %v1653_v2  ;;  %v1685_v55 = vld [vmem:[%s10381_s14 + $0x1ee8] sm:$0xff] }
 0x446   : > { %9899 = vpow2.f32 %v9638_v53  ;;  %7881 = vmatprep.subr.bf16.mxu1 %v9498_v51  ;;  %v1661_v51 = vld [vmem:[%s10381_s14 + $0x1e28] sm:$0xff]  ;;  %v9559_v53 = vcombine.low %v1644_v23, %v1652_v24  ;;  %v9576_v36 = vcombine.high %v1660_v50, %v1668_v3  ;;  %v9575_v56 = vcombine.low %v1660_v50, %v1668_v3  ;;  %v1708_v24 = vld [vmem:[%s10381_s14 + $0x1fa0] sm:$0xff]  ;;  %v711_v50 = vld [vmem:[%s10381_s14 + $0x78] sm:$0xff] }
 0x447   : > { %v9577_v59 = vcombine.low %v1661_v51, %v1669_v52  ;;  %v1693_v17 = vld [vmem:[%s10381_s14 + $0x1f28] sm:$0xff] }
 0x448   : > { %7718 = vmatpush1.bf16.msra.mxu0 %v9495_v37  ;;  %v9578_v37 = vcombine.high %v1661_v51, %v1669_v52  ;;  %v1701_v9 = vld [vmem:[%s10381_s14 + $0x1f68] sm:$0xff] }
 0x449   : > { %7882 = vmatpush1.bf16.msra.mxu1 %v9497_v39  ;;  %7719 = vmatprep.subr.bf16.mxu0 %v9512_v40  ;;  %v1676_v39 = vld [vmem:[%s10381_s14 + $0x1ea0] sm:$0xff]  ;;  %v9610_v23 = vcombine.high %v1693_v17, %v1701_v9  ;;  %v1717_v44 = vld [vmem:[%s10381_s14 + $0x1fe8] sm:$0xff] }
 0x44a   : > { %7883 = vmatprep.subr.bf16.mxu1 %v9514_v54  ;;  %v1684_v40 = vld [vmem:[%s10381_s14 + $0x1ee0] sm:$0xff]  ;;  %v1677_v54 = vld [vmem:[%s10381_s14 + $0x1ea8] sm:$0xff] }
 0x44b   : > { %v9592_v60 = vcombine.high %v1676_v39, %v1684_v40 }
 0x44c   : > { %7720 = vmatpush1.bf16.msra.mxu0 %v9511_v62 }
 0x44d   : > { %v9894_v11 = vpop.eup %9893  ;;  %7884 = vmatpush1.bf16.msra.mxu1 %v9513_v63  ;;  %7721 = vmatprep.subr.bf16.mxu0 %v9528_v0  ;;  %v9594_v63 = vcombine.high %v1677_v54, %v1685_v55  ;;  %v1692_v0 = vld [vmem:[%s10381_s14 + $0x1f20] sm:$0xff] }
 0x44e   : > { %v9896_v20 = vpop.eup %9895  ;;  %v8288_v18 = vadd.f32 1.0, %v9894_v11  ;;  %7885 = vmatprep.subr.bf16.mxu1 %v9530_v4  ;;  %v1700_v4 = vld [vmem:[%s10381_s14 + $0x1f60] sm:$0xff] }
 0x44f   : > { %v9898_v29 = vpop.eup %9897  ;;  %v8290_v28 = vadd.f32 1.0, %v9896_v20 }
 0x450   : > { %v9900_v38 = vpop.eup %9899  ;;  %9901 = vrcp.f32 %v8288_v18  ;;  %v8289_v42 = vadd.f32 1.0, %v9898_v29  ;;  %7722 = vmatpush1.bf16.msra.mxu0 %v9527_v10  ;;  %v9593_v18 = vcombine.low %v1677_v54, %v1685_v55  ;;  %v1716_v29 = vld [vmem:[%s10381_s14 + $0x1fe0] sm:$0xff]  ;;  %v727_v54 = vld [vmem:[%s10381_s14 + $0xf8] sm:$0xff] }
 0x451   : > { %9903 = vrcp.f32 %v8290_v28  ;;  %v8291_v43 = vadd.f32 1.0, %v9900_v38  ;;  %7886 = vmatpush1.bf16.msra.mxu1 %v9529_v13  ;;  %7723 = vmatprep.subr.bf16.mxu0 %v9544_v15  ;;  %v9591_v13 = vcombine.low %v1676_v39, %v1684_v40  ;;  %v9623_v51 = vcombine.low %v1708_v24, %v1716_v29  ;;  %v719_v40 = vld [vmem:[%s10381_s14 + $0xb8] sm:$0xff] }
 0x452   : > { %9905 = vrcp.f32 %v8289_v42  ;;  %7887 = vmatprep.subr.bf16.mxu1 %v9546_v21  ;;  %v9608_v21 = vcombine.high %v1692_v0, %v1700_v4  ;;  %v9609_v42 = vcombine.low %v1693_v17, %v1701_v9  ;;  %v750_v9 = vld [vmem:[%s10381_s14 + $0x1b0] sm:$0xff] }
 0x453   : > { %9907 = vrcp.f32 %v8291_v43 }
 0x454   : > { %7724 = vmatpush1.bf16.msra.mxu0 %v9543_v57 }
 0x455   : > { %7888 = vmatpush1.bf16.msra.mxu1 %v9545_v33  ;;  %7725 = vmatprep.subr.bf16.mxu0 %v9560_v49  ;;  %v702_v33 = vld [vmem:[%s10381_s14 + $0x30] sm:$0xff] }
 0x456   : > { %7889 = vmatprep.subr.bf16.mxu1 %v9562_v34  ;;  %v710_v49 = vld [vmem:[%s10381_s14 + $0x70] sm:$0xff]  ;;  %v703_v34 = vld [vmem:[%s10381_s14 + $0x38] sm:$0xff] }
 0x457   : > { %v8619_v39 = vcombine.low %v702_v33, %v710_v49  ;;  %v8621_v55 = vcombine.low %v703_v34, %v711_v50 }
 0x458   : > { %7726 = vmatpush1.bf16.msra.mxu0 %v9559_v53  ;;  %v8620_v53 = vcombine.high %v702_v33, %v710_v49  ;;  %v798_v49 = vld [vmem:[%s10381_s14 + $0x330] sm:$0xff] }
 0x459   : > { %7890 = vmatpush1.bf16.msra.mxu1 %v9561_v35  ;;  %7727 = vmatprep.subr.bf16.mxu0 %v9576_v36  ;;  %v8622_v35 = vcombine.high %v703_v34, %v711_v50  ;;  %v718_v36 = vld [vmem:[%s10381_s14 + $0xb0] sm:$0xff]  ;;  %v799_v50 = vld [vmem:[%s10381_s14 + $0x338] sm:$0xff] }
 0x45a   : > { %v9902_v62 = vpop.eup %9901  ;;  %7891 = vmatprep.subr.bf16.mxu1 %v9578_v37  ;;  %v726_v37 = vld [vmem:[%s10381_s14 + $0xf0] sm:$0xff] }
 0x45b   : > { %v9904_v5 = vpop.eup %9903  ;;  %v8336_v8 = vmul.f32 %v9902_v62, %v11342_v46  ;;  %v8638_v62 = vcombine.high %v719_v40, %v727_v54  ;;  %v806_v34 = vld [vmem:[%s10381_s14 + $0x370] sm:$0xff] }
 0x45c   : > { %v9906_v10 = vpop.eup %9905  ;;  %v8338_v11 = vmul.f32 %v9904_v5, %v11346_v32  ;;  %7728 = vmatpush1.bf16.msra.mxu0 %v9575_v56  ;;  %v1709_v32 = vld [vmem:[%s10381_s14 + $0x1fa8] sm:$0xff]  ;;  %v8636_v56 = vcombine.high %v718_v36, %v726_v37  ;;  %v8637_v5 = vcombine.low %v719_v40, %v727_v54  ;;  %v823_v40 = vld [vmem:[%s10381_s14 + $0x3f8] sm:$0xff]  ;;  %v8715_v54 = vcombine.low %v798_v49, %v806_v34 }
 0x45d   : > { %v9908_v15 = vpop.eup %9907  ;;  %v8337_v20 = vmul.f32 %v9906_v10, %v11348_v12  ;;  %7892 = vmatpush1.bf16.msra.mxu1 %v9577_v59  ;;  %7729 = vmatprep.subr.bf16.mxu0 %v9592_v60  ;;  %v9607_v12 = vcombine.low %v1692_v0, %v1700_v4  ;;  %v9626_v43 = vcombine.high %v1709_v32, %v1717_v44  ;;  %v734_v59 = vld [vmem:[%s10381_s14 + $0x130] sm:$0xff]  ;;  %v743_v0 = vld [vmem:[%s10381_s14 + $0x178] sm:$0xff] }
 0x45e   : > { %v8339_v46 = vmul.f32 %v9908_v15, %v11351_v14  ;;  %7893 = vmatprep.subr.bf16.mxu1 %v9594_v63  ;;  %v9624_v14 = vcombine.high %v1708_v24, %v1716_v29  ;;  %v9625_v52 = vcombine.low %v1709_v32, %v1717_v44  ;;  %v742_v60 = vld [vmem:[%s10381_s14 + $0x170] sm:$0xff]  ;;  %v735_v63 = vld [vmem:[%s10381_s14 + $0x138] sm:$0xff]  ;;  %v8635_v4 = vcombine.low %v718_v36, %v726_v37 }
 0x45f   : > { %v8381_v28 = vcombine.low %v8336_v8, %v8337_v20  ;;  %v8652_v8 = vcombine.high %v734_v59, %v742_v60  ;;  %v8654_v17 = vcombine.high %v735_v63, %v743_v0  ;;  %v758_v10 = vld [vmem:[%s10381_s14 + $0x1f0] sm:$0xff]  ;;  %v8651_v15 = vcombine.low %v734_v59, %v742_v60  ;;  %v775_v24 = vld [vmem:[%s10381_s14 + $0x278] sm:$0xff] }
 0x460   : > { %v8382_v2 = vcombine.low %v8338_v11, %v8339_v46  ;;  %7730 = vmatpush1.bf16.msra.mxu0 %v9591_v13  ;;  %v751_v11 = vld [vmem:[%s10381_s14 + $0x1b8] sm:$0xff]  ;;  %v8653_v20 = vcombine.low %v735_v63, %v743_v0  ;;  %v774_v46 = vld [vmem:[%s10381_s14 + $0x270] sm:$0xff]  ;;  %v8667_v29 = vcombine.low %v750_v9, %v758_v10 }
 0x461   : > { %v8389_v38 = vrot.slane %v8381_v28, %v11076_v30  ;;  %7894 = vmatpush1.bf16.msra.mxu1 %v9593_v18  ;;  %7731 = vmatprep.subr.bf16.mxu0 %v9608_v21  ;;  %v759_v13 = vld [vmem:[%s10381_s14 + $0x1f8] sm:$0xff]  ;;  %v8668_v18 = vcombine.high %v750_v9, %v758_v10  ;;  %v766_v21 = vld [vmem:[%s10381_s14 + $0x230] sm:$0xff] }
 0x462   : > { %v8396_v57 = vrot.slane %v8382_v2, %v11076_v30  ;;  %7895 = vmatprep.subr.bf16.mxu1 %v9610_v23  ;;  %v767_v23 = vld [vmem:[%s10381_s14 + $0x238] sm:$0xff]  ;;  %v8669_v28 = vcombine.low %v751_v11, %v759_v13  ;;  %v8684_v32 = vcombine.high %v766_v21, %v774_v46  ;;  %v782_v2 = vld [vmem:[%s10381_s14 + $0x2b0] sm:$0xff] }
 0x463   : > { %v8686_v44 = vcombine.high %v767_v23, %v775_v24  ;;  %v814_v36 = vld [vmem:[%s10381_s14 + $0x3b0] sm:$0xff]  ;;  %v831_v63 = vld [vmem:[%s10381_s14 + $0x438] sm:$0xff] }
 0x464   : > { %v8397_v3 = vcombine.low %v8389_v38, %v8396_v57  ;;  %7732 = vmatpush1.bf16.msra.mxu0 %v9607_v12  ;;  %v790_v12 = vld [vmem:[%s10381_s14 + $0x2f0] sm:$0xff]  ;;  %v783_v38 = vld [vmem:[%s10381_s14 + $0x2b8] sm:$0xff]  ;;  %v8685_v57 = vcombine.low %v767_v23, %v775_v24 }
 0x465   : > { %7896 = vmatpush1.bf16.msra.mxu1 %v9609_v42  ;;  %7733 = vmatprep.subr.bf16.mxu0 %v9624_v14  ;;  %v791_v42 = vld [vmem:[%s10381_s14 + $0x2f8] sm:$0xff]  ;;  %v8683_v14 = vcombine.low %v766_v21, %v774_v46  ;;  %v822_v37 = vld [vmem:[%s10381_s14 + $0x3f0] sm:$0xff] }
 0x466   : > { %8437 = vst [vmem:[%s11098_s1 + $0x8] sm:$0xff] %v8397_v3  ;;  %7897 = vmatprep.subr.bf16.mxu1 %v9626_v43  ;;  %v8700_v43 = vcombine.high %v782_v2, %v790_v12  ;;  %v8702_v33 = vcombine.high %v783_v38, %v791_v42  ;;  %v807_v3 = vld [vmem:[%s10381_s14 + $0x378] sm:$0xff]  ;;  %v830_v60 = vld [vmem:[%s10381_s14 + $0x430] sm:$0xff] }
 0x467   : > { %v839_v0 = vld [vmem:[%s10381_s14 + $0x478] sm:$0xff]  ;;  %v846_v9 = vld [vmem:[%s10381_s14 + $0x4b0] sm:$0xff] }
 0x468   : > { %7734 = vmatpush1.bf16.msra.mxu0 %v9623_v51  ;;  %v8699_v51 = vcombine.low %v782_v2, %v790_v12  ;;  %v854_v10 = vld [vmem:[%s10381_s14 + $0x4f0] sm:$0xff]  ;;  %v863_v23 = vld [vmem:[%s10381_s14 + $0x538] sm:$0xff] }
 0x469   : > { %7898 = vmatpush1.bf16.msra.mxu1 %v9625_v52  ;;  %7908 = vmatprep.subr.bf16.mxu0 %v8620_v53  ;;  %v8701_v52 = vcombine.low %v783_v38, %v791_v42  ;;  %v8716_v53 = vcombine.high %v798_v49, %v806_v34  ;;  %v862_v21 = vld [vmem:[%s10381_s14 + $0x530] sm:$0xff]  ;;  %v871_v24 = vld [vmem:[%s10381_s14 + $0x578] sm:$0xff] }
 0x46a   : > { %8072 = vmatprep.subr.bf16.mxu1 %v8622_v35  ;;  %v8718_v35 = vcombine.high %v799_v50, %v807_v3  ;;  %v870_v46 = vld [vmem:[%s10381_s14 + $0x570] sm:$0xff]  ;;  %v879_v38 = vld [vmem:[%s10381_s14 + $0x5b8] sm:$0xff] }
 0x46b   : > { %7736 = vmatmul.mubr.bf16.vlgmr.msra.gmra.mrb[16].mxu0 %v10783_v7  ;;  %v878_v2 = vld [vmem:[%s10381_s14 + $0x5b0] sm:$0xff]  ;;  %v887_v42 = vld [vmem:[%s10381_s14 + $0x5f8] sm:$0xff] }
 0x46c   : > { %7900 = vmatmul.mubr.bf16.vlgmr.msra.gmra.mrb[16].mxu1 %v10783_v7  ;;  %7909 = vmatpush1.bf16.msra.mxu0 %v8619_v39  ;;  %v815_v39 = vld [vmem:[%s10381_s14 + $0x3b8] sm:$0xff]  ;;  %v886_v12 = vld [vmem:[%s10381_s14 + $0x5f0] sm:$0xff] }
 0x46d   : > { %7940 = vmatprep.mubr.bf16.mxu0 %v10508_v25  ;;  %8073 = vmatpush1.bf16.msra.mxu1 %v8621_v55  ;;  %v8717_v55 = vcombine.low %v799_v50, %v807_v3  ;;  %v8734_v59 = vcombine.high %v815_v39, %v823_v40  ;;  %v894_v49 = vld [vmem:[%s10381_s14 + $0x630] sm:$0xff]  ;;  %v895_v50 = vld [vmem:[%s10381_s14 + $0x638] sm:$0xff] }
 0x46e   : > { %8104 = vmatprep.mubr.bf16.mxu1 %v10508_v25  ;;  %7910 = vmatprep.subr.bf16.mxu0 %v8636_v56  ;;  %v8670_v25 = vcombine.high %v751_v11, %v759_v13  ;;  %v8732_v56 = vcombine.high %v814_v36, %v822_v37  ;;  %v847_v11 = vld [vmem:[%s10381_s14 + $0x4b8] sm:$0xff]  ;;  %v902_v34 = vld [vmem:[%s10381_s14 + $0x670] sm:$0xff] }
 0x46f   : > { %8074 = vmatprep.subr.bf16.mxu1 %v8638_v62  ;;  %v838_v62 = vld [vmem:[%s10381_s14 + $0x470] sm:$0xff]  ;;  %v855_v13 = vld [vmem:[%s10381_s14 + $0x4f8] sm:$0xff] }
 0x470   : > { %7911 = vmatpush1.bf16.msra.mxu0 %v8635_v4  ;;  %v8731_v4 = vcombine.low %v814_v36, %v822_v37  ;;  %v903_v3 = vld [vmem:[%s10381_s14 + $0x678] sm:$0xff]  ;;  %v910_v36 = vld [vmem:[%s10381_s14 + $0x6b0] sm:$0xff] }
 0x471   : > { %8075 = vmatpush1.bf16.msra.mxu1 %v8637_v5  ;;  %7912 = vmatprep.subr.bf16.mxu0 %v8652_v8  ;;  %v8733_v5 = vcombine.low %v815_v39, %v823_v40  ;;  %v8748_v8 = vcombine.high %v830_v60, %v838_v62  ;;  %v918_v37 = vld [vmem:[%s10381_s14 + $0x6f0] sm:$0xff]  ;;  %v911_v39 = vld [vmem:[%s10381_s14 + $0x6b8] sm:$0xff] }
 0x472   : > { %8076 = vmatprep.subr.bf16.mxu1 %v8654_v17  ;;  %v8750_v17 = vcombine.high %v831_v63, %v839_v0  ;;  %v919_v40 = vld [vmem:[%s10381_s14 + $0x6f8] sm:$0xff] }
 0x474   : > { %7913 = vmatpush1.bf16.msra.mxu0 %v8651_v15  ;;  %v8747_v15 = vcombine.low %v830_v60, %v838_v62  ;;  %v926_v60 = vld [vmem:[%s10381_s14 + $0x730] sm:$0xff] }
 0x475   : > { %8077 = vmatpush1.bf16.msra.mxu1 %v8653_v20  ;;  %7914 = vmatprep.subr.bf16.mxu0 %v8668_v18  ;;  %v8749_v20 = vcombine.low %v831_v63, %v839_v0  ;;  %v8764_v18 = vcombine.high %v846_v9, %v854_v10  ;;  %v934_v62 = vld [vmem:[%s10381_s14 + $0x770] sm:$0xff]  ;;  %v927_v63 = vld [vmem:[%s10381_s14 + $0x738] sm:$0xff] }
 0x476   : > { %8078 = vmatprep.subr.bf16.mxu1 %v8670_v25  ;;  %v8766_v25 = vcombine.high %v847_v11, %v855_v13  ;;  %v935_v0 = vld [vmem:[%s10381_s14 + $0x778] sm:$0xff] }
 0x478   : > { %7915 = vmatpush1.bf16.msra.mxu0 %v8667_v29  ;;  %v8763_v29 = vcombine.low %v846_v9, %v854_v10  ;;  %v942_v9 = vld [vmem:[%s10381_s14 + $0x7b0] sm:$0xff] }
 0x479   : > { %8079 = vmatpush1.bf16.msra.mxu1 %v8669_v28  ;;  %7916 = vmatprep.subr.bf16.mxu0 %v8684_v32  ;;  %v8765_v28 = vcombine.low %v847_v11, %v855_v13  ;;  %v8780_v32 = vcombine.high %v862_v21, %v870_v46  ;;  %v950_v10 = vld [vmem:[%s10381_s14 + $0x7f0] sm:$0xff]  ;;  %v943_v11 = vld [vmem:[%s10381_s14 + $0x7b8] sm:$0xff] }
 0x47a   : > { %8080 = vmatprep.subr.bf16.mxu1 %v8686_v44  ;;  %v8782_v44 = vcombine.high %v863_v23, %v871_v24  ;;  %v951_v13 = vld [vmem:[%s10381_s14 + $0x7f8] sm:$0xff] }
 0x47c   : > { %7917 = vmatpush1.bf16.msra.mxu0 %v8683_v14  ;;  %v8779_v14 = vcombine.low %v862_v21, %v870_v46  ;;  %v958_v21 = vld [vmem:[%s10381_s14 + $0x830] sm:$0xff] }
 0x47d   : > { %8081 = vmatpush1.bf16.msra.mxu1 %v8685_v57  ;;  %7918 = vmatprep.subr.bf16.mxu0 %v8700_v43  ;;  %v8781_v57 = vcombine.low %v863_v23, %v871_v24  ;;  %v8796_v43 = vcombine.high %v878_v2, %v886_v12  ;;  %v966_v46 = vld [vmem:[%s10381_s14 + $0x870] sm:$0xff]  ;;  %v959_v23 = vld [vmem:[%s10381_s14 + $0x838] sm:$0xff] }
 0x47e   : > { %8082 = vmatprep.subr.bf16.mxu1 %v8702_v33  ;;  %v8798_v33 = vcombine.high %v879_v38, %v887_v42  ;;  %v967_v24 = vld [vmem:[%s10381_s14 + $0x878] sm:$0xff] }
 0x480   : > { %7919 = vmatpush1.bf16.msra.mxu0 %v8699_v51  ;;  %v8795_v51 = vcombine.low %v878_v2, %v886_v12  ;;  %v974_v2 = vld [vmem:[%s10381_s14 + $0x8b0] sm:$0xff] }
 0x481   : > { %8083 = vmatpush1.bf16.msra.mxu1 %v8701_v52  ;;  %7920 = vmatprep.subr.bf16.mxu0 %v8716_v53  ;;  %v8797_v52 = vcombine.low %v879_v38, %v887_v42  ;;  %v8812_v53 = vcombine.high %v894_v49, %v902_v34  ;;  %v982_v12 = vld [vmem:[%s10381_s14 + $0x8f0] sm:$0xff]  ;;  %v8875_v38 = vcombine.low %v958_v21, %v966_v46  ;;  %v975_v42 = vld [vmem:[%s10381_s14 + $0x8b8] sm:$0xff] }
 0x482   : > { %8084 = vmatprep.subr.bf16.mxu1 %v8718_v35  ;;  %v8814_v35 = vcombine.high %v895_v50, %v903_v3 }
 0x484   : > { %7921 = vmatpush1.bf16.msra.mxu0 %v8715_v54  ;;  %v8811_v54 = vcombine.low %v894_v49, %v902_v34  ;;  %v998_v49 = vld [vmem:[%s10381_s14 + $0x970] sm:$0xff] }
 0x485   : > { %8085 = vmatpush1.bf16.msra.mxu1 %v8717_v55  ;;  %7922 = vmatprep.subr.bf16.mxu0 %v8732_v56  ;;  %v8813_v55 = vcombine.low %v895_v50, %v903_v3  ;;  %v8828_v56 = vcombine.high %v910_v36, %v918_v37  ;;  %v991_v50 = vld [vmem:[%s10381_s14 + $0x938] sm:$0xff] }
 0x486   : > { %8086 = vmatprep.subr.bf16.mxu1 %v8734_v59  ;;  %v8830_v59 = vcombine.high %v911_v39, %v919_v40  ;;  %v999_v3 = vld [vmem:[%s10381_s14 + $0x978] sm:$0xff] }
 0x488   : > { %7923 = vmatpush1.bf16.msra.mxu0 %v8731_v4  ;;  %v8827_v4 = vcombine.low %v910_v36, %v918_v37  ;;  %v1006_v36 = vld [vmem:[%s10381_s14 + $0x9b0] sm:$0xff] }
 0x489   : > { %8087 = vmatpush1.bf16.msra.mxu1 %v8733_v5  ;;  %7924 = vmatprep.subr.bf16.mxu0 %v8748_v8  ;;  %v8829_v5 = vcombine.low %v911_v39, %v919_v40  ;;  %v8844_v8 = vcombine.high %v926_v60, %v934_v62  ;;  %v1014_v37 = vld [vmem:[%s10381_s14 + $0x9f0] sm:$0xff]  ;;  %v1007_v39 = vld [vmem:[%s10381_s14 + $0x9b8] sm:$0xff] }
 0x48a   : > { %8088 = vmatprep.subr.bf16.mxu1 %v8750_v17  ;;  %v8846_v17 = vcombine.high %v927_v63, %v935_v0 }
 0x48c   : > { %7925 = vmatpush1.bf16.msra.mxu0 %v8747_v15  ;;  %v8843_v15 = vcombine.low %v926_v60, %v934_v62  ;;  %v1023_v60 = vld [vmem:[%s10381_s14 + $0xa38] sm:$0xff] }
 0x48d   : > { %8089 = vmatpush1.bf16.msra.mxu1 %v8749_v20  ;;  %7926 = vmatprep.subr.bf16.mxu0 %v8764_v18  ;;  %v8845_v20 = vcombine.low %v927_v63, %v935_v0  ;;  %v8860_v18 = vcombine.high %v942_v9, %v950_v10  ;;  %v1031_v62 = vld [vmem:[%s10381_s14 + $0xa78] sm:$0xff]  ;;  %v8923_v63 = vcombine.low %v1006_v36, %v1014_v37 }
 0x48e   : > { %8090 = vmatprep.subr.bf16.mxu1 %v8766_v25  ;;  %v8862_v25 = vcombine.high %v943_v11, %v951_v13 }
 0x490   : > { %7927 = vmatpush1.bf16.msra.mxu0 %v8763_v29  ;;  %v8859_v29 = vcombine.low %v942_v9, %v950_v10  ;;  %v1039_v9 = vld [vmem:[%s10381_s14 + $0xab8] sm:$0xff] }
 0x491   : > { %8091 = vmatpush1.bf16.msra.mxu1 %v8765_v28  ;;  %7928 = vmatprep.subr.bf16.mxu0 %v8780_v32  ;;  %v8861_v28 = vcombine.low %v943_v11, %v951_v13  ;;  %v8876_v32 = vcombine.high %v958_v21, %v966_v46  ;;  %v1047_v10 = vld [vmem:[%s10381_s14 + $0xaf8] sm:$0xff]  ;;  %v8941_v13 = vcombine.low %v1023_v60, %v1031_v62 }
 0x492   : > { %8092 = vmatprep.subr.bf16.mxu1 %v8782_v44  ;;  %v8878_v44 = vcombine.high %v959_v23, %v967_v24  ;;  %v1055_v21 = vld [vmem:[%s10381_s14 + $0xb38] sm:$0xff] }
 0x493   : > { %v1063_v46 = vld [vmem:[%s10381_s14 + $0xb78] sm:$0xff] }
 0x494   : > { %7929 = vmatpush1.bf16.msra.mxu0 %v8779_v14  ;;  %v983_v14 = vld [vmem:[%s10381_s14 + $0x8f8] sm:$0xff] }
 0x495   : > { %8093 = vmatpush1.bf16.msra.mxu1 %v8781_v57  ;;  %7930 = vmatprep.subr.bf16.mxu0 %v8796_v43  ;;  %v8877_v57 = vcombine.low %v959_v23, %v967_v24  ;;  %v8892_v43 = vcombine.high %v974_v2, %v982_v12  ;;  %v8894_v34 = vcombine.high %v975_v42, %v983_v14 }
 0x496   : > { %8094 = vmatprep.subr.bf16.mxu1 %v8798_v33  ;;  %v990_v33 = vld [vmem:[%s10381_s14 + $0x930] sm:$0xff]  ;;  %v8957_v24 = vcombine.low %v1039_v9, %v1047_v10 }
 0x497   : > { %v8907_v40 = vcombine.low %v990_v33, %v998_v49 }
 0x498   : > { %7931 = vmatpush1.bf16.msra.mxu0 %v8795_v51  ;;  %v8891_v51 = vcombine.low %v974_v2, %v982_v12  ;;  %v1071_v2 = vld [vmem:[%s10381_s14 + $0xbb8] sm:$0xff] }
 0x499   : > { %8095 = vmatpush1.bf16.msra.mxu1 %v8797_v52  ;;  %7932 = vmatprep.subr.bf16.mxu0 %v8812_v53  ;;  %v8893_v52 = vcombine.low %v975_v42, %v983_v14  ;;  %v8908_v53 = vcombine.high %v990_v33, %v998_v49  ;;  %v1079_v12 = vld [vmem:[%s10381_s14 + $0xbf8] sm:$0xff]  ;;  %v8973_v42 = vcombine.low %v1055_v21, %v1063_v46  ;;  %v1094_v33 = vld [vmem:[%s10381_s14 + $0xc70] sm:$0xff] }
 0x49a   : > { %8096 = vmatprep.subr.bf16.mxu1 %v8814_v35  ;;  %v8910_v35 = vcombine.high %v991_v50, %v999_v3  ;;  %v1087_v49 = vld [vmem:[%s10381_s14 + $0xc38] sm:$0xff] }
 0x49c   : > { %7933 = vmatpush1.bf16.msra.mxu0 %v8811_v54  ;;  %v8909_v54 = vcombine.low %v991_v50, %v999_v3  ;;  %v8989_v3 = vcombine.low %v1071_v2, %v1079_v12 }
 0x49d   : > { %8097 = vmatpush1.bf16.msra.mxu1 %v8813_v55  ;;  %7934 = vmatprep.subr.bf16.mxu0 %v8828_v56  ;;  %v8924_v55 = vcombine.high %v1006_v36, %v1014_v37  ;;  %v1022_v56 = vld [vmem:[%s10381_s14 + $0xa30] sm:$0xff]  ;;  %v1103_v36 = vld [vmem:[%s10381_s14 + $0xcb8] sm:$0xff] }
 0x49e   : > { %8098 = vmatprep.subr.bf16.mxu1 %v8830_v59  ;;  %v1030_v59 = vld [vmem:[%s10381_s14 + $0xa70] sm:$0xff]  ;;  %v1111_v37 = vld [vmem:[%s10381_s14 + $0xcf8] sm:$0xff] }
 0x49f   : > { %v8939_v11 = vcombine.low %v1022_v56, %v1030_v59 }
 0x4a0   : > { %7935 = vmatpush1.bf16.msra.mxu0 %v8827_v4  ;;  %v8940_v4 = vcombine.high %v1022_v56, %v1030_v59  ;;  %v1119_v56 = vld [vmem:[%s10381_s14 + $0xd38] sm:$0xff] }
 0x4a1   : > { %8099 = vmatpush1.bf16.msra.mxu1 %v8829_v5  ;;  %7936 = vmatprep.subr.bf16.mxu0 %v8844_v8  ;;  %v8942_v5 = vcombine.high %v1023_v60, %v1031_v62  ;;  %v1038_v8 = vld [vmem:[%s10381_s14 + $0xab0] sm:$0xff]  ;;  %v1127_v59 = vld [vmem:[%s10381_s14 + $0xd78] sm:$0xff]  ;;  %v9021_v62 = vcombine.low %v1103_v36, %v1111_v37 }
 0x4a2   : > { %8100 = vmatprep.subr.bf16.mxu1 %v8846_v17  ;;  %v1046_v17 = vld [vmem:[%s10381_s14 + $0xaf0] sm:$0xff] }
 0x4a3   : > { %v8955_v23 = vcombine.low %v1038_v8, %v1046_v17 }
 0x4a4   : > { %7937 = vmatpush1.bf16.msra.mxu0 %v8843_v15  ;;  %v8956_v15 = vcombine.high %v1038_v8, %v1046_v17  ;;  %v1135_v8 = vld [vmem:[%s10381_s14 + $0xdb8] sm:$0xff] }
 0x4a5   : > { %8101 = vmatpush1.bf16.msra.mxu1 %v8845_v20  ;;  %7938 = vmatprep.subr.bf16.mxu0 %v8860_v18  ;;  %v8958_v20 = vcombine.high %v1039_v9, %v1047_v10  ;;  %v1054_v18 = vld [vmem:[%s10381_s14 + $0xb30] sm:$0xff]  ;;  %v1143_v17 = vld [vmem:[%s10381_s14 + $0xdf8] sm:$0xff]  ;;  %v9037_v10 = vcombine.low %v1119_v56, %v1127_v59 }
 0x4a6   : > { %8102 = vmatprep.subr.bf16.mxu1 %v8862_v25  ;;  %v1062_v25 = vld [vmem:[%s10381_s14 + $0xb70] sm:$0xff] }
 0x4a8   : > { %7939 = vmatpush1.bf16.msra.mxu0 %v8859_v29  ;;  %v8972_v29 = vcombine.high %v1054_v18, %v1062_v25 }
 0x4a9   : > { %8103 = vmatpush1.bf16.msra.mxu1 %v8861_v28  ;;  %7949 = vmatprep.subr.bf16.mxu0 %v8876_v32  ;;  %v8974_v28 = vcombine.high %v1055_v21, %v1063_v46  ;;  %v1070_v32 = vld [vmem:[%s10381_s14 + $0xbb0] sm:$0xff]  ;;  %v9053_v46 = vcombine.low %v1135_v8, %v1143_v17 }
 0x4aa   : > { %8113 = vmatprep.subr.bf16.mxu1 %v8878_v44  ;;  %v1078_v44 = vld [vmem:[%s10381_s14 + $0xbf0] sm:$0xff] }
 0x4ab   : > { %7941 = vmatmul.mubr.bf16.vlgmr.msra.gmra.mrb[20].mxu0 %v10510_v27  ;;  %v8988_v14 = vcombine.high %v1070_v32, %v1078_v44  ;;  %v8987_v50 = vcombine.low %v1070_v32, %v1078_v44  ;;  %v1167_v32 = vld [vmem:[%s10381_s14 + $0xeb8] sm:$0xff] }
 0x4ac   : > { %8105 = vmatmul.mubr.bf16.vlgmr.msra.gmra.mrb[20].mxu1 %v10510_v27  ;;  %7950 = vmatpush1.bf16.msra.mxu0 %v8875_v38  ;;  %v1015_v27 = vld [vmem:[%s10381_s14 + $0x9f8] sm:$0xff]  ;;  %v8971_v38 = vcombine.low %v1054_v18, %v1062_v25 }
 0x4ad   : > { %7981 = vmatprep.mubr.bf16.mxu0 %v10515_v31  ;;  %8114 = vmatpush1.bf16.msra.mxu1 %v8877_v57  ;;  %v8925_v0 = vcombine.low %v1007_v39, %v1015_v27  ;;  %v8990_v57 = vcombine.high %v1071_v2, %v1079_v12  ;;  %v1151_v18 = vld [vmem:[%s10381_s14 + $0xe38] sm:$0xff] }
 0x4ae   : > { %8145 = vmatprep.mubr.bf16.mxu1 %v10515_v31  ;;  %7951 = vmatprep.subr.bf16.mxu0 %v8892_v43  ;;  %v8926_v31 = vcombine.high %v1007_v39, %v1015_v27  ;;  %v1086_v43 = vld [vmem:[%s10381_s14 + $0xc30] sm:$0xff]  ;;  %v1159_v25 = vld [vmem:[%s10381_s14 + $0xe78] sm:$0xff] }
 0x4af   : > { %8115 = vmatprep.subr.bf16.mxu1 %v8894_v34  ;;  %v1095_v34 = vld [vmem:[%s10381_s14 + $0xc78] sm:$0xff]  ;;  %v9003_v39 = vcombine.low %v1086_v43, %v1094_v33  ;;  %v9069_v12 = vcombine.low %v1151_v18, %v1159_v25 }
 0x4b0   : > { %7952 = vmatpush1.bf16.msra.mxu0 %v8891_v51  ;;  %v9004_v51 = vcombine.high %v1086_v43, %v1094_v33  ;;  %v9005_v27 = vcombine.low %v1087_v49, %v1095_v34  ;;  %v1175_v44 = vld [vmem:[%s10381_s14 + $0xef8] sm:$0xff] }
 0x4b1   : > { %8116 = vmatpush1.bf16.msra.mxu1 %v8893_v52  ;;  %7953 = vmatprep.subr.bf16.mxu0 %v8908_v53  ;;  %v9006_v52 = vcombine.high %v1087_v49, %v1095_v34  ;;  %v1102_v53 = vld [vmem:[%s10381_s14 + $0xcb0] sm:$0xff]  ;;  %v1183_v43 = vld [vmem:[%s10381_s14 + $0xf38] sm:$0xff]  ;;  %v9085_v34 = vcombine.low %v1167_v32, %v1175_v44 }
 0x4b2   : > { %8117 = vmatprep.subr.bf16.mxu1 %v8910_v35  ;;  %v1110_v35 = vld [vmem:[%s10381_s14 + $0xcf0] sm:$0xff]  ;;  %v1191_v33 = vld [vmem:[%s10381_s14 + $0xf78] sm:$0xff] }
 0x4b3   : > { %v9019_v60 = vcombine.low %v1102_v53, %v1110_v35 }
 0x4b4   : > { %7954 = vmatpush1.bf16.msra.mxu0 %v8907_v40  ;;  %v9020_v40 = vcombine.high %v1102_v53, %v1110_v35  ;;  %v1199_v53 = vld [vmem:[%s10381_s14 + $0xfb8] sm:$0xff] }
 0x4b5   : > { %8118 = vmatpush1.bf16.msra.mxu1 %v8909_v54  ;;  %7955 = vmatprep.subr.bf16.mxu0 %v8924_v55  ;;  %v9022_v54 = vcombine.high %v1103_v36, %v1111_v37  ;;  %v1118_v55 = vld [vmem:[%s10381_s14 + $0xd30] sm:$0xff]  ;;  %v1207_v35 = vld [vmem:[%s10381_s14 + $0xff8] sm:$0xff]  ;;  %v9101_v37 = vcombine.low %v1183_v43, %v1191_v33 }
 0x4b6   : > { %8119 = vmatprep.subr.bf16.mxu1 %v8926_v31  ;;  %v1126_v31 = vld [vmem:[%s10381_s14 + $0xd70] sm:$0xff] }
 0x4b7   : > { %v9035_v9 = vcombine.low %v1118_v55, %v1126_v31 }
 0x4b8   : > { %7956 = vmatpush1.bf16.msra.mxu0 %v8923_v63  ;;  %v9036_v63 = vcombine.high %v1118_v55, %v1126_v31  ;;  %v1215_v55 = vld [vmem:[%s10381_s14 + $0x1038] sm:$0xff] }
 0x4b9   : > { %8120 = vmatpush1.bf16.msra.mxu1 %v8925_v0  ;;  %7957 = vmatprep.subr.bf16.mxu0 %v8940_v4  ;;  %v9038_v0 = vcombine.high %v1119_v56, %v1127_v59  ;;  %v1134_v4 = vld [vmem:[%s10381_s14 + $0xdb0] sm:$0xff]  ;;  %v1223_v31 = vld [vmem:[%s10381_s14 + $0x1078] sm:$0xff]  ;;  %v9117_v59 = vcombine.low %v1199_v53, %v1207_v35 }
 0x4ba   : > { %8121 = vmatprep.subr.bf16.mxu1 %v8942_v5  ;;  %v1142_v5 = vld [vmem:[%s10381_s14 + $0xdf0] sm:$0xff] }
 0x4bb   : > { %v9051_v21 = vcombine.low %v1134_v4, %v1142_v5 }
 0x4bc   : > { %7958 = vmatpush1.bf16.msra.mxu0 %v8939_v11  ;;  %v9052_v11 = vcombine.high %v1134_v4, %v1142_v5  ;;  %v1231_v5 = vld [vmem:[%s10381_s14 + $0x10b8] sm:$0xff] }
 0x4bd   : > { %8122 = vmatpush1.bf16.msra.mxu1 %v8941_v13  ;;  %7959 = vmatprep.subr.bf16.mxu0 %v8956_v15  ;;  %v9054_v13 = vcombine.high %v1135_v8, %v1143_v17  ;;  %v1150_v15 = vld [vmem:[%s10381_s14 + $0xe30] sm:$0xff]  ;;  %v1239_v8 = vld [vmem:[%s10381_s14 + $0x10f8] sm:$0xff]  ;;  %v9133_v17 = vcombine.low %v1215_v55, %v1223_v31 }
 0x4be   : > { %8123 = vmatprep.subr.bf16.mxu1 %v8958_v20  ;;  %v1158_v20 = vld [vmem:[%s10381_s14 + $0xe70] sm:$0xff] }
 0x4bf   : > { %v9067_v2 = vcombine.low %v1150_v15, %v1158_v20 }
 0x4c0   : > { %7960 = vmatpush1.bf16.msra.mxu0 %v8955_v23  ;;  %v9068_v23 = vcombine.high %v1150_v15, %v1158_v20  ;;  %v1247_v15 = vld [vmem:[%s10381_s14 + $0x1138] sm:$0xff] }
 0x4c1   : > { %8124 = vmatpush1.bf16.msra.mxu1 %v8957_v24  ;;  %7961 = vmatprep.subr.bf16.mxu0 %v8972_v29  ;;  %v9070_v24 = vcombine.high %v1151_v18, %v1159_v25  ;;  %v1166_v29 = vld [vmem:[%s10381_s14 + $0xeb0] sm:$0xff]  ;;  %v1255_v20 = vld [vmem:[%s10381_s14 + $0x1178] sm:$0xff]  ;;  %v9149_v25 = vcombine.low %v1231_v5, %v1239_v8 }
 0x4c2   : > { %8125 = vmatprep.subr.bf16.mxu1 %v8974_v28  ;;  %v1174_v28 = vld [vmem:[%s10381_s14 + $0xef0] sm:$0xff] }
 0x4c3   : > { %v9083_v49 = vcombine.low %v1166_v29, %v1174_v28 }
 0x4c4   : > { %7962 = vmatpush1.bf16.msra.mxu0 %v8971_v38  ;;  %v9084_v38 = vcombine.high %v1166_v29, %v1174_v28  ;;  %v1263_v29 = vld [vmem:[%s10381_s14 + $0x11b8] sm:$0xff] }
 0x4c5   : > { %8126 = vmatpush1.bf16.msra.mxu1 %v8973_v42  ;;  %7963 = vmatprep.subr.bf16.mxu0 %v8988_v14  ;;  %v9086_v42 = vcombine.high %v1167_v32, %v1175_v44  ;;  %v1182_v14 = vld [vmem:[%s10381_s14 + $0xf30] sm:$0xff]  ;;  %v9165_v32 = vcombine.low %v1247_v15, %v1255_v20 }
 0x4c6   : > { %8127 = vmatprep.subr.bf16.mxu1 %v8990_v57  ;;  %v1190_v57 = vld [vmem:[%s10381_s14 + $0xf70] sm:$0xff] }
 0x4c7   : > { %v9099_v36 = vcombine.low %v1182_v14, %v1190_v57 }
 0x4c8   : > { %7964 = vmatpush1.bf16.msra.mxu0 %v8987_v50  ;;  %v9100_v50 = vcombine.high %v1182_v14, %v1190_v57 }
 0x4c9   : > { %8128 = vmatpush1.bf16.msra.mxu1 %v8989_v3  ;;  %7965 = vmatprep.subr.bf16.mxu0 %v9004_v51  ;;  %v9102_v3 = vcombine.high %v1183_v43, %v1191_v33  ;;  %v1198_v51 = vld [vmem:[%s10381_s14 + $0xfb0] sm:$0xff] }
 0x4ca   : > { %8129 = vmatprep.subr.bf16.mxu1 %v9006_v52  ;;  %v1206_v52 = vld [vmem:[%s10381_s14 + $0xff0] sm:$0xff] }
 0x4cb   : > { %v9115_v56 = vcombine.low %v1198_v51, %v1206_v52 }
 0x4cc   : > { %7966 = vmatpush1.bf16.msra.mxu0 %v9003_v39  ;;  %v9116_v39 = vcombine.high %v1198_v51, %v1206_v52 }
 0x4cd   : > { %8130 = vmatpush1.bf16.msra.mxu1 %v9005_v27  ;;  %7967 = vmatprep.subr.bf16.mxu0 %v9020_v40  ;;  %v9118_v27 = vcombine.high %v1199_v53, %v1207_v35  ;;  %v1214_v40 = vld [vmem:[%s10381_s14 + $0x1030] sm:$0xff] }
 0x4ce   : > { %8131 = vmatprep.subr.bf16.mxu1 %v9022_v54  ;;  %v1222_v54 = vld [vmem:[%s10381_s14 + $0x1070] sm:$0xff] }
 0x4cf   : > { %v9131_v4 = vcombine.low %v1214_v40, %v1222_v54 }
 0x4d0   : > { %7968 = vmatpush1.bf16.msra.mxu0 %v9019_v60  ;;  %v9132_v60 = vcombine.high %v1214_v40, %v1222_v54 }
 0x4d1   : > { %8132 = vmatpush1.bf16.msra.mxu1 %v9021_v62  ;;  %7969 = vmatprep.subr.bf16.mxu0 %v9036_v63  ;;  %v9134_v62 = vcombine.high %v1215_v55, %v1223_v31  ;;  %v1230_v63 = vld [vmem:[%s10381_s14 + $0x10b0] sm:$0xff] }
 0x4d2   : > { %8133 = vmatprep.subr.bf16.mxu1 %v9038_v0  ;;  %v1238_v0 = vld [vmem:[%s10381_s14 + $0x10f0] sm:$0xff] }
 0x4d3   : > { %v9147_v18 = vcombine.low %v1230_v63, %v1238_v0 }
 0x4d4   : > { %7970 = vmatpush1.bf16.msra.mxu0 %v9035_v9  ;;  %v9148_v9 = vcombine.high %v1230_v63, %v1238_v0 }
 0x4d5   : > { %8134 = vmatpush1.bf16.msra.mxu1 %v9037_v10  ;;  %7971 = vmatprep.subr.bf16.mxu0 %v9052_v11  ;;  %v1246_v10 = vld [vmem:[%s10381_s14 + $0x1130] sm:$0xff] }
 0x4d6   : > { %8135 = vmatprep.subr.bf16.mxu1 %v9054_v13  ;;  %v1254_v11 = vld [vmem:[%s10381_s14 + $0x1170] sm:$0xff]  ;;  %v9150_v13 = vcombine.high %v1231_v5, %v1239_v8 }
 0x4d7   : > { %v9163_v28 = vcombine.low %v1246_v10, %v1254_v11  ;;  %v1342_v8 = vld [vmem:[%s10381_s14 + $0x1430] sm:$0xff] }
 0x4d8   : > { %7972 = vmatpush1.bf16.msra.mxu0 %v9051_v21  ;;  %v9164_v21 = vcombine.high %v1246_v10, %v1254_v11  ;;  %v1351_v10 = vld [vmem:[%s10381_s14 + $0x1478] sm:$0xff] }
 0x4d9   : > { %8136 = vmatpush1.bf16.msra.mxu1 %v9053_v46  ;;  %7973 = vmatprep.subr.bf16.mxu0 %v9068_v23  ;;  %v9166_v46 = vcombine.high %v1247_v15, %v1255_v20  ;;  %v1262_v23 = vld [vmem:[%s10381_s14 + $0x11b0] sm:$0xff] }
 0x4da   : > { %8137 = vmatprep.subr.bf16.mxu1 %v9070_v24  ;;  %v1270_v24 = vld [vmem:[%s10381_s14 + $0x11f0] sm:$0xff] }
 0x4db   : > { %v9180_v44 = vcombine.high %v1262_v23, %v1270_v24  ;;  %v9179_v14 = vcombine.low %v1262_v23, %v1270_v24 }
 0x4dc   : > { %7974 = vmatpush1.bf16.msra.mxu0 %v9067_v2  ;;  %v1278_v2 = vld [vmem:[%s10381_s14 + $0x1230] sm:$0xff] }
 0x4dd   : > { %8138 = vmatpush1.bf16.msra.mxu1 %v9069_v12  ;;  %7975 = vmatprep.subr.bf16.mxu0 %v9084_v38  ;;  %v1286_v12 = vld [vmem:[%s10381_s14 + $0x1270] sm:$0xff]  ;;  %v1279_v38 = vld [vmem:[%s10381_s14 + $0x1238] sm:$0xff] }
 0x4de   : > { %8139 = vmatprep.subr.bf16.mxu1 %v9086_v42  ;;  %v1287_v42 = vld [vmem:[%s10381_s14 + $0x1278] sm:$0xff]  ;;  %v9196_v43 = vcombine.high %v1278_v2, %v1286_v12  ;;  %v9195_v51 = vcombine.low %v1278_v2, %v1286_v12 }
 0x4df   : > { %v9198_v33 = vcombine.high %v1279_v38, %v1287_v42  ;;  %v9197_v52 = vcombine.low %v1279_v38, %v1287_v42 }
 0x4e0   : > { %7976 = vmatpush1.bf16.msra.mxu0 %v9083_v49  ;;  %v1294_v49 = vld [vmem:[%s10381_s14 + $0x12b0] sm:$0xff] }
 0x4e1   : > { %8140 = vmatpush1.bf16.msra.mxu1 %v9085_v34  ;;  %7977 = vmatprep.subr.bf16.mxu0 %v9100_v50  ;;  %v1302_v34 = vld [vmem:[%s10381_s14 + $0x12f0] sm:$0xff]  ;;  %v1295_v50 = vld [vmem:[%s10381_s14 + $0x12b8] sm:$0xff] }
 0x4e2   : > { %8141 = vmatprep.subr.bf16.mxu1 %v9102_v3  ;;  %v1303_v3 = vld [vmem:[%s10381_s14 + $0x12f8] sm:$0xff]  ;;  %v9212_v53 = vcombine.high %v1294_v49, %v1302_v34  ;;  %v9211_v40 = vcombine.low %v1294_v49, %v1302_v34 }
 0x4e3   : > { %v9214_v35 = vcombine.high %v1295_v50, %v1303_v3  ;;  %v9213_v54 = vcombine.low %v1295_v50, %v1303_v3 }
 0x4e4   : > { %7978 = vmatpush1.bf16.msra.mxu0 %v9099_v36  ;;  %v1310_v36 = vld [vmem:[%s10381_s14 + $0x1330] sm:$0xff] }
 0x4e5   : > { %8142 = vmatpush1.bf16.msra.mxu1 %v9101_v37  ;;  %7979 = vmatprep.subr.bf16.mxu0 %v9116_v39  ;;  %v1318_v37 = vld [vmem:[%s10381_s14 + $0x1370] sm:$0xff]  ;;  %v1311_v39 = vld [vmem:[%s10381_s14 + $0x1338] sm:$0xff] }
 0x4e6   : > { %8143 = vmatprep.subr.bf16.mxu1 %v9118_v27  ;;  %v1319_v27 = vld [vmem:[%s10381_s14 + $0x1378] sm:$0xff]  ;;  %v9228_v55 = vcombine.high %v1310_v36, %v1318_v37  ;;  %v9227_v63 = vcombine.low %v1310_v36, %v1318_v37 }
 0x4e7   : > { %v9230_v31 = vcombine.high %v1311_v39, %v1319_v27  ;;  %v9229_v0 = vcombine.low %v1311_v39, %v1319_v27 }
 0x4e8   : > { %7980 = vmatpush1.bf16.msra.mxu0 %v9115_v56  ;;  %v1326_v56 = vld [vmem:[%s10381_s14 + $0x13b0] sm:$0xff] }
 0x4e9   : > { %8144 = vmatpush1.bf16.msra.mxu1 %v9117_v59  ;;  %7990 = vmatprep.subr.bf16.mxu0 %v9132_v60  ;;  %v1334_v59 = vld [vmem:[%s10381_s14 + $0x13f0] sm:$0xff]  ;;  %v1327_v60 = vld [vmem:[%s10381_s14 + $0x13b8] sm:$0xff] }
 0x4ea   : > { %8154 = vmatprep.subr.bf16.mxu1 %v9134_v62  ;;  %v1335_v62 = vld [vmem:[%s10381_s14 + $0x13f8] sm:$0xff]  ;;  %v9243_v11 = vcombine.low %v1326_v56, %v1334_v59 }
 0x4eb   : > { %7982 = vmatmul.mubr.bf16.vlgmr.msra.gmra.mrb[20].mxu0 %v10610_v19  ;;  %v9246_v5 = vcombine.high %v1327_v60, %v1335_v62 }
 0x4ec   : > { %8146 = vmatmul.mubr.bf16.vlgmr.msra.gmra.mrb[20].mxu1 %v10610_v19  ;;  %7991 = vmatpush1.bf16.msra.mxu0 %v9131_v4  ;;  %v1271_v19 = vld [vmem:[%s10381_s14 + $0x11f8] sm:$0xff]  ;;  %v9244_v4 = vcombine.high %v1326_v56, %v1334_v59 }
 0x4ed   : > { %8022 = vmatprep.mubr.bf16.mxu0 %v10613_v22  ;;  %8155 = vmatpush1.bf16.msra.mxu1 %v9133_v17  ;;  %v9181_v57 = vcombine.low %v1263_v29, %v1271_v19  ;;  %v1350_v17 = vld [vmem:[%s10381_s14 + $0x1470] sm:$0xff] }
 0x4ee   : > { %8186 = vmatprep.mubr.bf16.mxu1 %v10613_v22  ;;  %7992 = vmatprep.subr.bf16.mxu0 %v9148_v9  ;;  %v9182_v22 = vcombine.high %v1263_v29, %v1271_v19  ;;  %v1343_v9 = vld [vmem:[%s10381_s14 + $0x1438] sm:$0xff]  ;;  %v9260_v15 = vcombine.high %v1342_v8, %v1350_v17  ;;  %v9259_v23 = vcombine.low %v1342_v8, %v1350_v17 }
 0x4ef   : > { %8156 = vmatprep.subr.bf16.mxu1 %v9150_v13  ;;  %v9245_v13 = vcombine.low %v1327_v60, %v1335_v62  ;;  %v9262_v20 = vcombine.high %v1343_v9, %v1351_v10  ;;  %v9261_v24 = vcombine.low %v1343_v9, %v1351_v10 }
 0x4f0   : > { %7993 = vmatpush1.bf16.msra.mxu0 %v9147_v18  ;;  %v1358_v18 = vld [vmem:[%s10381_s14 + $0x14b0] sm:$0xff] }
 0x4f1   : > { %8157 = vmatpush1.bf16.msra.mxu1 %v9149_v25  ;;  %7994 = vmatprep.subr.bf16.mxu0 %v9164_v21  ;;  %v1366_v25 = vld [vmem:[%s10381_s14 + $0x14f0] sm:$0xff]  ;;  %v1359_v21 = vld [vmem:[%s10381_s14 + $0x14b8] sm:$0xff] }
 0x4f2   : > { %8158 = vmatprep.subr.bf16.mxu1 %v9166_v46  ;;  %v1367_v46 = vld [vmem:[%s10381_s14 + $0x14f8] sm:$0xff]  ;;  %v9276_v29 = vcombine.high %v1358_v18, %v1366_v25  ;;  %v9275_v2 = vcombine.low %v1358_v18, %v1366_v25 }
 0x4f3   : > { %v9278_v19 = vcombine.high %v1359_v21, %v1367_v46  ;;  %v9277_v12 = vcombine.low %v1359_v21, %v1367_v46 }
 0x4f4   : > { %7995 = vmatpush1.bf16.msra.mxu0 %v9163_v28  ;;  %v1374_v28 = vld [vmem:[%s10381_s14 + $0x1530] sm:$0xff] }
 0x4f5   : > { %8159 = vmatpush1.bf16.msra.mxu1 %v9165_v32  ;;  %7996 = vmatprep.subr.bf16.mxu0 %v9180_v44  ;;  %v1382_v32 = vld [vmem:[%s10381_s14 + $0x1570] sm:$0xff]  ;;  %v1375_v44 = vld [vmem:[%s10381_s14 + $0x1538] sm:$0xff] }
 0x4f6   : > { %8160 = vmatprep.subr.bf16.mxu1 %v9182_v22  ;;  %v1383_v22 = vld [vmem:[%s10381_s14 + $0x1578] sm:$0xff]  ;;  %v9292_v38 = vcombine.high %v1374_v28, %v1382_v32  ;;  %v9291_v49 = vcombine.low %v1374_v28, %v1382_v32 }
 0x4f7   : > { %v9294_v42 = vcombine.high %v1375_v44, %v1383_v22  ;;  %v9293_v34 = vcombine.low %v1375_v44, %v1383_v22 }
 0x4f8   : > { %7997 = vmatpush1.bf16.msra.mxu0 %v9179_v14  ;;  %v1390_v14 = vld [vmem:[%s10381_s14 + $0x15b0] sm:$0xff] }
 0x4f9   : > { %8161 = vmatpush1.bf16.msra.mxu1 %v9181_v57  ;;  %7998 = vmatprep.subr.bf16.mxu0 %v9196_v43  ;;  %v1398_v57 = vld [vmem:[%s10381_s14 + $0x15f0] sm:$0xff]  ;;  %v1391_v43 = vld [vmem:[%s10381_s14 + $0x15b8] sm:$0xff] }
 0x4fa   : > { %8162 = vmatprep.subr.bf16.mxu1 %v9198_v33  ;;  %v1399_v33 = vld [vmem:[%s10381_s14 + $0x15f8] sm:$0xff]  ;;  %v9308_v50 = vcombine.high %v1390_v14, %v1398_v57  ;;  %v9307_v36 = vcombine.low %v1390_v14, %v1398_v57 }
 0x4fb   : > { %v9310_v3 = vcombine.high %v1391_v43, %v1399_v33  ;;  %v9309_v37 = vcombine.low %v1391_v43, %v1399_v33  ;;  %v1495_v14 = vld [vmem:[%s10381_s14 + $0x18f8] sm:$0xff]  ;;  %v1502_v33 = vld [vmem:[%s10381_s14 + $0x1930] sm:$0xff] }
 0x4fc   : > { %7999 = vmatpush1.bf16.msra.mxu0 %v9195_v51  ;;  %v1406_v51 = vld [vmem:[%s10381_s14 + $0x1630] sm:$0xff] }
 0x4fd   : > { %8163 = vmatpush1.bf16.msra.mxu1 %v9197_v52  ;;  %8000 = vmatprep.subr.bf16.mxu0 %v9212_v53  ;;  %v1414_v52 = vld [vmem:[%s10381_s14 + $0x1670] sm:$0xff]  ;;  %v1407_v53 = vld [vmem:[%s10381_s14 + $0x1638] sm:$0xff] }
 0x4fe   : > { %8164 = vmatprep.subr.bf16.mxu1 %v9214_v35  ;;  %v1415_v35 = vld [vmem:[%s10381_s14 + $0x1678] sm:$0xff]  ;;  %v9324_v39 = vcombine.high %v1406_v51, %v1414_v52  ;;  %v9323_v56 = vcombine.low %v1406_v51, %v1414_v52 }
 0x4ff   : > { %v9326_v27 = vcombine.high %v1407_v53, %v1415_v35  ;;  %v9325_v59 = vcombine.low %v1407_v53, %v1415_v35 }
 0x500   : > { %8001 = vmatpush1.bf16.msra.mxu0 %v9211_v40  ;;  %v1422_v40 = vld [vmem:[%s10381_s14 + $0x16b0] sm:$0xff] }
 0x501   : > { %8165 = vmatpush1.bf16.msra.mxu1 %v9213_v54  ;;  %8002 = vmatprep.subr.bf16.mxu0 %v9228_v55  ;;  %v1430_v54 = vld [vmem:[%s10381_s14 + $0x16f0] sm:$0xff]  ;;  %v1423_v55 = vld [vmem:[%s10381_s14 + $0x16b8] sm:$0xff] }
 0x502   : > { %8166 = vmatprep.subr.bf16.mxu1 %v9230_v31  ;;  %v1431_v31 = vld [vmem:[%s10381_s14 + $0x16f8] sm:$0xff]  ;;  %v9340_v60 = vcombine.high %v1422_v40, %v1430_v54  ;;  %v9339_v8 = vcombine.low %v1422_v40, %v1430_v54 }
 0x503   : > { %v9342_v62 = vcombine.high %v1423_v55, %v1431_v31  ;;  %v9341_v17 = vcombine.low %v1423_v55, %v1431_v31  ;;  %v1534_v55 = vld [vmem:[%s10381_s14 + $0x1a30] sm:$0xff] }
 0x504   : > { %8003 = vmatpush1.bf16.msra.mxu0 %v9227_v63  ;;  %v1438_v63 = vld [vmem:[%s10381_s14 + $0x1730] sm:$0xff] }
 0x505   : > { %8167 = vmatpush1.bf16.msra.mxu1 %v9229_v0  ;;  %8004 = vmatprep.subr.bf16.mxu0 %v9244_v4  ;;  %v1446_v0 = vld [vmem:[%s10381_s14 + $0x1770] sm:$0xff]  ;;  %v1439_v4 = vld [vmem:[%s10381_s14 + $0x1738] sm:$0xff] }
 0x506   : > { %8168 = vmatprep.subr.bf16.mxu1 %v9246_v5  ;;  %v1447_v5 = vld [vmem:[%s10381_s14 + $0x1778] sm:$0xff]  ;;  %v9356_v9 = vcombine.high %v1438_v63, %v1446_v0  ;;  %v9355_v18 = vcombine.low %v1438_v63, %v1446_v0  ;;  %v1542_v31 = vld [vmem:[%s10381_s14 + $0x1a70] sm:$0xff] }
 0x507   : > { %v9358_v10 = vcombine.high %v1439_v4, %v1447_v5  ;;  %v9357_v25 = vcombine.low %v1439_v4, %v1447_v5  ;;  %v9452_v63 = vcombine.high %v1534_v55, %v1542_v31  ;;  %v1550_v4 = vld [vmem:[%s10381_s14 + $0x1ab0] sm:$0xff] }
 0x508   : > { %8005 = vmatpush1.bf16.msra.mxu0 %v9243_v11  ;;  %v1454_v11 = vld [vmem:[%s10381_s14 + $0x17b0] sm:$0xff] }
 0x509   : > { %8169 = vmatpush1.bf16.msra.mxu1 %v9245_v13  ;;  %8006 = vmatprep.subr.bf16.mxu0 %v9260_v15  ;;  %v1462_v13 = vld [vmem:[%s10381_s14 + $0x17f0] sm:$0xff]  ;;  %v1455_v15 = vld [vmem:[%s10381_s14 + $0x17b8] sm:$0xff] }
 0x50a   : > { %8170 = vmatprep.subr.bf16.mxu1 %v9262_v20  ;;  %v1463_v20 = vld [vmem:[%s10381_s14 + $0x17f8] sm:$0xff]  ;;  %v9372_v21 = vcombine.high %v1454_v11, %v1462_v13  ;;  %v9371_v28 = vcombine.low %v1454_v11, %v1462_v13  ;;  %v1558_v5 = vld [vmem:[%s10381_s14 + $0x1af0] sm:$0xff] }
 0x50b   : > { %v9374_v46 = vcombine.high %v1455_v15, %v1463_v20  ;;  %v9373_v32 = vcombine.low %v1455_v15, %v1463_v20  ;;  %v9468_v13 = vcombine.high %v1550_v4, %v1558_v5  ;;  %v1566_v20 = vld [vmem:[%s10381_s14 + $0x1b30] sm:$0xff] }
 0x50c   : > { %8007 = vmatpush1.bf16.msra.mxu0 %v9259_v23  ;;  %v1470_v23 = vld [vmem:[%s10381_s14 + $0x1830] sm:$0xff] }
 0x50d   : > { %8171 = vmatpush1.bf16.msra.mxu1 %v9261_v24  ;;  %8008 = vmatprep.subr.bf16.mxu0 %v9276_v29  ;;  %v1478_v24 = vld [vmem:[%s10381_s14 + $0x1870] sm:$0xff]  ;;  %v1471_v29 = vld [vmem:[%s10381_s14 + $0x1838] sm:$0xff] }
 0x50e   : > { %8172 = vmatprep.subr.bf16.mxu1 %v9278_v19  ;;  %v1479_v19 = vld [vmem:[%s10381_s14 + $0x1878] sm:$0xff]  ;;  %v9388_v44 = vcombine.high %v1470_v23, %v1478_v24 }
 0x50f   : > { %v9390_v22 = vcombine.high %v1471_v29, %v1479_v19  ;;  %v9389_v57 = vcombine.low %v1471_v29, %v1479_v19  ;;  %v9467_v29 = vcombine.low %v1550_v4, %v1558_v5 }
 0x510   : > { %8009 = vmatpush1.bf16.msra.mxu0 %v9275_v2  ;;  %v1486_v2 = vld [vmem:[%s10381_s14 + $0x18b0] sm:$0xff] }
 0x511   : > { %8173 = vmatpush1.bf16.msra.mxu1 %v9277_v12  ;;  %8010 = vmatprep.subr.bf16.mxu0 %v9292_v38  ;;  %v1494_v12 = vld [vmem:[%s10381_s14 + $0x18f0] sm:$0xff]  ;;  %v9387_v38 = vcombine.low %v1470_v23, %v1478_v24 }
 0x512   : > { %8174 = vmatprep.subr.bf16.mxu1 %v9294_v42  ;;  %v1487_v42 = vld [vmem:[%s10381_s14 + $0x18b8] sm:$0xff]  ;;  %v9404_v43 = vcombine.high %v1486_v2, %v1494_v12  ;;  %v9403_v51 = vcombine.low %v1486_v2, %v1494_v12  ;;  %v1590_v2 = vld [vmem:[%s10381_s14 + $0x1bf0] sm:$0xff] }
 0x513   : > { %v9405_v52 = vcombine.low %v1487_v42, %v1495_v14 }
 0x514   : > { %8011 = vmatpush1.bf16.msra.mxu0 %v9291_v49  ;;  %v1510_v49 = vld [vmem:[%s10381_s14 + $0x1970] sm:$0xff] }
 0x515   : > { %8175 = vmatpush1.bf16.msra.mxu1 %v9293_v34  ;;  %8012 = vmatprep.subr.bf16.mxu0 %v9308_v50  ;;  %v9406_v34 = vcombine.high %v1487_v42, %v1495_v14  ;;  %v1503_v50 = vld [vmem:[%s10381_s14 + $0x1938] sm:$0xff]  ;;  %v9420_v53 = vcombine.high %v1502_v33, %v1510_v49 }
 0x516   : > { %8176 = vmatprep.subr.bf16.mxu1 %v9310_v3  ;;  %v1511_v3 = vld [vmem:[%s10381_s14 + $0x1978] sm:$0xff] }
 0x517   : > { %v9422_v35 = vcombine.high %v1503_v50, %v1511_v3  ;;  %v9421_v40 = vcombine.low %v1503_v50, %v1511_v3  ;;  %v1583_v42 = vld [vmem:[%s10381_s14 + $0x1bb8] sm:$0xff] }
 0x518   : > { %8013 = vmatpush1.bf16.msra.mxu0 %v9307_v36  ;;  %v1518_v36 = vld [vmem:[%s10381_s14 + $0x19b0] sm:$0xff] }
 0x519   : > { %8177 = vmatpush1.bf16.msra.mxu1 %v9309_v37  ;;  %8014 = vmatprep.subr.bf16.mxu0 %v9324_v39  ;;  %v1526_v37 = vld [vmem:[%s10381_s14 + $0x19f0] sm:$0xff]  ;;  %v1519_v39 = vld [vmem:[%s10381_s14 + $0x19b8] sm:$0xff] }
 0x51a   : > { %8178 = vmatprep.subr.bf16.mxu1 %v9326_v27  ;;  %v9419_v27 = vcombine.low %v1502_v33, %v1510_v49  ;;  %v9436_v54 = vcombine.high %v1518_v36, %v1526_v37 }
 0x51c   : > { %8015 = vmatpush1.bf16.msra.mxu0 %v9323_v56  ;;  %v1535_v56 = vld [vmem:[%s10381_s14 + $0x1a38] sm:$0xff] }
 0x51d   : > { %8179 = vmatpush1.bf16.msra.mxu1 %v9325_v59  ;;  %8016 = vmatprep.subr.bf16.mxu0 %v9340_v60  ;;  %v1543_v59 = vld [vmem:[%s10381_s14 + $0x1a78] sm:$0xff]  ;;  %v9435_v60 = vcombine.low %v1518_v36, %v1526_v37 }
 0x51e   : > { %8180 = vmatprep.subr.bf16.mxu1 %v9342_v62  ;;  %v9454_v0 = vcombine.high %v1535_v56, %v1543_v59  ;;  %v9453_v11 = vcombine.low %v1535_v56, %v1543_v59  ;;  %v1614_v59 = vld [vmem:[%s10381_s14 + $0x1cb0] sm:$0xff] }
 0x520   : > { %8017 = vmatpush1.bf16.msra.mxu0 %v9339_v8  ;;  %v1551_v8 = vld [vmem:[%s10381_s14 + $0x1ab8] sm:$0xff] }
 0x521   : > { %8181 = vmatpush1.bf16.msra.mxu1 %v9341_v17  ;;  %8018 = vmatprep.subr.bf16.mxu0 %v9356_v9  ;;  %v1559_v17 = vld [vmem:[%s10381_s14 + $0x1af8] sm:$0xff]  ;;  %v9451_v9 = vcombine.low %v1534_v55, %v1542_v31 }
 0x522   : > { %8182 = vmatprep.subr.bf16.mxu1 %v9358_v10  ;;  %v11628_v10 = vld [vmem:[%s11011_s15 + $0x8] sm:$0xff]  ;;  %v9470_v15 = vcombine.high %v1551_v8, %v1559_v17 }
 0x523   : > { %v1767_v23 = vrot.slane %v11628_v10, %v10543_v1  ;;  %v1763_v24 = vrot.slane %v11628_v10, %v10483_v47  ;;  %v1771_v19 = vrot.slane %v11628_v10, %v10486_v48  ;;  %v1591_v47 = vld [vmem:[%s10381_s14 + $0x1bf8] sm:$0xff] }
 0x524   : > { %8019 = vmatpush1.bf16.msra.mxu0 %v9355_v18  ;;  %v1574_v18 = vld [vmem:[%s10381_s14 + $0x1b70] sm:$0xff]  ;;  %v9501_v55 = vcombine.low %v1583_v42, %v1591_v47 }
 0x525   : > { %8183 = vmatpush1.bf16.msra.mxu1 %v9357_v25  ;;  %8020 = vmatprep.subr.bf16.mxu0 %v9372_v21  ;;  %v1759_v25 = vrot.slane %v11628_v10, %v10478_v45  ;;  %v1567_v21 = vld [vmem:[%s10381_s14 + $0x1b38] sm:$0xff]  ;;  %v9484_v45 = vcombine.high %v1566_v20, %v1574_v18  ;;  %v9483_v33 = vcombine.low %v1566_v20, %v1574_v18 }
 0x526   : > { %8184 = vmatprep.subr.bf16.mxu1 %v9374_v46  ;;  %v1575_v46 = vld [vmem:[%s10381_s14 + $0x1b78] sm:$0xff] }
 0x528   : > { %8021 = vmatpush1.bf16.msra.mxu0 %v9371_v28  ;;  %v9469_v28 = vcombine.low %v1551_v8, %v1559_v17  ;;  %v1630_v17 = vld [vmem:[%s10381_s14 + $0x1d30] sm:$0xff] }
 0x529   : > { %8185 = vmatpush1.bf16.msra.mxu1 %v9373_v32  ;;  %8031 = vmatprep.subr.bf16.mxu0 %v9388_v44  ;;  %v9486_v44 = vcombine.high %v1567_v21, %v1575_v46 }
 0x52a   : > { %8195 = vmatprep.subr.bf16.mxu1 %v9390_v22  ;;  %v1582_v22 = vld [vmem:[%s10381_s14 + $0x1bb0] sm:$0xff] }
 0x52b   : > { %8023 = vmatmul.mubr.bf16.vlgmr.msra.gmra.mrb[20].mxu0 %v10702_v16 }
 0x52c   : > { %8187 = vmatmul.mubr.bf16.vlgmr.msra.gmra.mrb[20].mxu1 %v10702_v16  ;;  %8032 = vmatpush1.bf16.msra.mxu0 %v9387_v38  ;;  %v1527_v16 = vld [vmem:[%s10381_s14 + $0x19f8] sm:$0xff] }
 0x52d   : > { %8063 = vmatprep.mubr.bf16.mxu0 %v10705_v26  ;;  %8196 = vmatpush1.bf16.msra.mxu1 %v9389_v57  ;;  %v9437_v62 = vcombine.low %v1519_v39, %v1527_v16 }
 0x52e   : > { %8227 = vmatprep.mubr.bf16.mxu1 %v10705_v26  ;;  %8033 = vmatprep.subr.bf16.mxu0 %v9404_v43  ;;  %v9438_v26 = vcombine.high %v1519_v39, %v1527_v16  ;;  %v9502_v39 = vcombine.high %v1583_v42, %v1591_v47  ;;  %v1606_v16 = vld [vmem:[%s10381_s14 + $0x1c70] sm:$0xff] }
 0x52f   : > { %8197 = vmatprep.subr.bf16.mxu1 %v9406_v34 }
 0x530   : > { %8034 = vmatpush1.bf16.msra.mxu0 %v9403_v51  ;;  %v9485_v51 = vcombine.low %v1567_v21, %v1575_v46 }
 0x531   : > { %8198 = vmatpush1.bf16.msra.mxu1 %v9405_v52  ;;  %8035 = vmatprep.subr.bf16.mxu0 %v9420_v53  ;;  %v9500_v52 = vcombine.high %v1582_v22, %v1590_v2  ;;  %v1598_v53 = vld [vmem:[%s10381_s14 + $0x1c30] sm:$0xff] }
 0x532   : > { %8199 = vmatprep.subr.bf16.mxu1 %v9422_v35  ;;  %v9516_v31 = vcombine.high %v1598_v53, %v1606_v16 }
 0x534   : > { %8036 = vmatpush1.bf16.msra.mxu0 %v9419_v27 }
 0x535   : > { %8200 = vmatpush1.bf16.msra.mxu1 %v9421_v40  ;;  %8037 = vmatprep.subr.bf16.mxu0 %v9436_v54  ;;  %v1599_v40 = vld [vmem:[%s10381_s14 + $0x1c38] sm:$0xff] }
 0x536   : > { %8201 = vmatprep.subr.bf16.mxu1 %v9438_v26  ;;  %v1607_v54 = vld [vmem:[%s10381_s14 + $0x1c78] sm:$0xff]  ;;  %v9499_v26 = vcombine.low %v1582_v22, %v1590_v2 }
 0x537   : > { %v9518_v56 = vcombine.high %v1599_v40, %v1607_v54  ;;  %v9517_v4 = vcombine.low %v1599_v40, %v1607_v54 }
 0x538   : > { %8038 = vmatpush1.bf16.msra.mxu0 %v9435_v60  ;;  %v1622_v60 = vld [vmem:[%s10381_s14 + $0x1cf0] sm:$0xff] }
 0x539   : > { %8202 = vmatpush1.bf16.msra.mxu1 %v9437_v62  ;;  %8039 = vmatprep.subr.bf16.mxu0 %v9452_v63  ;;  %v1615_v62 = vld [vmem:[%s10381_s14 + $0x1cb8] sm:$0xff]  ;;  %v9532_v5 = vcombine.high %v1614_v59, %v1622_v60 }
 0x53a   : > { %8203 = vmatprep.subr.bf16.mxu1 %v9454_v0  ;;  %v1623_v63 = vld [vmem:[%s10381_s14 + $0x1cf8] sm:$0xff]  ;;  %v9515_v0 = vcombine.low %v1598_v53, %v1606_v16  ;;  %v1678_v53 = vld [vmem:[%s10381_s14 + $0x1eb0] sm:$0xff] }
 0x53b   : > { %v9534_v8 = vcombine.high %v1615_v62, %v1623_v63  ;;  %v9533_v18 = vcombine.low %v1615_v62, %v1623_v63 }
 0x53c   : > { %8040 = vmatpush1.bf16.msra.mxu0 %v9451_v9  ;;  %v1638_v9 = vld [vmem:[%s10381_s14 + $0x1d70] sm:$0xff] }
 0x53d   : > { %8204 = vmatpush1.bf16.msra.mxu1 %v9453_v11  ;;  %8041 = vmatprep.subr.bf16.mxu0 %v9468_v13  ;;  %v1631_v11 = vld [vmem:[%s10381_s14 + $0x1d38] sm:$0xff]  ;;  %v9547_v2 = vcombine.low %v1630_v17, %v1638_v9 }
 0x53e   : > { %v7737_v32 = vpop.f32.mrb[16].mxu0  ;;  %8205 = vmatprep.subr.bf16.mxu1 %v9470_v15  ;;  %v1639_v13 = vld [vmem:[%s10381_s14 + $0x1d78] sm:$0xff]  ;;  %v9531_v15 = vcombine.low %v1614_v59, %v1622_v60 }
 0x53f   : > { %v11644_v12 = vadd.f32 %v7737_v32, %v1759_v25  ;;  %v7901_v1 = vpop.f32.mrb[16].mxu1  ;;  %v7739_v38 = vpop.f32.mrb[17].mxu0  ;;  %v9548_v25 = vcombine.high %v1630_v17, %v1638_v9  ;;  %v1655_v32 = vld [vmem:[%s10381_s14 + $0x1df8] sm:$0xff] }
 0x540   : > { %v11648_v14 = vadd.f32 %v7901_v1, %v1767_v23  ;;  %v11650_v57 = vadd.f32 %v7739_v38, %v1763_v24  ;;  %v7903_v48 = vpop.f32.mrb[17].mxu1  ;;  %v7741_v43 = vpop.f32.mrb[18].mxu0  ;;  %8042 = vmatpush1.bf16.msra.mxu0 %v9467_v29  ;;  %v9550_v23 = vcombine.high %v1631_v11, %v1639_v13  ;;  %v1646_v24 = vld [vmem:[%s10381_s14 + $0x1db0] sm:$0xff]  ;;  %v9549_v38 = vcombine.low %v1631_v11, %v1639_v13  ;;  %v1695_v59 = vld [vmem:[%s10381_s14 + $0x1f38] sm:$0xff] }
 0x541   : > { %v9639_v49 = vmul.f32 -1.442695, %v11644_v12  ;;  %v11653_v34 = vadd.f32 %v7903_v48, %v1771_v19  ;;  %v7905_v50 = vpop.f32.mrb[18].mxu1  ;;  %8206 = vmatpush1.bf16.msra.mxu1 %v9469_v28  ;;  %v7742_v3 = vpop.f32.mrb[19].mxu0  ;;  %8043 = vmatprep.subr.bf16.mxu0 %v9484_v45  ;;  %v1654_v29 = vld [vmem:[%s10381_s14 + $0x1df0] sm:$0xff]  ;;  %v1647_v45 = vld [vmem:[%s10381_s14 + $0x1db8] sm:$0xff] }
 0x542   : > { %v9641_v35 = vmul.f32 -1.442695, %v11648_v14  ;;  %v9640_v36 = vmul.f32 -1.442695, %v11650_v57  ;;  %v7906_v37 = vpop.f32.mrb[19].mxu1  ;;  %8207 = vmatprep.subr.bf16.mxu1 %v9486_v44  ;;  %v9564_v42 = vcombine.high %v1646_v24, %v1654_v29  ;;  %v9566_v47 = vcombine.high %v1647_v45, %v1655_v32  ;;  %v1662_v48 = vld [vmem:[%s10381_s14 + $0x1e30] sm:$0xff] }
 0x543   : > { %9909 = vpow2.f32 %v9639_v49  ;;  %v9642_v27 = vmul.f32 -1.442695, %v11653_v34  ;;  %v1670_v43 = vld [vmem:[%s10381_s14 + $0x1e70] sm:$0xff]  ;;  %v1671_v49 = vld [vmem:[%s10381_s14 + $0x1e78] sm:$0xff]  ;;  %v9563_v50 = vcombine.low %v1646_v24, %v1654_v29  ;;  %v9565_v3 = vcombine.low %v1647_v45, %v1655_v32 }
 0x544   : > { %9911 = vpow2.f32 %v9641_v35  ;;  %8044 = vmatpush1.bf16.msra.mxu0 %v9483_v33  ;;  %v1663_v33 = vld [vmem:[%s10381_s14 + $0x1e38] sm:$0xff]  ;;  %v1686_v35 = vld [vmem:[%s10381_s14 + $0x1ef0] sm:$0xff]  ;;  %v1783_v45 = vrot.slane %v11628_v10, %v10727_v41  ;;  %v1779_v32 = vrot.slane %v11628_v10, %v10546_v6 }
 0x545   : > { %9913 = vpow2.f32 %v9640_v36  ;;  %8208 = vmatpush1.bf16.msra.mxu1 %v9485_v51  ;;  %8045 = vmatprep.subr.bf16.mxu0 %v9500_v52  ;;  %v9580_v51 = vcombine.high %v1662_v48, %v1670_v43  ;;  %v9582_v52 = vcombine.high %v1663_v33, %v1671_v49  ;;  %v1679_v36 = vld [vmem:[%s10381_s14 + $0x1eb8] sm:$0xff]  ;;  %v9581_v16 = vcombine.low %v1663_v33, %v1671_v49  ;;  %v1710_v11 = vld [vmem:[%s10381_s14 + $0x1fb0] sm:$0xff] }
 0x546   : > { %9915 = vpow2.f32 %v9642_v27  ;;  %8209 = vmatprep.subr.bf16.mxu1 %v9502_v39  ;;  %v1687_v37 = vld [vmem:[%s10381_s14 + $0x1ef8] sm:$0xff]  ;;  %v9579_v39 = vcombine.low %v1662_v48, %v1670_v43  ;;  %v9596_v27 = vcombine.high %v1678_v53, %v1686_v35  ;;  %v1718_v13 = vld [vmem:[%s10381_s14 + $0x1ff0] sm:$0xff] }
 0x547   : > { %v9598_v54 = vcombine.high %v1679_v36, %v1687_v37  ;;  %v1703_v60 = vld [vmem:[%s10381_s14 + $0x1f78] sm:$0xff]  ;;  %v9627_v29 = vcombine.low %v1710_v11, %v1718_v13 }
 0x548   : > { %8046 = vmatpush1.bf16.msra.mxu0 %v9499_v26  ;;  %v1694_v26 = vld [vmem:[%s10381_s14 + $0x1f30] sm:$0xff]  ;;  %v9614_v9 = vcombine.high %v1695_v59, %v1703_v60 }
 0x549   : > { %8210 = vmatpush1.bf16.msra.mxu1 %v9501_v55  ;;  %8047 = vmatprep.subr.bf16.mxu0 %v9516_v31  ;;  %v1702_v55 = vld [vmem:[%s10381_s14 + $0x1f70] sm:$0xff] }
 0x54a   : > { %8211 = vmatprep.subr.bf16.mxu1 %v9518_v56  ;;  %v9612_v17 = vcombine.high %v1694_v26, %v1702_v55 }
 0x54c   : > { %8048 = vmatpush1.bf16.msra.mxu0 %v9515_v0  ;;  %v9595_v0 = vcombine.low %v1678_v53, %v1686_v35 }
 0x54d   : > { %v9910_v20 = vpop.eup %9909  ;;  %8212 = vmatpush1.bf16.msra.mxu1 %v9517_v4  ;;  %8049 = vmatprep.subr.bf16.mxu0 %v9532_v5 }
 0x54e   : > { %v9912_v21 = vpop.eup %9911  ;;  %v8292_v46 = vadd.f32 1.0, %v9910_v20  ;;  %8213 = vmatprep.subr.bf16.mxu1 %v9534_v8  ;;  %v9597_v8 = vcombine.low %v1679_v36, %v1687_v37  ;;  %v1711_v20 = vld [vmem:[%s10381_s14 + $0x1fb8] sm:$0xff] }
 0x54f   : > { %v9914_v19 = vpop.eup %9913  ;;  %v8294_v28 = vadd.f32 1.0, %v9912_v21 }
 0x550   : > { %v9916_v44 = vpop.eup %9915  ;;  %9917 = vrcp.f32 %v8292_v46  ;;  %v8293_v22 = vadd.f32 1.0, %v9914_v19  ;;  %8050 = vmatpush1.bf16.msra.mxu0 %v9531_v15  ;;  %v9628_v46 = vcombine.high %v1710_v11, %v1718_v13 }
 0x551   : > { %9919 = vrcp.f32 %v8294_v28  ;;  %v8295_v1 = vadd.f32 1.0, %v9916_v44  ;;  %8214 = vmatpush1.bf16.msra.mxu1 %v9533_v18  ;;  %8051 = vmatprep.subr.bf16.mxu0 %v9548_v25  ;;  %v1719_v18 = vld [vmem:[%s10381_s14 + $0x1ff8] sm:$0xff]  ;;  %v9611_v25 = vcombine.low %v1694_v26, %v1702_v55  ;;  %v1775_v28 = vrot.slane %v11628_v10, %v10635_v58 }
 0x552   : > { %9921 = vrcp.f32 %v8293_v22  ;;  %8215 = vmatprep.subr.bf16.mxu1 %v9550_v23  ;;  %v9629_v19 = vcombine.low %v1711_v20, %v1719_v18  ;;  %v1787_v44 = vrot.slane %v11628_v10, %v10638_v61 }
 0x553   : > { %9923 = vrcp.f32 %v8295_v1 }
 0x554   : > { %8052 = vmatpush1.bf16.msra.mxu0 %v9547_v2 }
 0x555   : > { %8216 = vmatpush1.bf16.msra.mxu1 %v9549_v38  ;;  %8053 = vmatprep.subr.bf16.mxu0 %v9564_v42 }
 0x556   : > { %8217 = vmatprep.subr.bf16.mxu1 %v9566_v47 }
 0x558   : > { %8054 = vmatpush1.bf16.msra.mxu0 %v9563_v50 }
 0x559   : > { %8218 = vmatpush1.bf16.msra.mxu1 %v9565_v3  ;;  %8055 = vmatprep.subr.bf16.mxu0 %v9580_v51 }
 0x55a   : > { %v9918_v40 = vpop.eup %9917  ;;  %8219 = vmatprep.subr.bf16.mxu1 %v9582_v52 }
 0x55b   : > { %v9920_v31 = vpop.eup %9919  ;;  %v8340_v56 = vmul.f32 %v9918_v40, %v11644_v12 }
 0x55c   : > { %v9922_v62 = vpop.eup %9921  ;;  %v8342_v63 = vmul.f32 %v9920_v31, %v11648_v14  ;;  %8056 = vmatpush1.bf16.msra.mxu0 %v9579_v39 }
 0x55d   : > { %v9924_v4 = vpop.eup %9923  ;;  %v8341_v5 = vmul.f32 %v9922_v62, %v11650_v57  ;;  %8220 = vmatpush1.bf16.msra.mxu1 %v9581_v16  ;;  %8057 = vmatprep.subr.bf16.mxu0 %v9596_v27  ;;  %v9613_v57 = vcombine.low %v1695_v59, %v1703_v60 }
 0x55e   : > { %v8343_v12 = vmul.f32 %v9924_v4, %v11653_v34  ;;  %8221 = vmatprep.subr.bf16.mxu1 %v9598_v54  ;;  %v9630_v34 = vcombine.high %v1711_v20, %v1719_v18 }
 0x55f   : > { %v8398_v15 = vcombine.low %v8340_v56, %v8341_v5 }
 0x560   : > { %v8399_v14 = vcombine.low %v8342_v63, %v8343_v12  ;;  %8058 = vmatpush1.bf16.msra.mxu0 %v9595_v0 }
 0x561   : > { %v8406_v21 = vrot.slane %v8398_v15, %v11076_v30  ;;  %8222 = vmatpush1.bf16.msra.mxu1 %v9597_v8  ;;  %8059 = vmatprep.subr.bf16.mxu0 %v9612_v17 }
 0x562   : > { %v8413_v23 = vrot.slane %v8399_v14, %v11076_v30  ;;  %8223 = vmatprep.subr.bf16.mxu1 %v9614_v9 }
 0x564   : > { %v8414_v24 = vcombine.low %v8406_v21, %v8413_v23  ;;  %8060 = vmatpush1.bf16.msra.mxu0 %v9611_v25 }
 0x565   : > { %8224 = vmatpush1.bf16.msra.mxu1 %v9613_v57  ;;  %8061 = vmatprep.subr.bf16.mxu0 %v9628_v46 }
 0x566   : > { %8438 = vst [vmem:[%s11098_s1 + $0x10] sm:$0xff] %v8414_v24  ;;  %8225 = vmatprep.subr.bf16.mxu1 %v9630_v34 }
 0x568   : > { %8062 = vmatpush1.bf16.msra.mxu0 %v9627_v29 }
 0x569   : > { %8226 = vmatpush1.bf16.msra.mxu1 %v9629_v19 }
 0x56b   : > { %8064 = vmatmul.mubr.bf16.vlgmr.msra.gmra.mrb[20].mxu0 %v10783_v7 }
 0x56c   : > { %8228 = vmatmul.mubr.bf16.vlgmr.msra.gmra.mrb[20].mxu1 %v10783_v7 }
 0x63e   : > { %v8065_v22 = vpop.f32.mrb[20].mxu0 }
 0x63f   : > { %v9663_v2 = vadd.f32 %v8065_v22, %v1775_v28  ;;  %v8229_v1 = vpop.f32.mrb[20].mxu1  ;;  %v8067_v38 = vpop.f32.mrb[21].mxu0 }
 0x640   : > { %v9665_v42 = vadd.f32 %v8229_v1, %v1783_v45  ;;  %v9664_v47 = vadd.f32 %v8067_v38, %v1779_v32  ;;  %v8231_v48 = vpop.f32.mrb[21].mxu1  ;;  %v8069_v7 = vpop.f32.mrb[22].mxu0 }
 0x641   : > { %v9643_v43 = vmul.f32 -1.442695, %v9663_v2  ;;  %v9666_v33 = vadd.f32 %v8231_v48, %v1787_v44  ;;  %v8233_v58 = vpop.f32.mrb[22].mxu1  ;;  %v8070_v49 = vpop.f32.mrb[23].mxu0 }
 0x642   : > { %v9645_v50 = vmul.f32 -1.442695, %v9665_v42  ;;  %v9644_v41 = vmul.f32 -1.442695, %v9664_v47  ;;  %v8234_v3 = vpop.f32.mrb[23].mxu1 }
 0x643   : > { %9925 = vpow2.f32 %v9643_v43  ;;  %v9646_v6 = vmul.f32 -1.442695, %v9666_v33 }
 0x644   : > { %9927 = vpow2.f32 %v9645_v50 }
 0x645   : > { %9929 = vpow2.f32 %v9644_v41 }
 0x646   : > { %9931 = vpow2.f32 %v9646_v6 }
 0x64d   : > { %v9926_v61 = vpop.eup %9925 }
 0x64e   : > { %v9928_v10 = vpop.eup %9927  ;;  %v8296_v51 = vadd.f32 1.0, %v9926_v61 }
 0x64f   : > { %v9930_v52 = vpop.eup %9929  ;;  %v8298_v53 = vadd.f32 1.0, %v9928_v10 }
 0x650   : > { %v9932_v35 = vpop.eup %9931  ;;  %9933 = vrcp.f32 %v8296_v51  ;;  %v8297_v36 = vadd.f32 1.0, %v9930_v52 }
 0x651   : > { %9935 = vrcp.f32 %v8298_v53  ;;  %v8299_v37 = vadd.f32 1.0, %v9932_v35 }
 0x652   : > { %9937 = vrcp.f32 %v8297_v36 }
 0x653   : > { %9939 = vrcp.f32 %v8299_v37 }
 0x65a   : > { %v9934_v39 = vpop.eup %9933 }
 0x65b   : > { %v9936_v16 = vpop.eup %9935  ;;  %v8344_v27 = vmul.f32 %v9934_v39, %v9663_v2 }
 0x65c   : > { %v9938_v40 = vpop.eup %9937  ;;  %v8346_v54 = vmul.f32 %v9936_v16, %v9665_v42 }
 0x65d   : > { %v9940_v26 = vpop.eup %9939  ;;  %v8345_v55 = vmul.f32 %v9938_v40, %v9664_v47 }
 0x65e   : > { %v8347_v31 = vmul.f32 %v9940_v26, %v9666_v33 }
 0x65f   : > { %v8415_v56 = vcombine.low %v8344_v27, %v8345_v55 }
 0x660   : > { %v8416_v59 = vcombine.low %v8346_v54, %v8347_v31 }
 0x661   : > { %v8423_v60 = vrot.slane %v8415_v56, %v11076_v30 }
 0x662   : > { %v8430_v62 = vrot.slane %v8416_v59, %v11076_v30 }
 0x664   : > { %v8431_v63 = vcombine.low %v8423_v60, %v8430_v62 }
 0x666   : > { %8439 = vst [vmem:[%s11098_s1 + $0x18] sm:$0xff] %v8431_v63 }
 0x667 PF: > { %s11762_s7 = sld [smem:[#allocation13_spill]]  ;;  %p17_p3 = scmp.ge.s32.totalorder %s10195_s23, 4  }
 0x668   : > { %s11763_s18 = smov %s10121_s19  ;;  %s11764_s19 = smov %s10125_s20 }
 0x669   : > { %s11766_s21 = smov %s10195_s23  ;;  %19 = sbr.rel (!%p17_p3) target bundleno = 8 (0x8), region = 104 }
 0x66d   : > { %s11765_s20 = smov %s11762_s7 }
 0x670   :  { %8462 = vsyncpa [#allocation3], 1 }
 0x671   :  { %8464 = vsyncpa [#allocation3 + $0x1], 1 }
 0x672   :  { %8465 = vsyncpa [#allocation5], 1 }
 0x673   :  { %8466 = vsyncpa [#allocation8], 1 }
 0x674   :  { %8468 = vsyncpa [#allocation8 + $0x1], 1 }

// kernel: model_forward.5
= control target key start
LH: loop header
LB: loop body
LE: loop exit
PB: predicated region body
PF: predicated region fallthrough
CT: control target
= control target key end

     0   :  { %s5771_s18 = smov 0   ;;  %s5773_s19 = smov 0   ;;  %s6369_s0 = inlined_call_operand.vmem [shape: f32[4,8,4096], index: 0, kind: input, shape index: {}]   ;;  %s6370_s1 = inlined_call_operand.vmem [shape: bf16[4,4096,256], index: 1, kind: input, shape index: {}]   ;;  %s6371_s2 = inlined_call_operand.vmem [shape: f32[1,1,256], index: 2, kind: input, shape index: {}]   ;;  %s6372_s3 = inlined_call_operand.vmem [shape: f32[1,1,256], index: 3, kind: input, shape index: {}]   ;;  %s6373_s4 = inlined_call_operand.vmem [shape: f32[1,1,256], index: 4, kind: input, shape index: {}]   ;;  %s6374_s5 = inlined_call_operand.vmem [shape: f32[4,8,256], index: 5, kind: output, shape index: {}]  }
   0x1   :  { %s5775_s20 = smov 0  }
   0x2 LB: > { %s27_s21 = sadd.s32 1, %s5735_s19  ;;  %p4331_p0 = scmp.ge.s32.totalorder %s5739_s20, 1  ;;  %s5739_s20 = sphi %s5775_s20, %s15_s20   ;;  %s5735_s19 = sphi %s5773_s19, %s6376_s19   ;;  %s5731_s18 = sphi %s5771_s18, %s6375_s18  }
   0x3   : > { %p29_p1 = scmp.ge.s32.totalorder %s27_s21, 4  ;;  %p248_p2 = scmp.lt.s32.totalorder %s5739_s20, 5 }
   0x5   : > { %s6378_s21 = smov (%p29_p1, %s27_s21), 0  ;;  %p249_p3 = pnand %p4331_p0, %p248_p2 }
   0x6   : > { %p301_p4 = scmp.lt.s32.totalorder (!%p249_p3), %s5731_s18, 3 }
   0x7   : > { %252 = sbr.rel (%p249_p3) target bundleno = 780 (0x30c), region = 40 }
   0xe   : > { %s6380_s18 = smov (!%p301_p4, %s5731_s18), 3 }
   0xf   : > { %s4855_s22 = sshll.u32 %s6380_s18, 12  ;;  %s4854_s26 = sshll.u32 %s6380_s18, 8 }
  0x10   : > { %s5795_s25 = scalar_lea.vmem %s6370_s1, %s4855_s22  ;;  %s5845_s29 = scalar_lea.vmem %s6369_s0, %s4854_s26 }
  0x11   : > { %v4941_v0 = vld [vmem:[%s5795_s25 + $0x4] ss:$8 sps:$4 sm:$0xff]   ;;  %v4945_v2 = vld [vmem:[%s5795_s25] ss:$8 sps:$4 sm:$0xff]   ;;  %v4947_v4 = vld [vmem:[%s5795_s25 + $0x14] ss:$8 sps:$4 sm:$0xff]  }
  0x12   : > { %v4943_v1 = vld [vmem:[%s5795_s25 + $0x804] ss:$8 sps:$4 sm:$0xff]   ;;  %3489 = vmatprep.subr.bf16.mxu1 %v4941_v0  ;;  %v4946_v3 = vld [vmem:[%s5795_s25 + $0x800] ss:$8 sps:$4 sm:$0xff]   ;;  %v4949_v5 = vld [vmem:[%s5795_s25 + $0x814] ss:$8 sps:$4 sm:$0xff]  }
  0x13   : > { %3817 = vmatprep.subr.bf16.mxu0 %v4943_v1  ;;  %3490 = vmatpush1.bf16.msra.mxu1 %v4945_v2  ;;  %v4951_v6 = vld [vmem:[%s5795_s25 + $0x10] ss:$8 sps:$4 sm:$0xff]   ;;  %v4953_v8 = vld [vmem:[%s5795_s25 + $0x24] ss:$8 sps:$4 sm:$0xff]   ;;  %v4957_v10 = vld [vmem:[%s5795_s25 + $0x20] ss:$8 sps:$4 sm:$0xff]  }
  0x14   : > { %3818 = vmatpush1.bf16.msra.mxu0 %v4946_v3  ;;  %3491 = vmatprep.subr.bf16.mxu1 %v4947_v4  ;;  %v4952_v7 = vld [vmem:[%s5795_s25 + $0x810] ss:$8 sps:$4 sm:$0xff]   ;;  %v4955_v9 = vld [vmem:[%s5795_s25 + $0x824] ss:$8 sps:$4 sm:$0xff]   ;;  %v4958_v11 = vld [vmem:[%s5795_s25 + $0x820] ss:$8 sps:$4 sm:$0xff]  }
  0x15   : > { %3819 = vmatprep.subr.bf16.mxu0 %v4949_v5  ;;  %v4959_v12 = vld [vmem:[%s5795_s25 + $0x34] ss:$8 sps:$4 sm:$0xff]   ;;  %v4963_v14 = vld [vmem:[%s5795_s25 + $0x30] ss:$8 sps:$4 sm:$0xff]   ;;  %v4965_v16 = vld [vmem:[%s5795_s25 + $0x44] ss:$8 sps:$4 sm:$0xff]  }
  0x16   : > { %v4961_v13 = vld [vmem:[%s5795_s25 + $0x834] ss:$8 sps:$4 sm:$0xff]   ;;  %v4964_v15 = vld [vmem:[%s5795_s25 + $0x830] ss:$8 sps:$4 sm:$0xff]   ;;  %v4967_v17 = vld [vmem:[%s5795_s25 + $0x844] ss:$8 sps:$4 sm:$0xff]  }
  0x17   : > { %3492 = vmatpush1.bf16.msra.mxu1 %v4951_v6  ;;  %v4969_v18 = vld [vmem:[%s5795_s25 + $0x40] ss:$8 sps:$4 sm:$0xff]   ;;  %v4971_v20 = vld [vmem:[%s5795_s25 + $0x54] ss:$8 sps:$4 sm:$0xff]   ;;  %v4975_v22 = vld [vmem:[%s5795_s25 + $0x50] ss:$8 sps:$4 sm:$0xff]  }
  0x18   : > { %3820 = vmatpush1.bf16.msra.mxu0 %v4952_v7  ;;  %3493 = vmatprep.subr.bf16.mxu1 %v4953_v8  ;;  %v4970_v19 = vld [vmem:[%s5795_s25 + $0x840] ss:$8 sps:$4 sm:$0xff]   ;;  %v4973_v21 = vld [vmem:[%s5795_s25 + $0x854] ss:$8 sps:$4 sm:$0xff]   ;;  %v4976_v23 = vld [vmem:[%s5795_s25 + $0x850] ss:$8 sps:$4 sm:$0xff]  }
  0x19   : > { %3821 = vmatprep.subr.bf16.mxu0 %v4955_v9  ;;  %v4977_v24 = vld [vmem:[%s5795_s25 + $0x64] ss:$8 sps:$4 sm:$0xff]   ;;  %v4981_v26 = vld [vmem:[%s5795_s25 + $0x60] ss:$8 sps:$4 sm:$0xff]   ;;  %v4983_v28 = vld [vmem:[%s5795_s25 + $0x74] ss:$8 sps:$4 sm:$0xff]  }
  0x1a   : > { %v4979_v25 = vld [vmem:[%s5795_s25 + $0x864] ss:$8 sps:$4 sm:$0xff]   ;;  %v4982_v27 = vld [vmem:[%s5795_s25 + $0x860] ss:$8 sps:$4 sm:$0xff]   ;;  %v4985_v29 = vld [vmem:[%s5795_s25 + $0x874] ss:$8 sps:$4 sm:$0xff]  }
  0x1b   : > { %3494 = vmatpush1.bf16.msra.mxu1 %v4957_v10  ;;  %v4987_v30 = vld [vmem:[%s5795_s25 + $0x70] ss:$8 sps:$4 sm:$0xff]   ;;  %v4989_v32 = vld [vmem:[%s5795_s25 + $0x84] ss:$8 sps:$4 sm:$0xff]   ;;  %v4993_v34 = vld [vmem:[%s5795_s25 + $0x80] ss:$8 sps:$4 sm:$0xff]  }
  0x1c   : > { %3822 = vmatpush1.bf16.msra.mxu0 %v4958_v11  ;;  %3495 = vmatprep.subr.bf16.mxu1 %v4959_v12  ;;  %v4988_v31 = vld [vmem:[%s5795_s25 + $0x870] ss:$8 sps:$4 sm:$0xff]   ;;  %v4991_v33 = vld [vmem:[%s5795_s25 + $0x884] ss:$8 sps:$4 sm:$0xff]   ;;  %v4994_v35 = vld [vmem:[%s5795_s25 + $0x880] ss:$8 sps:$4 sm:$0xff]  }
  0x1d   : > { %3823 = vmatprep.subr.bf16.mxu0 %v4961_v13  ;;  %v4995_v36 = vld [vmem:[%s5795_s25 + $0x94] ss:$8 sps:$4 sm:$0xff]   ;;  %v4999_v38 = vld [vmem:[%s5795_s25 + $0x90] ss:$8 sps:$4 sm:$0xff]   ;;  %v5001_v40 = vld [vmem:[%s5795_s25 + $0xa4] ss:$8 sps:$4 sm:$0xff]  }
  0x1e   : > { %v4997_v37 = vld [vmem:[%s5795_s25 + $0x894] ss:$8 sps:$4 sm:$0xff]   ;;  %v5000_v39 = vld [vmem:[%s5795_s25 + $0x890] ss:$8 sps:$4 sm:$0xff]   ;;  %v5003_v41 = vld [vmem:[%s5795_s25 + $0x8a4] ss:$8 sps:$4 sm:$0xff]  }
  0x1f   : > { %3496 = vmatpush1.bf16.msra.mxu1 %v4963_v14  ;;  %v5005_v42 = vld [vmem:[%s5795_s25 + $0xa0] ss:$8 sps:$4 sm:$0xff]   ;;  %v5007_v44 = vld [vmem:[%s5795_s25 + $0xb4] ss:$8 sps:$4 sm:$0xff]   ;;  %v5011_v47 = vld [vmem:[%s5795_s25 + $0xb0] ss:$8 sps:$4 sm:$0xff]  }
  0x20   : > { %3824 = vmatpush1.bf16.msra.mxu0 %v4964_v15  ;;  %3497 = vmatprep.subr.bf16.mxu1 %v4965_v16  ;;  %v5006_v43 = vld [vmem:[%s5795_s25 + $0x8a0] ss:$8 sps:$4 sm:$0xff]   ;;  %v5009_v45 = vld [vmem:[%s5795_s25 + $0x8b4] ss:$8 sps:$4 sm:$0xff]   ;;  %v5012_v49 = vld [vmem:[%s5795_s25 + $0x8b0] ss:$8 sps:$4 sm:$0xff]  }
  0x21   : > { %3825 = vmatprep.subr.bf16.mxu0 %v4967_v17  ;;  %v342_v46 = vld [vmem:[%s5845_s29 + $0x8] sm:$0xff]  ;;  %v5019_v56 = vld [vmem:[%s5795_s25 + $0xd4] ss:$8 sps:$4 sm:$0xff]   ;;  %v5023_v58 = vld [vmem:[%s5795_s25 + $0xd0] ss:$8 sps:$4 sm:$0xff]   ;;  %s4856_s11 = sshll.u32 %s6380_s18, 4 }
  0x22   : > { %v374_v48 = vpack.c.bf16 %v342_v46, %v342_v46  ;;  %v358_v50 = vld [vmem:[%s5845_s29 + $0x88] sm:$0xff]  ;;  %v5021_v57 = vld [vmem:[%s5795_s25 + $0x8d4] ss:$8 sps:$4 sm:$0xff]   ;;  %v5024_v59 = vld [vmem:[%s5795_s25 + $0x8d0] ss:$8 sps:$4 sm:$0xff]   ;;  %s339_s14 = scalar_lea.vmem %s6374_s5, %s4856_s11 }
  0x23   : > { %3498 = vmatpush1.bf16.msra.mxu1 %v4969_v18  ;;  %v5013_v51 = vld [vmem:[%s5795_s25 + $0xc4] ss:$8 sps:$4 sm:$0xff]   ;;  %v390_v53 = vpack.c.bf16 %v358_v50, %v358_v50  ;;  %v5017_v54 = vld [vmem:[%s5795_s25 + $0xc0] ss:$8 sps:$4 sm:$0xff]   ;;  %v5031_v0 = vld [vmem:[%s5795_s25 + $0xf4] ss:$8 sps:$4 sm:$0xff]  }
  0x24   : > { %3826 = vmatpush1.bf16.msra.mxu0 %v4970_v19  ;;  %3499 = vmatprep.subr.bf16.mxu1 %v4971_v20  ;;  %v5015_v52 = vld [vmem:[%s5795_s25 + $0x8c4] ss:$8 sps:$4 sm:$0xff]   ;;  %v5018_v55 = vld [vmem:[%s5795_s25 + $0x8c0] ss:$8 sps:$4 sm:$0xff]   ;;  %v5033_v1 = vld [vmem:[%s5795_s25 + $0x8f4] ss:$8 sps:$4 sm:$0xff]  }
  0x25   : > { %3827 = vmatprep.subr.bf16.mxu0 %v4973_v21  ;;  %3521 = vmatprep.mubr.bf16.mxu1 %v374_v48  ;;  %v5025_v60 = vld [vmem:[%s5795_s25 + $0xe4] ss:$8 sps:$4 sm:$0xff]   ;;  %v5029_v62 = vld [vmem:[%s5795_s25 + $0xe0] ss:$8 sps:$4 sm:$0xff]   ;;  %v5035_v2 = vld [vmem:[%s5795_s25 + $0xf0] ss:$8 sps:$4 sm:$0xff]  }
  0x26   : > { %3849 = vmatprep.mubr.bf16.mxu0 %v390_v53  ;;  %v5027_v61 = vld [vmem:[%s5795_s25 + $0x8e4] ss:$8 sps:$4 sm:$0xff]   ;;  %v5030_v63 = vld [vmem:[%s5795_s25 + $0x8e0] ss:$8 sps:$4 sm:$0xff]   ;;  %v5036_v3 = vld [vmem:[%s5795_s25 + $0x8f0] ss:$8 sps:$4 sm:$0xff]  }
  0x27   : > { %3500 = vmatpush1.bf16.msra.mxu1 %v4975_v22  ;;  %v5039_v4 = vld [vmem:[%s5795_s25 + $0x104] ss:$8 sps:$4 sm:$0xff]   ;;  %v5037_v8 = vld [vmem:[%s5795_s25 + $0x100] ss:$8 sps:$4 sm:$0xff]   ;;  %v5045_v12 = vld [vmem:[%s5795_s25 + $0x114] ss:$8 sps:$4 sm:$0xff]  }
  0x28   : > { %3828 = vmatpush1.bf16.msra.mxu0 %v4976_v23  ;;  %3501 = vmatprep.subr.bf16.mxu1 %v4977_v24  ;;  %v341_v5 = vld [vmem:[%s5845_s29] sm:$0xff]  ;;  %v5048_v13 = vld [vmem:[%s5795_s25 + $0x914] ss:$8 sps:$4 sm:$0xff]   ;;  %v5043_v14 = vld [vmem:[%s5795_s25 + $0x110] ss:$8 sps:$4 sm:$0xff]  }
  0x29   : > { %3829 = vmatprep.subr.bf16.mxu0 %v4979_v25  ;;  %v357_v6 = vld [vmem:[%s5845_s29 + $0x80] sm:$0xff]  ;;  %v373_v10 = vpack.c.bf16 %v341_v5, %v341_v5  ;;  %v5046_v15 = vld [vmem:[%s5795_s25 + $0x910] ss:$8 sps:$4 sm:$0xff]   ;;  %v5057_v20 = vld [vmem:[%s5795_s25 + $0x134] ss:$8 sps:$4 sm:$0xff]  }
  0x2a   : > { %v5042_v7 = vld [vmem:[%s5795_s25 + $0x904] ss:$8 sps:$4 sm:$0xff]   ;;  %v5040_v9 = vld [vmem:[%s5795_s25 + $0x900] ss:$8 sps:$4 sm:$0xff]   ;;  %v389_v11 = vpack.c.bf16 %v357_v6, %v357_v6  ;;  %v5060_v21 = vld [vmem:[%s5795_s25 + $0x934] ss:$8 sps:$4 sm:$0xff]  }
  0x2b   : > { %3502 = vmatpush1.bf16.msra.mxu1 %v4981_v26  ;;  %v5051_v16 = vld [vmem:[%s5795_s25 + $0x124] ss:$8 sps:$4 sm:$0xff]   ;;  %v5049_v18 = vld [vmem:[%s5795_s25 + $0x120] ss:$8 sps:$4 sm:$0xff]   ;;  %v5055_v22 = vld [vmem:[%s5795_s25 + $0x130] ss:$8 sps:$4 sm:$0xff]  }
  0x2c   : > { %3830 = vmatpush1.bf16.msra.mxu0 %v4982_v27  ;;  %3503 = vmatprep.subr.bf16.mxu1 %v4983_v28  ;;  %v5054_v17 = vld [vmem:[%s5795_s25 + $0x924] ss:$8 sps:$4 sm:$0xff]   ;;  %v5052_v19 = vld [vmem:[%s5795_s25 + $0x920] ss:$8 sps:$4 sm:$0xff]   ;;  %v5058_v23 = vld [vmem:[%s5795_s25 + $0x930] ss:$8 sps:$4 sm:$0xff]  }
  0x2d   : > { %3831 = vmatprep.subr.bf16.mxu0 %v4985_v29  ;;  %v5063_v24 = vld [vmem:[%s5795_s25 + $0x144] ss:$8 sps:$4 sm:$0xff]   ;;  %v5061_v26 = vld [vmem:[%s5795_s25 + $0x140] ss:$8 sps:$4 sm:$0xff]   ;;  %v5069_v28 = vld [vmem:[%s5795_s25 + $0x154] ss:$8 sps:$4 sm:$0xff]  }
  0x2e   : > { %v5066_v25 = vld [vmem:[%s5795_s25 + $0x944] ss:$8 sps:$4 sm:$0xff]   ;;  %v5064_v27 = vld [vmem:[%s5795_s25 + $0x940] ss:$8 sps:$4 sm:$0xff]   ;;  %v5072_v29 = vld [vmem:[%s5795_s25 + $0x954] ss:$8 sps:$4 sm:$0xff]  }
  0x2f   : > { %3504 = vmatpush1.bf16.msra.mxu1 %v4987_v30  ;;  %v5067_v30 = vld [vmem:[%s5795_s25 + $0x150] ss:$8 sps:$4 sm:$0xff]   ;;  %v5085_v46 = vld [vmem:[%s5795_s25 + $0x180] ss:$8 sps:$4 sm:$0xff]   ;;  %v5093_v48 = vld [vmem:[%s5795_s25 + $0x194] ss:$8 sps:$4 sm:$0xff]  }
  0x30   : > { %3832 = vmatpush1.bf16.msra.mxu0 %v4988_v31  ;;  %3505 = vmatprep.subr.bf16.mxu1 %v4989_v32  ;;  %v5070_v31 = vld [vmem:[%s5795_s25 + $0x950] ss:$8 sps:$4 sm:$0xff]   ;;  %v5075_v32 = vld [vmem:[%s5795_s25 + $0x164] ss:$8 sps:$4 sm:$0xff]   ;;  %v5121_v6 = vld [vmem:[%s5795_s25 + $0x1e0] ss:$8 sps:$4 sm:$0xff]  }
  0x31   : > { %3833 = vmatprep.subr.bf16.mxu0 %v4991_v33  ;;  %v5078_v33 = vld [vmem:[%s5795_s25 + $0x964] ss:$8 sps:$4 sm:$0xff]   ;;  %v5091_v50 = vld [vmem:[%s5795_s25 + $0x190] ss:$8 sps:$4 sm:$0xff]  }
  0x32   : > { %v5102_v53 = vld [vmem:[%s5795_s25 + $0x9a4] ss:$8 sps:$4 sm:$0xff]  }
  0x33   : > { %3506 = vmatpush1.bf16.msra.mxu1 %v4993_v34  ;;  %v344_v34 = vld [vmem:[%s5845_s29 + $0x18] sm:$0xff]  ;;  %v5126_v5 = vld [vmem:[%s5795_s25 + $0x9e4] ss:$8 sps:$4 sm:$0xff]  }
  0x34   : > { %3834 = vmatpush1.bf16.msra.mxu0 %v4994_v35  ;;  %3507 = vmatprep.subr.bf16.mxu1 %v4995_v36  ;;  %v5073_v35 = vld [vmem:[%s5795_s25 + $0x160] ss:$8 sps:$4 sm:$0xff]   ;;  %v376_v36 = vpack.c.bf16 %v344_v34, %v344_v34  ;;  %v5151_v34 = vld [vmem:[%s5795_s25 + $0x230] ss:$8 sps:$4 sm:$0xff]  }
  0x35   : > { %3835 = vmatprep.subr.bf16.mxu0 %v4997_v37  ;;  %v5076_v37 = vld [vmem:[%s5795_s25 + $0x960] ss:$8 sps:$4 sm:$0xff]  }
  0x37   : > { %3508 = vmatpush1.bf16.msra.mxu1 %v4999_v38  ;;  %v360_v38 = vld [vmem:[%s5845_s29 + $0x98] sm:$0xff] }
  0x38   : > { %3836 = vmatpush1.bf16.msra.mxu0 %v5000_v39  ;;  %3509 = vmatprep.subr.bf16.mxu1 %v5001_v40  ;;  %v5081_v39 = vld [vmem:[%s5795_s25 + $0x174] ss:$8 sps:$4 sm:$0xff]  }
  0x39   : > { %3837 = vmatprep.subr.bf16.mxu0 %v5003_v41  ;;  %v5084_v40 = vld [vmem:[%s5795_s25 + $0x974] ss:$8 sps:$4 sm:$0xff]   ;;  %v392_v41 = vpack.c.bf16 %v360_v38, %v360_v38  ;;  %v5157_v38 = vld [vmem:[%s5795_s25 + $0x240] ss:$8 sps:$4 sm:$0xff]  }
  0x3b   : > { %3510 = vmatpush1.bf16.msra.mxu1 %v5005_v42  ;;  %v5079_v42 = vld [vmem:[%s5795_s25 + $0x170] ss:$8 sps:$4 sm:$0xff]  }
  0x3c   : > { %3838 = vmatpush1.bf16.msra.mxu0 %v5006_v43  ;;  %3511 = vmatprep.subr.bf16.mxu1 %v5007_v44  ;;  %v5082_v43 = vld [vmem:[%s5795_s25 + $0x970] ss:$8 sps:$4 sm:$0xff]   ;;  %v5087_v44 = vld [vmem:[%s5795_s25 + $0x184] ss:$8 sps:$4 sm:$0xff]  }
  0x3d   : > { %3839 = vmatprep.subr.bf16.mxu0 %v5009_v45  ;;  %v5090_v45 = vld [vmem:[%s5795_s25 + $0x984] ss:$8 sps:$4 sm:$0xff]  }
  0x3f   : > { %3512 = vmatpush1.bf16.msra.mxu1 %v5011_v47  ;;  %v5088_v47 = vld [vmem:[%s5795_s25 + $0x980] ss:$8 sps:$4 sm:$0xff]  }
  0x40   : > { %3840 = vmatpush1.bf16.msra.mxu0 %v5012_v49  ;;  %3513 = vmatprep.subr.bf16.mxu1 %v5013_v51  ;;  %v5096_v49 = vld [vmem:[%s5795_s25 + $0x994] ss:$8 sps:$4 sm:$0xff]   ;;  %v5094_v51 = vld [vmem:[%s5795_s25 + $0x990] ss:$8 sps:$4 sm:$0xff]  }
  0x41   : > { %3841 = vmatprep.subr.bf16.mxu0 %v5015_v52  ;;  %v5099_v52 = vld [vmem:[%s5795_s25 + $0x1a4] ss:$8 sps:$4 sm:$0xff]  }
  0x43   : > { %3514 = vmatpush1.bf16.msra.mxu1 %v5017_v54  ;;  %v5097_v54 = vld [vmem:[%s5795_s25 + $0x1a0] ss:$8 sps:$4 sm:$0xff]  }
  0x44   : > { %3842 = vmatpush1.bf16.msra.mxu0 %v5018_v55  ;;  %3515 = vmatprep.subr.bf16.mxu1 %v5019_v56  ;;  %v5100_v55 = vld [vmem:[%s5795_s25 + $0x9a0] ss:$8 sps:$4 sm:$0xff]   ;;  %v5105_v56 = vld [vmem:[%s5795_s25 + $0x1b4] ss:$8 sps:$4 sm:$0xff]  }
  0x45   : > { %3843 = vmatprep.subr.bf16.mxu0 %v5021_v57  ;;  %v5108_v57 = vld [vmem:[%s5795_s25 + $0x9b4] ss:$8 sps:$4 sm:$0xff]  }
  0x47   : > { %3516 = vmatpush1.bf16.msra.mxu1 %v5023_v58  ;;  %v5103_v58 = vld [vmem:[%s5795_s25 + $0x1b0] ss:$8 sps:$4 sm:$0xff]  }
  0x48   : > { %3844 = vmatpush1.bf16.msra.mxu0 %v5024_v59  ;;  %3517 = vmatprep.subr.bf16.mxu1 %v5025_v60  ;;  %v5106_v59 = vld [vmem:[%s5795_s25 + $0x9b0] ss:$8 sps:$4 sm:$0xff]   ;;  %v5111_v60 = vld [vmem:[%s5795_s25 + $0x1c4] ss:$8 sps:$4 sm:$0xff]  }
  0x49   : > { %3845 = vmatprep.subr.bf16.mxu0 %v5027_v61  ;;  %v5114_v61 = vld [vmem:[%s5795_s25 + $0x9c4] ss:$8 sps:$4 sm:$0xff]  }
  0x4b   : > { %3518 = vmatpush1.bf16.msra.mxu1 %v5029_v62  ;;  %v5109_v62 = vld [vmem:[%s5795_s25 + $0x1c0] ss:$8 sps:$4 sm:$0xff]  }
  0x4c   : > { %3846 = vmatpush1.bf16.msra.mxu0 %v5030_v63  ;;  %3519 = vmatprep.subr.bf16.mxu1 %v5031_v0  ;;  %v5112_v63 = vld [vmem:[%s5795_s25 + $0x9c0] ss:$8 sps:$4 sm:$0xff]   ;;  %v5117_v0 = vld [vmem:[%s5795_s25 + $0x1d4] ss:$8 sps:$4 sm:$0xff]  }
  0x4d   : > { %3847 = vmatprep.subr.bf16.mxu0 %v5033_v1  ;;  %v5120_v1 = vld [vmem:[%s5795_s25 + $0x9d4] ss:$8 sps:$4 sm:$0xff]  }
  0x4f   : > { %3520 = vmatpush1.bf16.msra.mxu1 %v5035_v2  ;;  %v5115_v2 = vld [vmem:[%s5795_s25 + $0x1d0] ss:$8 sps:$4 sm:$0xff]  }
  0x50   : > { %3848 = vmatpush1.bf16.msra.mxu0 %v5036_v3  ;;  %3530 = vmatprep.subr.bf16.mxu1 %v5039_v4  ;;  %v5118_v3 = vld [vmem:[%s5795_s25 + $0x9d0] ss:$8 sps:$4 sm:$0xff]   ;;  %v5123_v4 = vld [vmem:[%s5795_s25 + $0x1e4] ss:$8 sps:$4 sm:$0xff]  }
  0x51   : > { %3858 = vmatprep.subr.bf16.mxu0 %v5042_v7  ;;  %v5124_v7 = vld [vmem:[%s5795_s25 + $0x9e0] ss:$8 sps:$4 sm:$0xff]  }
  0x52   : > { %3522 = vmatmul.mubr.bf16.vlgmr.msra.gmra.mrb[0].mxu1 %v373_v10  ;;  %v5127_v10 = vld [vmem:[%s5795_s25 + $0x1f0] ss:$8 sps:$4 sm:$0xff]  }
  0x53   : > { %3850 = vmatmul.mubr.bf16.vlgmr.msra.gmra.mrb[0].mxu0 %v389_v11  ;;  %3531 = vmatpush1.bf16.msra.mxu1 %v5037_v8  ;;  %v5129_v8 = vld [vmem:[%s5795_s25 + $0x1f4] ss:$8 sps:$4 sm:$0xff]   ;;  %v5130_v11 = vld [vmem:[%s5795_s25 + $0x9f0] ss:$8 sps:$4 sm:$0xff]  }
  0x54   : > { %3859 = vmatpush1.bf16.msra.mxu0 %v5040_v9  ;;  %3532 = vmatprep.subr.bf16.mxu1 %v5045_v12  ;;  %v5132_v9 = vld [vmem:[%s5795_s25 + $0x9f4] ss:$8 sps:$4 sm:$0xff]   ;;  %v5135_v12 = vld [vmem:[%s5795_s25 + $0x204] ss:$8 sps:$4 sm:$0xff]  }
  0x55   : > { %3860 = vmatprep.subr.bf16.mxu0 %v5048_v13  ;;  %3562 = vmatprep.mubr.bf16.mxu1 %v376_v36  ;;  %v343_v13 = vld [vmem:[%s5845_s29 + $0x10] sm:$0xff]  ;;  %v5159_v36 = vld [vmem:[%s5795_s25 + $0x244] ss:$8 sps:$4 sm:$0xff]  }
  0x56   : > { %3890 = vmatprep.mubr.bf16.mxu0 %v392_v41  ;;  %v5168_v41 = vld [vmem:[%s5795_s25 + $0xa54] ss:$8 sps:$4 sm:$0xff]  }
  0x57   : > { %3533 = vmatpush1.bf16.msra.mxu1 %v5043_v14  ;;  %v359_v14 = vld [vmem:[%s5845_s29 + $0x90] sm:$0xff] }
  0x58   : > { %3861 = vmatpush1.bf16.msra.mxu0 %v5046_v15  ;;  %3534 = vmatprep.subr.bf16.mxu1 %v5051_v16  ;;  %v5138_v15 = vld [vmem:[%s5795_s25 + $0xa04] ss:$8 sps:$4 sm:$0xff]   ;;  %v5133_v16 = vld [vmem:[%s5795_s25 + $0x200] ss:$8 sps:$4 sm:$0xff]  }
  0x59   : > { %3862 = vmatprep.subr.bf16.mxu0 %v5054_v17  ;;  %v5136_v17 = vld [vmem:[%s5795_s25 + $0xa00] ss:$8 sps:$4 sm:$0xff]  }
  0x5b   : > { %3535 = vmatpush1.bf16.msra.mxu1 %v5049_v18  ;;  %v375_v18 = vpack.c.bf16 %v343_v13, %v343_v13  ;;  %v5222_v13 = vld [vmem:[%s5795_s25 + $0xae4] ss:$8 sps:$4 sm:$0xff]  }
  0x5c   : > { %3863 = vmatpush1.bf16.msra.mxu0 %v5052_v19  ;;  %3536 = vmatprep.subr.bf16.mxu1 %v5057_v20  ;;  %v391_v19 = vpack.c.bf16 %v359_v14, %v359_v14  ;;  %v5141_v20 = vld [vmem:[%s5795_s25 + $0x214] ss:$8 sps:$4 sm:$0xff]   ;;  %v5217_v14 = vld [vmem:[%s5795_s25 + $0x2e0] ss:$8 sps:$4 sm:$0xff]  }
  0x5d   : > { %3864 = vmatprep.subr.bf16.mxu0 %v5060_v21  ;;  %v5144_v21 = vld [vmem:[%s5795_s25 + $0xa14] ss:$8 sps:$4 sm:$0xff]  }
  0x5f   : > { %3537 = vmatpush1.bf16.msra.mxu1 %v5055_v22  ;;  %v346_v22 = vld [vmem:[%s5845_s29 + $0x28] sm:$0xff] }
  0x60   : > { %3865 = vmatpush1.bf16.msra.mxu0 %v5058_v23  ;;  %3538 = vmatprep.subr.bf16.mxu1 %v5063_v24  ;;  %v5139_v23 = vld [vmem:[%s5795_s25 + $0x210] ss:$8 sps:$4 sm:$0xff]   ;;  %v378_v24 = vpack.c.bf16 %v346_v22, %v346_v22  ;;  %v361_v22 = vld [vmem:[%s5845_s29 + $0xa0] sm:$0xff] }
  0x61   : > { %3866 = vmatprep.subr.bf16.mxu0 %v5066_v25  ;;  %v5142_v25 = vld [vmem:[%s5795_s25 + $0xa10] ss:$8 sps:$4 sm:$0xff]  }
  0x63   : > { %3539 = vmatpush1.bf16.msra.mxu1 %v5061_v26  ;;  %v362_v26 = vld [vmem:[%s5845_s29 + $0xa8] sm:$0xff] }
  0x64   : > { %3867 = vmatpush1.bf16.msra.mxu0 %v5064_v27  ;;  %3540 = vmatprep.subr.bf16.mxu1 %v5069_v28  ;;  %v5147_v27 = vld [vmem:[%s5795_s25 + $0x224] ss:$8 sps:$4 sm:$0xff]  }
  0x65   : > { %3868 = vmatprep.subr.bf16.mxu0 %v5072_v29  ;;  %v5150_v28 = vld [vmem:[%s5795_s25 + $0xa24] ss:$8 sps:$4 sm:$0xff]   ;;  %v394_v29 = vpack.c.bf16 %v362_v26, %v362_v26 }
  0x67   : > { %3541 = vmatpush1.bf16.msra.mxu1 %v5067_v30  ;;  %v5145_v30 = vld [vmem:[%s5795_s25 + $0x220] ss:$8 sps:$4 sm:$0xff]  }
  0x68   : > { %3869 = vmatpush1.bf16.msra.mxu0 %v5070_v31  ;;  %3542 = vmatprep.subr.bf16.mxu1 %v5075_v32  ;;  %v5148_v31 = vld [vmem:[%s5795_s25 + $0xa20] ss:$8 sps:$4 sm:$0xff]   ;;  %v5153_v32 = vld [vmem:[%s5795_s25 + $0x234] ss:$8 sps:$4 sm:$0xff]  }
  0x69   : > { %3870 = vmatprep.subr.bf16.mxu0 %v5078_v33  ;;  %v5156_v33 = vld [vmem:[%s5795_s25 + $0xa34] ss:$8 sps:$4 sm:$0xff]  }
  0x6b   : > { %3543 = vmatpush1.bf16.msra.mxu1 %v5073_v35  ;;  %v5154_v35 = vld [vmem:[%s5795_s25 + $0xa30] ss:$8 sps:$4 sm:$0xff]  }
  0x6c   : > { %3871 = vmatpush1.bf16.msra.mxu0 %v5076_v37  ;;  %3544 = vmatprep.subr.bf16.mxu1 %v5081_v39  ;;  %v5162_v37 = vld [vmem:[%s5795_s25 + $0xa44] ss:$8 sps:$4 sm:$0xff]   ;;  %v5160_v39 = vld [vmem:[%s5795_s25 + $0xa40] ss:$8 sps:$4 sm:$0xff]  }
  0x6d   : > { %3872 = vmatprep.subr.bf16.mxu0 %v5084_v40  ;;  %v5165_v40 = vld [vmem:[%s5795_s25 + $0x254] ss:$8 sps:$4 sm:$0xff]  }
  0x6f   : > { %3545 = vmatpush1.bf16.msra.mxu1 %v5079_v42  ;;  %v5163_v42 = vld [vmem:[%s5795_s25 + $0x250] ss:$8 sps:$4 sm:$0xff]  }
  0x70   : > { %3873 = vmatpush1.bf16.msra.mxu0 %v5082_v43  ;;  %3546 = vmatprep.subr.bf16.mxu1 %v5087_v44  ;;  %v5166_v43 = vld [vmem:[%s5795_s25 + $0xa50] ss:$8 sps:$4 sm:$0xff]   ;;  %v5171_v44 = vld [vmem:[%s5795_s25 + $0x264] ss:$8 sps:$4 sm:$0xff]  }
  0x71   : > { %3874 = vmatprep.subr.bf16.mxu0 %v5090_v45  ;;  %v5174_v45 = vld [vmem:[%s5795_s25 + $0xa64] ss:$8 sps:$4 sm:$0xff]  }
  0x73   : > { %3547 = vmatpush1.bf16.msra.mxu1 %v5085_v46  ;;  %v5169_v46 = vld [vmem:[%s5795_s25 + $0x260] ss:$8 sps:$4 sm:$0xff]  }
  0x74   : > { %3875 = vmatpush1.bf16.msra.mxu0 %v5088_v47  ;;  %3548 = vmatprep.subr.bf16.mxu1 %v5093_v48  ;;  %v5172_v47 = vld [vmem:[%s5795_s25 + $0xa60] ss:$8 sps:$4 sm:$0xff]   ;;  %v5177_v48 = vld [vmem:[%s5795_s25 + $0x274] ss:$8 sps:$4 sm:$0xff]  }
  0x75   : > { %3876 = vmatprep.subr.bf16.mxu0 %v5096_v49  ;;  %v5180_v49 = vld [vmem:[%s5795_s25 + $0xa74] ss:$8 sps:$4 sm:$0xff]  }
  0x77   : > { %3549 = vmatpush1.bf16.msra.mxu1 %v5091_v50  ;;  %v5175_v50 = vld [vmem:[%s5795_s25 + $0x270] ss:$8 sps:$4 sm:$0xff]  }
  0x78   : > { %3877 = vmatpush1.bf16.msra.mxu0 %v5094_v51  ;;  %3550 = vmatprep.subr.bf16.mxu1 %v5099_v52  ;;  %v5178_v51 = vld [vmem:[%s5795_s25 + $0xa70] ss:$8 sps:$4 sm:$0xff]   ;;  %v5183_v52 = vld [vmem:[%s5795_s25 + $0x284] ss:$8 sps:$4 sm:$0xff]  }
  0x79   : > { %3878 = vmatprep.subr.bf16.mxu0 %v5102_v53  ;;  %v5186_v53 = vld [vmem:[%s5795_s25 + $0xa84] ss:$8 sps:$4 sm:$0xff]  }
  0x7b   : > { %3551 = vmatpush1.bf16.msra.mxu1 %v5097_v54  ;;  %v5181_v54 = vld [vmem:[%s5795_s25 + $0x280] ss:$8 sps:$4 sm:$0xff]  }
  0x7c   : > { %3879 = vmatpush1.bf16.msra.mxu0 %v5100_v55  ;;  %3552 = vmatprep.subr.bf16.mxu1 %v5105_v56  ;;  %v5184_v55 = vld [vmem:[%s5795_s25 + $0xa80] ss:$8 sps:$4 sm:$0xff]   ;;  %v5189_v56 = vld [vmem:[%s5795_s25 + $0x294] ss:$8 sps:$4 sm:$0xff]  }
  0x7d   : > { %3880 = vmatprep.subr.bf16.mxu0 %v5108_v57  ;;  %v5192_v57 = vld [vmem:[%s5795_s25 + $0xa94] ss:$8 sps:$4 sm:$0xff]  }
  0x7f   : > { %3553 = vmatpush1.bf16.msra.mxu1 %v5103_v58  ;;  %v5187_v58 = vld [vmem:[%s5795_s25 + $0x290] ss:$8 sps:$4 sm:$0xff]  }
  0x80   : > { %3881 = vmatpush1.bf16.msra.mxu0 %v5106_v59  ;;  %3554 = vmatprep.subr.bf16.mxu1 %v5111_v60  ;;  %v5190_v59 = vld [vmem:[%s5795_s25 + $0xa90] ss:$8 sps:$4 sm:$0xff]   ;;  %v5195_v60 = vld [vmem:[%s5795_s25 + $0x2a4] ss:$8 sps:$4 sm:$0xff]  }
  0x81   : > { %3882 = vmatprep.subr.bf16.mxu0 %v5114_v61  ;;  %v5198_v61 = vld [vmem:[%s5795_s25 + $0xaa4] ss:$8 sps:$4 sm:$0xff]  }
  0x83   : > { %3555 = vmatpush1.bf16.msra.mxu1 %v5109_v62  ;;  %v5193_v62 = vld [vmem:[%s5795_s25 + $0x2a0] ss:$8 sps:$4 sm:$0xff]  }
  0x84   : > { %3883 = vmatpush1.bf16.msra.mxu0 %v5112_v63  ;;  %3556 = vmatprep.subr.bf16.mxu1 %v5117_v0  ;;  %v5196_v63 = vld [vmem:[%s5795_s25 + $0xaa0] ss:$8 sps:$4 sm:$0xff]   ;;  %v5201_v0 = vld [vmem:[%s5795_s25 + $0x2b4] ss:$8 sps:$4 sm:$0xff]  }
  0x85   : > { %3884 = vmatprep.subr.bf16.mxu0 %v5120_v1  ;;  %v5204_v1 = vld [vmem:[%s5795_s25 + $0xab4] ss:$8 sps:$4 sm:$0xff]  }
  0x87   : > { %3557 = vmatpush1.bf16.msra.mxu1 %v5115_v2  ;;  %v5199_v2 = vld [vmem:[%s5795_s25 + $0x2b0] ss:$8 sps:$4 sm:$0xff]  }
  0x88   : > { %3885 = vmatpush1.bf16.msra.mxu0 %v5118_v3  ;;  %3558 = vmatprep.subr.bf16.mxu1 %v5123_v4  ;;  %v5202_v3 = vld [vmem:[%s5795_s25 + $0xab0] ss:$8 sps:$4 sm:$0xff]   ;;  %v5207_v4 = vld [vmem:[%s5795_s25 + $0x2c4] ss:$8 sps:$4 sm:$0xff]  }
  0x89   : > { %3886 = vmatprep.subr.bf16.mxu0 %v5126_v5  ;;  %v5210_v5 = vld [vmem:[%s5795_s25 + $0xac4] ss:$8 sps:$4 sm:$0xff]  }
  0x8b   : > { %3559 = vmatpush1.bf16.msra.mxu1 %v5121_v6  ;;  %v5205_v6 = vld [vmem:[%s5795_s25 + $0x2c0] ss:$8 sps:$4 sm:$0xff]  }
  0x8c   : > { %3887 = vmatpush1.bf16.msra.mxu0 %v5124_v7  ;;  %3560 = vmatprep.subr.bf16.mxu1 %v5129_v8  ;;  %v5208_v7 = vld [vmem:[%s5795_s25 + $0xac0] ss:$8 sps:$4 sm:$0xff]   ;;  %v5213_v8 = vld [vmem:[%s5795_s25 + $0x2d4] ss:$8 sps:$4 sm:$0xff]  }
  0x8d   : > { %3888 = vmatprep.subr.bf16.mxu0 %v5132_v9  ;;  %v5216_v9 = vld [vmem:[%s5795_s25 + $0xad4] ss:$8 sps:$4 sm:$0xff]  }
  0x8f   : > { %3561 = vmatpush1.bf16.msra.mxu1 %v5127_v10  ;;  %v5211_v10 = vld [vmem:[%s5795_s25 + $0x2d0] ss:$8 sps:$4 sm:$0xff]  }
  0x90   : > { %3889 = vmatpush1.bf16.msra.mxu0 %v5130_v11  ;;  %3571 = vmatprep.subr.bf16.mxu1 %v5135_v12  ;;  %v5214_v11 = vld [vmem:[%s5795_s25 + $0xad0] ss:$8 sps:$4 sm:$0xff]   ;;  %v5219_v12 = vld [vmem:[%s5795_s25 + $0x2e4] ss:$8 sps:$4 sm:$0xff]  }
  0x91   : > { %3899 = vmatprep.subr.bf16.mxu0 %v5138_v15  ;;  %v5220_v15 = vld [vmem:[%s5795_s25 + $0xae0] ss:$8 sps:$4 sm:$0xff]  }
  0x92   : > { %3563 = vmatmul.mubr.bf16.vlgmr.msra.gmra.mrb[0].mxu1 %v375_v18  ;;  %v5223_v18 = vld [vmem:[%s5795_s25 + $0x2f0] ss:$8 sps:$4 sm:$0xff]  }
  0x93   : > { %3891 = vmatmul.mubr.bf16.vlgmr.msra.gmra.mrb[0].mxu0 %v391_v19  ;;  %3572 = vmatpush1.bf16.msra.mxu1 %v5133_v16  ;;  %v5225_v16 = vld [vmem:[%s5795_s25 + $0x2f4] ss:$8 sps:$4 sm:$0xff]   ;;  %v5226_v19 = vld [vmem:[%s5795_s25 + $0xaf0] ss:$8 sps:$4 sm:$0xff]  }
  0x94   : > { %3900 = vmatpush1.bf16.msra.mxu0 %v5136_v17  ;;  %3573 = vmatprep.subr.bf16.mxu1 %v5141_v20  ;;  %v5228_v17 = vld [vmem:[%s5795_s25 + $0xaf4] ss:$8 sps:$4 sm:$0xff]   ;;  %v5231_v20 = vld [vmem:[%s5795_s25 + $0x304] ss:$8 sps:$4 sm:$0xff]  }
  0x95   : > { %3901 = vmatprep.subr.bf16.mxu0 %v5144_v21  ;;  %3603 = vmatprep.mubr.bf16.mxu1 %v378_v24  ;;  %v345_v21 = vld [vmem:[%s5845_s29 + $0x20] sm:$0xff] }
  0x96   : > { %3931 = vmatprep.mubr.bf16.mxu0 %v394_v29  ;;  %v5229_v24 = vld [vmem:[%s5795_s25 + $0x300] ss:$8 sps:$4 sm:$0xff]   ;;  %v377_v26 = vpack.c.bf16 %v345_v21, %v345_v21  ;;  %v364_v29 = vld [vmem:[%s5845_s29 + $0xb8] sm:$0xff]  ;;  %v5318_v21 = vld [vmem:[%s5795_s25 + $0xbe4] ss:$8 sps:$4 sm:$0xff]  }
  0x97   : > { %3574 = vmatpush1.bf16.msra.mxu1 %v5139_v23  ;;  %v5234_v23 = vld [vmem:[%s5795_s25 + $0xb04] ss:$8 sps:$4 sm:$0xff]  }
  0x98   : > { %3902 = vmatpush1.bf16.msra.mxu0 %v5142_v25  ;;  %3575 = vmatprep.subr.bf16.mxu1 %v5147_v27  ;;  %v5232_v25 = vld [vmem:[%s5795_s25 + $0xb00] ss:$8 sps:$4 sm:$0xff]   ;;  %v393_v27 = vpack.c.bf16 %v361_v22, %v361_v22 }
  0x99   : > { %3903 = vmatprep.subr.bf16.mxu0 %v5150_v28  ;;  %v348_v28 = vld [vmem:[%s5845_s29 + $0x38] sm:$0xff]  ;;  %v5313_v22 = vld [vmem:[%s5795_s25 + $0x3e0] ss:$8 sps:$4 sm:$0xff]  }
  0x9b   : > { %3576 = vmatpush1.bf16.msra.mxu1 %v5145_v30  ;;  %v5237_v30 = vld [vmem:[%s5795_s25 + $0x314] ss:$8 sps:$4 sm:$0xff]  }
  0x9c   : > { %3904 = vmatpush1.bf16.msra.mxu0 %v5148_v31  ;;  %3577 = vmatprep.subr.bf16.mxu1 %v5153_v32  ;;  %v5240_v31 = vld [vmem:[%s5795_s25 + $0xb14] ss:$8 sps:$4 sm:$0xff]   ;;  %v380_v32 = vpack.c.bf16 %v348_v28, %v348_v28  ;;  %v5327_v28 = vld [vmem:[%s5795_s25 + $0x404] ss:$8 sps:$4 sm:$0xff]  }
  0x9d   : > { %3905 = vmatprep.subr.bf16.mxu0 %v5156_v33  ;;  %v396_v33 = vpack.c.bf16 %v364_v29, %v364_v29  ;;  %v347_v29 = vld [vmem:[%s5845_s29 + $0x30] sm:$0xff] }
  0x9f   : > { %3578 = vmatpush1.bf16.msra.mxu1 %v5151_v34  ;;  %v5235_v34 = vld [vmem:[%s5795_s25 + $0x310] ss:$8 sps:$4 sm:$0xff]  }
  0xa0   : > { %3906 = vmatpush1.bf16.msra.mxu0 %v5154_v35  ;;  %3579 = vmatprep.subr.bf16.mxu1 %v5159_v36  ;;  %v5238_v35 = vld [vmem:[%s5795_s25 + $0xb10] ss:$8 sps:$4 sm:$0xff]   ;;  %v5243_v36 = vld [vmem:[%s5795_s25 + $0x324] ss:$8 sps:$4 sm:$0xff]  }
  0xa1   : > { %3907 = vmatprep.subr.bf16.mxu0 %v5162_v37  ;;  %v5246_v37 = vld [vmem:[%s5795_s25 + $0xb24] ss:$8 sps:$4 sm:$0xff]  }
  0xa3   : > { %3580 = vmatpush1.bf16.msra.mxu1 %v5157_v38  ;;  %v5241_v38 = vld [vmem:[%s5795_s25 + $0x320] ss:$8 sps:$4 sm:$0xff]  }
  0xa4   : > { %3908 = vmatpush1.bf16.msra.mxu0 %v5160_v39  ;;  %3581 = vmatprep.subr.bf16.mxu1 %v5165_v40  ;;  %v5244_v39 = vld [vmem:[%s5795_s25 + $0xb20] ss:$8 sps:$4 sm:$0xff]   ;;  %v5249_v40 = vld [vmem:[%s5795_s25 + $0x334] ss:$8 sps:$4 sm:$0xff]  }
  0xa5   : > { %3909 = vmatprep.subr.bf16.mxu0 %v5168_v41  ;;  %v5252_v41 = vld [vmem:[%s5795_s25 + $0xb34] ss:$8 sps:$4 sm:$0xff]  }
  0xa7   : > { %3582 = vmatpush1.bf16.msra.mxu1 %v5163_v42  ;;  %v5247_v42 = vld [vmem:[%s5795_s25 + $0x330] ss:$8 sps:$4 sm:$0xff]  }
  0xa8   : > { %3910 = vmatpush1.bf16.msra.mxu0 %v5166_v43  ;;  %3583 = vmatprep.subr.bf16.mxu1 %v5171_v44  ;;  %v5250_v43 = vld [vmem:[%s5795_s25 + $0xb30] ss:$8 sps:$4 sm:$0xff]   ;;  %v5255_v44 = vld [vmem:[%s5795_s25 + $0x344] ss:$8 sps:$4 sm:$0xff]  }
  0xa9   : > { %3911 = vmatprep.subr.bf16.mxu0 %v5174_v45  ;;  %v5258_v45 = vld [vmem:[%s5795_s25 + $0xb44] ss:$8 sps:$4 sm:$0xff]  }
  0xab   : > { %3584 = vmatpush1.bf16.msra.mxu1 %v5169_v46  ;;  %v5253_v46 = vld [vmem:[%s5795_s25 + $0x340] ss:$8 sps:$4 sm:$0xff]  }
  0xac   : > { %3912 = vmatpush1.bf16.msra.mxu0 %v5172_v47  ;;  %3585 = vmatprep.subr.bf16.mxu1 %v5177_v48  ;;  %v5256_v47 = vld [vmem:[%s5795_s25 + $0xb40] ss:$8 sps:$4 sm:$0xff]   ;;  %v5261_v48 = vld [vmem:[%s5795_s25 + $0x354] ss:$8 sps:$4 sm:$0xff]  }
  0xad   : > { %3913 = vmatprep.subr.bf16.mxu0 %v5180_v49  ;;  %v5264_v49 = vld [vmem:[%s5795_s25 + $0xb54] ss:$8 sps:$4 sm:$0xff]  }
  0xaf   : > { %3586 = vmatpush1.bf16.msra.mxu1 %v5175_v50  ;;  %v5259_v50 = vld [vmem:[%s5795_s25 + $0x350] ss:$8 sps:$4 sm:$0xff]  }
  0xb0   : > { %3914 = vmatpush1.bf16.msra.mxu0 %v5178_v51  ;;  %3587 = vmatprep.subr.bf16.mxu1 %v5183_v52  ;;  %v5262_v51 = vld [vmem:[%s5795_s25 + $0xb50] ss:$8 sps:$4 sm:$0xff]   ;;  %v5267_v52 = vld [vmem:[%s5795_s25 + $0x364] ss:$8 sps:$4 sm:$0xff]  }
  0xb1   : > { %3915 = vmatprep.subr.bf16.mxu0 %v5186_v53  ;;  %v5270_v53 = vld [vmem:[%s5795_s25 + $0xb64] ss:$8 sps:$4 sm:$0xff]  }
  0xb3   : > { %3588 = vmatpush1.bf16.msra.mxu1 %v5181_v54  ;;  %v5265_v54 = vld [vmem:[%s5795_s25 + $0x360] ss:$8 sps:$4 sm:$0xff]  }
  0xb4   : > { %3916 = vmatpush1.bf16.msra.mxu0 %v5184_v55  ;;  %3589 = vmatprep.subr.bf16.mxu1 %v5189_v56  ;;  %v5268_v55 = vld [vmem:[%s5795_s25 + $0xb60] ss:$8 sps:$4 sm:$0xff]   ;;  %v5273_v56 = vld [vmem:[%s5795_s25 + $0x374] ss:$8 sps:$4 sm:$0xff]  }
  0xb5   : > { %3917 = vmatprep.subr.bf16.mxu0 %v5192_v57  ;;  %v5276_v57 = vld [vmem:[%s5795_s25 + $0xb74] ss:$8 sps:$4 sm:$0xff]  }
  0xb7   : > { %3590 = vmatpush1.bf16.msra.mxu1 %v5187_v58  ;;  %v5271_v58 = vld [vmem:[%s5795_s25 + $0x370] ss:$8 sps:$4 sm:$0xff]  }
  0xb8   : > { %3918 = vmatpush1.bf16.msra.mxu0 %v5190_v59  ;;  %3591 = vmatprep.subr.bf16.mxu1 %v5195_v60  ;;  %v5274_v59 = vld [vmem:[%s5795_s25 + $0xb70] ss:$8 sps:$4 sm:$0xff]   ;;  %v5279_v60 = vld [vmem:[%s5795_s25 + $0x384] ss:$8 sps:$4 sm:$0xff]  }
  0xb9   : > { %3919 = vmatprep.subr.bf16.mxu0 %v5198_v61  ;;  %v5282_v61 = vld [vmem:[%s5795_s25 + $0xb84] ss:$8 sps:$4 sm:$0xff]  }
  0xbb   : > { %3592 = vmatpush1.bf16.msra.mxu1 %v5193_v62  ;;  %v5277_v62 = vld [vmem:[%s5795_s25 + $0x380] ss:$8 sps:$4 sm:$0xff]  }
  0xbc   : > { %3920 = vmatpush1.bf16.msra.mxu0 %v5196_v63  ;;  %3593 = vmatprep.subr.bf16.mxu1 %v5201_v0  ;;  %v5280_v63 = vld [vmem:[%s5795_s25 + $0xb80] ss:$8 sps:$4 sm:$0xff]   ;;  %v5285_v0 = vld [vmem:[%s5795_s25 + $0x394] ss:$8 sps:$4 sm:$0xff]  }
  0xbd   : > { %3921 = vmatprep.subr.bf16.mxu0 %v5204_v1  ;;  %v5288_v1 = vld [vmem:[%s5795_s25 + $0xb94] ss:$8 sps:$4 sm:$0xff]  }
  0xbf   : > { %3594 = vmatpush1.bf16.msra.mxu1 %v5199_v2  ;;  %v5283_v2 = vld [vmem:[%s5795_s25 + $0x390] ss:$8 sps:$4 sm:$0xff]  }
  0xc0   : > { %3922 = vmatpush1.bf16.msra.mxu0 %v5202_v3  ;;  %3595 = vmatprep.subr.bf16.mxu1 %v5207_v4  ;;  %v5286_v3 = vld [vmem:[%s5795_s25 + $0xb90] ss:$8 sps:$4 sm:$0xff]   ;;  %v5291_v4 = vld [vmem:[%s5795_s25 + $0x3a4] ss:$8 sps:$4 sm:$0xff]  }
  0xc1   : > { %3923 = vmatprep.subr.bf16.mxu0 %v5210_v5  ;;  %v5294_v5 = vld [vmem:[%s5795_s25 + $0xba4] ss:$8 sps:$4 sm:$0xff]  }
  0xc3   : > { %3596 = vmatpush1.bf16.msra.mxu1 %v5205_v6  ;;  %v5289_v6 = vld [vmem:[%s5795_s25 + $0x3a0] ss:$8 sps:$4 sm:$0xff]  }
  0xc4   : > { %3924 = vmatpush1.bf16.msra.mxu0 %v5208_v7  ;;  %3597 = vmatprep.subr.bf16.mxu1 %v5213_v8  ;;  %v5292_v7 = vld [vmem:[%s5795_s25 + $0xba0] ss:$8 sps:$4 sm:$0xff]   ;;  %v5297_v8 = vld [vmem:[%s5795_s25 + $0x3b4] ss:$8 sps:$4 sm:$0xff]  }
  0xc5   : > { %3925 = vmatprep.subr.bf16.mxu0 %v5216_v9  ;;  %v5300_v9 = vld [vmem:[%s5795_s25 + $0xbb4] ss:$8 sps:$4 sm:$0xff]  }
  0xc7   : > { %3598 = vmatpush1.bf16.msra.mxu1 %v5211_v10  ;;  %v5295_v10 = vld [vmem:[%s5795_s25 + $0x3b0] ss:$8 sps:$4 sm:$0xff]  }
  0xc8   : > { %3926 = vmatpush1.bf16.msra.mxu0 %v5214_v11  ;;  %3599 = vmatprep.subr.bf16.mxu1 %v5219_v12  ;;  %v5298_v11 = vld [vmem:[%s5795_s25 + $0xbb0] ss:$8 sps:$4 sm:$0xff]   ;;  %v5303_v12 = vld [vmem:[%s5795_s25 + $0x3c4] ss:$8 sps:$4 sm:$0xff]  }
  0xc9   : > { %3927 = vmatprep.subr.bf16.mxu0 %v5222_v13  ;;  %v5306_v13 = vld [vmem:[%s5795_s25 + $0xbc4] ss:$8 sps:$4 sm:$0xff]  }
  0xcb   : > { %3600 = vmatpush1.bf16.msra.mxu1 %v5217_v14  ;;  %v5301_v14 = vld [vmem:[%s5795_s25 + $0x3c0] ss:$8 sps:$4 sm:$0xff]  }
  0xcc   : > { %3928 = vmatpush1.bf16.msra.mxu0 %v5220_v15  ;;  %3601 = vmatprep.subr.bf16.mxu1 %v5225_v16  ;;  %v5304_v15 = vld [vmem:[%s5795_s25 + $0xbc0] ss:$8 sps:$4 sm:$0xff]   ;;  %v5309_v16 = vld [vmem:[%s5795_s25 + $0x3d4] ss:$8 sps:$4 sm:$0xff]  }
  0xcd   : > { %3929 = vmatprep.subr.bf16.mxu0 %v5228_v17  ;;  %v5312_v17 = vld [vmem:[%s5795_s25 + $0xbd4] ss:$8 sps:$4 sm:$0xff]  }
  0xcf   : > { %3602 = vmatpush1.bf16.msra.mxu1 %v5223_v18  ;;  %v5307_v18 = vld [vmem:[%s5795_s25 + $0x3d0] ss:$8 sps:$4 sm:$0xff]  }
  0xd0   : > { %3930 = vmatpush1.bf16.msra.mxu0 %v5226_v19  ;;  %3612 = vmatprep.subr.bf16.mxu1 %v5231_v20  ;;  %v5310_v19 = vld [vmem:[%s5795_s25 + $0xbd0] ss:$8 sps:$4 sm:$0xff]   ;;  %v5315_v20 = vld [vmem:[%s5795_s25 + $0x3e4] ss:$8 sps:$4 sm:$0xff]  }
  0xd1   : > { %3940 = vmatprep.subr.bf16.mxu0 %v5234_v23  ;;  %v5316_v23 = vld [vmem:[%s5795_s25 + $0xbe0] ss:$8 sps:$4 sm:$0xff]  }
  0xd2   : > { %3604 = vmatmul.mubr.bf16.vlgmr.msra.gmra.mrb[0].mxu1 %v377_v26  ;;  %v5319_v26 = vld [vmem:[%s5795_s25 + $0x3f0] ss:$8 sps:$4 sm:$0xff]  }
  0xd3   : > { %3932 = vmatmul.mubr.bf16.vlgmr.msra.gmra.mrb[0].mxu0 %v393_v27  ;;  %3613 = vmatpush1.bf16.msra.mxu1 %v5229_v24  ;;  %v5321_v24 = vld [vmem:[%s5795_s25 + $0x3f4] ss:$8 sps:$4 sm:$0xff]   ;;  %v5322_v27 = vld [vmem:[%s5795_s25 + $0xbf0] ss:$8 sps:$4 sm:$0xff]  }
  0xd4   : > { %3941 = vmatpush1.bf16.msra.mxu0 %v5232_v25  ;;  %3614 = vmatprep.subr.bf16.mxu1 %v5237_v30  ;;  %v5324_v25 = vld [vmem:[%s5795_s25 + $0xbf4] ss:$8 sps:$4 sm:$0xff]  }
  0xd5   : > { %3942 = vmatprep.subr.bf16.mxu0 %v5240_v31  ;;  %3644 = vmatprep.mubr.bf16.mxu1 %v380_v32  ;;  %v363_v30 = vld [vmem:[%s5845_s29 + $0xb0] sm:$0xff]  ;;  %v5330_v31 = vld [vmem:[%s5795_s25 + $0xc04] ss:$8 sps:$4 sm:$0xff]   ;;  %v5325_v32 = vld [vmem:[%s5795_s25 + $0x400] ss:$8 sps:$4 sm:$0xff]  }
  0xd6   : > { %3972 = vmatprep.mubr.bf16.mxu0 %v396_v33  ;;  %v5328_v33 = vld [vmem:[%s5795_s25 + $0xc00] ss:$8 sps:$4 sm:$0xff]  }
  0xd7   : > { %3615 = vmatpush1.bf16.msra.mxu1 %v5235_v34  ;;  %v379_v34 = vpack.c.bf16 %v347_v29, %v347_v29  ;;  %v5414_v29 = vld [vmem:[%s5795_s25 + $0xce4] ss:$8 sps:$4 sm:$0xff]  }
  0xd8   : > { %3943 = vmatpush1.bf16.msra.mxu0 %v5238_v35  ;;  %3616 = vmatprep.subr.bf16.mxu1 %v5243_v36  ;;  %v395_v35 = vpack.c.bf16 %v363_v30, %v363_v30  ;;  %v350_v36 = vld [vmem:[%s5845_s29 + $0x48] sm:$0xff] }
  0xd9   : > { %3944 = vmatprep.subr.bf16.mxu0 %v5246_v37  ;;  %v366_v37 = vld [vmem:[%s5845_s29 + $0xc8] sm:$0xff] }
  0xda   : > { %v5409_v30 = vld [vmem:[%s5795_s25 + $0x4e0] ss:$8 sps:$4 sm:$0xff]  }
  0xdb   : > { %3617 = vmatpush1.bf16.msra.mxu1 %v5241_v38  ;;  %v5333_v38 = vld [vmem:[%s5795_s25 + $0x414] ss:$8 sps:$4 sm:$0xff]  }
  0xdc   : > { %3945 = vmatpush1.bf16.msra.mxu0 %v5244_v39  ;;  %3618 = vmatprep.subr.bf16.mxu1 %v5249_v40  ;;  %v5336_v39 = vld [vmem:[%s5795_s25 + $0xc14] ss:$8 sps:$4 sm:$0xff]   ;;  %v382_v40 = vpack.c.bf16 %v350_v36, %v350_v36  ;;  %v5423_v36 = vld [vmem:[%s5795_s25 + $0x504] ss:$8 sps:$4 sm:$0xff]  }
  0xdd   : > { %3946 = vmatprep.subr.bf16.mxu0 %v5252_v41  ;;  %v398_v41 = vpack.c.bf16 %v366_v37, %v366_v37  ;;  %v5426_v37 = vld [vmem:[%s5795_s25 + $0xd04] ss:$8 sps:$4 sm:$0xff]  }
  0xdf   : > { %3619 = vmatpush1.bf16.msra.mxu1 %v5247_v42  ;;  %v5331_v42 = vld [vmem:[%s5795_s25 + $0x410] ss:$8 sps:$4 sm:$0xff]  }
  0xe0   : > { %3947 = vmatpush1.bf16.msra.mxu0 %v5250_v43  ;;  %3620 = vmatprep.subr.bf16.mxu1 %v5255_v44  ;;  %v5334_v43 = vld [vmem:[%s5795_s25 + $0xc10] ss:$8 sps:$4 sm:$0xff]   ;;  %v5339_v44 = vld [vmem:[%s5795_s25 + $0x424] ss:$8 sps:$4 sm:$0xff]  }
  0xe1   : > { %3948 = vmatprep.subr.bf16.mxu0 %v5258_v45  ;;  %v5342_v45 = vld [vmem:[%s5795_s25 + $0xc24] ss:$8 sps:$4 sm:$0xff]  }
  0xe3   : > { %3621 = vmatpush1.bf16.msra.mxu1 %v5253_v46  ;;  %v5337_v46 = vld [vmem:[%s5795_s25 + $0x420] ss:$8 sps:$4 sm:$0xff]  }
  0xe4   : > { %3949 = vmatpush1.bf16.msra.mxu0 %v5256_v47  ;;  %3622 = vmatprep.subr.bf16.mxu1 %v5261_v48  ;;  %v5340_v47 = vld [vmem:[%s5795_s25 + $0xc20] ss:$8 sps:$4 sm:$0xff]   ;;  %v5345_v48 = vld [vmem:[%s5795_s25 + $0x434] ss:$8 sps:$4 sm:$0xff]  }
  0xe5   : > { %3950 = vmatprep.subr.bf16.mxu0 %v5264_v49  ;;  %v5348_v49 = vld [vmem:[%s5795_s25 + $0xc34] ss:$8 sps:$4 sm:$0xff]  }
  0xe7   : > { %3623 = vmatpush1.bf16.msra.mxu1 %v5259_v50  ;;  %v5343_v50 = vld [vmem:[%s5795_s25 + $0x430] ss:$8 sps:$4 sm:$0xff]  }
  0xe8   : > { %3951 = vmatpush1.bf16.msra.mxu0 %v5262_v51  ;;  %3624 = vmatprep.subr.bf16.mxu1 %v5267_v52  ;;  %v5346_v51 = vld [vmem:[%s5795_s25 + $0xc30] ss:$8 sps:$4 sm:$0xff]   ;;  %v5351_v52 = vld [vmem:[%s5795_s25 + $0x444] ss:$8 sps:$4 sm:$0xff]  }
  0xe9   : > { %3952 = vmatprep.subr.bf16.mxu0 %v5270_v53  ;;  %v5354_v53 = vld [vmem:[%s5795_s25 + $0xc44] ss:$8 sps:$4 sm:$0xff]  }
  0xeb   : > { %3625 = vmatpush1.bf16.msra.mxu1 %v5265_v54  ;;  %v5349_v54 = vld [vmem:[%s5795_s25 + $0x440] ss:$8 sps:$4 sm:$0xff]  }
  0xec   : > { %3953 = vmatpush1.bf16.msra.mxu0 %v5268_v55  ;;  %3626 = vmatprep.subr.bf16.mxu1 %v5273_v56  ;;  %v5352_v55 = vld [vmem:[%s5795_s25 + $0xc40] ss:$8 sps:$4 sm:$0xff]   ;;  %v5357_v56 = vld [vmem:[%s5795_s25 + $0x454] ss:$8 sps:$4 sm:$0xff]  }
  0xed   : > { %3954 = vmatprep.subr.bf16.mxu0 %v5276_v57  ;;  %v5360_v57 = vld [vmem:[%s5795_s25 + $0xc54] ss:$8 sps:$4 sm:$0xff]  }
  0xef   : > { %3627 = vmatpush1.bf16.msra.mxu1 %v5271_v58  ;;  %v5355_v58 = vld [vmem:[%s5795_s25 + $0x450] ss:$8 sps:$4 sm:$0xff]  }
  0xf0   : > { %3955 = vmatpush1.bf16.msra.mxu0 %v5274_v59  ;;  %3628 = vmatprep.subr.bf16.mxu1 %v5279_v60  ;;  %v5358_v59 = vld [vmem:[%s5795_s25 + $0xc50] ss:$8 sps:$4 sm:$0xff]   ;;  %v5363_v60 = vld [vmem:[%s5795_s25 + $0x464] ss:$8 sps:$4 sm:$0xff]  }
  0xf1   : > { %3956 = vmatprep.subr.bf16.mxu0 %v5282_v61  ;;  %v5366_v61 = vld [vmem:[%s5795_s25 + $0xc64] ss:$8 sps:$4 sm:$0xff]  }
  0xf3   : > { %3629 = vmatpush1.bf16.msra.mxu1 %v5277_v62  ;;  %v5361_v62 = vld [vmem:[%s5795_s25 + $0x460] ss:$8 sps:$4 sm:$0xff]  }
  0xf4   : > { %3957 = vmatpush1.bf16.msra.mxu0 %v5280_v63  ;;  %3630 = vmatprep.subr.bf16.mxu1 %v5285_v0  ;;  %v5364_v63 = vld [vmem:[%s5795_s25 + $0xc60] ss:$8 sps:$4 sm:$0xff]   ;;  %v5369_v0 = vld [vmem:[%s5795_s25 + $0x474] ss:$8 sps:$4 sm:$0xff]  }
  0xf5   : > { %3958 = vmatprep.subr.bf16.mxu0 %v5288_v1  ;;  %v5372_v1 = vld [vmem:[%s5795_s25 + $0xc74] ss:$8 sps:$4 sm:$0xff]  }
  0xf7   : > { %3631 = vmatpush1.bf16.msra.mxu1 %v5283_v2  ;;  %v5367_v2 = vld [vmem:[%s5795_s25 + $0x470] ss:$8 sps:$4 sm:$0xff]  }
  0xf8   : > { %3959 = vmatpush1.bf16.msra.mxu0 %v5286_v3  ;;  %3632 = vmatprep.subr.bf16.mxu1 %v5291_v4  ;;  %v5370_v3 = vld [vmem:[%s5795_s25 + $0xc70] ss:$8 sps:$4 sm:$0xff]   ;;  %v5375_v4 = vld [vmem:[%s5795_s25 + $0x484] ss:$8 sps:$4 sm:$0xff]  }
  0xf9   : > { %3960 = vmatprep.subr.bf16.mxu0 %v5294_v5  ;;  %v5378_v5 = vld [vmem:[%s5795_s25 + $0xc84] ss:$8 sps:$4 sm:$0xff]  }
  0xfb   : > { %3633 = vmatpush1.bf16.msra.mxu1 %v5289_v6  ;;  %v5373_v6 = vld [vmem:[%s5795_s25 + $0x480] ss:$8 sps:$4 sm:$0xff]  }
  0xfc   : > { %3961 = vmatpush1.bf16.msra.mxu0 %v5292_v7  ;;  %3634 = vmatprep.subr.bf16.mxu1 %v5297_v8  ;;  %v5376_v7 = vld [vmem:[%s5795_s25 + $0xc80] ss:$8 sps:$4 sm:$0xff]   ;;  %v5381_v8 = vld [vmem:[%s5795_s25 + $0x494] ss:$8 sps:$4 sm:$0xff]  }
  0xfd   : > { %3962 = vmatprep.subr.bf16.mxu0 %v5300_v9  ;;  %v5384_v9 = vld [vmem:[%s5795_s25 + $0xc94] ss:$8 sps:$4 sm:$0xff]  }
  0xff   : > { %3635 = vmatpush1.bf16.msra.mxu1 %v5295_v10  ;;  %v5379_v10 = vld [vmem:[%s5795_s25 + $0x490] ss:$8 sps:$4 sm:$0xff]  }
 0x100   : > { %3963 = vmatpush1.bf16.msra.mxu0 %v5298_v11  ;;  %3636 = vmatprep.subr.bf16.mxu1 %v5303_v12  ;;  %v5382_v11 = vld [vmem:[%s5795_s25 + $0xc90] ss:$8 sps:$4 sm:$0xff]   ;;  %v5387_v12 = vld [vmem:[%s5795_s25 + $0x4a4] ss:$8 sps:$4 sm:$0xff]  }
 0x101   : > { %3964 = vmatprep.subr.bf16.mxu0 %v5306_v13  ;;  %v5390_v13 = vld [vmem:[%s5795_s25 + $0xca4] ss:$8 sps:$4 sm:$0xff]  }
 0x103   : > { %3637 = vmatpush1.bf16.msra.mxu1 %v5301_v14  ;;  %v5385_v14 = vld [vmem:[%s5795_s25 + $0x4a0] ss:$8 sps:$4 sm:$0xff]  }
 0x104   : > { %3965 = vmatpush1.bf16.msra.mxu0 %v5304_v15  ;;  %3638 = vmatprep.subr.bf16.mxu1 %v5309_v16  ;;  %v5388_v15 = vld [vmem:[%s5795_s25 + $0xca0] ss:$8 sps:$4 sm:$0xff]   ;;  %v5393_v16 = vld [vmem:[%s5795_s25 + $0x4b4] ss:$8 sps:$4 sm:$0xff]  }
 0x105   : > { %3966 = vmatprep.subr.bf16.mxu0 %v5312_v17  ;;  %v5396_v17 = vld [vmem:[%s5795_s25 + $0xcb4] ss:$8 sps:$4 sm:$0xff]  }
 0x107   : > { %3639 = vmatpush1.bf16.msra.mxu1 %v5307_v18  ;;  %v5391_v18 = vld [vmem:[%s5795_s25 + $0x4b0] ss:$8 sps:$4 sm:$0xff]  }
 0x108   : > { %3967 = vmatpush1.bf16.msra.mxu0 %v5310_v19  ;;  %3640 = vmatprep.subr.bf16.mxu1 %v5315_v20  ;;  %v5394_v19 = vld [vmem:[%s5795_s25 + $0xcb0] ss:$8 sps:$4 sm:$0xff]   ;;  %v5399_v20 = vld [vmem:[%s5795_s25 + $0x4c4] ss:$8 sps:$4 sm:$0xff]  }
 0x109   : > { %3968 = vmatprep.subr.bf16.mxu0 %v5318_v21  ;;  %v5402_v21 = vld [vmem:[%s5795_s25 + $0xcc4] ss:$8 sps:$4 sm:$0xff]  }
 0x10b   : > { %3641 = vmatpush1.bf16.msra.mxu1 %v5313_v22  ;;  %v5397_v22 = vld [vmem:[%s5795_s25 + $0x4c0] ss:$8 sps:$4 sm:$0xff]  }
 0x10c   : > { %3969 = vmatpush1.bf16.msra.mxu0 %v5316_v23  ;;  %3642 = vmatprep.subr.bf16.mxu1 %v5321_v24  ;;  %v5400_v23 = vld [vmem:[%s5795_s25 + $0xcc0] ss:$8 sps:$4 sm:$0xff]   ;;  %v5405_v24 = vld [vmem:[%s5795_s25 + $0x4d4] ss:$8 sps:$4 sm:$0xff]  }
 0x10d   : > { %3970 = vmatprep.subr.bf16.mxu0 %v5324_v25  ;;  %v5408_v25 = vld [vmem:[%s5795_s25 + $0xcd4] ss:$8 sps:$4 sm:$0xff]  }
 0x10f   : > { %3643 = vmatpush1.bf16.msra.mxu1 %v5319_v26  ;;  %v5403_v26 = vld [vmem:[%s5795_s25 + $0x4d0] ss:$8 sps:$4 sm:$0xff]  }
 0x110   : > { %3971 = vmatpush1.bf16.msra.mxu0 %v5322_v27  ;;  %3653 = vmatprep.subr.bf16.mxu1 %v5327_v28  ;;  %v5406_v27 = vld [vmem:[%s5795_s25 + $0xcd0] ss:$8 sps:$4 sm:$0xff]   ;;  %v5411_v28 = vld [vmem:[%s5795_s25 + $0x4e4] ss:$8 sps:$4 sm:$0xff]  }
 0x111   : > { %3981 = vmatprep.subr.bf16.mxu0 %v5330_v31  ;;  %v5412_v31 = vld [vmem:[%s5795_s25 + $0xce0] ss:$8 sps:$4 sm:$0xff]  }
 0x112   : > { %3645 = vmatmul.mubr.bf16.vlgmr.msra.gmra.mrb[0].mxu1 %v379_v34  ;;  %v5415_v34 = vld [vmem:[%s5795_s25 + $0x4f0] ss:$8 sps:$4 sm:$0xff]  }
 0x113   : > { %3973 = vmatmul.mubr.bf16.vlgmr.msra.gmra.mrb[0].mxu0 %v395_v35  ;;  %3654 = vmatpush1.bf16.msra.mxu1 %v5325_v32  ;;  %v5417_v32 = vld [vmem:[%s5795_s25 + $0x4f4] ss:$8 sps:$4 sm:$0xff]   ;;  %v5418_v35 = vld [vmem:[%s5795_s25 + $0xcf0] ss:$8 sps:$4 sm:$0xff]  }
 0x114   : > { %3982 = vmatpush1.bf16.msra.mxu0 %v5328_v33  ;;  %3655 = vmatprep.subr.bf16.mxu1 %v5333_v38  ;;  %v5420_v33 = vld [vmem:[%s5795_s25 + $0xcf4] ss:$8 sps:$4 sm:$0xff]   ;;  %v349_v38 = vld [vmem:[%s5845_s29 + $0x40] sm:$0xff] }
 0x115   : > { %3983 = vmatprep.subr.bf16.mxu0 %v5336_v39  ;;  %3685 = vmatprep.mubr.bf16.mxu1 %v382_v40  ;;  %v365_v39 = vld [vmem:[%s5845_s29 + $0xc0] sm:$0xff]  ;;  %v352_v40 = vld [vmem:[%s5845_s29 + $0x58] sm:$0xff] }
 0x116   : > { %4013 = vmatprep.mubr.bf16.mxu0 %v398_v41  ;;  %v368_v41 = vld [vmem:[%s5845_s29 + $0xd8] sm:$0xff] }
 0x117   : > { %3656 = vmatpush1.bf16.msra.mxu1 %v5331_v42  ;;  %v381_v42 = vpack.c.bf16 %v349_v38, %v349_v38  ;;  %v5505_v38 = vld [vmem:[%s5795_s25 + $0x5e0] ss:$8 sps:$4 sm:$0xff]  }
 0x118   : > { %3984 = vmatpush1.bf16.msra.mxu0 %v5334_v43  ;;  %3657 = vmatprep.subr.bf16.mxu1 %v5339_v44  ;;  %v397_v43 = vpack.c.bf16 %v365_v39, %v365_v39  ;;  %v5421_v44 = vld [vmem:[%s5795_s25 + $0x500] ss:$8 sps:$4 sm:$0xff]  }
 0x119   : > { %3985 = vmatprep.subr.bf16.mxu0 %v5342_v45  ;;  %v5424_v45 = vld [vmem:[%s5795_s25 + $0xd00] ss:$8 sps:$4 sm:$0xff]  }
 0x11a   : > { %v5508_v39 = vld [vmem:[%s5795_s25 + $0xde0] ss:$8 sps:$4 sm:$0xff]  }
 0x11b   : > { %3658 = vmatpush1.bf16.msra.mxu1 %v5337_v46  ;;  %v5429_v46 = vld [vmem:[%s5795_s25 + $0x514] ss:$8 sps:$4 sm:$0xff]  }
 0x11c   : > { %3986 = vmatpush1.bf16.msra.mxu0 %v5340_v47  ;;  %3659 = vmatprep.subr.bf16.mxu1 %v5345_v48  ;;  %v5432_v47 = vld [vmem:[%s5795_s25 + $0xd14] ss:$8 sps:$4 sm:$0xff]   ;;  %v384_v48 = vpack.c.bf16 %v352_v40, %v352_v40 }
 0x11d   : > { %3987 = vmatprep.subr.bf16.mxu0 %v5348_v49  ;;  %v400_v49 = vpack.c.bf16 %v368_v41, %v368_v41  ;;  %v5513_v40 = vld [vmem:[%s5795_s25 + $0x5f4] ss:$8 sps:$4 sm:$0xff]  }
 0x11e   : > { %v5516_v41 = vld [vmem:[%s5795_s25 + $0xdf4] ss:$8 sps:$4 sm:$0xff]  }
 0x11f   : > { %3660 = vmatpush1.bf16.msra.mxu1 %v5343_v50  ;;  %v5427_v50 = vld [vmem:[%s5795_s25 + $0x510] ss:$8 sps:$4 sm:$0xff]  }
 0x120   : > { %3988 = vmatpush1.bf16.msra.mxu0 %v5346_v51  ;;  %3661 = vmatprep.subr.bf16.mxu1 %v5351_v52  ;;  %v5430_v51 = vld [vmem:[%s5795_s25 + $0xd10] ss:$8 sps:$4 sm:$0xff]   ;;  %v5435_v52 = vld [vmem:[%s5795_s25 + $0x524] ss:$8 sps:$4 sm:$0xff]  }
 0x121   : > { %3989 = vmatprep.subr.bf16.mxu0 %v5354_v53  ;;  %v5438_v53 = vld [vmem:[%s5795_s25 + $0xd24] ss:$8 sps:$4 sm:$0xff]  }
 0x123   : > { %3662 = vmatpush1.bf16.msra.mxu1 %v5349_v54  ;;  %v5433_v54 = vld [vmem:[%s5795_s25 + $0x520] ss:$8 sps:$4 sm:$0xff]  }
 0x124   : > { %3990 = vmatpush1.bf16.msra.mxu0 %v5352_v55  ;;  %3663 = vmatprep.subr.bf16.mxu1 %v5357_v56  ;;  %v5436_v55 = vld [vmem:[%s5795_s25 + $0xd20] ss:$8 sps:$4 sm:$0xff]   ;;  %v5441_v56 = vld [vmem:[%s5795_s25 + $0x534] ss:$8 sps:$4 sm:$0xff]  }
 0x125   : > { %3991 = vmatprep.subr.bf16.mxu0 %v5360_v57  ;;  %v5444_v57 = vld [vmem:[%s5795_s25 + $0xd34] ss:$8 sps:$4 sm:$0xff]  }
 0x127   : > { %3664 = vmatpush1.bf16.msra.mxu1 %v5355_v58  ;;  %v5439_v58 = vld [vmem:[%s5795_s25 + $0x530] ss:$8 sps:$4 sm:$0xff]  }
 0x128   : > { %3992 = vmatpush1.bf16.msra.mxu0 %v5358_v59  ;;  %3665 = vmatprep.subr.bf16.mxu1 %v5363_v60  ;;  %v5442_v59 = vld [vmem:[%s5795_s25 + $0xd30] ss:$8 sps:$4 sm:$0xff]   ;;  %v5447_v60 = vld [vmem:[%s5795_s25 + $0x544] ss:$8 sps:$4 sm:$0xff]  }
 0x129   : > { %3993 = vmatprep.subr.bf16.mxu0 %v5366_v61  ;;  %v5450_v61 = vld [vmem:[%s5795_s25 + $0xd44] ss:$8 sps:$4 sm:$0xff]  }
 0x12b   : > { %3666 = vmatpush1.bf16.msra.mxu1 %v5361_v62  ;;  %v5445_v62 = vld [vmem:[%s5795_s25 + $0x540] ss:$8 sps:$4 sm:$0xff]  }
 0x12c   : > { %3994 = vmatpush1.bf16.msra.mxu0 %v5364_v63  ;;  %3667 = vmatprep.subr.bf16.mxu1 %v5369_v0  ;;  %v5448_v63 = vld [vmem:[%s5795_s25 + $0xd40] ss:$8 sps:$4 sm:$0xff]   ;;  %v5453_v0 = vld [vmem:[%s5795_s25 + $0x554] ss:$8 sps:$4 sm:$0xff]  }
 0x12d   : > { %3995 = vmatprep.subr.bf16.mxu0 %v5372_v1  ;;  %v5456_v1 = vld [vmem:[%s5795_s25 + $0xd54] ss:$8 sps:$4 sm:$0xff]  }
 0x12f   : > { %3668 = vmatpush1.bf16.msra.mxu1 %v5367_v2  ;;  %v5451_v2 = vld [vmem:[%s5795_s25 + $0x550] ss:$8 sps:$4 sm:$0xff]  }
 0x130   : > { %3996 = vmatpush1.bf16.msra.mxu0 %v5370_v3  ;;  %3669 = vmatprep.subr.bf16.mxu1 %v5375_v4  ;;  %v5454_v3 = vld [vmem:[%s5795_s25 + $0xd50] ss:$8 sps:$4 sm:$0xff]   ;;  %v5459_v4 = vld [vmem:[%s5795_s25 + $0x564] ss:$8 sps:$4 sm:$0xff]  }
 0x131   : > { %3997 = vmatprep.subr.bf16.mxu0 %v5378_v5  ;;  %v5462_v5 = vld [vmem:[%s5795_s25 + $0xd64] ss:$8 sps:$4 sm:$0xff]  }
 0x133   : > { %3670 = vmatpush1.bf16.msra.mxu1 %v5373_v6  ;;  %v5457_v6 = vld [vmem:[%s5795_s25 + $0x560] ss:$8 sps:$4 sm:$0xff]  }
 0x134   : > { %3998 = vmatpush1.bf16.msra.mxu0 %v5376_v7  ;;  %3671 = vmatprep.subr.bf16.mxu1 %v5381_v8  ;;  %v5460_v7 = vld [vmem:[%s5795_s25 + $0xd60] ss:$8 sps:$4 sm:$0xff]   ;;  %v5465_v8 = vld [vmem:[%s5795_s25 + $0x574] ss:$8 sps:$4 sm:$0xff]  }
 0x135   : > { %3999 = vmatprep.subr.bf16.mxu0 %v5384_v9  ;;  %v5468_v9 = vld [vmem:[%s5795_s25 + $0xd74] ss:$8 sps:$4 sm:$0xff]  }
 0x137   : > { %3672 = vmatpush1.bf16.msra.mxu1 %v5379_v10  ;;  %v5463_v10 = vld [vmem:[%s5795_s25 + $0x570] ss:$8 sps:$4 sm:$0xff]  }
 0x138   : > { %4000 = vmatpush1.bf16.msra.mxu0 %v5382_v11  ;;  %3673 = vmatprep.subr.bf16.mxu1 %v5387_v12  ;;  %v5466_v11 = vld [vmem:[%s5795_s25 + $0xd70] ss:$8 sps:$4 sm:$0xff]   ;;  %v5471_v12 = vld [vmem:[%s5795_s25 + $0x584] ss:$8 sps:$4 sm:$0xff]  }
 0x139   : > { %4001 = vmatprep.subr.bf16.mxu0 %v5390_v13  ;;  %v5474_v13 = vld [vmem:[%s5795_s25 + $0xd84] ss:$8 sps:$4 sm:$0xff]  }
 0x13b   : > { %3674 = vmatpush1.bf16.msra.mxu1 %v5385_v14  ;;  %v5469_v14 = vld [vmem:[%s5795_s25 + $0x580] ss:$8 sps:$4 sm:$0xff]  }
 0x13c   : > { %4002 = vmatpush1.bf16.msra.mxu0 %v5388_v15  ;;  %3675 = vmatprep.subr.bf16.mxu1 %v5393_v16  ;;  %v5472_v15 = vld [vmem:[%s5795_s25 + $0xd80] ss:$8 sps:$4 sm:$0xff]   ;;  %v5477_v16 = vld [vmem:[%s5795_s25 + $0x594] ss:$8 sps:$4 sm:$0xff]  }
 0x13d   : > { %4003 = vmatprep.subr.bf16.mxu0 %v5396_v17  ;;  %v5480_v17 = vld [vmem:[%s5795_s25 + $0xd94] ss:$8 sps:$4 sm:$0xff]  }
 0x13f   : > { %3676 = vmatpush1.bf16.msra.mxu1 %v5391_v18  ;;  %v5475_v18 = vld [vmem:[%s5795_s25 + $0x590] ss:$8 sps:$4 sm:$0xff]  }
 0x140   : > { %4004 = vmatpush1.bf16.msra.mxu0 %v5394_v19  ;;  %3677 = vmatprep.subr.bf16.mxu1 %v5399_v20  ;;  %v5478_v19 = vld [vmem:[%s5795_s25 + $0xd90] ss:$8 sps:$4 sm:$0xff]   ;;  %v5483_v20 = vld [vmem:[%s5795_s25 + $0x5a4] ss:$8 sps:$4 sm:$0xff]  }
 0x141   : > { %4005 = vmatprep.subr.bf16.mxu0 %v5402_v21  ;;  %v5486_v21 = vld [vmem:[%s5795_s25 + $0xda4] ss:$8 sps:$4 sm:$0xff]  }
 0x143   : > { %3678 = vmatpush1.bf16.msra.mxu1 %v5397_v22  ;;  %v5481_v22 = vld [vmem:[%s5795_s25 + $0x5a0] ss:$8 sps:$4 sm:$0xff]  }
 0x144   : > { %4006 = vmatpush1.bf16.msra.mxu0 %v5400_v23  ;;  %3679 = vmatprep.subr.bf16.mxu1 %v5405_v24  ;;  %v5484_v23 = vld [vmem:[%s5795_s25 + $0xda0] ss:$8 sps:$4 sm:$0xff]   ;;  %v5489_v24 = vld [vmem:[%s5795_s25 + $0x5b4] ss:$8 sps:$4 sm:$0xff]  }
 0x145   : > { %4007 = vmatprep.subr.bf16.mxu0 %v5408_v25  ;;  %v5492_v25 = vld [vmem:[%s5795_s25 + $0xdb4] ss:$8 sps:$4 sm:$0xff]  }
 0x147   : > { %3680 = vmatpush1.bf16.msra.mxu1 %v5403_v26  ;;  %v5487_v26 = vld [vmem:[%s5795_s25 + $0x5b0] ss:$8 sps:$4 sm:$0xff]  }
 0x148   : > { %4008 = vmatpush1.bf16.msra.mxu0 %v5406_v27  ;;  %3681 = vmatprep.subr.bf16.mxu1 %v5411_v28  ;;  %v5490_v27 = vld [vmem:[%s5795_s25 + $0xdb0] ss:$8 sps:$4 sm:$0xff]   ;;  %v5495_v28 = vld [vmem:[%s5795_s25 + $0x5c4] ss:$8 sps:$4 sm:$0xff]  }
 0x149   : > { %4009 = vmatprep.subr.bf16.mxu0 %v5414_v29  ;;  %v5498_v29 = vld [vmem:[%s5795_s25 + $0xdc4] ss:$8 sps:$4 sm:$0xff]  }
 0x14b   : > { %3682 = vmatpush1.bf16.msra.mxu1 %v5409_v30  ;;  %v5493_v30 = vld [vmem:[%s5795_s25 + $0x5c0] ss:$8 sps:$4 sm:$0xff]  }
 0x14c   : > { %4010 = vmatpush1.bf16.msra.mxu0 %v5412_v31  ;;  %3683 = vmatprep.subr.bf16.mxu1 %v5417_v32  ;;  %v5496_v31 = vld [vmem:[%s5795_s25 + $0xdc0] ss:$8 sps:$4 sm:$0xff]   ;;  %v5501_v32 = vld [vmem:[%s5795_s25 + $0x5d4] ss:$8 sps:$4 sm:$0xff]  }
 0x14d   : > { %4011 = vmatprep.subr.bf16.mxu0 %v5420_v33  ;;  %v5504_v33 = vld [vmem:[%s5795_s25 + $0xdd4] ss:$8 sps:$4 sm:$0xff]  }
 0x14f   : > { %3684 = vmatpush1.bf16.msra.mxu1 %v5415_v34  ;;  %v5499_v34 = vld [vmem:[%s5795_s25 + $0x5d0] ss:$8 sps:$4 sm:$0xff]  }
 0x150   : > { %4012 = vmatpush1.bf16.msra.mxu0 %v5418_v35  ;;  %3694 = vmatprep.subr.bf16.mxu1 %v5423_v36  ;;  %v5502_v35 = vld [vmem:[%s5795_s25 + $0xdd0] ss:$8 sps:$4 sm:$0xff]   ;;  %v5507_v36 = vld [vmem:[%s5795_s25 + $0x5e4] ss:$8 sps:$4 sm:$0xff]  }
 0x151   : > { %4022 = vmatprep.subr.bf16.mxu0 %v5426_v37  ;;  %v5510_v37 = vld [vmem:[%s5795_s25 + $0xde4] ss:$8 sps:$4 sm:$0xff]  }
 0x152   : > { %3686 = vmatmul.mubr.bf16.vlgmr.msra.gmra.mrb[0].mxu1 %v381_v42  ;;  %v5511_v42 = vld [vmem:[%s5795_s25 + $0x5f0] ss:$8 sps:$4 sm:$0xff]  }
 0x153   : > { %4014 = vmatmul.mubr.bf16.vlgmr.msra.gmra.mrb[0].mxu0 %v397_v43  ;;  %3695 = vmatpush1.bf16.msra.mxu1 %v5421_v44  ;;  %v5514_v43 = vld [vmem:[%s5795_s25 + $0xdf0] ss:$8 sps:$4 sm:$0xff]  }
 0x154   : > { %4023 = vmatpush1.bf16.msra.mxu0 %v5424_v45  ;;  %3696 = vmatprep.subr.bf16.mxu1 %v5429_v46  ;;  %v351_v44 = vld [vmem:[%s5845_s29 + $0x50] sm:$0xff]  ;;  %v5519_v46 = vld [vmem:[%s5795_s25 + $0x604] ss:$8 sps:$4 sm:$0xff]  }
 0x155   : > { %4024 = vmatprep.subr.bf16.mxu0 %v5432_v47  ;;  %3726 = vmatprep.mubr.bf16.mxu1 %v384_v48  ;;  %v367_v45 = vld [vmem:[%s5845_s29 + $0xd0] sm:$0xff]  ;;  %v5522_v47 = vld [vmem:[%s5795_s25 + $0xe04] ss:$8 sps:$4 sm:$0xff]   ;;  %v383_v48 = vpack.c.bf16 %v351_v44, %v351_v44 }
 0x156   : > { %4054 = vmatprep.mubr.bf16.mxu0 %v400_v49  ;;  %v399_v49 = vpack.c.bf16 %v367_v45, %v367_v45  ;;  %v5603_v44 = vld [vmem:[%s5795_s25 + $0x6e4] ss:$8 sps:$4 sm:$0xff]  }
 0x157   : > { %3697 = vmatpush1.bf16.msra.mxu1 %v5427_v50  ;;  %v354_v50 = vld [vmem:[%s5845_s29 + $0x68] sm:$0xff] }
 0x158   : > { %4025 = vmatpush1.bf16.msra.mxu0 %v5430_v51  ;;  %3698 = vmatprep.subr.bf16.mxu1 %v5435_v52  ;;  %v370_v51 = vld [vmem:[%s5845_s29 + $0xe8] sm:$0xff] }
 0x159   : > { %4026 = vmatprep.subr.bf16.mxu0 %v5438_v53  ;;  %v5517_v52 = vld [vmem:[%s5795_s25 + $0x600] ss:$8 sps:$4 sm:$0xff]   ;;  %v5606_v45 = vld [vmem:[%s5795_s25 + $0xee4] ss:$8 sps:$4 sm:$0xff]  }
 0x15a   : > { %v5520_v53 = vld [vmem:[%s5795_s25 + $0xe00] ss:$8 sps:$4 sm:$0xff]  }
 0x15b   : > { %3699 = vmatpush1.bf16.msra.mxu1 %v5433_v54  ;;  %v5525_v54 = vld [vmem:[%s5795_s25 + $0x614] ss:$8 sps:$4 sm:$0xff]  }
 0x15c   : > { %4027 = vmatpush1.bf16.msra.mxu0 %v5436_v55  ;;  %3700 = vmatprep.subr.bf16.mxu1 %v5441_v56  ;;  %v5528_v55 = vld [vmem:[%s5795_s25 + $0xe14] ss:$8 sps:$4 sm:$0xff]   ;;  %v386_v56 = vpack.c.bf16 %v354_v50, %v354_v50  ;;  %v5607_v50 = vld [vmem:[%s5795_s25 + $0x6f0] ss:$8 sps:$4 sm:$0xff]  }
 0x15d   : > { %4028 = vmatprep.subr.bf16.mxu0 %v5444_v57  ;;  %v402_v57 = vpack.c.bf16 %v370_v51, %v370_v51  ;;  %v5610_v51 = vld [vmem:[%s5795_s25 + $0xef0] ss:$8 sps:$4 sm:$0xff]  }
 0x15f   : > { %3701 = vmatpush1.bf16.msra.mxu1 %v5439_v58  ;;  %v5523_v58 = vld [vmem:[%s5795_s25 + $0x610] ss:$8 sps:$4 sm:$0xff]  }
 0x160   : > { %4029 = vmatpush1.bf16.msra.mxu0 %v5442_v59  ;;  %3702 = vmatprep.subr.bf16.mxu1 %v5447_v60  ;;  %v5526_v59 = vld [vmem:[%s5795_s25 + $0xe10] ss:$8 sps:$4 sm:$0xff]   ;;  %v5531_v60 = vld [vmem:[%s5795_s25 + $0x624] ss:$8 sps:$4 sm:$0xff]  }
 0x161   : > { %4030 = vmatprep.subr.bf16.mxu0 %v5450_v61  ;;  %v5534_v61 = vld [vmem:[%s5795_s25 + $0xe24] ss:$8 sps:$4 sm:$0xff]  }
 0x163   : > { %3703 = vmatpush1.bf16.msra.mxu1 %v5445_v62  ;;  %v5529_v62 = vld [vmem:[%s5795_s25 + $0x620] ss:$8 sps:$4 sm:$0xff]  }
 0x164   : > { %4031 = vmatpush1.bf16.msra.mxu0 %v5448_v63  ;;  %3704 = vmatprep.subr.bf16.mxu1 %v5453_v0  ;;  %v5532_v63 = vld [vmem:[%s5795_s25 + $0xe20] ss:$8 sps:$4 sm:$0xff]   ;;  %v5537_v0 = vld [vmem:[%s5795_s25 + $0x634] ss:$8 sps:$4 sm:$0xff]  }
 0x165   : > { %4032 = vmatprep.subr.bf16.mxu0 %v5456_v1  ;;  %v5540_v1 = vld [vmem:[%s5795_s25 + $0xe34] ss:$8 sps:$4 sm:$0xff]  }
 0x167   : > { %3705 = vmatpush1.bf16.msra.mxu1 %v5451_v2  ;;  %v5535_v2 = vld [vmem:[%s5795_s25 + $0x630] ss:$8 sps:$4 sm:$0xff]  }
 0x168   : > { %4033 = vmatpush1.bf16.msra.mxu0 %v5454_v3  ;;  %3706 = vmatprep.subr.bf16.mxu1 %v5459_v4  ;;  %v5538_v3 = vld [vmem:[%s5795_s25 + $0xe30] ss:$8 sps:$4 sm:$0xff]   ;;  %v5543_v4 = vld [vmem:[%s5795_s25 + $0x644] ss:$8 sps:$4 sm:$0xff]  }
 0x169   : > { %4034 = vmatprep.subr.bf16.mxu0 %v5462_v5  ;;  %v5546_v5 = vld [vmem:[%s5795_s25 + $0xe44] ss:$8 sps:$4 sm:$0xff]  }
 0x16b   : > { %3707 = vmatpush1.bf16.msra.mxu1 %v5457_v6  ;;  %v5541_v6 = vld [vmem:[%s5795_s25 + $0x640] ss:$8 sps:$4 sm:$0xff]  }
 0x16c   : > { %4035 = vmatpush1.bf16.msra.mxu0 %v5460_v7  ;;  %3708 = vmatprep.subr.bf16.mxu1 %v5465_v8  ;;  %v5544_v7 = vld [vmem:[%s5795_s25 + $0xe40] ss:$8 sps:$4 sm:$0xff]   ;;  %v5549_v8 = vld [vmem:[%s5795_s25 + $0x654] ss:$8 sps:$4 sm:$0xff]  }
 0x16d   : > { %4036 = vmatprep.subr.bf16.mxu0 %v5468_v9  ;;  %v5552_v9 = vld [vmem:[%s5795_s25 + $0xe54] ss:$8 sps:$4 sm:$0xff]  }
 0x16f   : > { %3709 = vmatpush1.bf16.msra.mxu1 %v5463_v10  ;;  %v5547_v10 = vld [vmem:[%s5795_s25 + $0x650] ss:$8 sps:$4 sm:$0xff]  }
 0x170   : > { %4037 = vmatpush1.bf16.msra.mxu0 %v5466_v11  ;;  %3710 = vmatprep.subr.bf16.mxu1 %v5471_v12  ;;  %v5550_v11 = vld [vmem:[%s5795_s25 + $0xe50] ss:$8 sps:$4 sm:$0xff]   ;;  %v5555_v12 = vld [vmem:[%s5795_s25 + $0x664] ss:$8 sps:$4 sm:$0xff]  }
 0x171   : > { %4038 = vmatprep.subr.bf16.mxu0 %v5474_v13  ;;  %v5558_v13 = vld [vmem:[%s5795_s25 + $0xe64] ss:$8 sps:$4 sm:$0xff]  }
 0x173   : > { %3711 = vmatpush1.bf16.msra.mxu1 %v5469_v14  ;;  %v5553_v14 = vld [vmem:[%s5795_s25 + $0x660] ss:$8 sps:$4 sm:$0xff]  }
 0x174   : > { %4039 = vmatpush1.bf16.msra.mxu0 %v5472_v15  ;;  %3712 = vmatprep.subr.bf16.mxu1 %v5477_v16  ;;  %v5556_v15 = vld [vmem:[%s5795_s25 + $0xe60] ss:$8 sps:$4 sm:$0xff]   ;;  %v5561_v16 = vld [vmem:[%s5795_s25 + $0x674] ss:$8 sps:$4 sm:$0xff]  }
 0x175   : > { %4040 = vmatprep.subr.bf16.mxu0 %v5480_v17  ;;  %v5564_v17 = vld [vmem:[%s5795_s25 + $0xe74] ss:$8 sps:$4 sm:$0xff]  }
 0x177   : > { %3713 = vmatpush1.bf16.msra.mxu1 %v5475_v18  ;;  %v5559_v18 = vld [vmem:[%s5795_s25 + $0x670] ss:$8 sps:$4 sm:$0xff]  }
 0x178   : > { %4041 = vmatpush1.bf16.msra.mxu0 %v5478_v19  ;;  %3714 = vmatprep.subr.bf16.mxu1 %v5483_v20  ;;  %v5562_v19 = vld [vmem:[%s5795_s25 + $0xe70] ss:$8 sps:$4 sm:$0xff]   ;;  %v5567_v20 = vld [vmem:[%s5795_s25 + $0x684] ss:$8 sps:$4 sm:$0xff]  }
 0x179   : > { %4042 = vmatprep.subr.bf16.mxu0 %v5486_v21  ;;  %v5570_v21 = vld [vmem:[%s5795_s25 + $0xe84] ss:$8 sps:$4 sm:$0xff]  }
 0x17b   : > { %3715 = vmatpush1.bf16.msra.mxu1 %v5481_v22  ;;  %v5565_v22 = vld [vmem:[%s5795_s25 + $0x680] ss:$8 sps:$4 sm:$0xff]  }
 0x17c   : > { %4043 = vmatpush1.bf16.msra.mxu0 %v5484_v23  ;;  %3716 = vmatprep.subr.bf16.mxu1 %v5489_v24  ;;  %v5568_v23 = vld [vmem:[%s5795_s25 + $0xe80] ss:$8 sps:$4 sm:$0xff]   ;;  %v5573_v24 = vld [vmem:[%s5795_s25 + $0x694] ss:$8 sps:$4 sm:$0xff]  }
 0x17d   : > { %4044 = vmatprep.subr.bf16.mxu0 %v5492_v25  ;;  %v5576_v25 = vld [vmem:[%s5795_s25 + $0xe94] ss:$8 sps:$4 sm:$0xff]  }
 0x17f   : > { %3717 = vmatpush1.bf16.msra.mxu1 %v5487_v26  ;;  %v5571_v26 = vld [vmem:[%s5795_s25 + $0x690] ss:$8 sps:$4 sm:$0xff]  }
 0x180   : > { %4045 = vmatpush1.bf16.msra.mxu0 %v5490_v27  ;;  %3718 = vmatprep.subr.bf16.mxu1 %v5495_v28  ;;  %v5574_v27 = vld [vmem:[%s5795_s25 + $0xe90] ss:$8 sps:$4 sm:$0xff]   ;;  %v5579_v28 = vld [vmem:[%s5795_s25 + $0x6a4] ss:$8 sps:$4 sm:$0xff]  }
 0x181   : > { %4046 = vmatprep.subr.bf16.mxu0 %v5498_v29  ;;  %v5582_v29 = vld [vmem:[%s5795_s25 + $0xea4] ss:$8 sps:$4 sm:$0xff]  }
 0x183   : > { %3719 = vmatpush1.bf16.msra.mxu1 %v5493_v30  ;;  %v5577_v30 = vld [vmem:[%s5795_s25 + $0x6a0] ss:$8 sps:$4 sm:$0xff]  }
 0x184   : > { %4047 = vmatpush1.bf16.msra.mxu0 %v5496_v31  ;;  %3720 = vmatprep.subr.bf16.mxu1 %v5501_v32  ;;  %v5580_v31 = vld [vmem:[%s5795_s25 + $0xea0] ss:$8 sps:$4 sm:$0xff]   ;;  %v5585_v32 = vld [vmem:[%s5795_s25 + $0x6b4] ss:$8 sps:$4 sm:$0xff]  }
 0x185   : > { %4048 = vmatprep.subr.bf16.mxu0 %v5504_v33  ;;  %v5588_v33 = vld [vmem:[%s5795_s25 + $0xeb4] ss:$8 sps:$4 sm:$0xff]  }
 0x187   : > { %3721 = vmatpush1.bf16.msra.mxu1 %v5499_v34  ;;  %v5583_v34 = vld [vmem:[%s5795_s25 + $0x6b0] ss:$8 sps:$4 sm:$0xff]  }
 0x188   : > { %4049 = vmatpush1.bf16.msra.mxu0 %v5502_v35  ;;  %3722 = vmatprep.subr.bf16.mxu1 %v5507_v36  ;;  %v5586_v35 = vld [vmem:[%s5795_s25 + $0xeb0] ss:$8 sps:$4 sm:$0xff]   ;;  %v5591_v36 = vld [vmem:[%s5795_s25 + $0x6c4] ss:$8 sps:$4 sm:$0xff]  }
 0x189   : > { %4050 = vmatprep.subr.bf16.mxu0 %v5510_v37  ;;  %v5594_v37 = vld [vmem:[%s5795_s25 + $0xec4] ss:$8 sps:$4 sm:$0xff]  }
 0x18b   : > { %3723 = vmatpush1.bf16.msra.mxu1 %v5505_v38  ;;  %v5589_v38 = vld [vmem:[%s5795_s25 + $0x6c0] ss:$8 sps:$4 sm:$0xff]  }
 0x18c   : > { %4051 = vmatpush1.bf16.msra.mxu0 %v5508_v39  ;;  %3724 = vmatprep.subr.bf16.mxu1 %v5513_v40  ;;  %v5592_v39 = vld [vmem:[%s5795_s25 + $0xec0] ss:$8 sps:$4 sm:$0xff]   ;;  %v5597_v40 = vld [vmem:[%s5795_s25 + $0x6d4] ss:$8 sps:$4 sm:$0xff]  }
 0x18d   : > { %4052 = vmatprep.subr.bf16.mxu0 %v5516_v41  ;;  %v5600_v41 = vld [vmem:[%s5795_s25 + $0xed4] ss:$8 sps:$4 sm:$0xff]  }
 0x18f   : > { %3725 = vmatpush1.bf16.msra.mxu1 %v5511_v42  ;;  %v5595_v42 = vld [vmem:[%s5795_s25 + $0x6d0] ss:$8 sps:$4 sm:$0xff]  }
 0x190   : > { %4053 = vmatpush1.bf16.msra.mxu0 %v5514_v43  ;;  %3735 = vmatprep.subr.bf16.mxu1 %v5519_v46  ;;  %v5598_v43 = vld [vmem:[%s5795_s25 + $0xed0] ss:$8 sps:$4 sm:$0xff]   ;;  %v5601_v46 = vld [vmem:[%s5795_s25 + $0x6e0] ss:$8 sps:$4 sm:$0xff]  }
 0x191   : > { %4063 = vmatprep.subr.bf16.mxu0 %v5522_v47  ;;  %v5604_v47 = vld [vmem:[%s5795_s25 + $0xee0] ss:$8 sps:$4 sm:$0xff]  }
 0x192   : > { %3727 = vmatmul.mubr.bf16.vlgmr.msra.gmra.mrb[0].mxu1 %v383_v48  ;;  %v5609_v48 = vld [vmem:[%s5795_s25 + $0x6f4] ss:$8 sps:$4 sm:$0xff]  }
 0x193   : > { %4055 = vmatmul.mubr.bf16.vlgmr.msra.gmra.mrb[0].mxu0 %v399_v49  ;;  %3736 = vmatpush1.bf16.msra.mxu1 %v5517_v52  ;;  %v5612_v49 = vld [vmem:[%s5795_s25 + $0xef4] ss:$8 sps:$4 sm:$0xff]   ;;  %v353_v52 = vld [vmem:[%s5845_s29 + $0x60] sm:$0xff] }
 0x194   : > { %4064 = vmatpush1.bf16.msra.mxu0 %v5520_v53  ;;  %3737 = vmatprep.subr.bf16.mxu1 %v5525_v54  ;;  %v369_v53 = vld [vmem:[%s5845_s29 + $0xe0] sm:$0xff] }
 0x195   : > { %4065 = vmatprep.subr.bf16.mxu0 %v5528_v55  ;;  %3767 = vmatprep.mubr.bf16.mxu1 %v386_v56  ;;  %v5615_v54 = vld [vmem:[%s5795_s25 + $0x704] ss:$8 sps:$4 sm:$0xff]   ;;  %v385_v56 = vpack.c.bf16 %v353_v52, %v353_v52 }
 0x196   : > { %4095 = vmatprep.mubr.bf16.mxu0 %v402_v57  ;;  %v5618_v55 = vld [vmem:[%s5795_s25 + $0xf04] ss:$8 sps:$4 sm:$0xff]   ;;  %v401_v57 = vpack.c.bf16 %v369_v53, %v369_v53 }
 0x197   : > { %3738 = vmatpush1.bf16.msra.mxu1 %v5523_v58  ;;  %v356_v58 = vld [vmem:[%s5845_s29 + $0x78] sm:$0xff]  ;;  %v5699_v52 = vld [vmem:[%s5795_s25 + $0x7e4] ss:$8 sps:$4 sm:$0xff]  }
 0x198   : > { %4066 = vmatpush1.bf16.msra.mxu0 %v5526_v59  ;;  %3739 = vmatprep.subr.bf16.mxu1 %v5531_v60  ;;  %v372_v59 = vld [vmem:[%s5845_s29 + $0xf8] sm:$0xff]  ;;  %v5613_v60 = vld [vmem:[%s5795_s25 + $0x700] ss:$8 sps:$4 sm:$0xff]   ;;  %v5702_v53 = vld [vmem:[%s5795_s25 + $0xfe4] ss:$8 sps:$4 sm:$0xff]  }
 0x199   : > { %4067 = vmatprep.subr.bf16.mxu0 %v5534_v61  ;;  %v5616_v61 = vld [vmem:[%s5795_s25 + $0xf00] ss:$8 sps:$4 sm:$0xff]  }
 0x19b   : > { %3740 = vmatpush1.bf16.msra.mxu1 %v5529_v62  ;;  %v5621_v62 = vld [vmem:[%s5795_s25 + $0x714] ss:$8 sps:$4 sm:$0xff]  }
 0x19c   : > { %4068 = vmatpush1.bf16.msra.mxu0 %v5532_v63  ;;  %3741 = vmatprep.subr.bf16.mxu1 %v5537_v0  ;;  %v5624_v63 = vld [vmem:[%s5795_s25 + $0xf14] ss:$8 sps:$4 sm:$0xff]   ;;  %v388_v0 = vpack.c.bf16 %v356_v58, %v356_v58  ;;  %v5703_v58 = vld [vmem:[%s5795_s25 + $0x7f0] ss:$8 sps:$4 sm:$0xff]  }
 0x19d   : > { %4069 = vmatprep.subr.bf16.mxu0 %v5540_v1  ;;  %v404_v1 = vpack.c.bf16 %v372_v59, %v372_v59  ;;  %v5706_v59 = vld [vmem:[%s5795_s25 + $0xff0] ss:$8 sps:$4 sm:$0xff]  }
 0x19f   : > { %3742 = vmatpush1.bf16.msra.mxu1 %v5535_v2  ;;  %v5619_v2 = vld [vmem:[%s5795_s25 + $0x710] ss:$8 sps:$4 sm:$0xff]  }
 0x1a0   : > { %4070 = vmatpush1.bf16.msra.mxu0 %v5538_v3  ;;  %3743 = vmatprep.subr.bf16.mxu1 %v5543_v4  ;;  %v5622_v3 = vld [vmem:[%s5795_s25 + $0xf10] ss:$8 sps:$4 sm:$0xff]   ;;  %v5627_v4 = vld [vmem:[%s5795_s25 + $0x724] ss:$8 sps:$4 sm:$0xff]  }
 0x1a1   : > { %4071 = vmatprep.subr.bf16.mxu0 %v5546_v5  ;;  %v5630_v5 = vld [vmem:[%s5795_s25 + $0xf24] ss:$8 sps:$4 sm:$0xff]  }
 0x1a3   : > { %3744 = vmatpush1.bf16.msra.mxu1 %v5541_v6  ;;  %v5625_v6 = vld [vmem:[%s5795_s25 + $0x720] ss:$8 sps:$4 sm:$0xff]  }
 0x1a4   : > { %4072 = vmatpush1.bf16.msra.mxu0 %v5544_v7  ;;  %3745 = vmatprep.subr.bf16.mxu1 %v5549_v8  ;;  %v5628_v7 = vld [vmem:[%s5795_s25 + $0xf20] ss:$8 sps:$4 sm:$0xff]   ;;  %v5633_v8 = vld [vmem:[%s5795_s25 + $0x734] ss:$8 sps:$4 sm:$0xff]  }
 0x1a5   : > { %4073 = vmatprep.subr.bf16.mxu0 %v5552_v9  ;;  %v5636_v9 = vld [vmem:[%s5795_s25 + $0xf34] ss:$8 sps:$4 sm:$0xff]  }
 0x1a7   : > { %3746 = vmatpush1.bf16.msra.mxu1 %v5547_v10  ;;  %v5631_v10 = vld [vmem:[%s5795_s25 + $0x730] ss:$8 sps:$4 sm:$0xff]  }
 0x1a8   : > { %4074 = vmatpush1.bf16.msra.mxu0 %v5550_v11  ;;  %3747 = vmatprep.subr.bf16.mxu1 %v5555_v12  ;;  %v5634_v11 = vld [vmem:[%s5795_s25 + $0xf30] ss:$8 sps:$4 sm:$0xff]   ;;  %v5639_v12 = vld [vmem:[%s5795_s25 + $0x744] ss:$8 sps:$4 sm:$0xff]  }
 0x1a9   : > { %4075 = vmatprep.subr.bf16.mxu0 %v5558_v13  ;;  %v5642_v13 = vld [vmem:[%s5795_s25 + $0xf44] ss:$8 sps:$4 sm:$0xff]  }
 0x1ab   : > { %3748 = vmatpush1.bf16.msra.mxu1 %v5553_v14  ;;  %v5637_v14 = vld [vmem:[%s5795_s25 + $0x740] ss:$8 sps:$4 sm:$0xff]  }
 0x1ac   : > { %4076 = vmatpush1.bf16.msra.mxu0 %v5556_v15  ;;  %3749 = vmatprep.subr.bf16.mxu1 %v5561_v16  ;;  %v5640_v15 = vld [vmem:[%s5795_s25 + $0xf40] ss:$8 sps:$4 sm:$0xff]   ;;  %v5645_v16 = vld [vmem:[%s5795_s25 + $0x754] ss:$8 sps:$4 sm:$0xff]  }
 0x1ad   : > { %4077 = vmatprep.subr.bf16.mxu0 %v5564_v17  ;;  %v5648_v17 = vld [vmem:[%s5795_s25 + $0xf54] ss:$8 sps:$4 sm:$0xff]  }
 0x1af   : > { %3750 = vmatpush1.bf16.msra.mxu1 %v5559_v18  ;;  %v5643_v18 = vld [vmem:[%s5795_s25 + $0x750] ss:$8 sps:$4 sm:$0xff]  }
 0x1b0   : > { %4078 = vmatpush1.bf16.msra.mxu0 %v5562_v19  ;;  %3751 = vmatprep.subr.bf16.mxu1 %v5567_v20  ;;  %v5646_v19 = vld [vmem:[%s5795_s25 + $0xf50] ss:$8 sps:$4 sm:$0xff]   ;;  %v5651_v20 = vld [vmem:[%s5795_s25 + $0x764] ss:$8 sps:$4 sm:$0xff]  }
 0x1b1   : > { %4079 = vmatprep.subr.bf16.mxu0 %v5570_v21  ;;  %v5654_v21 = vld [vmem:[%s5795_s25 + $0xf64] ss:$8 sps:$4 sm:$0xff]  }
 0x1b3   : > { %3752 = vmatpush1.bf16.msra.mxu1 %v5565_v22  ;;  %v5649_v22 = vld [vmem:[%s5795_s25 + $0x760] ss:$8 sps:$4 sm:$0xff]  }
 0x1b4   : > { %4080 = vmatpush1.bf16.msra.mxu0 %v5568_v23  ;;  %3753 = vmatprep.subr.bf16.mxu1 %v5573_v24  ;;  %v5652_v23 = vld [vmem:[%s5795_s25 + $0xf60] ss:$8 sps:$4 sm:$0xff]   ;;  %v5657_v24 = vld [vmem:[%s5795_s25 + $0x774] ss:$8 sps:$4 sm:$0xff]  }
 0x1b5   : > { %4081 = vmatprep.subr.bf16.mxu0 %v5576_v25  ;;  %v5660_v25 = vld [vmem:[%s5795_s25 + $0xf74] ss:$8 sps:$4 sm:$0xff]  }
 0x1b7   : > { %3754 = vmatpush1.bf16.msra.mxu1 %v5571_v26  ;;  %v5655_v26 = vld [vmem:[%s5795_s25 + $0x770] ss:$8 sps:$4 sm:$0xff]  }
 0x1b8   : > { %4082 = vmatpush1.bf16.msra.mxu0 %v5574_v27  ;;  %3755 = vmatprep.subr.bf16.mxu1 %v5579_v28  ;;  %v5658_v27 = vld [vmem:[%s5795_s25 + $0xf70] ss:$8 sps:$4 sm:$0xff]   ;;  %v5663_v28 = vld [vmem:[%s5795_s25 + $0x784] ss:$8 sps:$4 sm:$0xff]  }
 0x1b9   : > { %4083 = vmatprep.subr.bf16.mxu0 %v5582_v29  ;;  %v5666_v29 = vld [vmem:[%s5795_s25 + $0xf84] ss:$8 sps:$4 sm:$0xff]  }
 0x1bb   : > { %3756 = vmatpush1.bf16.msra.mxu1 %v5577_v30  ;;  %v5661_v30 = vld [vmem:[%s5795_s25 + $0x780] ss:$8 sps:$4 sm:$0xff]  }
 0x1bc   : > { %4084 = vmatpush1.bf16.msra.mxu0 %v5580_v31  ;;  %3757 = vmatprep.subr.bf16.mxu1 %v5585_v32  ;;  %v5664_v31 = vld [vmem:[%s5795_s25 + $0xf80] ss:$8 sps:$4 sm:$0xff]   ;;  %v5669_v32 = vld [vmem:[%s5795_s25 + $0x794] ss:$8 sps:$4 sm:$0xff]  }
 0x1bd   : > { %4085 = vmatprep.subr.bf16.mxu0 %v5588_v33  ;;  %v5672_v33 = vld [vmem:[%s5795_s25 + $0xf94] ss:$8 sps:$4 sm:$0xff]  }
 0x1bf   : > { %3758 = vmatpush1.bf16.msra.mxu1 %v5583_v34  ;;  %v5667_v34 = vld [vmem:[%s5795_s25 + $0x790] ss:$8 sps:$4 sm:$0xff]  }
 0x1c0   : > { %4086 = vmatpush1.bf16.msra.mxu0 %v5586_v35  ;;  %3759 = vmatprep.subr.bf16.mxu1 %v5591_v36  ;;  %v5670_v35 = vld [vmem:[%s5795_s25 + $0xf90] ss:$8 sps:$4 sm:$0xff]   ;;  %v5675_v36 = vld [vmem:[%s5795_s25 + $0x7a4] ss:$8 sps:$4 sm:$0xff]  }
 0x1c1   : > { %4087 = vmatprep.subr.bf16.mxu0 %v5594_v37  ;;  %v5678_v37 = vld [vmem:[%s5795_s25 + $0xfa4] ss:$8 sps:$4 sm:$0xff]  }
 0x1c3   : > { %3760 = vmatpush1.bf16.msra.mxu1 %v5589_v38  ;;  %v5673_v38 = vld [vmem:[%s5795_s25 + $0x7a0] ss:$8 sps:$4 sm:$0xff]  }
 0x1c4   : > { %4088 = vmatpush1.bf16.msra.mxu0 %v5592_v39  ;;  %3761 = vmatprep.subr.bf16.mxu1 %v5597_v40  ;;  %v5676_v39 = vld [vmem:[%s5795_s25 + $0xfa0] ss:$8 sps:$4 sm:$0xff]   ;;  %v5681_v40 = vld [vmem:[%s5795_s25 + $0x7b4] ss:$8 sps:$4 sm:$0xff]  }
 0x1c5   : > { %4089 = vmatprep.subr.bf16.mxu0 %v5600_v41  ;;  %v5684_v41 = vld [vmem:[%s5795_s25 + $0xfb4] ss:$8 sps:$4 sm:$0xff]  }
 0x1c7   : > { %3762 = vmatpush1.bf16.msra.mxu1 %v5595_v42  ;;  %v5679_v42 = vld [vmem:[%s5795_s25 + $0x7b0] ss:$8 sps:$4 sm:$0xff]  }
 0x1c8   : > { %4090 = vmatpush1.bf16.msra.mxu0 %v5598_v43  ;;  %3763 = vmatprep.subr.bf16.mxu1 %v5603_v44  ;;  %v5682_v43 = vld [vmem:[%s5795_s25 + $0xfb0] ss:$8 sps:$4 sm:$0xff]   ;;  %v5687_v44 = vld [vmem:[%s5795_s25 + $0x7c4] ss:$8 sps:$4 sm:$0xff]  }
 0x1c9   : > { %4091 = vmatprep.subr.bf16.mxu0 %v5606_v45  ;;  %v5690_v45 = vld [vmem:[%s5795_s25 + $0xfc4] ss:$8 sps:$4 sm:$0xff]  }
 0x1cb   : > { %3764 = vmatpush1.bf16.msra.mxu1 %v5601_v46  ;;  %v5685_v46 = vld [vmem:[%s5795_s25 + $0x7c0] ss:$8 sps:$4 sm:$0xff]  }
 0x1cc   : > { %4092 = vmatpush1.bf16.msra.mxu0 %v5604_v47  ;;  %3765 = vmatprep.subr.bf16.mxu1 %v5609_v48  ;;  %v5688_v47 = vld [vmem:[%s5795_s25 + $0xfc0] ss:$8 sps:$4 sm:$0xff]   ;;  %v5693_v48 = vld [vmem:[%s5795_s25 + $0x7d4] ss:$8 sps:$4 sm:$0xff]  }
 0x1cd   : > { %4093 = vmatprep.subr.bf16.mxu0 %v5612_v49  ;;  %v5696_v49 = vld [vmem:[%s5795_s25 + $0xfd4] ss:$8 sps:$4 sm:$0xff]  }
 0x1cf   : > { %3766 = vmatpush1.bf16.msra.mxu1 %v5607_v50  ;;  %v5691_v50 = vld [vmem:[%s5795_s25 + $0x7d0] ss:$8 sps:$4 sm:$0xff]  }
 0x1d0   : > { %4094 = vmatpush1.bf16.msra.mxu0 %v5610_v51  ;;  %3776 = vmatprep.subr.bf16.mxu1 %v5615_v54  ;;  %v5694_v51 = vld [vmem:[%s5795_s25 + $0xfd0] ss:$8 sps:$4 sm:$0xff]   ;;  %v5697_v54 = vld [vmem:[%s5795_s25 + $0x7e0] ss:$8 sps:$4 sm:$0xff]  }
 0x1d1   : > { %4104 = vmatprep.subr.bf16.mxu0 %v5618_v55  ;;  %v5700_v55 = vld [vmem:[%s5795_s25 + $0xfe0] ss:$8 sps:$4 sm:$0xff]  }
 0x1d2   : > { %3768 = vmatmul.mubr.bf16.vlgmr.msra.gmra.mrb[0].mxu1 %v385_v56  ;;  %v5705_v56 = vld [vmem:[%s5795_s25 + $0x7f4] ss:$8 sps:$4 sm:$0xff]  }
 0x1d3   : > { %4096 = vmatmul.mubr.bf16.vlgmr.msra.gmra.mrb[0].mxu0 %v401_v57  ;;  %3777 = vmatpush1.bf16.msra.mxu1 %v5613_v60  ;;  %v5708_v57 = vld [vmem:[%s5795_s25 + $0xff4] ss:$8 sps:$4 sm:$0xff]  }
 0x1d4   : > { %4105 = vmatpush1.bf16.msra.mxu0 %v5616_v61  ;;  %3778 = vmatprep.subr.bf16.mxu1 %v5621_v62  ;;  %v355_v60 = vld [vmem:[%s5845_s29 + $0x70] sm:$0xff] }
 0x1d5   : > { %4106 = vmatprep.subr.bf16.mxu0 %v5624_v63  ;;  %3808 = vmatprep.mubr.bf16.mxu1 %v388_v0  ;;  %v371_v61 = vld [vmem:[%s5845_s29 + $0xf0] sm:$0xff]  ;;  %v387_v62 = vpack.c.bf16 %v355_v60, %v355_v60  ;;  %v919_v0 = vlaneseq }
 0x1d6   : > { %4136 = vmatprep.mubr.bf16.mxu0 %v404_v1  ;;  %v403_v63 = vpack.c.bf16 %v371_v61, %v371_v61 }
 0x1d7   : > { %3779 = vmatpush1.bf16.msra.mxu1 %v5619_v2  ;;  %v920_v1 = vshrl.u32 %v919_v0, 7 }
 0x1d8   : > { %4107 = vmatpush1.bf16.msra.mxu0 %v5622_v3  ;;  %3780 = vmatprep.subr.bf16.mxu1 %v5627_v4  ;;  %v917_v3 = vld [vmem:[%s6371_s2] sm:$0x3] }
 0x1d9   : > { %4108 = vmatprep.subr.bf16.mxu0 %v5630_v5  ;;  %v921_v2 = vsub.s32 0, %v920_v1  ;;  %v925_v4 = vsub.s32 1, %v920_v1 }
 0x1db   : > { %3781 = vmatpush1.bf16.msra.mxu1 %v5625_v6  ;;  %v922_v5 = vrot.slane %v917_v3, %v921_v2  ;;  %v4145_v6 = vld [vmem:[%s6372_s3] sm:$0x3] }
 0x1dc   : > { %4109 = vmatpush1.bf16.msra.mxu0 %v5628_v7  ;;  %3782 = vmatprep.subr.bf16.mxu1 %v5633_v8  ;;  %v926_v7 = vrot.slane %v917_v3, %v925_v4 }
 0x1dd   : > { %4110 = vmatprep.subr.bf16.mxu0 %v5636_v9 }
 0x1df   : > { %3783 = vmatpush1.bf16.msra.mxu1 %v5631_v10  ;;  %v4159_v10 = vld [vmem:[%s6373_s4] sm:$0x3] }
 0x1e0   : > { %4111 = vmatpush1.bf16.msra.mxu0 %v5634_v11  ;;  %3784 = vmatprep.subr.bf16.mxu1 %v5639_v12  ;;  %v4150_v12 = vrot.slane %v4145_v6, %v921_v2 }
 0x1e1   : > { %4112 = vmatprep.subr.bf16.mxu0 %v5642_v13 }
 0x1e3   : > { %3785 = vmatpush1.bf16.msra.mxu1 %v5637_v14 }
 0x1e4   : > { %4113 = vmatpush1.bf16.msra.mxu0 %v5640_v15  ;;  %3786 = vmatprep.subr.bf16.mxu1 %v5645_v16  ;;  %v4154_v16 = vrot.slane %v4145_v6, %v925_v4 }
 0x1e5   : > { %4114 = vmatprep.subr.bf16.mxu0 %v5648_v17 }
 0x1e7   : > { %3787 = vmatpush1.bf16.msra.mxu1 %v5643_v18 }
 0x1e8   : > { %4115 = vmatpush1.bf16.msra.mxu0 %v5646_v19  ;;  %3788 = vmatprep.subr.bf16.mxu1 %v5651_v20  ;;  %v4164_v20 = vrot.slane %v4159_v10, %v921_v2 }
 0x1e9   : > { %4116 = vmatprep.subr.bf16.mxu0 %v5654_v21 }
 0x1eb   : > { %3789 = vmatpush1.bf16.msra.mxu1 %v5649_v22 }
 0x1ec   : > { %4117 = vmatpush1.bf16.msra.mxu0 %v5652_v23  ;;  %3790 = vmatprep.subr.bf16.mxu1 %v5657_v24  ;;  %v4168_v24 = vrot.slane %v4159_v10, %v925_v4 }
 0x1ed   : > { %4118 = vmatprep.subr.bf16.mxu0 %v5660_v25 }
 0x1ef   : > { %3791 = vmatpush1.bf16.msra.mxu1 %v5655_v26 }
 0x1f0   : > { %4119 = vmatpush1.bf16.msra.mxu0 %v5658_v27  ;;  %3792 = vmatprep.subr.bf16.mxu1 %v5663_v28 }
 0x1f1   : > { %4120 = vmatprep.subr.bf16.mxu0 %v5666_v29 }
 0x1f3   : > { %3793 = vmatpush1.bf16.msra.mxu1 %v5661_v30 }
 0x1f4   : > { %4121 = vmatpush1.bf16.msra.mxu0 %v5664_v31  ;;  %3794 = vmatprep.subr.bf16.mxu1 %v5669_v32 }
 0x1f5   : > { %4122 = vmatprep.subr.bf16.mxu0 %v5672_v33 }
 0x1f7   : > { %3795 = vmatpush1.bf16.msra.mxu1 %v5667_v34 }
 0x1f8   : > { %4123 = vmatpush1.bf16.msra.mxu0 %v5670_v35  ;;  %3796 = vmatprep.subr.bf16.mxu1 %v5675_v36 }
 0x1f9   : > { %4124 = vmatprep.subr.bf16.mxu0 %v5678_v37 }
 0x1fb   : > { %3797 = vmatpush1.bf16.msra.mxu1 %v5673_v38 }
 0x1fc   : > { %4125 = vmatpush1.bf16.msra.mxu0 %v5676_v39  ;;  %3798 = vmatprep.subr.bf16.mxu1 %v5681_v40 }
 0x1fd   : > { %4126 = vmatprep.subr.bf16.mxu0 %v5684_v41 }
 0x1ff   : > { %3799 = vmatpush1.bf16.msra.mxu1 %v5679_v42 }
 0x200   : > { %4127 = vmatpush1.bf16.msra.mxu0 %v5682_v43  ;;  %3800 = vmatprep.subr.bf16.mxu1 %v5687_v44 }
 0x201   : > { %4128 = vmatprep.subr.bf16.mxu0 %v5690_v45 }
 0x203   : > { %3801 = vmatpush1.bf16.msra.mxu1 %v5685_v46 }
 0x204   : > { %4129 = vmatpush1.bf16.msra.mxu0 %v5688_v47  ;;  %3802 = vmatprep.subr.bf16.mxu1 %v5693_v48 }
 0x205   : > { %4130 = vmatprep.subr.bf16.mxu0 %v5696_v49 }
 0x207   : > { %3803 = vmatpush1.bf16.msra.mxu1 %v5691_v50 }
 0x208   : > { %4131 = vmatpush1.bf16.msra.mxu0 %v5694_v51  ;;  %3804 = vmatprep.subr.bf16.mxu1 %v5699_v52 }
 0x209   : > { %4132 = vmatprep.subr.bf16.mxu0 %v5702_v53 }
 0x20b   : > { %3805 = vmatpush1.bf16.msra.mxu1 %v5697_v54 }
 0x20c   : > { %4133 = vmatpush1.bf16.msra.mxu0 %v5700_v55  ;;  %3806 = vmatprep.subr.bf16.mxu1 %v5705_v56 }
 0x20d   : > { %4134 = vmatprep.subr.bf16.mxu0 %v5708_v57 }
 0x20f   : > { %3807 = vmatpush1.bf16.msra.mxu1 %v5703_v58 }
 0x210   : > { %4135 = vmatpush1.bf16.msra.mxu0 %v5706_v59 }
 0x212   : > { %3809 = vmatmul.mubr.bf16.vlgmr.msra.gmra.mrb[0].mxu1 %v387_v62 }
 0x213   : > { %4137 = vmatmul.mubr.bf16.vlgmr.msra.gmra.mrb[0].mxu0 %v403_v63 }
 0x2e5   : > { %v3810_v8 = vpop.f32.mrb[0].mxu1 }
 0x2e6   : > { %v4138_v9 = vpop.f32.mrb[0].mxu0  ;;  %v4857_v11 = vadd.f32 %v3810_v8, %v922_v5  ;;  %v3812_v13 = vpop.f32.mrb[1].mxu1 }
 0x2e7   : > { %v4140_v14 = vpop.f32.mrb[1].mxu0  ;;  %v4859_v15 = vadd.f32 %v3812_v13, %v926_v7  ;;  %v3814_v17 = vpop.f32.mrb[2].mxu1 }
 0x2e8   : > { %v4142_v18 = vpop.f32.mrb[2].mxu0  ;;  %v4858_v19 = vadd.f32 %v4857_v11, %v4138_v9  ;;  %v3815_v21 = vpop.f32.mrb[3].mxu1 }
 0x2e9   : > { %v4143_v22 = vpop.f32.mrb[3].mxu0  ;;  %v4860_v23 = vadd.f32 %v4859_v15, %v4140_v14 }
 0x2ea   : > { %v4157_v25 = vmul.f32 %v4858_v19, %v4150_v12 }
 0x2eb   : > { %v4158_v26 = vmul.f32 %v4860_v23, %v4154_v16 }
 0x2ec   : > { %v4171_v27 = vadd.f32 %v4164_v20, %v4157_v25 }
 0x2ed   : > { %v4172_v28 = vadd.f32 %v4168_v24, %v4158_v26 }
 0x2ee   : > { %v4850_v29 = vmul.f32 -1.442695, %v4171_v27 }
 0x2ef   : > { %v4851_v30 = vmul.f32 -1.442695, %v4172_v28 }
 0x2f0   : > { %5709 = vpow2.f32 %v4850_v29 }
 0x2f1   : > { %5711 = vpow2.f32 %v4851_v30 }
 0x2fa   : > { %v5710_v31 = vpop.eup %5709 }
 0x2fb   : > { %v5712_v32 = vpop.eup %5711  ;;  %v4179_v33 = vadd.f32 1.0, %v5710_v31 }
 0x2fc   : > { %v4180_v34 = vadd.f32 1.0, %v5712_v32 }
 0x2fd   : > { %5713 = vrcp.f32 %v4179_v33 }
 0x2fe   : > { %5715 = vrcp.f32 %v4180_v34 }
 0x307   : > { %v5714_v35 = vpop.eup %5713 }
 0x308   : > { %v5716_v36 = vpop.eup %5715  ;;  %v4185_v37 = vmul.f32 %v5714_v35, %v4171_v27 }
 0x309   : > { %v4186_v38 = vmul.f32 %v5716_v36, %v4172_v28 }
 0x30a   : > { %4187 = vst [vmem:[%s339_s14] sm:$0xff] %v4185_v37 }
 0x30b   : > { %4188 = vst [vmem:[%s339_s14 + $0x8] sm:$0xff] %v4186_v38 }
 0x30c PF: > { %s15_s20 = sadd.s32 1, %s5739_s20   ;;  %s6375_s18 = smov %s5735_s19 }
 0x30d   : > { %p12_p5 = scmp.ge.s32.totalorder %s15_s20, 6   ;;  %s6376_s19 = smov %s6378_s21 }
 0x30f   :  { %14 = sbr.rel (!%p12_p5) target bundleno = 2 (0x2), region = 82 }

// kernel: model_forward.6
= control target key start
LH: loop header
LB: loop body
LE: loop exit
PB: predicated region body
PF: predicated region fallthrough
CT: control target
= control target key end

     0   :  { %s1628_s18 = smov 0   ;;  %s1630_s19 = smov 0   ;;  %s1778_s0 = inlined_call_operand.vmem [shape: f32[4,32,1024], index: 0, kind: input, shape index: {}]   ;;  %s1779_s1 = inlined_call_operand.vmem [shape: bf16[4,1024,128], index: 1, kind: input, shape index: {}]   ;;  %s1780_s2 = inlined_call_operand.vmem [shape: f32[1,1,128], index: 2, kind: input, shape index: {}]   ;;  %s1781_s3 = inlined_call_operand.vmem [shape: f32[1,1,128], index: 3, kind: input, shape index: {}]   ;;  %s1782_s4 = inlined_call_operand.vmem [shape: f32[1,1,128], index: 4, kind: input, shape index: {}]   ;;  %s1783_s5 = inlined_call_operand.vmem [shape: f32[4,32,128], index: 5, kind: output, shape index: {}]  }
   0x1   :  { %s1632_s20 = smov 0  }
   0x2 LB: > { %s27_s21 = sadd.s32 1, %s1592_s19  ;;  %p1275_p0 = scmp.ge.s32.totalorder %s1596_s20, 1  ;;  %s1596_s20 = sphi %s1632_s20, %s15_s20   ;;  %s1592_s19 = sphi %s1630_s19, %s1785_s19   ;;  %s1588_s18 = sphi %s1628_s18, %s1784_s18  }
   0x3   : > { %p29_p1 = scmp.ge.s32.totalorder %s27_s21, 4  ;;  %p240_p2 = scmp.lt.s32.totalorder %s1596_s20, 5 }
   0x5   : > { %s1787_s21 = smov (%p29_p1, %s27_s21), 0  ;;  %p241_p3 = pnand %p1275_p0, %p240_p2 }
   0x6   : > { %p288_p4 = scmp.lt.s32.totalorder (!%p241_p3), %s1588_s18, 3 }
   0x7   : > { %244 = sbr.rel (%p241_p3) target bundleno = 345 (0x159), region = 40 }
   0xe   : > { %s1789_s18 = smov (!%p288_p4, %s1588_s18), 3 }
   0xf   : > { %s1356_s22 = sshll.u32 %s1789_s18, 9  ;;  %s1355_s26 = sshll.u32 %s1789_s18, 8 }
  0x10   : > { %s1652_s25 = scalar_lea.vmem %s1779_s1, %s1356_s22  ;;  %s1688_s29 = scalar_lea.vmem %s1778_s0, %s1355_s26 }
  0x11   : > { %v1494_v0 = vld [vmem:[%s1652_s25 + $0x40] sm:$0xff]   ;;  %v1498_v4 = vld [vmem:[%s1652_s25 + $0x48] sm:$0xff]   ;;  %v1502_v8 = vld [vmem:[%s1652_s25 + $0x50] sm:$0xff]   ;;  %s1357_s11 = sshll.u32 %s1789_s18, 5 }
  0x12   : > { %v1495_v1 = vld [vmem:[%s1652_s25 + $0xc0] sm:$0xff]   ;;  %1358 = vmatprep.subr.bf16.mxu0 %v1494_v0  ;;  %v1499_v5 = vld [vmem:[%s1652_s25 + $0xc8] sm:$0xff]   ;;  %v1503_v9 = vld [vmem:[%s1652_s25 + $0xd0] sm:$0xff]   ;;  %s317_s14 = scalar_lea.vmem %s1783_s5, %s1357_s11 }
  0x13   : > { %v1496_v2 = vld [vmem:[%s1652_s25] sm:$0xff]   ;;  %1386 = vmatprep.subr.bf16.mxu1 %v1495_v1  ;;  %v1500_v6 = vld [vmem:[%s1652_s25 + $0x8] sm:$0xff]   ;;  %v1504_v10 = vld [vmem:[%s1652_s25 + $0x10] sm:$0xff]  }
  0x14   : > { %v1497_v3 = vld [vmem:[%s1652_s25 + $0x80] sm:$0xff]   ;;  %1359 = vmatpush3.bf16.msra.mxu0 %v1496_v2  ;;  %v1501_v7 = vld [vmem:[%s1652_s25 + $0x88] sm:$0xff]   ;;  %v1505_v11 = vld [vmem:[%s1652_s25 + $0x90] sm:$0xff]  }
  0x15   : > { %1387 = vmatpush3.bf16.msra.mxu1 %v1497_v3  ;;  %1360 = vmatprep.subr.bf16.mxu0 %v1498_v4  ;;  %v1506_v12 = vld [vmem:[%s1652_s25 + $0x58] sm:$0xff]   ;;  %v1510_v16 = vld [vmem:[%s1652_s25 + $0x60] sm:$0xff]   ;;  %v1514_v20 = vld [vmem:[%s1652_s25 + $0x68] sm:$0xff]  }
  0x16   : > { %1388 = vmatprep.subr.bf16.mxu1 %v1499_v5  ;;  %v1507_v13 = vld [vmem:[%s1652_s25 + $0xd8] sm:$0xff]   ;;  %v1511_v17 = vld [vmem:[%s1652_s25 + $0xe0] sm:$0xff]   ;;  %v1515_v21 = vld [vmem:[%s1652_s25 + $0xe8] sm:$0xff]  }
  0x17   : > { %v1508_v14 = vld [vmem:[%s1652_s25 + $0x18] sm:$0xff]   ;;  %v1512_v18 = vld [vmem:[%s1652_s25 + $0x20] sm:$0xff]   ;;  %v1516_v22 = vld [vmem:[%s1652_s25 + $0x28] sm:$0xff]  }
  0x18   : > { %1361 = vmatpush3.bf16.msra.mxu0 %v1500_v6  ;;  %v1509_v15 = vld [vmem:[%s1652_s25 + $0x98] sm:$0xff]   ;;  %v1513_v19 = vld [vmem:[%s1652_s25 + $0xa0] sm:$0xff]   ;;  %v1517_v23 = vld [vmem:[%s1652_s25 + $0xa8] sm:$0xff]  }
  0x19   : > { %1389 = vmatpush3.bf16.msra.mxu1 %v1501_v7  ;;  %1362 = vmatprep.subr.bf16.mxu0 %v1502_v8  ;;  %v1518_v24 = vld [vmem:[%s1652_s25 + $0x70] sm:$0xff]   ;;  %v1522_v28 = vld [vmem:[%s1652_s25 + $0x78] sm:$0xff]   ;;  %v320_v32 = vld [vmem:[%s1688_s29 + $0x8] sm:$0xff] }
  0x1a   : > { %1390 = vmatprep.subr.bf16.mxu1 %v1503_v9  ;;  %v1519_v25 = vld [vmem:[%s1652_s25 + $0xf0] sm:$0xff]   ;;  %v1523_v29 = vld [vmem:[%s1652_s25 + $0xf8] sm:$0xff]   ;;  %v328_v33 = vld [vmem:[%s1688_s29 + $0x48] sm:$0xff] }
  0x1b   : > { %v1520_v26 = vld [vmem:[%s1652_s25 + $0x30] sm:$0xff]   ;;  %v1524_v30 = vld [vmem:[%s1652_s25 + $0x38] sm:$0xff]   ;;  %v352_v35 = vpack.c.bf16 %v328_v33, %v320_v32  ;;  %v319_v37 = vld [vmem:[%s1688_s29] sm:$0xff] }
  0x1c   : > { %1363 = vmatpush3.bf16.msra.mxu0 %v1504_v10  ;;  %v1521_v27 = vld [vmem:[%s1652_s25 + $0xb0] sm:$0xff]   ;;  %v1525_v31 = vld [vmem:[%s1652_s25 + $0xb8] sm:$0xff]   ;;  %v327_v38 = vld [vmem:[%s1688_s29 + $0x40] sm:$0xff] }
  0x1d   : > { %1391 = vmatpush3.bf16.msra.mxu1 %v1505_v11  ;;  %1364 = vmatprep.subr.bf16.mxu0 %v1506_v12  ;;  %v322_v34 = vld [vmem:[%s1688_s29 + $0x18] sm:$0xff]  ;;  %v351_v40 = vpack.c.bf16 %v327_v38, %v319_v37  ;;  %v321_v41 = vld [vmem:[%s1688_s29 + $0x10] sm:$0xff]  ;;  %v1526_v44 = vld [vmem:[%s1652_s25 + $0x140] sm:$0xff]  }
  0x1e   : > { %1392 = vmatprep.subr.bf16.mxu1 %v1507_v13  ;;  %v330_v36 = vld [vmem:[%s1688_s29 + $0x58] sm:$0xff]  ;;  %v329_v42 = vld [vmem:[%s1688_s29 + $0x50] sm:$0xff]  ;;  %918 = vmatprep.mubr.bf16.mxu0 %v352_v35  ;;  %v1527_v45 = vld [vmem:[%s1652_s25 + $0x1c0] sm:$0xff]  }
  0x1f   : > { %v354_v39 = vpack.c.bf16 %v330_v36, %v322_v34  ;;  %v353_v43 = vpack.c.bf16 %v329_v42, %v321_v41  ;;  %v1528_v46 = vld [vmem:[%s1652_s25 + $0x100] sm:$0xff]   ;;  %v1530_v48 = vld [vmem:[%s1652_s25 + $0x148] sm:$0xff]   ;;  %v1534_v52 = vld [vmem:[%s1652_s25 + $0x150] sm:$0xff]  }
  0x20   : > { %1365 = vmatpush3.bf16.msra.mxu0 %v1508_v14  ;;  %v1529_v47 = vld [vmem:[%s1652_s25 + $0x180] sm:$0xff]   ;;  %v1531_v49 = vld [vmem:[%s1652_s25 + $0x1c8] sm:$0xff]   ;;  %v1535_v53 = vld [vmem:[%s1652_s25 + $0x1d0] sm:$0xff]  }
  0x21   : > { %1393 = vmatpush3.bf16.msra.mxu1 %v1509_v15  ;;  %1366 = vmatprep.subr.bf16.mxu0 %v1510_v16  ;;  %v1532_v50 = vld [vmem:[%s1652_s25 + $0x108] sm:$0xff]   ;;  %v1536_v54 = vld [vmem:[%s1652_s25 + $0x110] sm:$0xff]   ;;  %v1538_v56 = vld [vmem:[%s1652_s25 + $0x158] sm:$0xff]  }
  0x22   : > { %1394 = vmatprep.subr.bf16.mxu1 %v1511_v17  ;;  %967 = vmatprep.mubr.bf16.mxu1 %v354_v39  ;;  %v1533_v51 = vld [vmem:[%s1652_s25 + $0x188] sm:$0xff]   ;;  %v1537_v55 = vld [vmem:[%s1652_s25 + $0x190] sm:$0xff]   ;;  %v1539_v57 = vld [vmem:[%s1652_s25 + $0x1d8] sm:$0xff]  }
  0x23   : > { %v1540_v58 = vld [vmem:[%s1652_s25 + $0x118] sm:$0xff]   ;;  %v1542_v60 = vld [vmem:[%s1652_s25 + $0x160] sm:$0xff]   ;;  %v336_v0 = vld [vmem:[%s1688_s29 + $0x88] sm:$0xff] }
  0x24   : > { %1367 = vmatpush3.bf16.msra.mxu0 %v1512_v18  ;;  %v1541_v59 = vld [vmem:[%s1652_s25 + $0x198] sm:$0xff]   ;;  %v1543_v61 = vld [vmem:[%s1652_s25 + $0x1e0] sm:$0xff]   ;;  %v344_v1 = vld [vmem:[%s1688_s29 + $0xc8] sm:$0xff] }
  0x25   : > { %1395 = vmatpush3.bf16.msra.mxu1 %v1513_v19  ;;  %1368 = vmatprep.subr.bf16.mxu0 %v1514_v20  ;;  %v1544_v62 = vld [vmem:[%s1652_s25 + $0x120] sm:$0xff]   ;;  %v360_v2 = vpack.c.bf16 %v344_v1, %v336_v0  ;;  %v1546_v3 = vld [vmem:[%s1652_s25 + $0x168] sm:$0xff]   ;;  %v338_v10 = vld [vmem:[%s1688_s29 + $0x98] sm:$0xff] }
  0x26   : > { %1396 = vmatprep.subr.bf16.mxu1 %v1515_v21  ;;  %v1545_v63 = vld [vmem:[%s1652_s25 + $0x1a0] sm:$0xff]   ;;  %v1547_v4 = vld [vmem:[%s1652_s25 + $0x1e8] sm:$0xff]   ;;  %v346_v11 = vld [vmem:[%s1688_s29 + $0xd8] sm:$0xff] }
  0x27   : > { %v335_v5 = vld [vmem:[%s1688_s29 + $0x80] sm:$0xff]  ;;  %v1548_v8 = vld [vmem:[%s1652_s25 + $0x128] sm:$0xff]   ;;  %v337_v12 = vld [vmem:[%s1688_s29 + $0x90] sm:$0xff]  ;;  %v362_v13 = vpack.c.bf16 %v346_v11, %v338_v10 }
  0x28   : > { %1369 = vmatpush3.bf16.msra.mxu0 %v1516_v22  ;;  %v343_v6 = vld [vmem:[%s1688_s29 + $0xc0] sm:$0xff]  ;;  %v1549_v9 = vld [vmem:[%s1652_s25 + $0x1a8] sm:$0xff]   ;;  %v345_v14 = vld [vmem:[%s1688_s29 + $0xd0] sm:$0xff] }
  0x29   : > { %1397 = vmatpush3.bf16.msra.mxu1 %v1517_v23  ;;  %1370 = vmatprep.subr.bf16.mxu0 %v1518_v24  ;;  %v359_v7 = vpack.c.bf16 %v343_v6, %v335_v5  ;;  %v361_v15 = vpack.c.bf16 %v345_v14, %v337_v12  ;;  %v1550_v16 = vld [vmem:[%s1652_s25 + $0x170] sm:$0xff]   ;;  %v1554_v20 = vld [vmem:[%s1652_s25 + $0x178] sm:$0xff]   ;;  %v324_v24 = vld [vmem:[%s1688_s29 + $0x28] sm:$0xff] }
  0x2a   : > { %1398 = vmatprep.subr.bf16.mxu1 %v1519_v25  ;;  %v1551_v17 = vld [vmem:[%s1652_s25 + $0x1f0] sm:$0xff]   ;;  %v1555_v21 = vld [vmem:[%s1652_s25 + $0x1f8] sm:$0xff]   ;;  %v332_v25 = vld [vmem:[%s1688_s29 + $0x68] sm:$0xff] }
  0x2b   : > { %v1552_v18 = vld [vmem:[%s1652_s25 + $0x130] sm:$0xff]   ;;  %v1556_v22 = vld [vmem:[%s1652_s25 + $0x138] sm:$0xff]   ;;  %v340_v36 = vld [vmem:[%s1688_s29 + $0xa8] sm:$0xff] }
  0x2c   : > { %1371 = vmatpush3.bf16.msra.mxu0 %v1520_v26  ;;  %v1553_v19 = vld [vmem:[%s1652_s25 + $0x1b0] sm:$0xff]   ;;  %v1557_v23 = vld [vmem:[%s1652_s25 + $0x1b8] sm:$0xff]   ;;  %v356_v26 = vpack.c.bf16 %v332_v25, %v324_v24  ;;  %v348_v37 = vld [vmem:[%s1688_s29 + $0xe8] sm:$0xff] }
  0x2d   : > { %1399 = vmatpush3.bf16.msra.mxu1 %v1521_v27  ;;  %1372 = vmatprep.subr.bf16.mxu0 %v1522_v28  ;;  %v326_v27 = vld [vmem:[%s1688_s29 + $0x38] sm:$0xff]  ;;  %v325_v32 = vld [vmem:[%s1688_s29 + $0x30] sm:$0xff]  ;;  %v364_v39 = vpack.c.bf16 %v348_v37, %v340_v36  ;;  %v339_v42 = vld [vmem:[%s1688_s29 + $0xa0] sm:$0xff] }
  0x2e   : > { %1400 = vmatprep.subr.bf16.mxu1 %v1523_v29  ;;  %v334_v28 = vld [vmem:[%s1688_s29 + $0x78] sm:$0xff]  ;;  %v323_v29 = vld [vmem:[%s1688_s29 + $0x20] sm:$0xff]  ;;  %v333_v33 = vld [vmem:[%s1688_s29 + $0x70] sm:$0xff] }
  0x2f   : > { %v357_v35 = vpack.c.bf16 %v333_v33, %v325_v32  ;;  %v342_v38 = vld [vmem:[%s1688_s29 + $0xb8] sm:$0xff]  ;;  %v1348_v33 = vld [vmem:[%s1782_s4] ss:$0 sm:$0xff] }
  0x30   : > { %1373 = vmatpush3.bf16.msra.mxu0 %v1524_v30  ;;  %v358_v30 = vpack.c.bf16 %v334_v28, %v326_v27 }
  0x31   : > { %1401 = vmatpush3.bf16.msra.mxu1 %v1525_v31  ;;  %1414 = vmatprep.subr.bf16.mxu0 %v1526_v44  ;;  %v331_v31 = vld [vmem:[%s1688_s29 + $0x60] sm:$0xff]  ;;  %v341_v44 = vld [vmem:[%s1688_s29 + $0xb0] sm:$0xff] }
  0x32   : > { %1442 = vmatprep.subr.bf16.mxu1 %v1527_v45  ;;  %v355_v34 = vpack.c.bf16 %v331_v31, %v323_v29  ;;  %v349_v45 = vld [vmem:[%s1688_s29 + $0xf0] sm:$0xff] }
  0x33   : > { %919 = vmatmul.mubr.bf16.vlgmr.msra.gmra.mrb[0].mxu0 %v351_v40  ;;  %v350_v40 = vld [vmem:[%s1688_s29 + $0xf8] sm:$0xff] }
  0x34   : > { %968 = vmatmul.mubr.bf16.vlgmr.msra.gmra.mrb[0].mxu1 %v353_v43  ;;  %1415 = vmatpush3.bf16.msra.mxu0 %v1528_v46  ;;  %v366_v41 = vpack.c.bf16 %v350_v40, %v342_v38  ;;  %v347_v43 = vld [vmem:[%s1688_s29 + $0xe0] sm:$0xff] }
  0x35   : > { %1443 = vmatpush3.bf16.msra.mxu1 %v1529_v47  ;;  %1416 = vmatprep.subr.bf16.mxu0 %v1530_v48  ;;  %v363_v46 = vpack.c.bf16 %v347_v43, %v339_v42  ;;  %v365_v47 = vpack.c.bf16 %v349_v45, %v341_v44 }
  0x36   : > { %1444 = vmatprep.subr.bf16.mxu1 %v1531_v49  ;;  %926 = vmatprep.mubr.bf16.mxu0 %v360_v2 }
  0x37   : > { %975 = vmatprep.mubr.bf16.mxu1 %v362_v13 }
  0x38   : > { %1417 = vmatpush3.bf16.msra.mxu0 %v1532_v50  ;;  %v1282_v50 = vld [vmem:[%s1780_s2] ss:$0 sm:$0xff] }
  0x39   : > { %1445 = vmatpush3.bf16.msra.mxu1 %v1533_v51  ;;  %1418 = vmatprep.subr.bf16.mxu0 %v1534_v52 }
  0x3a   : > { %1446 = vmatprep.subr.bf16.mxu1 %v1535_v53 }
  0x3b   : > { %927 = vmatmul.mubr.bf16.gmra.mrb[4].mxu0 %v359_v7 }
  0x3c   : > { %1419 = vmatpush3.bf16.msra.mxu0 %v1536_v54  ;;  %976 = vmatmul.mubr.bf16.gmra.mrb[4].mxu1 %v361_v15 }
  0x3d   : > { %1447 = vmatpush3.bf16.msra.mxu1 %v1537_v55  ;;  %1420 = vmatprep.subr.bf16.mxu0 %v1538_v56 }
  0x3e   : > { %1448 = vmatprep.subr.bf16.mxu1 %v1539_v57  ;;  %1016 = vmatprep.mubr.bf16.mxu0 %v356_v26 }
  0x3f   : > { %1065 = vmatprep.mubr.bf16.mxu1 %v358_v30  ;;  %v1347_v30 = vld [vmem:[%s1781_s3] ss:$0 sm:$0xff] }
  0x40   : > { %1421 = vmatpush3.bf16.msra.mxu0 %v1540_v58 }
  0x41   : > { %1449 = vmatpush3.bf16.msra.mxu1 %v1541_v59  ;;  %1422 = vmatprep.subr.bf16.mxu0 %v1542_v60 }
  0x42   : > { %1450 = vmatprep.subr.bf16.mxu1 %v1543_v61 }
  0x44   : > { %1423 = vmatpush3.bf16.msra.mxu0 %v1544_v62 }
  0x45   : > { %1451 = vmatpush3.bf16.msra.mxu1 %v1545_v63  ;;  %1424 = vmatprep.subr.bf16.mxu0 %v1546_v3 }
  0x46   : > { %1452 = vmatprep.subr.bf16.mxu1 %v1547_v4 }
  0x48   : > { %1425 = vmatpush3.bf16.msra.mxu0 %v1548_v8 }
  0x49   : > { %1453 = vmatpush3.bf16.msra.mxu1 %v1549_v9  ;;  %1426 = vmatprep.subr.bf16.mxu0 %v1550_v16 }
  0x4a   : > { %1454 = vmatprep.subr.bf16.mxu1 %v1551_v17 }
  0x4c   : > { %1427 = vmatpush3.bf16.msra.mxu0 %v1552_v18 }
  0x4d   : > { %1455 = vmatpush3.bf16.msra.mxu1 %v1553_v19  ;;  %1428 = vmatprep.subr.bf16.mxu0 %v1554_v20 }
  0x4e   : > { %1456 = vmatprep.subr.bf16.mxu1 %v1555_v21 }
  0x50   : > { %1429 = vmatpush3.bf16.msra.mxu0 %v1556_v22 }
  0x51   : > { %1457 = vmatpush3.bf16.msra.mxu1 %v1557_v23 }
  0x53   : > { %1017 = vmatmul.mubr.bf16.vlgmr.msra.gmra.mrb[8].mxu0 %v355_v34 }
  0x54   : > { %1066 = vmatmul.mubr.bf16.vlgmr.msra.gmra.mrb[8].mxu1 %v357_v35  ;;  %1024 = vmatprep.mubr.bf16.mxu0 %v364_v39 }
  0x55   : > { %1073 = vmatprep.mubr.bf16.mxu1 %v366_v41 }
  0x5b   : > { %1025 = vmatmul.mubr.bf16.gmra.mrb[12].mxu0 %v363_v46 }
  0x5c   : > { %1074 = vmatmul.mubr.bf16.gmra.mrb[12].mxu1 %v365_v47 }
 0x106   : > { %v1374_v48 = vpop.f32.mrb[0].mxu0 }
 0x107   : > { %v1402_v49 = vpop.f32.mrb[0].mxu1  ;;  %v1375_v51 = vpop.f32.mrb[1].mxu0 }
 0x108   : > { %v1376_v52 = vadd.f32 %v1375_v51, %v1374_v48  ;;  %v1403_v53 = vpop.f32.mrb[1].mxu1  ;;  %v1377_v54 = vpop.f32.mrb[2].mxu0 }
 0x109   : > { %v1404_v55 = vadd.f32 %v1403_v53, %v1402_v49  ;;  %v1405_v56 = vpop.f32.mrb[2].mxu1  ;;  %v1378_v57 = vpop.f32.mrb[3].mxu0 }
 0x10a   : > { %v921_v58 = vadd.f32 %v1376_v52, %v1282_v50  ;;  %v1379_v59 = vadd.f32 %v1378_v57, %v1377_v54  ;;  %v1406_v60 = vpop.f32.mrb[3].mxu1 }
 0x10b   : > { %v1407_v61 = vadd.f32 %v1406_v60, %v1405_v56 }
 0x10c   : > { %v970_v62 = vadd.f32 %v1404_v55, %v921_v58  ;;  %v924_v63 = vadd.f32 %v1379_v59, %v1282_v50 }
 0x10e   : > { %v973_v0 = vadd.f32 %v1407_v61, %v924_v63  ;;  %v1380_v1 = vpop.f32.mrb[4].mxu0 }
 0x10f   : > { %v1381_v2 = vpop.f32.mrb[5].mxu0  ;;  %v1408_v7 = vpop.f32.mrb[4].mxu1 }
 0x110   : > { %v1382_v3 = vadd.f32 %v1381_v2, %v1380_v1  ;;  %v1383_v4 = vpop.f32.mrb[6].mxu0  ;;  %v1409_v9 = vpop.f32.mrb[5].mxu1 }
 0x111   : > { %v1384_v5 = vpop.f32.mrb[7].mxu0  ;;  %v1410_v11 = vadd.f32 %v1409_v9, %v1408_v7  ;;  %v1411_v12 = vpop.f32.mrb[6].mxu1 }
 0x112   : > { %v929_v6 = vadd.f32 %v1382_v3, %v1282_v50  ;;  %v1385_v8 = vadd.f32 %v1384_v5, %v1383_v4  ;;  %v1412_v13 = vpop.f32.mrb[7].mxu1 }
 0x113   : > { %v1413_v15 = vadd.f32 %v1412_v13, %v1411_v12 }
 0x114   : > { %v932_v10 = vadd.f32 %v1385_v8, %v1282_v50  ;;  %v978_v14 = vadd.f32 %v1410_v11, %v929_v6 }
 0x116   : > { %v981_v16 = vadd.f32 %v1413_v15, %v932_v10 }
 0x126   : > { %v1430_v17 = vpop.f32.mrb[8].mxu0 }
 0x127   : > { %v1458_v18 = vpop.f32.mrb[8].mxu1  ;;  %v1431_v19 = vpop.f32.mrb[9].mxu0 }
 0x128   : > { %v1459_v20 = vpop.f32.mrb[9].mxu1  ;;  %v1432_v21 = vadd.f32 %v1431_v19, %v1430_v17  ;;  %v1433_v23 = vpop.f32.mrb[10].mxu0 }
 0x129   : > { %v1460_v22 = vadd.f32 %v1459_v20, %v1458_v18  ;;  %v1461_v24 = vpop.f32.mrb[10].mxu1  ;;  %v1434_v25 = vpop.f32.mrb[11].mxu0 }
 0x12a   : > { %v1462_v26 = vpop.f32.mrb[11].mxu1  ;;  %v1019_v27 = vadd.f32 %v1432_v21, %v970_v62  ;;  %v1435_v28 = vadd.f32 %v1434_v25, %v1433_v23 }
 0x12b   : > { %v1463_v29 = vadd.f32 %v1462_v26, %v1461_v24 }
 0x12c   : > { %v1068_v31 = vadd.f32 %v1460_v22, %v1019_v27  ;;  %v1022_v32 = vadd.f32 %v1435_v28, %v973_v0 }
 0x12e   : > { %v1089_v34 = vmul.f32 %v1347_v30, %v1068_v31  ;;  %v1071_v35 = vadd.f32 %v1463_v29, %v1022_v32  ;;  %v1436_v36 = vpop.f32.mrb[12].mxu0 }
 0x12f   : > { %v1464_v37 = vpop.f32.mrb[12].mxu1  ;;  %v1437_v38 = vpop.f32.mrb[13].mxu0 }
 0x130   : > { %v1465_v39 = vpop.f32.mrb[13].mxu1  ;;  %v1100_v40 = vadd.f32 %v1348_v33, %v1089_v34  ;;  %v1090_v41 = vmul.f32 %v1347_v30, %v1071_v35  ;;  %v1438_v42 = vadd.f32 %v1437_v38, %v1436_v36  ;;  %v1439_v44 = vpop.f32.mrb[14].mxu0 }
 0x131   : > { %v1466_v43 = vadd.f32 %v1465_v39, %v1464_v37  ;;  %v1467_v45 = vpop.f32.mrb[14].mxu1  ;;  %v1440_v46 = vpop.f32.mrb[15].mxu0 }
 0x132   : > { %v1468_v47 = vpop.f32.mrb[15].mxu1  ;;  %v1349_v48 = vmul.f32 -1.442695, %v1100_v40  ;;  %v1101_v49 = vadd.f32 %v1348_v33, %v1090_v41  ;;  %v1027_v50 = vadd.f32 %v1438_v42, %v978_v14  ;;  %v1441_v51 = vadd.f32 %v1440_v46, %v1439_v44 }
 0x133   : > { %v1469_v52 = vadd.f32 %v1468_v47, %v1467_v45 }
 0x134   : > { %1558 = vpow2.f32 %v1349_v48  ;;  %v1350_v53 = vmul.f32 -1.442695, %v1101_v49  ;;  %v1076_v54 = vadd.f32 %v1466_v43, %v1027_v50  ;;  %v1030_v55 = vadd.f32 %v1441_v51, %v981_v16 }
 0x136   : > { %1560 = vpow2.f32 %v1350_v53  ;;  %v1091_v56 = vmul.f32 %v1347_v30, %v1076_v54  ;;  %v1079_v57 = vadd.f32 %v1469_v52, %v1030_v55 }
 0x138   : > { %v1102_v58 = vadd.f32 %v1348_v33, %v1091_v56  ;;  %v1092_v59 = vmul.f32 %v1347_v30, %v1079_v57 }
 0x13a   : > { %v1351_v60 = vmul.f32 -1.442695, %v1102_v58  ;;  %v1103_v61 = vadd.f32 %v1348_v33, %v1092_v59 }
 0x13c   : > { %1562 = vpow2.f32 %v1351_v60  ;;  %v1352_v62 = vmul.f32 -1.442695, %v1103_v61 }
 0x13e   : > { %v1559_v63 = vpop.eup %1558  ;;  %1564 = vpow2.f32 %v1352_v62 }
 0x13f   : > { %v1116_v0 = vadd.f32 1.0, %v1559_v63 }
 0x140   : > { %v1561_v1 = vpop.eup %1560 }
 0x141   : > { %1566 = vrcp.f32 %v1116_v0  ;;  %v1117_v2 = vadd.f32 1.0, %v1561_v1 }
 0x143   : > { %1568 = vrcp.f32 %v1117_v2 }
 0x146   : > { %v1563_v3 = vpop.eup %1562 }
 0x147   : > { %v1118_v4 = vadd.f32 1.0, %v1563_v3 }
 0x148   : > { %v1565_v5 = vpop.eup %1564 }
 0x149   : > { %1570 = vrcp.f32 %v1118_v4  ;;  %v1119_v6 = vadd.f32 1.0, %v1565_v5 }
 0x14b   : > { %v1567_v7 = vpop.eup %1566  ;;  %1572 = vrcp.f32 %v1119_v6 }
 0x14c   : > { %v1128_v8 = vmul.f32 %v1567_v7, %v1100_v40 }
 0x14d   : > { %v1569_v9 = vpop.eup %1568 }
 0x14e   : > { %1132 = vst [vmem:[%s317_s14] sm:$0xff] %v1128_v8  ;;  %v1129_v10 = vmul.f32 %v1569_v9, %v1101_v49 }
 0x150   : > { %1133 = vst [vmem:[%s317_s14 + $0x8] sm:$0xff] %v1129_v10 }
 0x153   : > { %v1571_v11 = vpop.eup %1570 }
 0x154   : > { %v1130_v12 = vmul.f32 %v1571_v11, %v1102_v58 }
 0x155   : > { %v1573_v13 = vpop.eup %1572 }
 0x156   : > { %1134 = vst [vmem:[%s317_s14 + $0x10] sm:$0xff] %v1130_v12  ;;  %v1131_v14 = vmul.f32 %v1573_v13, %v1103_v61 }
 0x158   : > { %1135 = vst [vmem:[%s317_s14 + $0x18] sm:$0xff] %v1131_v14 }
 0x159 PF: > { %s15_s20 = sadd.s32 1, %s1596_s20   ;;  %s1784_s18 = smov %s1592_s19 }
 0x15a   : > { %p12_p5 = scmp.ge.s32.totalorder %s15_s20, 6   ;;  %s1785_s19 = smov %s1787_s21 }
 0x15c   :  { %14 = sbr.rel (!%p12_p5) target bundleno = 2 (0x2), region = 82 }

// kernel: model_forward.7
= control target key start
LH: loop header
LB: loop body
LE: loop exit
PB: predicated region body
PF: predicated region fallthrough
CT: control target
= control target key end

     0   :  { %s794_s18 = smov 0   ;;  %s796_s19 = smov 0   ;;  %s910_s0 = inlined_call_operand.vmem [shape: bf16[4,1,512], index: 0, kind: input, shape index: {}]   ;;  %s911_s1 = inlined_call_operand.vmem [shape: f32[4,512,128], index: 1, kind: input, shape index: {}]   ;;  %s912_s2 = inlined_call_operand.vmem [shape: f32[1,1,128], index: 2, kind: input, shape index: {}]   ;;  %s913_s3 = inlined_call_operand.vmem [shape: f32[1,1,128], index: 3, kind: input, shape index: {}]   ;;  %s914_s4 = inlined_call_operand.vmem [shape: f32[1,1,128], index: 4, kind: input, shape index: {}]   ;;  %s915_s5 = inlined_call_operand.vmem [shape: f32[4,1,128], index: 5, kind: output, shape index: {}]  }
   0x1   :  { %s798_s20 = smov 0  }
   0x2 LB: > { %s27_s21 = sadd.s32 1, %s757_s19  ;;  %p657_p0 = scmp.ge.s32.totalorder %s761_s20, 1  ;;  %s761_s20 = sphi %s798_s20, %s15_s20   ;;  %s757_s19 = sphi %s796_s19, %s917_s19   ;;  %s753_s18 = sphi %s794_s18, %s916_s18  }
   0x3   : > { %p29_p1 = scmp.ge.s32.totalorder %s27_s21, 4  ;;  %p239_p2 = scmp.lt.s32.totalorder %s761_s20, 5 }
   0x5   : > { %s919_s21 = smov (%p29_p1, %s27_s21), 0  ;;  %p240_p3 = pnand %p657_p0, %p239_p2 }
   0x6   : > { %p284_p4 = scmp.lt.s32.totalorder (!%p240_p3), %s753_s18, 3  ;;  %v763_v51 = vmov (!%p240_p3), 1966171168   ;;  %v422_v53 = vlaneseq (!%p240_p3) }
   0x7   : > { %243 = sbr.rel (%p240_p3) target bundleno = 303 (0x12f), region = 40  ;;  %v420_v52 = vunpack.c.l.s4 (!%p240_p3), %v763_v51 }
   0xe   : > { %s921_s18 = smov (!%p284_p4, %s753_s18), 3 }
   0xf   : > { %s665_s22 = sshll.u32 %s921_s18, 9  ;;  %s658_s26 = sshll.u32 %s921_s18, 2 }
  0x10   : > { %s818_s25 = scalar_lea.vmem %s911_s1, %s665_s22  ;;  %s287_s29 = scalar_lea.vmem %s910_s0, %s658_s26 }
  0x11   : > { %v329_v0 = vld [vmem:[%s818_s25 + $0x80] sm:$0xff]  ;;  %v330_v1 = vld [vmem:[%s818_s25 + $0x88] sm:$0xff]  ;;  %v331_v11 = vld [vmem:[%s818_s25 + $0x90] sm:$0xff]  ;;  %s310_s13 = scalar_lea.vmem %s915_s5, %s921_s18 }
  0x12   : > { %v361_v2 = vld [vmem:[%s818_s25 + $0x180] sm:$0xff]  ;;  %v385_v3 = vpack.c.bf16 %v330_v1, %v329_v0  ;;  %v362_v4 = vld [vmem:[%s818_s25 + $0x188] sm:$0xff]  ;;  %v332_v13 = vld [vmem:[%s818_s25 + $0x98] sm:$0xff] }
  0x13   : > { %v313_v5 = vld [vmem:[%s818_s25] sm:$0xff]  ;;  %v314_v6 = vld [vmem:[%s818_s25 + $0x8] sm:$0xff]  ;;  %v401_v7 = vpack.c.bf16 %v362_v4, %v361_v2  ;;  %v363_v14 = vld [vmem:[%s818_s25 + $0x190] sm:$0xff]  ;;  %v386_v16 = vpack.c.bf16 %v332_v13, %v331_v11  ;;  %v421_v2 = vunpack.c.0.s8 %v420_v52 }
  0x14   : > { %v377_v8 = vpack.c.bf16 %v314_v6, %v313_v5  ;;  %v345_v9 = vld [vmem:[%s818_s25 + $0x100] sm:$0xff]  ;;  %v346_v10 = vld [vmem:[%s818_s25 + $0x108] sm:$0xff]  ;;  %666 = vmatprep.subr.bf16.mxu0 %v385_v3  ;;  %v364_v15 = vld [vmem:[%s818_s25 + $0x198] sm:$0xff]  ;;  %v423_v3 = vshrl.u32 %v422_v53, 7 }
  0x15   : > { %v393_v12 = vpack.c.bf16 %v346_v10, %v345_v9  ;;  %688 = vmatprep.subr.bf16.mxu1 %v401_v7  ;;  %v402_v17 = vpack.c.bf16 %v364_v15, %v363_v14  ;;  %v315_v18 = vld [vmem:[%s818_s25 + $0x10] sm:$0xff]  ;;  %v316_v19 = vld [vmem:[%s818_s25 + $0x18] sm:$0xff]  ;;  %v333_v23 = vld [vmem:[%s818_s25 + $0xa0] sm:$0xff] }
  0x16   : > { %667 = vmatpush3.bf16.msra.mxu0 %v377_v8  ;;  %v347_v20 = vld [vmem:[%s818_s25 + $0x110] sm:$0xff]  ;;  %v378_v21 = vpack.c.bf16 %v316_v19, %v315_v18  ;;  %v348_v22 = vld [vmem:[%s818_s25 + $0x118] sm:$0xff]  ;;  %v334_v24 = vld [vmem:[%s818_s25 + $0xa8] sm:$0xff] }
  0x17   : > { %689 = vmatpush3.bf16.msra.mxu1 %v393_v12  ;;  %668 = vmatprep.subr.bf16.mxu0 %v386_v16  ;;  %v394_v25 = vpack.c.bf16 %v348_v22, %v347_v20  ;;  %v387_v26 = vpack.c.bf16 %v334_v24, %v333_v23  ;;  %v365_v27 = vld [vmem:[%s818_s25 + $0x1a0] sm:$0xff]  ;;  %v366_v28 = vld [vmem:[%s818_s25 + $0x1a8] sm:$0xff]  ;;  %v335_v35 = vld [vmem:[%s818_s25 + $0xb0] sm:$0xff] }
  0x18   : > { %690 = vmatprep.subr.bf16.mxu1 %v402_v17  ;;  %v317_v29 = vld [vmem:[%s818_s25 + $0x20] sm:$0xff]  ;;  %v403_v30 = vpack.c.bf16 %v366_v28, %v365_v27  ;;  %v318_v31 = vld [vmem:[%s818_s25 + $0x28] sm:$0xff]  ;;  %v336_v36 = vld [vmem:[%s818_s25 + $0xb8] sm:$0xff]  ;;  %v424_v17 = vsub.s32 %v421_v2, %v423_v3 }
  0x19   : > { %v349_v32 = vld [vmem:[%s818_s25 + $0x120] sm:$0xff]  ;;  %v350_v33 = vld [vmem:[%s818_s25 + $0x128] sm:$0xff]  ;;  %v379_v34 = vpack.c.bf16 %v318_v31, %v317_v29  ;;  %v367_v37 = vld [vmem:[%s818_s25 + $0x1b0] sm:$0xff]  ;;  %v388_v39 = vpack.c.bf16 %v336_v36, %v335_v35 }
  0x1a   : > { %669 = vmatpush3.bf16.msra.mxu0 %v378_v21  ;;  %v395_v38 = vpack.c.bf16 %v350_v33, %v349_v32  ;;  %v368_v40 = vld [vmem:[%s818_s25 + $0x1b8] sm:$0xff]  ;;  %v319_v41 = vld [vmem:[%s818_s25 + $0x30] sm:$0xff]  ;;  %v337_v46 = vld [vmem:[%s818_s25 + $0xc0] sm:$0xff] }
  0x1b   : > { %691 = vmatpush3.bf16.msra.mxu1 %v394_v25  ;;  %670 = vmatprep.subr.bf16.mxu0 %v387_v26  ;;  %v320_v42 = vld [vmem:[%s818_s25 + $0x38] sm:$0xff]  ;;  %v404_v43 = vpack.c.bf16 %v368_v40, %v367_v37  ;;  %v351_v44 = vld [vmem:[%s818_s25 + $0x130] sm:$0xff]  ;;  %v338_v47 = vld [vmem:[%s818_s25 + $0xc8] sm:$0xff] }
  0x1c   : > { %692 = vmatprep.subr.bf16.mxu1 %v403_v30  ;;  %v352_v45 = vld [vmem:[%s818_s25 + $0x138] sm:$0xff]  ;;  %v369_v48 = vld [vmem:[%s818_s25 + $0x1c0] sm:$0xff]  ;;  %v370_v49 = vld [vmem:[%s818_s25 + $0x1c8] sm:$0xff]  ;;  %v380_v50 = vpack.c.bf16 %v320_v42, %v319_v41  ;;  %v389_v55 = vpack.c.bf16 %v338_v47, %v337_v46 }
  0x1d   : > { %v396_v54 = vpack.c.bf16 %v352_v45, %v351_v44  ;;  %v321_v56 = vld [vmem:[%s818_s25 + $0x40] sm:$0xff]  ;;  %v322_v57 = vld [vmem:[%s818_s25 + $0x48] sm:$0xff]  ;;  %v405_v59 = vpack.c.bf16 %v370_v49, %v369_v48  ;;  %v339_v61 = vld [vmem:[%s818_s25 + $0xd0] sm:$0xff] }
  0x1e   : > { %671 = vmatpush3.bf16.msra.mxu0 %v379_v34  ;;  %v353_v58 = vld [vmem:[%s818_s25 + $0x140] sm:$0xff]  ;;  %v354_v60 = vld [vmem:[%s818_s25 + $0x148] sm:$0xff]  ;;  %v340_v62 = vld [vmem:[%s818_s25 + $0xd8] sm:$0xff]  ;;  %v381_v1 = vpack.c.bf16 %v322_v57, %v321_v56 }
  0x1f   : > { %693 = vmatpush3.bf16.msra.mxu1 %v395_v38  ;;  %672 = vmatprep.subr.bf16.mxu0 %v388_v39  ;;  %v371_v63 = vld [vmem:[%s818_s25 + $0x1d0] sm:$0xff]  ;;  %v372_v0 = vld [vmem:[%s818_s25 + $0x1d8] sm:$0xff]  ;;  %v397_v4 = vpack.c.bf16 %v354_v60, %v353_v58  ;;  %v390_v5 = vpack.c.bf16 %v340_v62, %v339_v61  ;;  %v341_v11 = vld [vmem:[%s818_s25 + $0xe0] sm:$0xff] }
  0x20   : > { %694 = vmatprep.subr.bf16.mxu1 %v404_v43  ;;  %v323_v6 = vld [vmem:[%s818_s25 + $0x50] sm:$0xff]  ;;  %v324_v7 = vld [vmem:[%s818_s25 + $0x58] sm:$0xff]  ;;  %v406_v9 = vpack.c.bf16 %v372_v0, %v371_v63  ;;  %v342_v12 = vld [vmem:[%s818_s25 + $0xe8] sm:$0xff] }
  0x21   : > { %v355_v8 = vld [vmem:[%s818_s25 + $0x150] sm:$0xff]  ;;  %v356_v10 = vld [vmem:[%s818_s25 + $0x158] sm:$0xff]  ;;  %v373_v13 = vld [vmem:[%s818_s25 + $0x1e0] sm:$0xff]  ;;  %v382_v15 = vpack.c.bf16 %v324_v7, %v323_v6  ;;  %v391_v19 = vpack.c.bf16 %v342_v12, %v341_v11 }
  0x22   : > { %673 = vmatpush3.bf16.msra.mxu0 %v380_v50  ;;  %v374_v14 = vld [vmem:[%s818_s25 + $0x1e8] sm:$0xff]  ;;  %v325_v16 = vld [vmem:[%s818_s25 + $0x60] sm:$0xff]  ;;  %v398_v18 = vpack.c.bf16 %v356_v10, %v355_v8  ;;  %v343_v25 = vld [vmem:[%s818_s25 + $0xf0] sm:$0xff] }
  0x23   : > { %695 = vmatpush3.bf16.msra.mxu1 %v396_v54  ;;  %674 = vmatprep.subr.bf16.mxu0 %v389_v55  ;;  %v326_v20 = vld [vmem:[%s818_s25 + $0x68] sm:$0xff]  ;;  %v357_v21 = vld [vmem:[%s818_s25 + $0x160] sm:$0xff]  ;;  %v407_v23 = vpack.c.bf16 %v374_v14, %v373_v13  ;;  %v344_v26 = vld [vmem:[%s818_s25 + $0xf8] sm:$0xff] }
  0x24   : > { %696 = vmatprep.subr.bf16.mxu1 %v405_v59  ;;  %v661_v22 = vld.sshfl [vmem:[%s287_s29] sm:$0x33 pattern:$0x75316420]  ;;  %v358_v24 = vld [vmem:[%s818_s25 + $0x168] sm:$0xff]  ;;  %v375_v28 = vld [vmem:[%s818_s25 + $0x1f0] sm:$0xff]  ;;  %v383_v30 = vpack.c.bf16 %v326_v20, %v325_v16  ;;  %v392_v33 = vpack.c.bf16 %v344_v26, %v343_v25 }
  0x25   : > { %v418_v27 = vcombine.high %v661_v22, %v661_v22  ;;  %v376_v29 = vld [vmem:[%s818_s25 + $0x1f8] sm:$0xff]  ;;  %v399_v32 = vpack.c.bf16 %v358_v24, %v357_v21  ;;  %v327_v34 = vld [vmem:[%s818_s25 + $0x70] sm:$0xff]  ;;  %v425_v41 = vrot.slane %v661_v22, %v424_v17  ;;  %v409_v46 = vld [vmem:[%s912_s2] sm:$0x1] }
  0x26   : > { %675 = vmatpush3.bf16.msra.mxu0 %v381_v1  ;;  %v328_v35 = vld [vmem:[%s818_s25 + $0x78] sm:$0xff]  ;;  %v408_v36 = vpack.c.bf16 %v376_v29, %v375_v28  ;;  %v359_v37 = vld [vmem:[%s818_s25 + $0x170] sm:$0xff]  ;;  %v519_v56 = vld [vmem:[%s913_s3] sm:$0x1] }
  0x27   : > { %697 = vmatpush3.bf16.msra.mxu1 %v397_v4  ;;  %676 = vmatprep.subr.bf16.mxu0 %v390_v5  ;;  %v432_v31 = vrot.slane %v418_v27, %v424_v17  ;;  %v360_v38 = vld [vmem:[%s818_s25 + $0x178] sm:$0xff]  ;;  %v384_v40 = vpack.c.bf16 %v328_v35, %v327_v34  ;;  %v433_v43 = vcombine.high %v425_v41, %v425_v41  ;;  %v521_v58 = vld [vmem:[%s914_s4] sm:$0x1] }
  0x28   : > { %698 = vmatprep.subr.bf16.mxu1 %v406_v9  ;;  %v400_v42 = vpack.c.bf16 %v360_v38, %v359_v37 }
  0x29   : > { %471 = vmatprep.mubr.bf16.mxu0 %v432_v31  ;;  %v434_v39 = vcombine.high %v432_v31, %v432_v31 }
  0x2a   : > { %677 = vmatpush3.bf16.msra.mxu0 %v382_v15 }
  0x2b   : > { %699 = vmatpush3.bf16.msra.mxu1 %v398_v18  ;;  %678 = vmatprep.subr.bf16.mxu0 %v391_v19 }
  0x2c   : > { %700 = vmatprep.subr.bf16.mxu1 %v407_v23  ;;  %511 = vmatprep.mubr.bf16.mxu1 %v434_v39 }
  0x2e   : > { %679 = vmatpush3.bf16.msra.mxu0 %v383_v30 }
  0x2f   : > { %701 = vmatpush3.bf16.msra.mxu1 %v399_v32  ;;  %680 = vmatprep.subr.bf16.mxu0 %v392_v33 }
  0x30   : > { %702 = vmatprep.subr.bf16.mxu1 %v408_v36 }
  0x32   : > { %681 = vmatpush3.bf16.msra.mxu0 %v384_v40 }
  0x33   : > { %703 = vmatpush3.bf16.msra.mxu1 %v400_v42 }
  0x35   : > { %472 = vmatmul.mubr.bf16.vlgmr.msra.gmra.mrb[0].mxu0 %v425_v41 }
  0x36   : > { %512 = vmatmul.mubr.bf16.vlgmr.msra.gmra.mrb[0].mxu1 %v433_v43 }
 0x108   : > { %v682_v44 = vpop.f32.mrb[0].mxu0 }
 0x109   : > { %v704_v45 = vpop.f32.mrb[0].mxu1  ;;  %v683_v47 = vpop.f32.mrb[1].mxu0 }
 0x10a   : > { %v684_v48 = vadd.f32 %v683_v47, %v682_v44  ;;  %v705_v49 = vpop.f32.mrb[1].mxu1  ;;  %v685_v50 = vpop.f32.mrb[2].mxu0 }
 0x10b   : > { %v706_v51 = vadd.f32 %v705_v49, %v704_v45  ;;  %v707_v52 = vpop.f32.mrb[2].mxu1  ;;  %v686_v53 = vpop.f32.mrb[3].mxu0 }
 0x10c   : > { %v474_v54 = vadd.f32 %v684_v48, %v409_v46  ;;  %v708_v55 = vpop.f32.mrb[3].mxu1 }
 0x10e   : > { %v514_v57 = vadd.f32 %v706_v51, %v474_v54 }
 0x110   : > { %v520_v59 = vmul.f32 %v519_v56, %v514_v57 }
 0x112   : > { %v522_v60 = vadd.f32 %v521_v58, %v520_v59 }
 0x114   : > { %v662_v61 = vmul.f32 -1.442695, %v522_v60 }
 0x116   : > { %735 = vpow2.f32 %v662_v61 }
 0x120   : > { %v736_v62 = vpop.eup %735 }
 0x121   : > { %v526_v63 = vadd.f32 1.0, %v736_v62 }
 0x123   : > { %737 = vrcp.f32 %v526_v63 }
 0x12d   : > { %v738_v0 = vpop.eup %737 }
 0x12e   : > { %529 = vst [vmem:[%s310_s13] sm:$0x1] %v738_v0 }
 0x12f PF: > { %s15_s20 = sadd.s32 1, %s761_s20   ;;  %s916_s18 = smov %s757_s19 }
 0x130   : > { %p12_p5 = scmp.ge.s32.totalorder %s15_s20, 6   ;;  %s917_s19 = smov %s919_s21 }
 0x132   :  { %14 = sbr.rel (!%p12_p5) target bundleno = 2 (0x2), region = 82 }

// kernel: squeeze.1
= control target key start
LH: loop header
LB: loop body
LE: loop exit
PB: predicated region body
PF: predicated region fallthrough
CT: control target
= control target key end

     0   :  { %s176_s8 = smov 104   ;;  %s177_s9 = smov 112   ;;  %vm7_vm0 = vcmask 64512   ;;  %s331_s0 = inlined_call_operand.vmem [shape: f32[4,128], index: 0, kind: input, shape index: {}]   ;;  %s332_s1 = inlined_call_operand.vmem [shape: f32[2,2,2,8,8], index: 1, kind: output, shape index: {}]  }
   0x1   :  { %v4_v0 = vld [vmem:[%s331_s0] sm:$0xf]  ;;  %s175_s0 = smov 120   ;;  %s178_s10 = smov 96  }
   0x2   :  { %5 = vst [vmem:[#allocation0] sm:$0xf] %v4_v0  ;;  %s179_s11 = smov 88   ;;  %s180_s12 = smov 80  }
   0x3   :  { %s181_s13 = smov 72   ;;  %s182_s14 = smov 64  }
   0x4   :  { %s183_s19 = smov 56   ;;  %s184_s20 = smov 48  }
   0x5   :  { %s185_s21 = smov 40   ;;  %s186_s22 = smov 32  }
   0x6   :  { %s187_s23 = smov 24   ;;  %s188_s24 = smov 16  }
   0x7   :  { %s189_s25 = smov 8  }
   0x9   :  { %v10_v1 = vld [vmem:[#allocation0] sm:$0xf]  }
   0xa   :  { %v26_v2 = vld [vmem:[#allocation0] sm:$0xf]   ;;  %11 = vrot.lane.b32.xlu0 %v10_v1, %s175_s0 }
   0xb   :  { %27 = vrot.lane.b32.xlu1 %v26_v2, %s176_s8  ;;  %v18_v3 = vld [vmem:[#allocation0] sm:$0xf]  }
   0xc   :  { %v34_v4 = vld [vmem:[#allocation0] sm:$0xf]  }
   0xd   :  { %v42_v5 = vld [vmem:[#allocation0] sm:$0xf]  }
   0xe   :  { %19 = vrot.lane.b32.xlu0 %v18_v3, %s177_s9  ;;  %v50_v6 = vld [vmem:[#allocation0] sm:$0xf]  }
   0xf   :  { %35 = vrot.lane.b32.xlu1 %v34_v4, %s178_s10  ;;  %v58_v7 = vld [vmem:[#allocation0] sm:$0xf]  }
  0x10   :  { %v66_v8 = vld [vmem:[#allocation0] sm:$0xf]  }
  0x11   :  { %v74_v9 = vld [vmem:[#allocation0] sm:$0xf]  }
  0x12   :  { %43 = vrot.lane.b32.xlu0 %v42_v5, %s179_s11  ;;  %v82_v10 = vld [vmem:[#allocation0] sm:$0xf]  }
  0x13   :  { %51 = vrot.lane.b32.xlu1 %v50_v6, %s180_s12  ;;  %v6_v11 = vld [vmem:[#allocation0] sm:$0xf]  }
  0x14   :  { %8 = vst.msk [vmem:[%s332_s1] ss:$16 sm:$0x3] %vm7_vm0, %v6_v11   ;;  %9 = vst.msk [vmem:[%s332_s1] ss:$16 sm:$0xc] %vm7_vm0, %v6_v11  }
  0x15   :  { %v90_v12 = vld [vmem:[#allocation0] sm:$0xf]  }
  0x16   :  { %59 = vrot.lane.b32.xlu0 %v58_v7, %s181_s13  ;;  %v98_v13 = vld [vmem:[#allocation0] sm:$0xf]  }
  0x17   :  { %67 = vrot.lane.b32.xlu1 %v66_v8, %s182_s14  ;;  %v106_v14 = vld [vmem:[#allocation0] sm:$0xf]  }
  0x18   :  { %v114_v15 = vld [vmem:[#allocation0] sm:$0xf]  }
  0x19   :  { %v122_v16 = vld [vmem:[#allocation0] sm:$0xf]  }
  0x1a   :  { %75 = vrot.lane.b32.xlu0 %v74_v9, %s183_s19 }
  0x1b   :  { %83 = vrot.lane.b32.xlu1 %v82_v10, %s184_s20 }
  0x1e   :  { %91 = vrot.lane.b32.xlu0 %v90_v12, %s185_s21 }
  0x1f   :  { %99 = vrot.lane.b32.xlu1 %v98_v13, %s186_s22 }
  0x22   :  { %107 = vrot.lane.b32.xlu0 %v106_v14, %s187_s23 }
  0x23   :  { %115 = vrot.lane.b32.xlu1 %v114_v15, %s188_s24 }
  0x26   :  { %123 = vrot.lane.b32.xlu0 %v122_v16, %s189_s25 }
  0x7c   :  { %v12_v17 = vpop.permute.xlu0 %11  }
  0x7d   :  { %v28_v18 = vpop.permute.xlu1 %27   ;;  %130 = vst.msk [vmem:[%s332_s1 + $0x1] ss:$16 sm:$0x3] %vm7_vm0, %v12_v17   ;;  %131 = vst.msk [vmem:[%s332_s1 + $0x1] ss:$16 sm:$0xc] %vm7_vm0, %v12_v17  }
  0x7e   :  { %134 = vst.msk [vmem:[%s332_s1 + $0x3] ss:$16 sm:$0x3] %vm7_vm0, %v28_v18   ;;  %135 = vst.msk [vmem:[%s332_s1 + $0x3] ss:$16 sm:$0xc] %vm7_vm0, %v28_v18  }
  0x80   :  { %v20_v19 = vpop.permute.xlu0 %19  }
  0x81   :  { %v36_v20 = vpop.permute.xlu1 %35   ;;  %132 = vst.msk [vmem:[%s332_s1 + $0x2] ss:$16 sm:$0x3] %vm7_vm0, %v20_v19   ;;  %133 = vst.msk [vmem:[%s332_s1 + $0x2] ss:$16 sm:$0xc] %vm7_vm0, %v20_v19  }
  0x82   :  { %136 = vst.msk [vmem:[%s332_s1 + $0x4] ss:$16 sm:$0x3] %vm7_vm0, %v36_v20   ;;  %137 = vst.msk [vmem:[%s332_s1 + $0x4] ss:$16 sm:$0xc] %vm7_vm0, %v36_v20  }
  0x84   :  { %v44_v21 = vpop.permute.xlu0 %43  }
  0x85   :  { %v52_v22 = vpop.permute.xlu1 %51   ;;  %138 = vst.msk [vmem:[%s332_s1 + $0x5] ss:$16 sm:$0x3] %vm7_vm0, %v44_v21   ;;  %139 = vst.msk [vmem:[%s332_s1 + $0x5] ss:$16 sm:$0xc] %vm7_vm0, %v44_v21  }
  0x86   :  { %140 = vst.msk [vmem:[%s332_s1 + $0x6] ss:$16 sm:$0x3] %vm7_vm0, %v52_v22   ;;  %141 = vst.msk [vmem:[%s332_s1 + $0x6] ss:$16 sm:$0xc] %vm7_vm0, %v52_v22  }
  0x88   :  { %v60_v23 = vpop.permute.xlu0 %59  }
  0x89   :  { %v68_v24 = vpop.permute.xlu1 %67   ;;  %142 = vst.msk [vmem:[%s332_s1 + $0x7] ss:$16 sm:$0x3] %vm7_vm0, %v60_v23   ;;  %143 = vst.msk [vmem:[%s332_s1 + $0x7] ss:$16 sm:$0xc] %vm7_vm0, %v60_v23  }
  0x8a   :  { %144 = vst.msk [vmem:[%s332_s1 + $0x8] ss:$16 sm:$0x3] %vm7_vm0, %v68_v24   ;;  %145 = vst.msk [vmem:[%s332_s1 + $0x8] ss:$16 sm:$0xc] %vm7_vm0, %v68_v24  }
  0x8c   :  { %v76_v25 = vpop.permute.xlu0 %75  }
  0x8d   :  { %v84_v26 = vpop.permute.xlu1 %83   ;;  %146 = vst.msk [vmem:[%s332_s1 + $0x9] ss:$16 sm:$0x3] %vm7_vm0, %v76_v25   ;;  %147 = vst.msk [vmem:[%s332_s1 + $0x9] ss:$16 sm:$0xc] %vm7_vm0, %v76_v25  }
  0x8e   :  { %148 = vst.msk [vmem:[%s332_s1 + $0xa] ss:$16 sm:$0x3] %vm7_vm0, %v84_v26   ;;  %149 = vst.msk [vmem:[%s332_s1 + $0xa] ss:$16 sm:$0xc] %vm7_vm0, %v84_v26  }
  0x90   :  { %v92_v27 = vpop.permute.xlu0 %91  }
  0x91   :  { %v100_v28 = vpop.permute.xlu1 %99   ;;  %150 = vst.msk [vmem:[%s332_s1 + $0xb] ss:$16 sm:$0x3] %vm7_vm0, %v92_v27   ;;  %151 = vst.msk [vmem:[%s332_s1 + $0xb] ss:$16 sm:$0xc] %vm7_vm0, %v92_v27  }
  0x92   :  { %152 = vst.msk [vmem:[%s332_s1 + $0xc] ss:$16 sm:$0x3] %vm7_vm0, %v100_v28   ;;  %153 = vst.msk [vmem:[%s332_s1 + $0xc] ss:$16 sm:$0xc] %vm7_vm0, %v100_v28  }
  0x94   :  { %v108_v29 = vpop.permute.xlu0 %107  }
  0x95   :  { %v116_v30 = vpop.permute.xlu1 %115   ;;  %154 = vst.msk [vmem:[%s332_s1 + $0xd] ss:$16 sm:$0x3] %vm7_vm0, %v108_v29   ;;  %155 = vst.msk [vmem:[%s332_s1 + $0xd] ss:$16 sm:$0xc] %vm7_vm0, %v108_v29  }
  0x96   :  { %156 = vst.msk [vmem:[%s332_s1 + $0xe] ss:$16 sm:$0x3] %vm7_vm0, %v116_v30   ;;  %157 = vst.msk [vmem:[%s332_s1 + $0xe] ss:$16 sm:$0xc] %vm7_vm0, %v116_v30  }
  0x98   :  { %v124_v31 = vpop.permute.xlu0 %123  }
  0x99   :  { %158 = vst.msk [vmem:[%s332_s1 + $0xf] ss:$16 sm:$0x3] %vm7_vm0, %v124_v31   ;;  %159 = vst.msk [vmem:[%s332_s1 + $0xf] ss:$16 sm:$0xc] %vm7_vm0, %v124_v31  }

</bundles_post_ra>
